<compile_context>
chip_gen: v7x
topology: tpu7x:2x2x1
jax: 0.10.0
libtpu: 0.0.40
codegen_flags: <defaults>
</compile_context>

<pallas_src>
import functools
import math

import jax
import jax.numpy as jnp
from jax.experimental import pallas as pl
from jax.experimental.pallas import tpu as pltpu

LANE = 128
MIB = 1024 * 1024


def _round_up(v, m):
    return (v + m - 1) // m * m


def _pad2(arr, rows, cols, dtype):
    out = jnp.zeros((rows, cols), dtype=dtype)
    return out.at[: arr.shape[0], : arr.shape[1]].set(arr.astype(dtype))


# --------------------------------------------------------------------------
# Tiny projection kernel:  P = X @ W   (f32 accumulation, bf16 output)
# --------------------------------------------------------------------------
def _proj_kernel(x_ref, w_ref, o_ref):
    o_ref[...] = jnp.dot(
        x_ref[...], w_ref[...], preferred_element_type=jnp.float32
    ).astype(o_ref.dtype)


def _project(x_p, w_p, *, out_dtype, tm):
    n_rows, f_dim = x_p.shape
    h_dim = w_p.shape[1]
    return pl.pallas_call(
        _proj_kernel,
        out_shape=jax.ShapeDtypeStruct((n_rows, h_dim), out_dtype),
        grid_spec=pltpu.PrefetchScalarGridSpec(
            num_scalar_prefetch=0,
            grid=(n_rows // tm,),
            in_specs=[
                pl.BlockSpec((tm, f_dim), lambda i: (i, 0)),      # X row tile
                pl.BlockSpec((f_dim, h_dim), lambda i: (0, 0)),   # W resident
            ],
            out_specs=pl.BlockSpec((tm, h_dim), lambda i: (i, 0)),
        ),
        compiler_params=pltpu.CompilerParams(
            dimension_semantics=("parallel",),
        ),
    )(x_p, w_p)


# --------------------------------------------------------------------------
# Aggregation layer:  out = [ act(A_hat @ P + b) ] [@ W_next]
#   project=True  : layer-1 pass -> epilogue fuses bias + leaky_relu + (@ W2)
#   project=False : layer-2 pass -> epilogue is just bias
# --------------------------------------------------------------------------
def _aggregate_kernel(a_ref, p_ref, *rest, tk, activation, project,
                      resident_rhs):
    if project:
        w_ref, b_ref, o_ref, acc_ref = rest
    else:
        b_ref, o_ref, acc_ref = rest
        w_ref = None

    k = pl.program_id(1)

    if resident_rhs:
        src = pl.multiple_of(k * tk, tk)
        rhs = p_ref[pl.ds(src, tk), :]
    else:
        rhs = p_ref[...]

    # bf16 MXU inputs, f32 accumulation.
    contrib = jnp.dot(a_ref[...], rhs, preferred_element_type=jnp.float32)

    @pl.when(k == 0)
    def _():
        acc_ref[...] = contrib          # direct overwrite: no zero-init pass

    @pl.when(k != 0)
    def _():
        acc_ref[...] += contrib

    @pl.when(k == pl.num_programs(1) - 1)
    def _():
        h = acc_ref[...] + b_ref[...]
        if activation:
            h = jnp.where(h > 0, h, 0.01 * h)      # LeakyReLU(0.01)
        if project:
            # Fused projection for the next layer (bf16 MXU, f32 accumulate).
            h = jnp.dot(h.astype(w_ref.dtype), w_ref[...],
                        preferred_element_type=jnp.float32)
        o_ref[...] = h.astype(o_ref.dtype)


def _aggregate_layer(a_p, p_p, w_p, b_p, *, activation, project, out_dtype,
                     tm, tk, resident_budget_bytes):
    n_rows, n_cols = a_p.shape
    h_dim = p_p.shape[1]
    grid = (n_rows // tm, n_cols // tk)

    # ---- VMEM footprint accounting (conservative: assume double-buffering) --
    out_isz = jnp.dtype(out_dtype).itemsize
    a_tile_bytes = 2 * tm * tk * a_p.dtype.itemsize
    acc_bytes = tm * h_dim * 4
    out_bytes = 2 * tm * h_dim * out_isz
    bias_bytes = 2 * h_dim * 4
    w_bytes = 2 * w_p.size * w_p.dtype.itemsize if project else 0
    rhs_full_bytes = p_p.size * p_p.dtype.itemsize

    footprint_resident = (2 * rhs_full_bytes + a_tile_bytes + acc_bytes
                          + out_bytes + bias_bytes + w_bytes)
    resident_rhs = footprint_resident <= resident_budget_bytes

    if resident_rhs:
        # Whole RHS resident in VMEM (constant block index -> no re-DMA per i).
        rhs_spec = pl.BlockSpec((n_cols, h_dim), lambda i, k: (0, 0))
        footprint = footprint_resident
    else:
        # Fallback for graphs whose RHS does not fit v7x's 64 MiB/TC VMEM.
        rhs_spec = pl.BlockSpec((tk, h_dim), lambda i, k: (k, 0))
        footprint = (2 * tk * h_dim * p_p.dtype.itemsize + a_tile_bytes
                     + acc_bytes + out_bytes + bias_bytes + w_bytes)

    # Derive the scoped-VMEM limit from the footprint; stay <= 56 MiB so the
    # same config is safe on v7x (64 MiB/TC) as well as v5e/v6e (128 MiB).
    vmem_limit = int(min(max(footprint + 4 * MIB, 32 * MIB), 56 * MIB))

    kernel = functools.partial(
        _aggregate_kernel, tk=tk, activation=activation, project=project,
        resident_rhs=resident_rhs)

    in_specs = [
        pl.BlockSpec((tm, tk), lambda i, k: (i, k)),        # A_hat tile
        rhs_spec,                                           # P (resident/stream)
    ]
    operands = [a_p, p_p]
    if project:
        in_specs.append(pl.BlockSpec((h_dim, h_dim), lambda i, k: (0, 0)))
        operands.append(w_p)
    in_specs.append(pl.BlockSpec((1, h_dim), lambda i, k: (0, 0)))
    operands.append(b_p)

    return pl.pallas_call(
        kernel,
        out_shape=jax.ShapeDtypeStruct((n_rows, h_dim), out_dtype),
        grid_spec=pltpu.PrefetchScalarGridSpec(
            num_scalar_prefetch=0,
            grid=grid,
            in_specs=in_specs,
            out_specs=pl.BlockSpec((tm, h_dim), lambda i, k: (i, 0)),
            scratch_shapes=[pltpu.VMEM((tm, h_dim), jnp.float32)],
        ),
        compiler_params=pltpu.CompilerParams(
            dimension_semantics=("parallel", "arbitrary"),
            vmem_limit_bytes=vmem_limit,
        ),
    )(*operands)


# --------------------------------------------------------------------------
# Glue: sparse edges -> dense symmetrically-normalized adjacency, built
# DIRECTLY in its padded low-precision form (single N^2 array, reused twice).
# A_hat[target, source] = D^{-1/2} (A + I) D^{-1/2}     (PyG gcn_norm)
# --------------------------------------------------------------------------
def gcn_norm_dense(edge_index, edge_weight, num_nodes, n_pad,
                   dtype=jnp.bfloat16):
    row, col = edge_index[0], edge_index[1]          # row = source, col = target
    loop = jnp.arange(num_nodes, dtype=edge_index.dtype)
    row = jnp.concatenate([row, loop])
    col = jnp.concatenate([col, loop])
    if edge_weight is None:
        edge_weight = jnp.ones((edge_index.shape[1],), dtype=jnp.float32)
    ew = jnp.concatenate(
        [edge_weight.astype(jnp.float32),
         jnp.ones((num_nodes,), dtype=jnp.float32)])
    deg = jnp.zeros((num_nodes,), dtype=jnp.float32).at[col].add(ew)
    dinv = jnp.where(deg > 0, jax.lax.rsqrt(deg), 0.0)
    norm = dinv[row] * ew * dinv[col]
    a_hat = jnp.zeros((n_pad, n_pad), dtype=dtype)
    a_hat = a_hat.at[col, row].add(norm.astype(dtype))   # messages source->target
    return a_hat


# --------------------------------------------------------------------------
# Full 2-layer GCN forward
# --------------------------------------------------------------------------
def gcn_forward(x, edge_index, edge_weight, w1, b1, w2, b2, *,
                tm=1024, tk=1024, resident_budget_bytes=48 * MIB):
    n, f = x.shape
    h = w1.shape[1]

    # The node axis is used both as the row axis (tiled by tm) and the source
    # axis (tiled by tk) of the SAME padded A_hat (and the layer-1 output
    # feeds layer 2), so it must be a multiple of both tile sizes.  With the
    # default tm == tk this is just one tile size (no lcm inflation).
    n_blk = math.lcm(tm, tk)
    n_pad = max(_round_up(n, n_blk), n_blk)
    f_pad = max(_round_up(f, LANE), LANE)
    h_pad = max(_round_up(h, LANE), LANE)

    # Padded A_hat built once, in bf16, reused by both layers.
    a_p = gcn_norm_dense(edge_index, edge_weight, n, n_pad, dtype=jnp.bfloat16)

    # bf16 MXU operands, f32 bias.
    x_p = _pad2(x, n_pad, f_pad, jnp.bfloat16)
    w1_p = _pad2(w1, f_pad, h_pad, jnp.bfloat16)
    w2_p = _pad2(w2, h_pad, h_pad, jnp.bfloat16)
    b1_p = _pad2(jnp.reshape(b1, (1, -1)), 1, h_pad, jnp.float32)
    b2_p = _pad2(jnp.reshape(b2, (1, -1)), 1, h_pad, jnp.float32)

    # 1) Narrow-side pre-projection:  P0 = X @ W1   (n_pad, h_pad) bf16.
    p0 = _project(x_p, w1_p, out_dtype=jnp.bfloat16, tm=tm)

    # 2) Layer-1 aggregation, fused epilogue: Z1 = leaky_relu(A@P0 + b1) @ W2.
    z1 = _aggregate_layer(a_p, p0, w2_p, b1_p,
                          activation=True, project=True,
                          out_dtype=jnp.bfloat16, tm=tm, tk=tk,
                          resident_budget_bytes=resident_budget_bytes)

    # 3) Layer-2 aggregation: out = A @ Z1 + b2.
    out_p = _aggregate_layer(a_p, z1, None, b2_p,
                             activation=False, project=False,
                             out_dtype=jnp.float32, tm=tm, tk=tk,
                             resident_budget_bytes=resident_budget_bytes)

    return out_p[:n, :h]


if __name__ == "__main__":
    key = jax.random.PRNGKey(0)
    k_x, k_ew, k_w1, k_w2, k_b1, k_b2 = jax.random.split(key, 6)

    # Small synthetic graph consistent with the module's forward:
    #   data.x: (N, nfeat), data.edge_index: (2, E), data.edge_weight: (E,)
    N, NFEAT, NHID = 1000, 16, 32
    # 512 tiles keep the demo small yet give n_pad=1024 -> a (2, 2) grid, so
    # the K-accumulation loop and pipelining are actually exercised.  Real
    # graphs should use the defaults (tm=tk=1024).
    TM = TK = 512

    x = jax.random.normal(k_x, (N, NFEAT), dtype=jnp.float32)

    # Deterministic ring graph (both directions) -> E = 2N edges.
    src = jnp.arange(N, dtype=jnp.int32)
    dst = (src + 1) % N
    edge_index = jnp.stack(
        [jnp.concatenate([src, dst]), jnp.concatenate([dst, src])], axis=0)
    edge_weight = jax.random.uniform(
        k_ew, (edge_index.shape[1],), dtype=jnp.float32, minval=0.5, maxval=1.5)

    # GCNConv parameters (shapes from __init__).
    w1 = jax.random.normal(k_w1, (NFEAT, NHID), jnp.float32) * (1.0 / NFEAT ** 0.5)
    b1 = jax.random.normal(k_b1, (NHID,), jnp.float32) * 0.01
    w2 = jax.random.normal(k_w2, (NHID, NHID), jnp.float32) * (1.0 / NHID ** 0.5)
    b2 = jax.random.normal(k_b2, (NHID,), jnp.float32) * 0.01

    fwd = jax.jit(functools.partial(gcn_forward, tm=TM, tk=TK))
    out = jax.block_until_ready(fwd(x, edge_index, edge_weight, w1, b1, w2, b2))

    # Also exercise the streamed-RHS fallback path (budget 0 forces streaming).
    fwd_stream = jax.jit(functools.partial(
        gcn_forward, tm=TM, tk=TK, resident_budget_bytes=0))
    out_stream = jax.block_until_ready(
        fwd_stream(x, edge_index, edge_weight, w1, b1, w2, b2))

    # Pure-JAX f32 reference (kernel uses bf16 aggregation -> loose tolerance).
    a_ref = gcn_norm_dense(edge_index, edge_weight, N, N, dtype=jnp.float32)
    h1_ref = a_ref @ (x @ w1) + b1[None, :]
    h1_ref = jnp.where(h1_ref > 0, h1_ref, 0.01 * h1_ref)
    out_ref = a_ref @ (h1_ref @ w2) + b2[None, :]

    assert out.shape == (N, NHID)
    err = float(jnp.max(jnp.abs(out - out_ref)))
    err_s = float(jnp.max(jnp.abs(out_stream - out_ref)))
    assert jnp.allclose(out, out_ref, atol=6e-2, rtol=5e-2), err
    assert jnp.allclose(out_stream, out_ref, atol=6e-2, rtol=5e-2), err_s

    print("KERNEL_OK")
</pallas_src>

<mosaic_0001>
module attributes {stable_mosaic.version = 11 : i64} {
  func.func @_proj_kernel(%arg0: i32, %arg1: memref<512x128xbf16, #tpu.memory_space<vmem>>, %arg2: memref<128x128xbf16, #tpu.memory_space<vmem>>, %arg3: memref<512x128xbf16, #tpu.memory_space<vmem>>) attributes {dimension_semantics = [#tpu.dimension_semantics<parallel>], iteration_bounds = array<i64: 2>, scalar_prefetch = 0 : i64, scratch_operands = 0 : i64, tpu.core_type = #tpu.core_type<tc>, window_params = [{transform_indices = @transform_0, window_bounds = array<i64: 512, 128>}, {pipeline_mode = #tpu.pipeline_mode<synchronous>, transform_indices = @transform_1, window_bounds = array<i64: 128, 128>}, {transform_indices = @transform_2, window_bounds = array<i64: 512, 128>}]} {
    %c0 = arith.constant 0 : index
    %c0_0 = arith.constant 0 : index
    %0 = vector.load %arg1[%c0, %c0_0] : memref<512x128xbf16, #tpu.memory_space<vmem>>, vector<512x128xbf16>
    %c0_1 = arith.constant 0 : index
    %c0_2 = arith.constant 0 : index
    %1 = vector.load %arg2[%c0_1, %c0_2] : memref<128x128xbf16, #tpu.memory_space<vmem>>, vector<128x128xbf16>
    %cst = arith.constant dense<0.000000e+00> : vector<512x128xf32>
    %2 = tpu.matmul %0, %1, %cst {dimension_numbers = #tpu.dot_dimension_numbers<[1], [0], [0], [1], [0, 0, 1, 1], [], []>} : vector<512x128xbf16>, vector<128x128xbf16>, vector<512x128xf32> -> vector<512x128xf32>
    %3 = arith.truncf %2 : vector<512x128xf32> to vector<512x128xbf16>
    %c0_3 = arith.constant 0 : index
    %c0_4 = arith.constant 0 : index
    %4 = vector.load %arg3[%c0_3, %c0_4] : memref<512x128xbf16, #tpu.memory_space<vmem>>, vector<512x128xbf16>
    tpu.vector_store %arg3[%c0_3, %c0_4], %3 {strides = array<i32>} : memref<512x128xbf16, #tpu.memory_space<vmem>>, vector<512x128xbf16>,
    return
  }
  func.func @transform_0(%arg0: i32) -> (i32, i32) {
    %c0_i32 = arith.constant 0 : i32
    %c0_i32_0 = arith.constant 0 : i32
    return %arg0, %c0_i32 : i32, i32
  }
  func.func @transform_1(%arg0: i32) -> (i32, i32) {
    %c0_i32 = arith.constant 0 : i32
    %c0_i32_0 = arith.constant 0 : i32
    %c0_i32_1 = arith.constant 0 : i32
    return %c0_i32, %c0_i32_0 : i32, i32
  }
  func.func @transform_2(%arg0: i32) -> (i32, i32) {
    %c0_i32 = arith.constant 0 : i32
    %c0_i32_0 = arith.constant 0 : i32
    return %arg0, %c0_i32 : i32, i32
  }
}

module attributes {stable_mosaic.version = 11 : i64} {
  func.func @_aggregate_kernel(%arg0: i32, %arg1: i32, %arg2: memref<512x512xbf16, #tpu.memory_space<vmem>>, %arg3: memref<1024x128xbf16, #tpu.memory_space<vmem>>, %arg4: memref<128x128xbf16, #tpu.memory_space<vmem>>, %arg5: memref<1x128xf32, #tpu.memory_space<vmem>>, %arg6: memref<512x128xbf16, #tpu.memory_space<vmem>>, %arg7: memref<512x128xf32, #tpu.memory_space<vmem>>) attributes {dimension_semantics = [#tpu.dimension_semantics<parallel>, #tpu.dimension_semantics<arbitrary>], iteration_bounds = array<i64: 2, 2>, scalar_prefetch = 0 : i64, scratch_operands = 1 : i64, tpu.core_type = #tpu.core_type<tc>, window_params = [{transform_indices = @transform_0, window_bounds = array<i64: 512, 512>}, {pipeline_mode = #tpu.pipeline_mode<synchronous>, transform_indices = @transform_1, window_bounds = array<i64: 1024, 128>}, {pipeline_mode = #tpu.pipeline_mode<synchronous>, transform_indices = @transform_2, window_bounds = array<i64: 128, 128>}, {pipeline_mode = #tpu.pipeline_mode<synchronous>, transform_indices = @transform_3, window_bounds = array<i64: 1, 128>}, {transform_indices = @transform_4, window_bounds = array<i64: 512, 128>}]} {
    %c512_i32 = arith.constant 512 : i32
    %0 = arith.muli %arg1, %c512_i32 : i32
    %1 = tpu.assume_multiple %0, 512 : i32
    %2 = arith.index_cast %1 : i32 to index
    %c0 = arith.constant 0 : index
    %3 = vector.load %arg3[%2, %c0] : memref<1024x128xbf16, #tpu.memory_space<vmem>>, vector<512x128xbf16>
    %c0_0 = arith.constant 0 : index
    %c0_1 = arith.constant 0 : index
    %4 = vector.load %arg2[%c0_0, %c0_1] : memref<512x512xbf16, #tpu.memory_space<vmem>>, vector<512x512xbf16>
    %cst = arith.constant dense<0.000000e+00> : vector<512x128xf32>
    %5 = tpu.matmul %4, %3, %cst {dimension_numbers = #tpu.dot_dimension_numbers<[1], [0], [0], [1], [0, 0, 1, 1], [], []>} : vector<512x512xbf16>, vector<512x128xbf16>, vector<512x128xf32> -> vector<512x128xf32>
    %c0_i32 = arith.constant 0 : i32
    %6 = arith.cmpi eq, %arg1, %c0_i32 : i32
    %7 = arith.extui %6 : i1 to i32
    %c0_i32_2 = arith.constant 0 : i32
    %8 = arith.cmpi ne, %7, %c0_i32_2 : i32
    scf.if %8 {
      %c0_6 = arith.constant 0 : index
      %c0_7 = arith.constant 0 : index
      %15 = vector.load %arg7[%c0_6, %c0_7] : memref<512x128xf32, #tpu.memory_space<vmem>>, vector<512x128xf32>
      tpu.vector_store %arg7[%c0_6, %c0_7], %5 {strides = array<i32>} : memref<512x128xf32, #tpu.memory_space<vmem>>, vector<512x128xf32>,
    } else {
    }
    %c0_i32_3 = arith.constant 0 : i32
    %9 = arith.cmpi ne, %arg1, %c0_i32_3 : i32
    %10 = arith.extui %9 : i1 to i32
    %c0_i32_4 = arith.constant 0 : i32
    %11 = arith.cmpi ne, %10, %c0_i32_4 : i32
    scf.if %11 {
      %c0_6 = arith.constant 0 : index
      %c0_7 = arith.constant 0 : index
      %15 = vector.load %arg7[%c0_6, %c0_7] : memref<512x128xf32, #tpu.memory_space<vmem>>, vector<512x128xf32>
      %16 = arith.addf %15, %5 : vector<512x128xf32>
      %c0_8 = arith.constant 0 : index
      %c0_9 = arith.constant 0 : index
      %17 = vector.load %arg7[%c0_8, %c0_9] : memref<512x128xf32, #tpu.memory_space<vmem>>, vector<512x128xf32>
      tpu.vector_store %arg7[%c0_8, %c0_9], %16 {strides = array<i32>} : memref<512x128xf32, #tpu.memory_space<vmem>>, vector<512x128xf32>,
    } else {
    }
    %c1_i32 = arith.constant 1 : i32
    %12 = arith.cmpi eq, %arg1, %c1_i32 : i32
    %13 = arith.extui %12 : i1 to i32
    %c0_i32_5 = arith.constant 0 : i32
    %14 = arith.cmpi ne, %13, %c0_i32_5 : i32
    scf.if %14 {
      %c0_6 = arith.constant 0 : index
      %c0_7 = arith.constant 0 : index
      %15 = vector.load %arg7[%c0_6, %c0_7] : memref<512x128xf32, #tpu.memory_space<vmem>>, vector<512x128xf32>
      %c0_8 = arith.constant 0 : index
      %c0_9 = arith.constant 0 : index
      %16 = vector.load %arg5[%c0_8, %c0_9] : memref<1x128xf32, #tpu.memory_space<vmem>>, vector<1x128xf32>
      %17 = vector.broadcast %16 : vector<1x128xf32> to vector<512x128xf32>
      %18 = arith.addf %15, %17 : vector<512x128xf32>
      %cst_10 = arith.constant 0.000000e+00 : f32
      %19 = vector.broadcast %cst_10 : f32 to vector<512x128xf32>
      %20 = arith.cmpf ogt, %18, %19 : vector<512x128xf32>
      %cst_11 = arith.constant 0.00999999977 : f32
      %21 = vector.broadcast %cst_11 : f32 to vector<512x128xf32>
      %22 = arith.mulf %21, %18 : vector<512x128xf32>
      %23 = arith.select %20, %18, %22 : vector<512x128xi1>, vector<512x128xf32>
      %24 = arith.truncf %23 : vector<512x128xf32> to vector<512x128xbf16>
      %c0_12 = arith.constant 0 : index
      %c0_13 = arith.constant 0 : index
      %25 = vector.load %arg4[%c0_12, %c0_13] : memref<128x128xbf16, #tpu.memory_space<vmem>>, vector<128x128xbf16>
      %cst_14 = arith.constant dense<0.000000e+00> : vector<512x128xf32>
      %26 = tpu.matmul %24, %25, %cst_14 {dimension_numbers = #tpu.dot_dimension_numbers<[1], [0], [0], [1], [0, 0, 1, 1], [], []>} : vector<512x128xbf16>, vector<128x128xbf16>, vector<512x128xf32> -> vector<512x128xf32>
      %27 = arith.truncf %26 : vector<512x128xf32> to vector<512x128xbf16>
      %c0_15 = arith.constant 0 : index
      %c0_16 = arith.constant 0 : index
      %28 = vector.load %arg6[%c0_15, %c0_16] : memref<512x128xbf16, #tpu.memory_space<vmem>>, vector<512x128xbf16>
      tpu.vector_store %arg6[%c0_15, %c0_16], %27 {strides = array<i32>} : memref<512x128xbf16, #tpu.memory_space<vmem>>, vector<512x128xbf16>,
    } else {
    }
    return
  }
  func.func @transform_0(%arg0: i32, %arg1: i32) -> (i32, i32) {
    %c0_i32 = arith.constant 0 : i32
    return %arg0, %arg1 : i32, i32
  }
  func.func @transform_1(%arg0: i32, %arg1: i32) -> (i32, i32) {
    %c0_i32 = arith.constant 0 : i32
    %c0_i32_0 = arith.constant 0 : i32
    %c0_i32_1 = arith.constant 0 : i32
    return %c0_i32, %c0_i32_0 : i32, i32
  }
  func.func @transform_2(%arg0: i32, %arg1: i32) -> (i32, i32) {
    %c0_i32 = arith.constant 0 : i32
    %c0_i32_0 = arith.constant 0 : i32
    %c0_i32_1 = arith.constant 0 : i32
    return %c0_i32, %c0_i32_0 : i32, i32
  }
  func.func @transform_3(%arg0: i32, %arg1: i32) -> (i32, i32) {
    %c0_i32 = arith.constant 0 : i32
    %c0_i32_0 = arith.constant 0 : i32
    %c0_i32_1 = arith.constant 0 : i32
    return %c0_i32, %c0_i32_0 : i32, i32
  }
  func.func @transform_4(%arg0: i32, %arg1: i32) -> (i32, i32) {
    %c0_i32 = arith.constant 0 : i32
    %c0_i32_0 = arith.constant 0 : i32
    return %arg0, %c0_i32 : i32, i32
  }
}

module attributes {stable_mosaic.version = 11 : i64} {
  func.func @_aggregate_kernel(%arg0: i32, %arg1: i32, %arg2: memref<512x512xbf16, #tpu.memory_space<vmem>>, %arg3: memref<1024x128xbf16, #tpu.memory_space<vmem>>, %arg4: memref<1x128xf32, #tpu.memory_space<vmem>>, %arg5: memref<512x128xf32, #tpu.memory_space<vmem>>, %arg6: memref<512x128xf32, #tpu.memory_space<vmem>>) attributes {dimension_semantics = [#tpu.dimension_semantics<parallel>, #tpu.dimension_semantics<arbitrary>], iteration_bounds = array<i64: 2, 2>, scalar_prefetch = 0 : i64, scratch_operands = 1 : i64, tpu.core_type = #tpu.core_type<tc>, window_params = [{transform_indices = @transform_0, window_bounds = array<i64: 512, 512>}, {pipeline_mode = #tpu.pipeline_mode<synchronous>, transform_indices = @transform_1, window_bounds = array<i64: 1024, 128>}, {pipeline_mode = #tpu.pipeline_mode<synchronous>, transform_indices = @transform_2, window_bounds = array<i64: 1, 128>}, {transform_indices = @transform_3, window_bounds = array<i64: 512, 128>}]} {
    %c512_i32 = arith.constant 512 : i32
    %0 = arith.muli %arg1, %c512_i32 : i32
    %1 = tpu.assume_multiple %0, 512 : i32
    %2 = arith.index_cast %1 : i32 to index
    %c0 = arith.constant 0 : index
    %3 = vector.load %arg3[%2, %c0] : memref<1024x128xbf16, #tpu.memory_space<vmem>>, vector<512x128xbf16>
    %c0_0 = arith.constant 0 : index
    %c0_1 = arith.constant 0 : index
    %4 = vector.load %arg2[%c0_0, %c0_1] : memref<512x512xbf16, #tpu.memory_space<vmem>>, vector<512x512xbf16>
    %cst = arith.constant dense<0.000000e+00> : vector<512x128xf32>
    %5 = tpu.matmul %4, %3, %cst {dimension_numbers = #tpu.dot_dimension_numbers<[1], [0], [0], [1], [0, 0, 1, 1], [], []>} : vector<512x512xbf16>, vector<512x128xbf16>, vector<512x128xf32> -> vector<512x128xf32>
    %c0_i32 = arith.constant 0 : i32
    %6 = arith.cmpi eq, %arg1, %c0_i32 : i32
    %7 = arith.extui %6 : i1 to i32
    %c0_i32_2 = arith.constant 0 : i32
    %8 = arith.cmpi ne, %7, %c0_i32_2 : i32
    scf.if %8 {
      %c0_6 = arith.constant 0 : index
      %c0_7 = arith.constant 0 : index
      %15 = vector.load %arg6[%c0_6, %c0_7] : memref<512x128xf32, #tpu.memory_space<vmem>>, vector<512x128xf32>
      tpu.vector_store %arg6[%c0_6, %c0_7], %5 {strides = array<i32>} : memref<512x128xf32, #tpu.memory_space<vmem>>, vector<512x128xf32>,
    } else {
    }
    %c0_i32_3 = arith.constant 0 : i32
    %9 = arith.cmpi ne, %arg1, %c0_i32_3 : i32
    %10 = arith.extui %9 : i1 to i32
    %c0_i32_4 = arith.constant 0 : i32
    %11 = arith.cmpi ne, %10, %c0_i32_4 : i32
    scf.if %11 {
      %c0_6 = arith.constant 0 : index
      %c0_7 = arith.constant 0 : index
      %15 = vector.load %arg6[%c0_6, %c0_7] : memref<512x128xf32, #tpu.memory_space<vmem>>, vector<512x128xf32>
      %16 = arith.addf %15, %5 : vector<512x128xf32>
      %c0_8 = arith.constant 0 : index
      %c0_9 = arith.constant 0 : index
      %17 = vector.load %arg6[%c0_8, %c0_9] : memref<512x128xf32, #tpu.memory_space<vmem>>, vector<512x128xf32>
      tpu.vector_store %arg6[%c0_8, %c0_9], %16 {strides = array<i32>} : memref<512x128xf32, #tpu.memory_space<vmem>>, vector<512x128xf32>,
    } else {
    }
    %c1_i32 = arith.constant 1 : i32
    %12 = arith.cmpi eq, %arg1, %c1_i32 : i32
    %13 = arith.extui %12 : i1 to i32
    %c0_i32_5 = arith.constant 0 : i32
    %14 = arith.cmpi ne, %13, %c0_i32_5 : i32
    scf.if %14 {
      %c0_6 = arith.constant 0 : index
      %c0_7 = arith.constant 0 : index
      %15 = vector.load %arg6[%c0_6, %c0_7] : memref<512x128xf32, #tpu.memory_space<vmem>>, vector<512x128xf32>
      %c0_8 = arith.constant 0 : index
      %c0_9 = arith.constant 0 : index
      %16 = vector.load %arg4[%c0_8, %c0_9] : memref<1x128xf32, #tpu.memory_space<vmem>>, vector<1x128xf32>
      %17 = vector.broadcast %16 : vector<1x128xf32> to vector<512x128xf32>
      %18 = arith.addf %15, %17 : vector<512x128xf32>
      %c0_10 = arith.constant 0 : index
      %c0_11 = arith.constant 0 : index
      %19 = vector.load %arg5[%c0_10, %c0_11] : memref<512x128xf32, #tpu.memory_space<vmem>>, vector<512x128xf32>
      tpu.vector_store %arg5[%c0_10, %c0_11], %18 {strides = array<i32>} : memref<512x128xf32, #tpu.memory_space<vmem>>, vector<512x128xf32>,
    } else {
    }
    return
  }
  func.func @transform_0(%arg0: i32, %arg1: i32) -> (i32, i32) {
    %c0_i32 = arith.constant 0 : i32
    return %arg0, %arg1 : i32, i32
  }
  func.func @transform_1(%arg0: i32, %arg1: i32) -> (i32, i32) {
    %c0_i32 = arith.constant 0 : i32
    %c0_i32_0 = arith.constant 0 : i32
    %c0_i32_1 = arith.constant 0 : i32
    return %c0_i32, %c0_i32_0 : i32, i32
  }
  func.func @transform_2(%arg0: i32, %arg1: i32) -> (i32, i32) {
    %c0_i32 = arith.constant 0 : i32
    %c0_i32_0 = arith.constant 0 : i32
    %c0_i32_1 = arith.constant 0 : i32
    return %c0_i32, %c0_i32_0 : i32, i32
  }
  func.func @transform_3(%arg0: i32, %arg1: i32) -> (i32, i32) {
    %c0_i32 = arith.constant 0 : i32
    %c0_i32_0 = arith.constant 0 : i32
    return %arg0, %c0_i32 : i32, i32
  }
}

</mosaic_0001>

<bundles_post_ra>
// kernel: gcn_forward.3
= control target key start
LH: loop header
LB: loop body
LE: loop exit
PB: predicated region body
PF: predicated region fallthrough
CT: control target
= control target key end

     0   :  { %s1710_s9 = smov 0   ;;  %s1826_s0 = inlined_call_operand.vmem [shape: bf16[1024,128], index: 0, kind: input, shape index: {}]   ;;  %s1827_s1 = inlined_call_operand.vmem [shape: bf16[128,128], index: 1, kind: input, shape index: {}]   ;;  %s1828_s2 = inlined_call_operand.vmem [shape: bf16[1024,128], index: 2, kind: output, shape index: {}]  }
   0x1 LB: > { %s1133_s10 = sadd.s32 4294967295, %s1693_s9   ;;  %p1137_p0 = scmp.ge.s32.totalorder %s1693_s9, 1  ;;  %s1693_s9 = sphi %s1710_s9, %s12_s9  }
   0x2   : > { %p113_p1 = scmp.lt.s32.totalorder %s1693_s9, 3 }
   0x4   : > { %p114_p2 = pnand %p1137_p0, %p113_p1 }
   0x5   : > { %v1647_v0 = vld [vmem:[%s1827_s1] sm:$0xff] (!%p114_p2)   ;;  %s1138_s13 = sshll.u32 (!%p114_p2), %s1133_s10, 6  ;;  %v1648_v1 = vld [vmem:[%s1827_s1 + $0x8] sm:$0xff] (!%p114_p2)   ;;  %v1649_v2 = vld [vmem:[%s1827_s1 + $0x10] sm:$0xff] (!%p114_p2)  }
   0x6   : > { %117 = sbr.rel (%p114_p2) target bundleno = 312 (0x138), region = 28  ;;  %p136_p3 = scmp.lt.s32.totalorder (!%p114_p2), %s1138_s13, 127  ;;  %1543 = vmatprep.subr.bf16.mxu0 (!%p114_p2), %v1647_v0  ;;  %1623 = vmatprep.subr.bf16.mxu1 (!%p114_p2), %v1647_v0  ;;  %v1650_v3 = vld [vmem:[%s1827_s1 + $0x18] sm:$0xff] (!%p114_p2)   ;;  %v1651_v6 = vld [vmem:[%s1827_s1 + $0x20] sm:$0xff] (!%p114_p2)   ;;  %v1652_v7 = vld [vmem:[%s1827_s1 + $0x28] sm:$0xff] (!%p114_p2)  }
   0x7   : > { %1544 = vmatpush3.bf16.msra.mxu0 (!%p114_p2), %v1647_v0  ;;  %1631 = vmatpush3.bf16.msra.mxu1 (!%p114_p2), %v1647_v0  ;;  %v1653_v8 = vld [vmem:[%s1827_s1 + $0x30] sm:$0xff] (!%p114_p2)   ;;  %v1654_v9 = vld [vmem:[%s1827_s1 + $0x38] sm:$0xff] (!%p114_p2)  }
   0x8   : > { %1545 = vmatprep.subr.bf16.mxu0 (!%p114_p2), %v1648_v1  ;;  %1624 = vmatprep.subr.bf16.mxu1 (!%p114_p2), %v1648_v1 }
   0xb   : > { %1546 = vmatpush3.bf16.msra.mxu0 (!%p114_p2), %v1648_v1  ;;  %1632 = vmatpush3.bf16.msra.mxu1 (!%p114_p2), %v1648_v1 }
   0xc   : > { %1547 = vmatprep.subr.bf16.mxu0 (!%p114_p2), %v1649_v2  ;;  %1625 = vmatprep.subr.bf16.mxu1 (!%p114_p2), %v1649_v2 }
   0xd   : > { %s1830_s13 = smov (!%p136_p3, %s1138_s13), 127 }
   0xe   : > { %s1139_s18 = sshll.u32 %s1830_s13, 2 }
   0xf   : > { %s1735_s21 = scalar_lea.vmem %s1826_s0, %s1139_s18  ;;  %1548 = vmatpush3.bf16.msra.mxu0 %v1649_v2  ;;  %1633 = vmatpush3.bf16.msra.mxu1 %v1649_v2  ;;  %s1789_s6 = scalar_lea.vmem %s1828_s2, %s1139_s18 }
  0x10   : > { %v1655_v4 = vld [vmem:[%s1735_s21] sm:$0xff]   ;;  %1549 = vmatprep.subr.bf16.mxu0 %v1650_v3  ;;  %1626 = vmatprep.subr.bf16.mxu1 %v1650_v3  ;;  %v1657_v10 = vld [vmem:[%s1735_s21 + $0x8] sm:$0xff]   ;;  %v1659_v12 = vld [vmem:[%s1735_s21 + $0x10] sm:$0xff]  }
  0x11   : > { %v1656_v5 = vld [vmem:[%s1735_s21 + $0x80] sm:$0xff]   ;;  %1559 = vmatprep.mubr.bf16.mxu0 %v1655_v4  ;;  %v1658_v11 = vld [vmem:[%s1735_s21 + $0x88] sm:$0xff]   ;;  %v1660_v13 = vld [vmem:[%s1735_s21 + $0x90] sm:$0xff]  }
  0x12   : > { %1591 = vmatprep.mubr.bf16.mxu1 %v1656_v5  ;;  %v1661_v14 = vld [vmem:[%s1735_s21 + $0x18] sm:$0xff]   ;;  %v1663_v16 = vld [vmem:[%s1735_s21 + $0x20] sm:$0xff]   ;;  %v1665_v18 = vld [vmem:[%s1735_s21 + $0x28] sm:$0xff]  }
  0x13   : > { %1550 = vmatpush3.bf16.msra.mxu0 %v1650_v3  ;;  %1634 = vmatpush3.bf16.msra.mxu1 %v1650_v3  ;;  %v1662_v15 = vld [vmem:[%s1735_s21 + $0x98] sm:$0xff]   ;;  %v1664_v17 = vld [vmem:[%s1735_s21 + $0xa0] sm:$0xff]   ;;  %v1666_v19 = vld [vmem:[%s1735_s21 + $0xa8] sm:$0xff]  }
  0x14   : > { %1551 = vmatprep.subr.bf16.mxu0 %v1651_v6  ;;  %1627 = vmatprep.subr.bf16.mxu1 %v1651_v6  ;;  %v1667_v20 = vld [vmem:[%s1735_s21 + $0x30] sm:$0xff]   ;;  %v1669_v22 = vld [vmem:[%s1735_s21 + $0x38] sm:$0xff]   ;;  %v1671_v24 = vld [vmem:[%s1735_s21 + $0x40] sm:$0xff]  }
  0x15   : > { %v1668_v21 = vld [vmem:[%s1735_s21 + $0xb0] sm:$0xff]   ;;  %v1670_v23 = vld [vmem:[%s1735_s21 + $0xb8] sm:$0xff]   ;;  %v1672_v25 = vld [vmem:[%s1735_s21 + $0xc0] sm:$0xff]  }
  0x16   : > { %v1673_v26 = vld [vmem:[%s1735_s21 + $0x48] sm:$0xff]   ;;  %v1675_v28 = vld [vmem:[%s1735_s21 + $0x50] sm:$0xff]   ;;  %v1677_v30 = vld [vmem:[%s1735_s21 + $0x58] sm:$0xff]  }
  0x17   : > { %1552 = vmatpush3.bf16.msra.mxu0 %v1651_v6  ;;  %1635 = vmatpush3.bf16.msra.mxu1 %v1651_v6  ;;  %v1674_v27 = vld [vmem:[%s1735_s21 + $0xc8] sm:$0xff]   ;;  %v1676_v29 = vld [vmem:[%s1735_s21 + $0xd0] sm:$0xff]   ;;  %v1678_v31 = vld [vmem:[%s1735_s21 + $0xd8] sm:$0xff]  }
  0x18   : > { %1553 = vmatprep.subr.bf16.mxu0 %v1652_v7  ;;  %1628 = vmatprep.subr.bf16.mxu1 %v1652_v7  ;;  %v1679_v32 = vld [vmem:[%s1735_s21 + $0x60] sm:$0xff]   ;;  %v1681_v34 = vld [vmem:[%s1735_s21 + $0x68] sm:$0xff]   ;;  %v1683_v36 = vld [vmem:[%s1735_s21 + $0x70] sm:$0xff]  }
  0x19   : > { %v1680_v33 = vld [vmem:[%s1735_s21 + $0xe0] sm:$0xff]   ;;  %v1682_v35 = vld [vmem:[%s1735_s21 + $0xe8] sm:$0xff]   ;;  %v1684_v37 = vld [vmem:[%s1735_s21 + $0xf0] sm:$0xff]  }
  0x1a   : > { %v1685_v38 = vld [vmem:[%s1735_s21 + $0x78] sm:$0xff]  }
  0x1b   : > { %1554 = vmatpush3.bf16.msra.mxu0 %v1652_v7  ;;  %1636 = vmatpush3.bf16.msra.mxu1 %v1652_v7  ;;  %v1686_v39 = vld [vmem:[%s1735_s21 + $0xf8] sm:$0xff]  }
  0x1c   : > { %1555 = vmatprep.subr.bf16.mxu0 %v1653_v8  ;;  %1629 = vmatprep.subr.bf16.mxu1 %v1653_v8 }
  0x1f   : > { %1556 = vmatpush3.bf16.msra.mxu0 %v1653_v8  ;;  %1637 = vmatpush3.bf16.msra.mxu1 %v1653_v8 }
  0x20   : > { %1557 = vmatprep.subr.bf16.mxu0 %v1654_v9  ;;  %1630 = vmatprep.subr.bf16.mxu1 %v1654_v9 }
  0x23   : > { %1558 = vmatpush3.bf16.msra.mxu0 %v1654_v9  ;;  %1638 = vmatpush3.bf16.msra.mxu1 %v1654_v9 }
  0x26   : > { %1560 = vmatmul.mubr.bf16.vlgmr.msra.gmra.mrb[0].mxu0 %v1657_v10  ;;  %1592 = vmatmul.mubr.bf16.vlgmr.msra.gmra.mrb[0].mxu1 %v1658_v11 }
  0x27   : > { %1563 = vmatprep.mubr.bf16.mxu0 %v1659_v12  ;;  %1595 = vmatprep.mubr.bf16.mxu1 %v1660_v13 }
  0x2e   : > { %1564 = vmatmul.mubr.bf16.gmra.mrb[4].mxu0 %v1661_v14  ;;  %1596 = vmatmul.mubr.bf16.gmra.mrb[4].mxu1 %v1662_v15 }
  0x2f   : > { %1567 = vmatprep.mubr.bf16.mxu0 %v1663_v16  ;;  %1599 = vmatprep.mubr.bf16.mxu1 %v1664_v17 }
  0x36   : > { %1568 = vmatmul.mubr.bf16.gmra.mrb[8].mxu0 %v1665_v18  ;;  %1600 = vmatmul.mubr.bf16.gmra.mrb[8].mxu1 %v1666_v19 }
  0x37   : > { %1571 = vmatprep.mubr.bf16.mxu0 %v1667_v20  ;;  %1603 = vmatprep.mubr.bf16.mxu1 %v1668_v21 }
  0x3e   : > { %1572 = vmatmul.mubr.bf16.gmra.mrb[12].mxu0 %v1669_v22  ;;  %1604 = vmatmul.mubr.bf16.gmra.mrb[12].mxu1 %v1670_v23 }
  0x3f   : > { %1575 = vmatprep.mubr.bf16.mxu0 %v1671_v24  ;;  %1607 = vmatprep.mubr.bf16.mxu1 %v1672_v25 }
  0x46   : > { %1576 = vmatmul.mubr.bf16.gmra.mrb[16].mxu0 %v1673_v26  ;;  %1608 = vmatmul.mubr.bf16.gmra.mrb[16].mxu1 %v1674_v27 }
  0x47   : > { %1579 = vmatprep.mubr.bf16.mxu0 %v1675_v28  ;;  %1611 = vmatprep.mubr.bf16.mxu1 %v1676_v29 }
  0x4e   : > { %1580 = vmatmul.mubr.bf16.gmra.mrb[20].mxu0 %v1677_v30  ;;  %1612 = vmatmul.mubr.bf16.gmra.mrb[20].mxu1 %v1678_v31 }
  0x4f   : > { %1583 = vmatprep.mubr.bf16.mxu0 %v1679_v32  ;;  %1615 = vmatprep.mubr.bf16.mxu1 %v1680_v33 }
  0x56   : > { %1584 = vmatmul.mubr.bf16.gmra.mrb[24].mxu0 %v1681_v34  ;;  %1616 = vmatmul.mubr.bf16.gmra.mrb[24].mxu1 %v1682_v35 }
  0x57   : > { %1587 = vmatprep.mubr.bf16.mxu0 %v1683_v36  ;;  %1619 = vmatprep.mubr.bf16.mxu1 %v1684_v37 }
  0x5e   : > { %1588 = vmatmul.mubr.bf16.gmra.mrb[28].mxu0 %v1685_v38  ;;  %1620 = vmatmul.mubr.bf16.gmra.mrb[28].mxu1 %v1686_v39 }
  0xf9   : > { %v1561_v40 = vpop.f32.mrb[0].mxu0  ;;  %v1593_v41 = vpop.f32.mrb[0].mxu1 }
  0xfa   : > { %v502_v42 = vpop.f32.mrb[1].mxu0  ;;  %v630_v43 = vpop.f32.mrb[1].mxu1 }
  0xfb   : > { %v1562_v44 = vpop.f32.mrb[2].mxu0  ;;  %v1594_v45 = vpop.f32.mrb[2].mxu1 }
  0xfc   : > { %v1320_v46 = vpack.c.bf16 %v1562_v44, %v1561_v40  ;;  %v1400_v47 = vpack.c.bf16 %v1594_v45, %v1593_v41  ;;  %v505_v48 = vpop.f32.mrb[3].mxu0  ;;  %v633_v49 = vpop.f32.mrb[3].mxu1 }
  0xfd   : > { %v1315_v50 = vpack.c.bf16 %v505_v48, %v502_v42  ;;  %v1395_v51 = vpack.c.bf16 %v633_v49, %v630_v43 }
  0xfe   : > { %1472 = vst [vmem:[%s1789_s6 + $0x8] sm:$0xff] %v1320_v46   ;;  %1488 = vst [vmem:[%s1789_s6 + $0x88] sm:$0xff] %v1400_v47  }
  0xff   : > { %1316 = vst [vmem:[%s1789_s6] sm:$0xff] %v1315_v50   ;;  %1487 = vst [vmem:[%s1789_s6 + $0x80] sm:$0xff] %v1395_v51  }
 0x101   : > { %v1565_v52 = vpop.f32.mrb[4].mxu0  ;;  %v1597_v53 = vpop.f32.mrb[4].mxu1 }
 0x102   : > { %v518_v54 = vpop.f32.mrb[5].mxu0  ;;  %v646_v55 = vpop.f32.mrb[5].mxu1 }
 0x103   : > { %v1566_v56 = vpop.f32.mrb[6].mxu0  ;;  %v1598_v57 = vpop.f32.mrb[6].mxu1 }
 0x104   : > { %v1330_v58 = vpack.c.bf16 %v1566_v56, %v1565_v52  ;;  %v1410_v59 = vpack.c.bf16 %v1598_v57, %v1597_v53  ;;  %v521_v60 = vpop.f32.mrb[7].mxu0  ;;  %v649_v61 = vpop.f32.mrb[7].mxu1 }
 0x105   : > { %v1325_v62 = vpack.c.bf16 %v521_v60, %v518_v54  ;;  %v1405_v63 = vpack.c.bf16 %v649_v61, %v646_v55 }
 0x106   : > { %1474 = vst [vmem:[%s1789_s6 + $0x18] sm:$0xff] %v1330_v58   ;;  %1490 = vst [vmem:[%s1789_s6 + $0x98] sm:$0xff] %v1410_v59  }
 0x107   : > { %1473 = vst [vmem:[%s1789_s6 + $0x10] sm:$0xff] %v1325_v62   ;;  %1489 = vst [vmem:[%s1789_s6 + $0x90] sm:$0xff] %v1405_v63  }
 0x109   : > { %v1569_v0 = vpop.f32.mrb[8].mxu0  ;;  %v1601_v1 = vpop.f32.mrb[8].mxu1 }
 0x10a   : > { %v534_v2 = vpop.f32.mrb[9].mxu0  ;;  %v662_v3 = vpop.f32.mrb[9].mxu1 }
 0x10b   : > { %v1570_v4 = vpop.f32.mrb[10].mxu0  ;;  %v1602_v5 = vpop.f32.mrb[10].mxu1 }
 0x10c   : > { %v1340_v6 = vpack.c.bf16 %v1570_v4, %v1569_v0  ;;  %v1420_v7 = vpack.c.bf16 %v1602_v5, %v1601_v1  ;;  %v537_v8 = vpop.f32.mrb[11].mxu0  ;;  %v665_v9 = vpop.f32.mrb[11].mxu1 }
 0x10d   : > { %v1335_v10 = vpack.c.bf16 %v537_v8, %v534_v2  ;;  %v1415_v11 = vpack.c.bf16 %v665_v9, %v662_v3 }
 0x10e   : > { %1476 = vst [vmem:[%s1789_s6 + $0x28] sm:$0xff] %v1340_v6   ;;  %1492 = vst [vmem:[%s1789_s6 + $0xa8] sm:$0xff] %v1420_v7  }
 0x10f   : > { %1475 = vst [vmem:[%s1789_s6 + $0x20] sm:$0xff] %v1335_v10   ;;  %1491 = vst [vmem:[%s1789_s6 + $0xa0] sm:$0xff] %v1415_v11  }
 0x111   : > { %v1573_v12 = vpop.f32.mrb[12].mxu0  ;;  %v1605_v13 = vpop.f32.mrb[12].mxu1 }
 0x112   : > { %v550_v14 = vpop.f32.mrb[13].mxu0  ;;  %v678_v15 = vpop.f32.mrb[13].mxu1 }
 0x113   : > { %v1574_v16 = vpop.f32.mrb[14].mxu0  ;;  %v1606_v17 = vpop.f32.mrb[14].mxu1 }
 0x114   : > { %v1350_v18 = vpack.c.bf16 %v1574_v16, %v1573_v12  ;;  %v1430_v19 = vpack.c.bf16 %v1606_v17, %v1605_v13  ;;  %v553_v20 = vpop.f32.mrb[15].mxu0  ;;  %v681_v21 = vpop.f32.mrb[15].mxu1 }
 0x115   : > { %v1345_v22 = vpack.c.bf16 %v553_v20, %v550_v14  ;;  %v1425_v23 = vpack.c.bf16 %v681_v21, %v678_v15 }
 0x116   : > { %1478 = vst [vmem:[%s1789_s6 + $0x38] sm:$0xff] %v1350_v18   ;;  %1494 = vst [vmem:[%s1789_s6 + $0xb8] sm:$0xff] %v1430_v19  }
 0x117   : > { %1477 = vst [vmem:[%s1789_s6 + $0x30] sm:$0xff] %v1345_v22   ;;  %1493 = vst [vmem:[%s1789_s6 + $0xb0] sm:$0xff] %v1425_v23  }
 0x119   : > { %v1577_v24 = vpop.f32.mrb[16].mxu0  ;;  %v1609_v25 = vpop.f32.mrb[16].mxu1 }
 0x11a   : > { %v566_v26 = vpop.f32.mrb[17].mxu0  ;;  %v694_v27 = vpop.f32.mrb[17].mxu1 }
 0x11b   : > { %v1578_v28 = vpop.f32.mrb[18].mxu0  ;;  %v1610_v29 = vpop.f32.mrb[18].mxu1 }
 0x11c   : > { %v1360_v30 = vpack.c.bf16 %v1578_v28, %v1577_v24  ;;  %v1440_v31 = vpack.c.bf16 %v1610_v29, %v1609_v25  ;;  %v569_v32 = vpop.f32.mrb[19].mxu0  ;;  %v697_v33 = vpop.f32.mrb[19].mxu1 }
 0x11d   : > { %v1355_v34 = vpack.c.bf16 %v569_v32, %v566_v26  ;;  %v1435_v35 = vpack.c.bf16 %v697_v33, %v694_v27 }
 0x11e   : > { %1480 = vst [vmem:[%s1789_s6 + $0x48] sm:$0xff] %v1360_v30   ;;  %1496 = vst [vmem:[%s1789_s6 + $0xc8] sm:$0xff] %v1440_v31  }
 0x11f   : > { %1479 = vst [vmem:[%s1789_s6 + $0x40] sm:$0xff] %v1355_v34   ;;  %1495 = vst [vmem:[%s1789_s6 + $0xc0] sm:$0xff] %v1435_v35  }
 0x121   : > { %v1581_v36 = vpop.f32.mrb[20].mxu0  ;;  %v1613_v37 = vpop.f32.mrb[20].mxu1 }
 0x122   : > { %v582_v38 = vpop.f32.mrb[21].mxu0  ;;  %v710_v39 = vpop.f32.mrb[21].mxu1 }
 0x123   : > { %v1582_v40 = vpop.f32.mrb[22].mxu0  ;;  %v1614_v41 = vpop.f32.mrb[22].mxu1 }
 0x124   : > { %v1370_v42 = vpack.c.bf16 %v1582_v40, %v1581_v36  ;;  %v1450_v43 = vpack.c.bf16 %v1614_v41, %v1613_v37  ;;  %v585_v44 = vpop.f32.mrb[23].mxu0  ;;  %v713_v45 = vpop.f32.mrb[23].mxu1 }
 0x125   : > { %v1365_v46 = vpack.c.bf16 %v585_v44, %v582_v38  ;;  %v1445_v47 = vpack.c.bf16 %v713_v45, %v710_v39 }
 0x126   : > { %1482 = vst [vmem:[%s1789_s6 + $0x58] sm:$0xff] %v1370_v42   ;;  %1498 = vst [vmem:[%s1789_s6 + $0xd8] sm:$0xff] %v1450_v43  }
 0x127   : > { %1481 = vst [vmem:[%s1789_s6 + $0x50] sm:$0xff] %v1365_v46   ;;  %1497 = vst [vmem:[%s1789_s6 + $0xd0] sm:$0xff] %v1445_v47  }
 0x129   : > { %v1585_v48 = vpop.f32.mrb[24].mxu0  ;;  %v1617_v49 = vpop.f32.mrb[24].mxu1 }
 0x12a   : > { %v598_v50 = vpop.f32.mrb[25].mxu0  ;;  %v726_v51 = vpop.f32.mrb[25].mxu1 }
 0x12b   : > { %v1586_v52 = vpop.f32.mrb[26].mxu0  ;;  %v1618_v53 = vpop.f32.mrb[26].mxu1 }
 0x12c   : > { %v1380_v54 = vpack.c.bf16 %v1586_v52, %v1585_v48  ;;  %v1460_v55 = vpack.c.bf16 %v1618_v53, %v1617_v49  ;;  %v601_v56 = vpop.f32.mrb[27].mxu0  ;;  %v729_v57 = vpop.f32.mrb[27].mxu1 }
 0x12d   : > { %v1375_v58 = vpack.c.bf16 %v601_v56, %v598_v50  ;;  %v1455_v59 = vpack.c.bf16 %v729_v57, %v726_v51 }
 0x12e   : > { %1484 = vst [vmem:[%s1789_s6 + $0x68] sm:$0xff] %v1380_v54   ;;  %1500 = vst [vmem:[%s1789_s6 + $0xe8] sm:$0xff] %v1460_v55  }
 0x12f   : > { %1483 = vst [vmem:[%s1789_s6 + $0x60] sm:$0xff] %v1375_v58   ;;  %1499 = vst [vmem:[%s1789_s6 + $0xe0] sm:$0xff] %v1455_v59  }
 0x131   : > { %v1589_v60 = vpop.f32.mrb[28].mxu0  ;;  %v1621_v61 = vpop.f32.mrb[28].mxu1 }
 0x132   : > { %v614_v62 = vpop.f32.mrb[29].mxu0  ;;  %v742_v63 = vpop.f32.mrb[29].mxu1 }
 0x133   : > { %v1590_v0 = vpop.f32.mrb[30].mxu0  ;;  %v1622_v1 = vpop.f32.mrb[30].mxu1 }
 0x134   : > { %v1390_v2 = vpack.c.bf16 %v1590_v0, %v1589_v60  ;;  %v1470_v3 = vpack.c.bf16 %v1622_v1, %v1621_v61  ;;  %v617_v4 = vpop.f32.mrb[31].mxu0  ;;  %v745_v5 = vpop.f32.mrb[31].mxu1 }
 0x135   : > { %v1385_v6 = vpack.c.bf16 %v617_v4, %v614_v62  ;;  %v1465_v7 = vpack.c.bf16 %v745_v5, %v742_v63 }
 0x136   : > { %1486 = vst [vmem:[%s1789_s6 + $0x78] sm:$0xff] %v1390_v2   ;;  %1502 = vst [vmem:[%s1789_s6 + $0xf8] sm:$0xff] %v1470_v3  }
 0x137   : > { %1485 = vst [vmem:[%s1789_s6 + $0x70] sm:$0xff] %v1385_v6   ;;  %1501 = vst [vmem:[%s1789_s6 + $0xf0] sm:$0xff] %v1465_v7  }
 0x138 PF: > { %s12_s9 = sadd.s32 1, %s1693_s9  }
 0x139   : > { %p9_p4 = scmp.ge.s32.totalorder %s12_s9, 4  }
 0x13b   :  { %11 = sbr.rel (!%p9_p4) target bundleno = 1 (0x1), region = 58 }

// kernel: gcn_forward.4
= control target key start
LH: loop header
LB: loop body
LE: loop exit
PB: predicated region body
PF: predicated region fallthrough
CT: control target
= control target key end

     0   :  { %s4559_s15 = smov 0   ;;  %s4561_s16 = smov 0   ;;  %s5577_s0 = inlined_call_operand.vmem [shape: bf16[1024,1024], index: 0, kind: input, shape index: {}]   ;;  %s5578_s1 = inlined_call_operand.vmem [shape: bf16[1024,128], index: 1, kind: input, shape index: {}]   ;;  %s5579_s2 = inlined_call_operand.vmem [shape: bf16[128,128], index: 2, kind: input, shape index: {}]   ;;  %s5580_s3 = inlined_call_operand.vmem [shape: f32[1,128], index: 3, kind: input, shape index: {}]   ;;  %s5581_s4 = inlined_call_operand.vmem [shape: bf16[1024,128], index: 4, kind: output, shape index: {}]  }
   0x1   :  { %s4563_s17 = smov 0   ;;  %s4565_s18 = smov 0  }
   0x2   :  { %s4567_s19 = smov 0   ;;  %s4569_s20 = smov 0  }
   0x3   :  { %s4571_s21 = smov 0  }
   0x4 LB: > { %s23_s22 = sadd.s32 1, %s4523_s19  ;;  %s26_s23 = sadd.s32 1, %s4527_s20  ;;  %s4531_s21 = sphi %s4571_s21, %s14_s21   ;;  %s4527_s20 = sphi %s4569_s20, %s5632_s20   ;;  %s4523_s19 = sphi %s4567_s19, %s5631_s19   ;;  %s4519_s18 = sphi %s4565_s18, %s5630_s18   ;;  %s4515_s17 = sphi %s4563_s17, %s5629_s17   ;;  %s4511_s16 = sphi %s4561_s16, %s5628_s16   ;;  %s4507_s15 = sphi %s4559_s15, %s5627_s15  }
   0x5   : > { %p24_p0 = scmp.ge.s32.totalorder %s23_s22, 2  ;;  %p42_p1 = scmp.ne.s32.totalorder %s4511_s16, %s4507_s15 }
   0x6   : > { %p43_p2 = scmp.eq.s32.totalorder %s4531_s21, 0  ;;  %s35_s27 = sadd.s32 1, %s4511_s16 }
   0x7   : > { %s5634_s22 = smov (%p24_p0, %s23_s22), 0  ;;  %s5636_s23 = smov (!%p24_p0, %s26_s23), %s4527_s20 }
   0x8   : > { %p44_p3 = por %p43_p2, %p42_p1  ;;  %p28_p4 = scmp.ge.s32.totalorder %s5636_s23, 2 }
   0x9   : > { %s31_s24 = ssub.s32 %s4523_s19, %s5634_s22  ;;  %p3482_p6 = scmp.ge.s32.totalorder %s4531_s21, 4 }
   0xa   : > { %s5638_s23 = smov (%p28_p4, %s5636_s23), 0 }
   0xb   : > { %s30_s25 = ssub.s32 %s4527_s20, %s5638_s23  ;;  %166 = sbr.rel (%p3482_p6) target bundleno = 89 (0x59), region = 28 }
   0xc   : > { %s32_s26 = sor.u32 %s31_s24, %s30_s25 }
   0xd   : > { %p33_p5 = scmp.eq.s32.totalorder %s32_s26, 0 }
   0xf   : > { %s4610_s28 = scalar_select %p33_p5, %s4511_s16, %s35_s27  }
  0x12   : > { %169 = sbr.rel (!%p44_p3) target bundleno = 89 (0x59), region = 32  ;;  %s171_s29 = sand.u32 (%p44_p3), 1, %s4511_s16  }
  0x13   : > { %s3485_s30 = sshll.u32 (%p44_p3), %s4523_s19, 2  ;;  %s3483_s5 = sshll.u32 (%p44_p3), %s171_s29, 10 }
  0x14   : > { %s3732_s6 = sshll.u32 (%p44_p3), %s4527_s20, 9  ;;  %s4624_s12 = scalar_lea.vmem (%p44_p3), [#allocation3], %s3483_s5 }
  0x15   : > { %s177_s7 = sadd.s32 (%p44_p3), %s3732_s6, %s3485_s30 }
  0x16   : > { %s3487_s8 = sshll.u32 (%p44_p3), %s177_s7, 2 }
  0x17   : > { %s4619_s11 = scalar_lea.vmem (%p44_p3), %s5577_s0, %s3487_s8 }
  0x18   : > { %v192_v0 = vld [vmem:[%s4619_s11] sm:$0xff] (%p44_p3)  ;;  %v194_v1 = vld [vmem:[%s4619_s11 + $0x8] sm:$0xff] (%p44_p3) }
  0x19   : > { %v196_v2 = vld [vmem:[%s4619_s11 + $0x20] sm:$0xff]  ;;  %193 = vst [vmem:[%s4624_s12] sm:$0xff] %v192_v0  ;;  %195 = vst [vmem:[%s4624_s12 + $0x8] sm:$0xff] %v194_v1  ;;  %v198_v3 = vld [vmem:[%s4619_s11 + $0x28] sm:$0xff] }
  0x1a   : > { %197 = vst [vmem:[%s4624_s12 + $0x10] sm:$0xff] %v196_v2  ;;  %v200_v4 = vld [vmem:[%s4619_s11 + $0x40] sm:$0xff]  ;;  %v202_v5 = vld [vmem:[%s4619_s11 + $0x48] sm:$0xff]  ;;  %199 = vst [vmem:[%s4624_s12 + $0x18] sm:$0xff] %v198_v3 }
  0x1b   : > { %201 = vst [vmem:[%s4624_s12 + $0x20] sm:$0xff] %v200_v4  ;;  %203 = vst [vmem:[%s4624_s12 + $0x28] sm:$0xff] %v202_v5  ;;  %v204_v6 = vld [vmem:[%s4619_s11 + $0x60] sm:$0xff]  ;;  %v206_v7 = vld [vmem:[%s4619_s11 + $0x68] sm:$0xff] }
  0x1c   : > { %v208_v8 = vld [vmem:[%s4619_s11 + $0x80] sm:$0xff]  ;;  %205 = vst [vmem:[%s4624_s12 + $0x30] sm:$0xff] %v204_v6  ;;  %207 = vst [vmem:[%s4624_s12 + $0x38] sm:$0xff] %v206_v7  ;;  %v210_v9 = vld [vmem:[%s4619_s11 + $0x88] sm:$0xff] }
  0x1d   : > { %209 = vst [vmem:[%s4624_s12 + $0x40] sm:$0xff] %v208_v8  ;;  %v212_v10 = vld [vmem:[%s4619_s11 + $0xa0] sm:$0xff]  ;;  %v214_v11 = vld [vmem:[%s4619_s11 + $0xa8] sm:$0xff]  ;;  %211 = vst [vmem:[%s4624_s12 + $0x48] sm:$0xff] %v210_v9 }
  0x1e   : > { %213 = vst [vmem:[%s4624_s12 + $0x50] sm:$0xff] %v212_v10  ;;  %215 = vst [vmem:[%s4624_s12 + $0x58] sm:$0xff] %v214_v11  ;;  %v216_v12 = vld [vmem:[%s4619_s11 + $0xc0] sm:$0xff]  ;;  %v218_v13 = vld [vmem:[%s4619_s11 + $0xc8] sm:$0xff] }
  0x1f   : > { %v220_v14 = vld [vmem:[%s4619_s11 + $0xe0] sm:$0xff]  ;;  %217 = vst [vmem:[%s4624_s12 + $0x60] sm:$0xff] %v216_v12  ;;  %219 = vst [vmem:[%s4624_s12 + $0x68] sm:$0xff] %v218_v13  ;;  %v222_v15 = vld [vmem:[%s4619_s11 + $0xe8] sm:$0xff] }
  0x20   : > { %221 = vst [vmem:[%s4624_s12 + $0x70] sm:$0xff] %v220_v14  ;;  %v224_v16 = vld [vmem:[%s4619_s11 + $0x100] sm:$0xff]  ;;  %v226_v17 = vld [vmem:[%s4619_s11 + $0x108] sm:$0xff]  ;;  %223 = vst [vmem:[%s4624_s12 + $0x78] sm:$0xff] %v222_v15 }
  0x21   : > { %225 = vst [vmem:[%s4624_s12 + $0x80] sm:$0xff] %v224_v16  ;;  %227 = vst [vmem:[%s4624_s12 + $0x88] sm:$0xff] %v226_v17  ;;  %v228_v18 = vld [vmem:[%s4619_s11 + $0x120] sm:$0xff]  ;;  %v230_v19 = vld [vmem:[%s4619_s11 + $0x128] sm:$0xff] }
  0x22   : > { %v232_v20 = vld [vmem:[%s4619_s11 + $0x140] sm:$0xff]  ;;  %229 = vst [vmem:[%s4624_s12 + $0x90] sm:$0xff] %v228_v18  ;;  %231 = vst [vmem:[%s4624_s12 + $0x98] sm:$0xff] %v230_v19  ;;  %v234_v21 = vld [vmem:[%s4619_s11 + $0x148] sm:$0xff] }
  0x23   : > { %233 = vst [vmem:[%s4624_s12 + $0xa0] sm:$0xff] %v232_v20  ;;  %v236_v22 = vld [vmem:[%s4619_s11 + $0x160] sm:$0xff]  ;;  %v238_v23 = vld [vmem:[%s4619_s11 + $0x168] sm:$0xff]  ;;  %235 = vst [vmem:[%s4624_s12 + $0xa8] sm:$0xff] %v234_v21 }
  0x24   : > { %237 = vst [vmem:[%s4624_s12 + $0xb0] sm:$0xff] %v236_v22  ;;  %239 = vst [vmem:[%s4624_s12 + $0xb8] sm:$0xff] %v238_v23  ;;  %v240_v24 = vld [vmem:[%s4619_s11 + $0x180] sm:$0xff]  ;;  %v242_v25 = vld [vmem:[%s4619_s11 + $0x188] sm:$0xff] }
  0x25   : > { %v244_v26 = vld [vmem:[%s4619_s11 + $0x1a0] sm:$0xff]  ;;  %241 = vst [vmem:[%s4624_s12 + $0xc0] sm:$0xff] %v240_v24  ;;  %243 = vst [vmem:[%s4624_s12 + $0xc8] sm:$0xff] %v242_v25  ;;  %v246_v27 = vld [vmem:[%s4619_s11 + $0x1a8] sm:$0xff] }
  0x26   : > { %245 = vst [vmem:[%s4624_s12 + $0xd0] sm:$0xff] %v244_v26  ;;  %v248_v28 = vld [vmem:[%s4619_s11 + $0x1c0] sm:$0xff]  ;;  %v250_v29 = vld [vmem:[%s4619_s11 + $0x1c8] sm:$0xff]  ;;  %247 = vst [vmem:[%s4624_s12 + $0xd8] sm:$0xff] %v246_v27 }
  0x27   : > { %249 = vst [vmem:[%s4624_s12 + $0xe0] sm:$0xff] %v248_v28  ;;  %251 = vst [vmem:[%s4624_s12 + $0xe8] sm:$0xff] %v250_v29  ;;  %v252_v30 = vld [vmem:[%s4619_s11 + $0x1e0] sm:$0xff]  ;;  %v254_v31 = vld [vmem:[%s4619_s11 + $0x1e8] sm:$0xff] }
  0x28   : > { %v256_v32 = vld [vmem:[%s4619_s11 + $0x200] sm:$0xff]  ;;  %253 = vst [vmem:[%s4624_s12 + $0xf0] sm:$0xff] %v252_v30  ;;  %255 = vst [vmem:[%s4624_s12 + $0xf8] sm:$0xff] %v254_v31  ;;  %v258_v33 = vld [vmem:[%s4619_s11 + $0x208] sm:$0xff] }
  0x29   : > { %257 = vst [vmem:[%s4624_s12 + $0x100] sm:$0xff] %v256_v32  ;;  %v260_v34 = vld [vmem:[%s4619_s11 + $0x220] sm:$0xff]  ;;  %v262_v35 = vld [vmem:[%s4619_s11 + $0x228] sm:$0xff]  ;;  %259 = vst [vmem:[%s4624_s12 + $0x108] sm:$0xff] %v258_v33 }
  0x2a   : > { %261 = vst [vmem:[%s4624_s12 + $0x110] sm:$0xff] %v260_v34  ;;  %263 = vst [vmem:[%s4624_s12 + $0x118] sm:$0xff] %v262_v35  ;;  %v264_v36 = vld [vmem:[%s4619_s11 + $0x240] sm:$0xff]  ;;  %v266_v37 = vld [vmem:[%s4619_s11 + $0x248] sm:$0xff] }
  0x2b   : > { %v268_v38 = vld [vmem:[%s4619_s11 + $0x260] sm:$0xff]  ;;  %265 = vst [vmem:[%s4624_s12 + $0x120] sm:$0xff] %v264_v36  ;;  %267 = vst [vmem:[%s4624_s12 + $0x128] sm:$0xff] %v266_v37  ;;  %v270_v39 = vld [vmem:[%s4619_s11 + $0x268] sm:$0xff] }
  0x2c   : > { %269 = vst [vmem:[%s4624_s12 + $0x130] sm:$0xff] %v268_v38  ;;  %v272_v40 = vld [vmem:[%s4619_s11 + $0x280] sm:$0xff]  ;;  %v274_v41 = vld [vmem:[%s4619_s11 + $0x288] sm:$0xff]  ;;  %271 = vst [vmem:[%s4624_s12 + $0x138] sm:$0xff] %v270_v39 }
  0x2d   : > { %273 = vst [vmem:[%s4624_s12 + $0x140] sm:$0xff] %v272_v40  ;;  %275 = vst [vmem:[%s4624_s12 + $0x148] sm:$0xff] %v274_v41  ;;  %v276_v42 = vld [vmem:[%s4619_s11 + $0x2a0] sm:$0xff]  ;;  %v278_v43 = vld [vmem:[%s4619_s11 + $0x2a8] sm:$0xff] }
  0x2e   : > { %v280_v44 = vld [vmem:[%s4619_s11 + $0x2c0] sm:$0xff]  ;;  %277 = vst [vmem:[%s4624_s12 + $0x150] sm:$0xff] %v276_v42  ;;  %279 = vst [vmem:[%s4624_s12 + $0x158] sm:$0xff] %v278_v43  ;;  %v282_v45 = vld [vmem:[%s4619_s11 + $0x2c8] sm:$0xff] }
  0x2f   : > { %281 = vst [vmem:[%s4624_s12 + $0x160] sm:$0xff] %v280_v44  ;;  %v284_v46 = vld [vmem:[%s4619_s11 + $0x2e0] sm:$0xff]  ;;  %v286_v47 = vld [vmem:[%s4619_s11 + $0x2e8] sm:$0xff]  ;;  %283 = vst [vmem:[%s4624_s12 + $0x168] sm:$0xff] %v282_v45 }
  0x30   : > { %285 = vst [vmem:[%s4624_s12 + $0x170] sm:$0xff] %v284_v46  ;;  %287 = vst [vmem:[%s4624_s12 + $0x178] sm:$0xff] %v286_v47  ;;  %v288_v48 = vld [vmem:[%s4619_s11 + $0x300] sm:$0xff]  ;;  %v290_v49 = vld [vmem:[%s4619_s11 + $0x308] sm:$0xff] }
  0x31   : > { %v292_v50 = vld [vmem:[%s4619_s11 + $0x320] sm:$0xff]  ;;  %289 = vst [vmem:[%s4624_s12 + $0x180] sm:$0xff] %v288_v48  ;;  %291 = vst [vmem:[%s4624_s12 + $0x188] sm:$0xff] %v290_v49  ;;  %v294_v51 = vld [vmem:[%s4619_s11 + $0x328] sm:$0xff] }
  0x32   : > { %293 = vst [vmem:[%s4624_s12 + $0x190] sm:$0xff] %v292_v50  ;;  %v296_v52 = vld [vmem:[%s4619_s11 + $0x340] sm:$0xff]  ;;  %v298_v53 = vld [vmem:[%s4619_s11 + $0x348] sm:$0xff]  ;;  %295 = vst [vmem:[%s4624_s12 + $0x198] sm:$0xff] %v294_v51 }
  0x33   : > { %297 = vst [vmem:[%s4624_s12 + $0x1a0] sm:$0xff] %v296_v52  ;;  %299 = vst [vmem:[%s4624_s12 + $0x1a8] sm:$0xff] %v298_v53  ;;  %v300_v54 = vld [vmem:[%s4619_s11 + $0x360] sm:$0xff]  ;;  %v302_v55 = vld [vmem:[%s4619_s11 + $0x368] sm:$0xff] }
  0x34   : > { %v304_v56 = vld [vmem:[%s4619_s11 + $0x380] sm:$0xff]  ;;  %301 = vst [vmem:[%s4624_s12 + $0x1b0] sm:$0xff] %v300_v54  ;;  %303 = vst [vmem:[%s4624_s12 + $0x1b8] sm:$0xff] %v302_v55  ;;  %v306_v57 = vld [vmem:[%s4619_s11 + $0x388] sm:$0xff] }
  0x35   : > { %305 = vst [vmem:[%s4624_s12 + $0x1c0] sm:$0xff] %v304_v56  ;;  %v308_v58 = vld [vmem:[%s4619_s11 + $0x3a0] sm:$0xff]  ;;  %v310_v59 = vld [vmem:[%s4619_s11 + $0x3a8] sm:$0xff]  ;;  %307 = vst [vmem:[%s4624_s12 + $0x1c8] sm:$0xff] %v306_v57 }
  0x36   : > { %309 = vst [vmem:[%s4624_s12 + $0x1d0] sm:$0xff] %v308_v58  ;;  %311 = vst [vmem:[%s4624_s12 + $0x1d8] sm:$0xff] %v310_v59  ;;  %v312_v60 = vld [vmem:[%s4619_s11 + $0x3c0] sm:$0xff]  ;;  %v314_v61 = vld [vmem:[%s4619_s11 + $0x3c8] sm:$0xff] }
  0x37   : > { %v316_v62 = vld [vmem:[%s4619_s11 + $0x3e0] sm:$0xff]  ;;  %313 = vst [vmem:[%s4624_s12 + $0x1e0] sm:$0xff] %v312_v60  ;;  %315 = vst [vmem:[%s4624_s12 + $0x1e8] sm:$0xff] %v314_v61  ;;  %v318_v63 = vld [vmem:[%s4619_s11 + $0x3e8] sm:$0xff] }
  0x38   : > { %317 = vst [vmem:[%s4624_s12 + $0x1f0] sm:$0xff] %v316_v62  ;;  %v320_v0 = vld [vmem:[%s4619_s11 + $0x400] sm:$0xff]  ;;  %v322_v1 = vld [vmem:[%s4619_s11 + $0x408] sm:$0xff]  ;;  %319 = vst [vmem:[%s4624_s12 + $0x1f8] sm:$0xff] %v318_v63 }
  0x39   : > { %321 = vst [vmem:[%s4624_s12 + $0x200] sm:$0xff] %v320_v0  ;;  %323 = vst [vmem:[%s4624_s12 + $0x208] sm:$0xff] %v322_v1  ;;  %v324_v2 = vld [vmem:[%s4619_s11 + $0x420] sm:$0xff]  ;;  %v326_v3 = vld [vmem:[%s4619_s11 + $0x428] sm:$0xff] }
  0x3a   : > { %v328_v4 = vld [vmem:[%s4619_s11 + $0x440] sm:$0xff]  ;;  %325 = vst [vmem:[%s4624_s12 + $0x210] sm:$0xff] %v324_v2  ;;  %327 = vst [vmem:[%s4624_s12 + $0x218] sm:$0xff] %v326_v3  ;;  %v330_v5 = vld [vmem:[%s4619_s11 + $0x448] sm:$0xff] }
  0x3b   : > { %329 = vst [vmem:[%s4624_s12 + $0x220] sm:$0xff] %v328_v4  ;;  %v332_v6 = vld [vmem:[%s4619_s11 + $0x460] sm:$0xff]  ;;  %v334_v7 = vld [vmem:[%s4619_s11 + $0x468] sm:$0xff]  ;;  %331 = vst [vmem:[%s4624_s12 + $0x228] sm:$0xff] %v330_v5 }
  0x3c   : > { %333 = vst [vmem:[%s4624_s12 + $0x230] sm:$0xff] %v332_v6  ;;  %335 = vst [vmem:[%s4624_s12 + $0x238] sm:$0xff] %v334_v7  ;;  %v336_v8 = vld [vmem:[%s4619_s11 + $0x480] sm:$0xff]  ;;  %v338_v9 = vld [vmem:[%s4619_s11 + $0x488] sm:$0xff] }
  0x3d   : > { %v340_v10 = vld [vmem:[%s4619_s11 + $0x4a0] sm:$0xff]  ;;  %337 = vst [vmem:[%s4624_s12 + $0x240] sm:$0xff] %v336_v8  ;;  %339 = vst [vmem:[%s4624_s12 + $0x248] sm:$0xff] %v338_v9  ;;  %v342_v11 = vld [vmem:[%s4619_s11 + $0x4a8] sm:$0xff] }
  0x3e   : > { %341 = vst [vmem:[%s4624_s12 + $0x250] sm:$0xff] %v340_v10  ;;  %v344_v12 = vld [vmem:[%s4619_s11 + $0x4c0] sm:$0xff]  ;;  %v346_v13 = vld [vmem:[%s4619_s11 + $0x4c8] sm:$0xff]  ;;  %343 = vst [vmem:[%s4624_s12 + $0x258] sm:$0xff] %v342_v11 }
  0x3f   : > { %345 = vst [vmem:[%s4624_s12 + $0x260] sm:$0xff] %v344_v12  ;;  %347 = vst [vmem:[%s4624_s12 + $0x268] sm:$0xff] %v346_v13  ;;  %v348_v14 = vld [vmem:[%s4619_s11 + $0x4e0] sm:$0xff]  ;;  %v350_v15 = vld [vmem:[%s4619_s11 + $0x4e8] sm:$0xff] }
  0x40   : > { %v352_v16 = vld [vmem:[%s4619_s11 + $0x500] sm:$0xff]  ;;  %349 = vst [vmem:[%s4624_s12 + $0x270] sm:$0xff] %v348_v14  ;;  %351 = vst [vmem:[%s4624_s12 + $0x278] sm:$0xff] %v350_v15  ;;  %v354_v17 = vld [vmem:[%s4619_s11 + $0x508] sm:$0xff] }
  0x41   : > { %353 = vst [vmem:[%s4624_s12 + $0x280] sm:$0xff] %v352_v16  ;;  %v356_v18 = vld [vmem:[%s4619_s11 + $0x520] sm:$0xff]  ;;  %v358_v19 = vld [vmem:[%s4619_s11 + $0x528] sm:$0xff]  ;;  %355 = vst [vmem:[%s4624_s12 + $0x288] sm:$0xff] %v354_v17 }
  0x42   : > { %357 = vst [vmem:[%s4624_s12 + $0x290] sm:$0xff] %v356_v18  ;;  %359 = vst [vmem:[%s4624_s12 + $0x298] sm:$0xff] %v358_v19  ;;  %v360_v20 = vld [vmem:[%s4619_s11 + $0x540] sm:$0xff]  ;;  %v362_v21 = vld [vmem:[%s4619_s11 + $0x548] sm:$0xff] }
  0x43   : > { %v364_v22 = vld [vmem:[%s4619_s11 + $0x560] sm:$0xff]  ;;  %361 = vst [vmem:[%s4624_s12 + $0x2a0] sm:$0xff] %v360_v20  ;;  %363 = vst [vmem:[%s4624_s12 + $0x2a8] sm:$0xff] %v362_v21  ;;  %v366_v23 = vld [vmem:[%s4619_s11 + $0x568] sm:$0xff] }
  0x44   : > { %365 = vst [vmem:[%s4624_s12 + $0x2b0] sm:$0xff] %v364_v22  ;;  %v368_v24 = vld [vmem:[%s4619_s11 + $0x580] sm:$0xff]  ;;  %v370_v25 = vld [vmem:[%s4619_s11 + $0x588] sm:$0xff]  ;;  %367 = vst [vmem:[%s4624_s12 + $0x2b8] sm:$0xff] %v366_v23 }
  0x45   : > { %369 = vst [vmem:[%s4624_s12 + $0x2c0] sm:$0xff] %v368_v24  ;;  %371 = vst [vmem:[%s4624_s12 + $0x2c8] sm:$0xff] %v370_v25  ;;  %v372_v26 = vld [vmem:[%s4619_s11 + $0x5a0] sm:$0xff]  ;;  %v374_v27 = vld [vmem:[%s4619_s11 + $0x5a8] sm:$0xff] }
  0x46   : > { %v376_v28 = vld [vmem:[%s4619_s11 + $0x5c0] sm:$0xff]  ;;  %373 = vst [vmem:[%s4624_s12 + $0x2d0] sm:$0xff] %v372_v26  ;;  %375 = vst [vmem:[%s4624_s12 + $0x2d8] sm:$0xff] %v374_v27  ;;  %v378_v29 = vld [vmem:[%s4619_s11 + $0x5c8] sm:$0xff] }
  0x47   : > { %377 = vst [vmem:[%s4624_s12 + $0x2e0] sm:$0xff] %v376_v28  ;;  %v380_v30 = vld [vmem:[%s4619_s11 + $0x5e0] sm:$0xff]  ;;  %v382_v31 = vld [vmem:[%s4619_s11 + $0x5e8] sm:$0xff]  ;;  %379 = vst [vmem:[%s4624_s12 + $0x2e8] sm:$0xff] %v378_v29 }
  0x48   : > { %381 = vst [vmem:[%s4624_s12 + $0x2f0] sm:$0xff] %v380_v30  ;;  %383 = vst [vmem:[%s4624_s12 + $0x2f8] sm:$0xff] %v382_v31  ;;  %v384_v32 = vld [vmem:[%s4619_s11 + $0x600] sm:$0xff]  ;;  %v386_v33 = vld [vmem:[%s4619_s11 + $0x608] sm:$0xff] }
  0x49   : > { %v388_v34 = vld [vmem:[%s4619_s11 + $0x620] sm:$0xff]  ;;  %385 = vst [vmem:[%s4624_s12 + $0x300] sm:$0xff] %v384_v32  ;;  %387 = vst [vmem:[%s4624_s12 + $0x308] sm:$0xff] %v386_v33  ;;  %v390_v35 = vld [vmem:[%s4619_s11 + $0x628] sm:$0xff] }
  0x4a   : > { %389 = vst [vmem:[%s4624_s12 + $0x310] sm:$0xff] %v388_v34  ;;  %v392_v36 = vld [vmem:[%s4619_s11 + $0x640] sm:$0xff]  ;;  %v394_v37 = vld [vmem:[%s4619_s11 + $0x648] sm:$0xff]  ;;  %391 = vst [vmem:[%s4624_s12 + $0x318] sm:$0xff] %v390_v35 }
  0x4b   : > { %393 = vst [vmem:[%s4624_s12 + $0x320] sm:$0xff] %v392_v36  ;;  %395 = vst [vmem:[%s4624_s12 + $0x328] sm:$0xff] %v394_v37  ;;  %v396_v38 = vld [vmem:[%s4619_s11 + $0x660] sm:$0xff]  ;;  %v398_v39 = vld [vmem:[%s4619_s11 + $0x668] sm:$0xff] }
  0x4c   : > { %v400_v40 = vld [vmem:[%s4619_s11 + $0x680] sm:$0xff]  ;;  %397 = vst [vmem:[%s4624_s12 + $0x330] sm:$0xff] %v396_v38  ;;  %399 = vst [vmem:[%s4624_s12 + $0x338] sm:$0xff] %v398_v39  ;;  %v402_v41 = vld [vmem:[%s4619_s11 + $0x688] sm:$0xff] }
  0x4d   : > { %401 = vst [vmem:[%s4624_s12 + $0x340] sm:$0xff] %v400_v40  ;;  %v404_v42 = vld [vmem:[%s4619_s11 + $0x6a0] sm:$0xff]  ;;  %v406_v43 = vld [vmem:[%s4619_s11 + $0x6a8] sm:$0xff]  ;;  %403 = vst [vmem:[%s4624_s12 + $0x348] sm:$0xff] %v402_v41 }
  0x4e   : > { %405 = vst [vmem:[%s4624_s12 + $0x350] sm:$0xff] %v404_v42  ;;  %407 = vst [vmem:[%s4624_s12 + $0x358] sm:$0xff] %v406_v43  ;;  %v408_v44 = vld [vmem:[%s4619_s11 + $0x6c0] sm:$0xff]  ;;  %v410_v45 = vld [vmem:[%s4619_s11 + $0x6c8] sm:$0xff] }
  0x4f   : > { %v412_v46 = vld [vmem:[%s4619_s11 + $0x6e0] sm:$0xff]  ;;  %409 = vst [vmem:[%s4624_s12 + $0x360] sm:$0xff] %v408_v44  ;;  %411 = vst [vmem:[%s4624_s12 + $0x368] sm:$0xff] %v410_v45  ;;  %v414_v47 = vld [vmem:[%s4619_s11 + $0x6e8] sm:$0xff] }
  0x50   : > { %413 = vst [vmem:[%s4624_s12 + $0x370] sm:$0xff] %v412_v46  ;;  %v416_v48 = vld [vmem:[%s4619_s11 + $0x700] sm:$0xff]  ;;  %v418_v49 = vld [vmem:[%s4619_s11 + $0x708] sm:$0xff]  ;;  %415 = vst [vmem:[%s4624_s12 + $0x378] sm:$0xff] %v414_v47 }
  0x51   : > { %417 = vst [vmem:[%s4624_s12 + $0x380] sm:$0xff] %v416_v48  ;;  %419 = vst [vmem:[%s4624_s12 + $0x388] sm:$0xff] %v418_v49  ;;  %v420_v50 = vld [vmem:[%s4619_s11 + $0x720] sm:$0xff]  ;;  %v422_v51 = vld [vmem:[%s4619_s11 + $0x728] sm:$0xff] }
  0x52   : > { %v424_v52 = vld [vmem:[%s4619_s11 + $0x740] sm:$0xff]  ;;  %421 = vst [vmem:[%s4624_s12 + $0x390] sm:$0xff] %v420_v50  ;;  %423 = vst [vmem:[%s4624_s12 + $0x398] sm:$0xff] %v422_v51  ;;  %v426_v53 = vld [vmem:[%s4619_s11 + $0x748] sm:$0xff] }
  0x53   : > { %425 = vst [vmem:[%s4624_s12 + $0x3a0] sm:$0xff] %v424_v52  ;;  %v428_v54 = vld [vmem:[%s4619_s11 + $0x760] sm:$0xff]  ;;  %v430_v55 = vld [vmem:[%s4619_s11 + $0x768] sm:$0xff]  ;;  %427 = vst [vmem:[%s4624_s12 + $0x3a8] sm:$0xff] %v426_v53 }
  0x54   : > { %429 = vst [vmem:[%s4624_s12 + $0x3b0] sm:$0xff] %v428_v54  ;;  %431 = vst [vmem:[%s4624_s12 + $0x3b8] sm:$0xff] %v430_v55  ;;  %v432_v56 = vld [vmem:[%s4619_s11 + $0x780] sm:$0xff]  ;;  %v434_v57 = vld [vmem:[%s4619_s11 + $0x788] sm:$0xff] }
  0x55   : > { %v436_v58 = vld [vmem:[%s4619_s11 + $0x7a0] sm:$0xff]  ;;  %433 = vst [vmem:[%s4624_s12 + $0x3c0] sm:$0xff] %v432_v56  ;;  %435 = vst [vmem:[%s4624_s12 + $0x3c8] sm:$0xff] %v434_v57  ;;  %v438_v59 = vld [vmem:[%s4619_s11 + $0x7a8] sm:$0xff] }
  0x56   : > { %437 = vst [vmem:[%s4624_s12 + $0x3d0] sm:$0xff] %v436_v58  ;;  %v440_v60 = vld [vmem:[%s4619_s11 + $0x7c0] sm:$0xff]  ;;  %v442_v61 = vld [vmem:[%s4619_s11 + $0x7c8] sm:$0xff]  ;;  %439 = vst [vmem:[%s4624_s12 + $0x3d8] sm:$0xff] %v438_v59 }
  0x57   : > { %441 = vst [vmem:[%s4624_s12 + $0x3e0] sm:$0xff] %v440_v60  ;;  %443 = vst [vmem:[%s4624_s12 + $0x3e8] sm:$0xff] %v442_v61  ;;  %v444_v62 = vld [vmem:[%s4619_s11 + $0x7e0] sm:$0xff]  ;;  %v446_v63 = vld [vmem:[%s4619_s11 + $0x7e8] sm:$0xff] }
  0x58   : > { %445 = vst [vmem:[%s4624_s12 + $0x3f0] sm:$0xff] %v444_v62  ;;  %447 = vst [vmem:[%s4624_s12 + $0x3f8] sm:$0xff] %v446_v63 }
  0x59 PF: > { %p3488_p7 = scmp.ge.s32.totalorder %s4531_s21, 1  ;;  %p452_p8 = scmp.lt.s32.totalorder %s4531_s21, 5 }
  0x5b   : > { %p453_p9 = pnand %p3488_p7, %p452_p8 }
  0x5d   : > { %456 = sbr.rel (%p453_p9) target bundleno = 983 (0x3d7), region = 55 }
  0x64   : > { %s3490_s13 = sshll.u32 %s4519_s18, 6  ;;  %s3492_s14 = sshll.u32 %s4515_s17, 9  ;;  %v4533_v0 = vmov 0  }
  0x65   : > { %p487_p10 = scmp.lt.s32.totalorder %s3490_s13, 127  ;;  %1522 = vmatprep.subr.bf16.mxu1 %v4533_v0  ;;  %1811 = vmatprep.subr.bf16.mxu0 %v4533_v0  ;;  %s494_s24 = sshra.s32 %s3492_s14, 3 }
  0x66   : > { %s3493_s25 = sshll.u32 %s494_s24, 2  ;;  %s459_s7 = sand.u32 1, %s4507_s15  }
  0x67   : > { %s5640_s13 = smov (!%p487_p10, %s3490_s13), 127  ;;  %s4888_s29 = scalar_lea.vmem %s5578_s1, %s3493_s25 }
  0x68   : > { %s3491_s18 = sshll.u32 %s5640_s13, 2  ;;  %v4245_v1 = vld [vmem:[%s4888_s29] sm:$0xff]   ;;  %v4247_v3 = vld [vmem:[%s4888_s29 + $0x8] sm:$0xff]   ;;  %v4249_v5 = vld [vmem:[%s4888_s29 + $0x10] sm:$0xff]   ;;  %s3489_s8 = sshll.u32 %s459_s7, 10 }
  0x69   : > { %s4894_s6 = scalar_lea.vmem %s5581_s4, %s3491_s18  ;;  %v4246_v2 = vld [vmem:[%s4888_s29 + $0x80] sm:$0xff]   ;;  %1523 = vmatpush1.bf16.msra.mxu1 %v4245_v1  ;;  %v4248_v4 = vld [vmem:[%s4888_s29 + $0x88] sm:$0xff]   ;;  %v4250_v6 = vld [vmem:[%s4888_s29 + $0x90] sm:$0xff]   ;;  %s4930_s15 = scalar_lea.vmem [#allocation3], %s3489_s8 }
  0x6a   : > { %1812 = vmatpush1.bf16.msra.mxu0 %v4246_v2  ;;  %1524 = vmatprep.subr.bf16.mxu1 %v4533_v0  ;;  %v4251_v7 = vld [vmem:[%s4888_s29 + $0x18] sm:$0xff]   ;;  %v4253_v9 = vld [vmem:[%s4888_s29 + $0x20] sm:$0xff]   ;;  %v4255_v11 = vld [vmem:[%s4888_s29 + $0x28] sm:$0xff]   ;;  %p3654_p11 = scmp.ne.s32.totalorder %s4515_s17, 0 }
  0x6b   : > { %1813 = vmatprep.subr.bf16.mxu0 %v4533_v0  ;;  %v4252_v8 = vld [vmem:[%s4888_s29 + $0x98] sm:$0xff]   ;;  %v4254_v10 = vld [vmem:[%s4888_s29 + $0xa0] sm:$0xff]   ;;  %v4256_v12 = vld [vmem:[%s4888_s29 + $0xa8] sm:$0xff]  }
  0x6c   : > { %v4257_v13 = vld [vmem:[%s4888_s29 + $0x30] sm:$0xff]   ;;  %v4259_v15 = vld [vmem:[%s4888_s29 + $0x38] sm:$0xff]   ;;  %v4261_v17 = vld [vmem:[%s4888_s29 + $0x40] sm:$0xff]  }
  0x6d   : > { %1525 = vmatpush1.bf16.msra.mxu1 %v4247_v3  ;;  %v4258_v14 = vld [vmem:[%s4888_s29 + $0xb0] sm:$0xff]   ;;  %v4260_v16 = vld [vmem:[%s4888_s29 + $0xb8] sm:$0xff]   ;;  %v4262_v18 = vld [vmem:[%s4888_s29 + $0xc0] sm:$0xff]  }
  0x6e   : > { %1814 = vmatpush1.bf16.msra.mxu0 %v4248_v4  ;;  %1526 = vmatprep.subr.bf16.mxu1 %v4533_v0  ;;  %v4279_v19 = vld [vmem:[%s4930_s15 + $0x4] ss:$16 sps:$4 sm:$0xff]   ;;  %v4263_v20 = vld [vmem:[%s4888_s29 + $0x48] sm:$0xff]   ;;  %v4267_v25 = vld [vmem:[%s4888_s29 + $0x58] sm:$0xff]  }
  0x6f   : > { %1815 = vmatprep.subr.bf16.mxu0 %v4533_v0  ;;  %v4282_v21 = vld [vmem:[%s4930_s15 + $0xc] ss:$16 sps:$4 sm:$0xff]   ;;  %1554 = vmatprep.mubr.bf16.mxu1 %v4279_v19  ;;  %v4265_v23 = vld [vmem:[%s4888_s29 + $0x50] sm:$0xff]   ;;  %v4269_v27 = vld [vmem:[%s4888_s29 + $0x60] sm:$0xff]  }
  0x70   : > { %v4264_v22 = vld [vmem:[%s4888_s29 + $0xc8] sm:$0xff]   ;;  %1843 = vmatprep.mubr.bf16.mxu0 %v4282_v21  ;;  %v4266_v24 = vld [vmem:[%s4888_s29 + $0xd0] sm:$0xff]   ;;  %v4268_v26 = vld [vmem:[%s4888_s29 + $0xd8] sm:$0xff]  }
  0x71   : > { %1527 = vmatpush1.bf16.msra.mxu1 %v4249_v5  ;;  %v4270_v28 = vld [vmem:[%s4888_s29 + $0xe0] sm:$0xff]   ;;  %v4271_v29 = vld [vmem:[%s4888_s29 + $0x68] sm:$0xff]   ;;  %v4273_v31 = vld [vmem:[%s4888_s29 + $0x70] sm:$0xff]  }
  0x72   : > { %1816 = vmatpush1.bf16.msra.mxu0 %v4250_v6  ;;  %1528 = vmatprep.subr.bf16.mxu1 %v4533_v0  ;;  %v4272_v30 = vld [vmem:[%s4888_s29 + $0xe8] sm:$0xff]   ;;  %v4274_v32 = vld [vmem:[%s4888_s29 + $0xf0] sm:$0xff]   ;;  %v4275_v33 = vld [vmem:[%s4888_s29 + $0x78] sm:$0xff]  }
  0x73   : > { %1817 = vmatprep.subr.bf16.mxu0 %v4533_v0  ;;  %v4276_v34 = vld [vmem:[%s4888_s29 + $0xf8] sm:$0xff]   ;;  %v4277_v35 = vld [vmem:[%s4930_s15] ss:$16 sps:$4 sm:$0xff]   ;;  %v4283_v37 = vld [vmem:[%s4930_s15 + $0x24] ss:$16 sps:$4 sm:$0xff]  }
  0x74   : > { %v4280_v36 = vld [vmem:[%s4930_s15 + $0x8] ss:$16 sps:$4 sm:$0xff]   ;;  %v4285_v38 = vld [vmem:[%s4930_s15 + $0x2c] ss:$16 sps:$4 sm:$0xff]   ;;  %v4287_v39 = vld [vmem:[%s4930_s15 + $0x20] ss:$16 sps:$4 sm:$0xff]  }
  0x75   : > { %1529 = vmatpush1.bf16.msra.mxu1 %v4251_v7  ;;  %v4288_v40 = vld [vmem:[%s4930_s15 + $0x28] ss:$16 sps:$4 sm:$0xff]   ;;  %v4289_v41 = vld [vmem:[%s4930_s15 + $0x44] ss:$16 sps:$4 sm:$0xff]   ;;  %v4291_v42 = vld [vmem:[%s4930_s15 + $0x4c] ss:$16 sps:$4 sm:$0xff]  }
  0x76   : > { %1818 = vmatpush1.bf16.msra.mxu0 %v4252_v8  ;;  %1530 = vmatprep.subr.bf16.mxu1 %v4533_v0  ;;  %v4293_v43 = vld [vmem:[%s4930_s15 + $0x40] ss:$16 sps:$4 sm:$0xff]   ;;  %v4294_v44 = vld [vmem:[%s4930_s15 + $0x48] ss:$16 sps:$4 sm:$0xff]   ;;  %v4295_v45 = vld [vmem:[%s4930_s15 + $0x64] ss:$16 sps:$4 sm:$0xff]  }
  0x77   : > { %1819 = vmatprep.subr.bf16.mxu0 %v4533_v0  ;;  %v4297_v46 = vld [vmem:[%s4930_s15 + $0x6c] ss:$16 sps:$4 sm:$0xff]   ;;  %v4299_v47 = vld [vmem:[%s4930_s15 + $0x60] ss:$16 sps:$4 sm:$0xff]   ;;  %v4300_v48 = vld [vmem:[%s4930_s15 + $0x68] ss:$16 sps:$4 sm:$0xff]  }
  0x78   : > { %v4301_v49 = vld [vmem:[%s4930_s15 + $0x84] ss:$16 sps:$4 sm:$0xff]   ;;  %v4303_v50 = vld [vmem:[%s4930_s15 + $0x8c] ss:$16 sps:$4 sm:$0xff]   ;;  %v4305_v51 = vld [vmem:[%s4930_s15 + $0x80] ss:$16 sps:$4 sm:$0xff]  }
  0x79   : > { %1531 = vmatpush1.bf16.msra.mxu1 %v4253_v9  ;;  %v4306_v52 = vld [vmem:[%s4930_s15 + $0x88] ss:$16 sps:$4 sm:$0xff]   ;;  %v4307_v53 = vld [vmem:[%s4930_s15 + $0xa4] ss:$16 sps:$4 sm:$0xff]   ;;  %v4309_v54 = vld [vmem:[%s4930_s15 + $0xac] ss:$16 sps:$4 sm:$0xff]  }
  0x7a   : > { %1820 = vmatpush1.bf16.msra.mxu0 %v4254_v10  ;;  %1532 = vmatprep.subr.bf16.mxu1 %v4533_v0  ;;  %v4311_v55 = vld [vmem:[%s4930_s15 + $0xa0] ss:$16 sps:$4 sm:$0xff]   ;;  %v4312_v56 = vld [vmem:[%s4930_s15 + $0xa8] ss:$16 sps:$4 sm:$0xff]   ;;  %v4313_v57 = vld [vmem:[%s4930_s15 + $0xc4] ss:$16 sps:$4 sm:$0xff]  }
  0x7b   : > { %1821 = vmatprep.subr.bf16.mxu0 %v4533_v0  ;;  %v4315_v58 = vld [vmem:[%s4930_s15 + $0xcc] ss:$16 sps:$4 sm:$0xff]   ;;  %v4317_v59 = vld [vmem:[%s4930_s15 + $0xc0] ss:$16 sps:$4 sm:$0xff]   ;;  %v4318_v60 = vld [vmem:[%s4930_s15 + $0xc8] ss:$16 sps:$4 sm:$0xff]  }
  0x7c   : > { %v4319_v61 = vld [vmem:[%s4930_s15 + $0xe4] ss:$16 sps:$4 sm:$0xff]   ;;  %v4321_v62 = vld [vmem:[%s4930_s15 + $0xec] ss:$16 sps:$4 sm:$0xff]   ;;  %v4323_v63 = vld [vmem:[%s4930_s15 + $0xe0] ss:$16 sps:$4 sm:$0xff]  }
  0x7d   : > { %1533 = vmatpush1.bf16.msra.mxu1 %v4255_v11  ;;  %v4325_v1 = vld [vmem:[%s4930_s15 + $0x104] ss:$16 sps:$4 sm:$0xff]   ;;  %v4327_v2 = vld [vmem:[%s4930_s15 + $0x10c] ss:$16 sps:$4 sm:$0xff]   ;;  %v4329_v3 = vld [vmem:[%s4930_s15 + $0x100] ss:$16 sps:$4 sm:$0xff]  }
  0x7e   : > { %1822 = vmatpush1.bf16.msra.mxu0 %v4256_v12  ;;  %1534 = vmatprep.subr.bf16.mxu1 %v4533_v0  ;;  %v4330_v4 = vld [vmem:[%s4930_s15 + $0x108] ss:$16 sps:$4 sm:$0xff]   ;;  %v4331_v5 = vld [vmem:[%s4930_s15 + $0x124] ss:$16 sps:$4 sm:$0xff]   ;;  %v4333_v6 = vld [vmem:[%s4930_s15 + $0x12c] ss:$16 sps:$4 sm:$0xff]  }
  0x7f   : > { %1823 = vmatprep.subr.bf16.mxu0 %v4533_v0  ;;  %v4335_v7 = vld [vmem:[%s4930_s15 + $0x120] ss:$16 sps:$4 sm:$0xff]   ;;  %v4336_v8 = vld [vmem:[%s4930_s15 + $0x128] ss:$16 sps:$4 sm:$0xff]   ;;  %v4337_v9 = vld [vmem:[%s4930_s15 + $0x144] ss:$16 sps:$4 sm:$0xff]  }
  0x80   : > { %v4339_v10 = vld [vmem:[%s4930_s15 + $0x14c] ss:$16 sps:$4 sm:$0xff]   ;;  %v4341_v11 = vld [vmem:[%s4930_s15 + $0x140] ss:$16 sps:$4 sm:$0xff]   ;;  %v4342_v12 = vld [vmem:[%s4930_s15 + $0x148] ss:$16 sps:$4 sm:$0xff]  }
  0x81   : > { %1535 = vmatpush1.bf16.msra.mxu1 %v4257_v13  ;;  %v4343_v13 = vld [vmem:[%s4930_s15 + $0x164] ss:$16 sps:$4 sm:$0xff]   ;;  %v4353_v19 = vld [vmem:[%s4930_s15 + $0x180] ss:$16 sps:$4 sm:$0xff]  }
  0x82   : > { %1824 = vmatpush1.bf16.msra.mxu0 %v4258_v14  ;;  %1536 = vmatprep.subr.bf16.mxu1 %v4533_v0  ;;  %v4345_v14 = vld [vmem:[%s4930_s15 + $0x16c] ss:$16 sps:$4 sm:$0xff]   ;;  %v4355_v21 = vld [vmem:[%s4930_s15 + $0x1a4] ss:$16 sps:$4 sm:$0xff]  }
  0x83   : > { %1825 = vmatprep.subr.bf16.mxu0 %v4533_v0 }
  0x85   : > { %1537 = vmatpush1.bf16.msra.mxu1 %v4259_v15  ;;  %v4347_v15 = vld [vmem:[%s4930_s15 + $0x160] ss:$16 sps:$4 sm:$0xff]  }
  0x86   : > { %1826 = vmatpush1.bf16.msra.mxu0 %v4260_v16  ;;  %1538 = vmatprep.subr.bf16.mxu1 %v4533_v0  ;;  %v4348_v16 = vld [vmem:[%s4930_s15 + $0x168] ss:$16 sps:$4 sm:$0xff]  }
  0x87   : > { %1827 = vmatprep.subr.bf16.mxu0 %v4533_v0 }
  0x89   : > { %1539 = vmatpush1.bf16.msra.mxu1 %v4261_v17  ;;  %v4349_v17 = vld [vmem:[%s4930_s15 + $0x184] ss:$16 sps:$4 sm:$0xff]  }
  0x8a   : > { %1828 = vmatpush1.bf16.msra.mxu0 %v4262_v18  ;;  %1540 = vmatprep.subr.bf16.mxu1 %v4533_v0  ;;  %v4351_v18 = vld [vmem:[%s4930_s15 + $0x18c] ss:$16 sps:$4 sm:$0xff]  }
  0x8b   : > { %1829 = vmatprep.subr.bf16.mxu0 %v4533_v0 }
  0x8d   : > { %1541 = vmatpush1.bf16.msra.mxu1 %v4263_v20  ;;  %v4354_v20 = vld [vmem:[%s4930_s15 + $0x188] ss:$16 sps:$4 sm:$0xff]  }
  0x8e   : > { %1830 = vmatpush1.bf16.msra.mxu0 %v4264_v22  ;;  %1542 = vmatprep.subr.bf16.mxu1 %v4533_v0  ;;  %v4357_v22 = vld [vmem:[%s4930_s15 + $0x1ac] ss:$16 sps:$4 sm:$0xff]  }
  0x8f   : > { %1831 = vmatprep.subr.bf16.mxu0 %v4533_v0 }
  0x91   : > { %1543 = vmatpush1.bf16.msra.mxu1 %v4265_v23  ;;  %v4359_v23 = vld [vmem:[%s4930_s15 + $0x1a0] ss:$16 sps:$4 sm:$0xff]  }
  0x92   : > { %1832 = vmatpush1.bf16.msra.mxu0 %v4266_v24  ;;  %1544 = vmatprep.subr.bf16.mxu1 %v4533_v0  ;;  %v4360_v24 = vld [vmem:[%s4930_s15 + $0x1a8] ss:$16 sps:$4 sm:$0xff]  }
  0x93   : > { %1833 = vmatprep.subr.bf16.mxu0 %v4533_v0 }
  0x95   : > { %1545 = vmatpush1.bf16.msra.mxu1 %v4267_v25  ;;  %v4361_v25 = vld [vmem:[%s4930_s15 + $0x1c4] ss:$16 sps:$4 sm:$0xff]  }
  0x96   : > { %1834 = vmatpush1.bf16.msra.mxu0 %v4268_v26  ;;  %1546 = vmatprep.subr.bf16.mxu1 %v4533_v0  ;;  %v4363_v26 = vld [vmem:[%s4930_s15 + $0x1cc] ss:$16 sps:$4 sm:$0xff]  }
  0x97   : > { %1835 = vmatprep.subr.bf16.mxu0 %v4533_v0 }
  0x99   : > { %1547 = vmatpush1.bf16.msra.mxu1 %v4269_v27  ;;  %v4365_v27 = vld [vmem:[%s4930_s15 + $0x1c0] ss:$16 sps:$4 sm:$0xff]  }
  0x9a   : > { %1836 = vmatpush1.bf16.msra.mxu0 %v4270_v28  ;;  %1548 = vmatprep.subr.bf16.mxu1 %v4533_v0  ;;  %v4366_v28 = vld [vmem:[%s4930_s15 + $0x1c8] ss:$16 sps:$4 sm:$0xff]  }
  0x9b   : > { %1837 = vmatprep.subr.bf16.mxu0 %v4533_v0 }
  0x9d   : > { %1549 = vmatpush1.bf16.msra.mxu1 %v4271_v29  ;;  %v4367_v29 = vld [vmem:[%s4930_s15 + $0x1e4] ss:$16 sps:$4 sm:$0xff]  }
  0x9e   : > { %1838 = vmatpush1.bf16.msra.mxu0 %v4272_v30  ;;  %1550 = vmatprep.subr.bf16.mxu1 %v4533_v0  ;;  %v4369_v30 = vld [vmem:[%s4930_s15 + $0x1ec] ss:$16 sps:$4 sm:$0xff]  }
  0x9f   : > { %1839 = vmatprep.subr.bf16.mxu0 %v4533_v0 }
  0xa1   : > { %1551 = vmatpush1.bf16.msra.mxu1 %v4273_v31  ;;  %v4371_v31 = vld [vmem:[%s4930_s15 + $0x1e0] ss:$16 sps:$4 sm:$0xff]  }
  0xa2   : > { %1840 = vmatpush1.bf16.msra.mxu0 %v4274_v32  ;;  %1552 = vmatprep.subr.bf16.mxu1 %v4533_v0  ;;  %v4372_v32 = vld [vmem:[%s4930_s15 + $0x1e8] ss:$16 sps:$4 sm:$0xff]  }
  0xa3   : > { %1841 = vmatprep.subr.bf16.mxu0 %v4533_v0  ;;  %v4324_v0 = vld [vmem:[%s4930_s15 + $0xe8] ss:$16 sps:$4 sm:$0xff]  }
  0xa5   : > { %1553 = vmatpush1.bf16.msra.mxu1 %v4275_v33  ;;  %v4373_v33 = vld [vmem:[%s4930_s15 + $0x204] ss:$16 sps:$4 sm:$0xff]  }
  0xa6   : > { %1842 = vmatpush1.bf16.msra.mxu0 %v4276_v34  ;;  %v4375_v34 = vld [vmem:[%s4930_s15 + $0x20c] ss:$16 sps:$4 sm:$0xff]  }
  0xa8   : > { %1555 = vmatmul.mubr.bf16.vlgmr.msra.gmra.mrb[0].mxu1 %v4277_v35  ;;  %v4377_v35 = vld [vmem:[%s4930_s15 + $0x200] ss:$16 sps:$4 sm:$0xff]  }
  0xa9   : > { %1844 = vmatmul.mubr.bf16.vlgmr.msra.gmra.mrb[0].mxu0 %v4280_v36  ;;  %1562 = vmatprep.mubr.bf16.mxu1 %v4283_v37  ;;  %v4378_v36 = vld [vmem:[%s4930_s15 + $0x208] ss:$16 sps:$4 sm:$0xff]   ;;  %v4379_v37 = vld [vmem:[%s4930_s15 + $0x224] ss:$16 sps:$4 sm:$0xff]  }
  0xaa   : > { %1851 = vmatprep.mubr.bf16.mxu0 %v4285_v38  ;;  %v4381_v38 = vld [vmem:[%s4930_s15 + $0x22c] ss:$16 sps:$4 sm:$0xff]  }
  0xb0   : > { %1563 = vmatmul.mubr.bf16.gmra.mrb[4].mxu1 %v4287_v39  ;;  %v4383_v39 = vld [vmem:[%s4930_s15 + $0x220] ss:$16 sps:$4 sm:$0xff]  }
  0xb1   : > { %1852 = vmatmul.mubr.bf16.gmra.mrb[4].mxu0 %v4288_v40  ;;  %1570 = vmatprep.mubr.bf16.mxu1 %v4289_v41  ;;  %v4384_v40 = vld [vmem:[%s4930_s15 + $0x228] ss:$16 sps:$4 sm:$0xff]   ;;  %v4385_v41 = vld [vmem:[%s4930_s15 + $0x244] ss:$16 sps:$4 sm:$0xff]  }
  0xb2   : > { %1859 = vmatprep.mubr.bf16.mxu0 %v4291_v42  ;;  %v4387_v42 = vld [vmem:[%s4930_s15 + $0x24c] ss:$16 sps:$4 sm:$0xff]  }
  0xb8   : > { %1571 = vmatmul.mubr.bf16.gmra.mrb[8].mxu1 %v4293_v43  ;;  %v4389_v43 = vld [vmem:[%s4930_s15 + $0x240] ss:$16 sps:$4 sm:$0xff]  }
  0xb9   : > { %1860 = vmatmul.mubr.bf16.gmra.mrb[8].mxu0 %v4294_v44  ;;  %1578 = vmatprep.mubr.bf16.mxu1 %v4295_v45  ;;  %v4390_v44 = vld [vmem:[%s4930_s15 + $0x248] ss:$16 sps:$4 sm:$0xff]   ;;  %v4391_v45 = vld [vmem:[%s4930_s15 + $0x264] ss:$16 sps:$4 sm:$0xff]  }
  0xba   : > { %1867 = vmatprep.mubr.bf16.mxu0 %v4297_v46  ;;  %v4393_v46 = vld [vmem:[%s4930_s15 + $0x26c] ss:$16 sps:$4 sm:$0xff]  }
  0xc0   : > { %1579 = vmatmul.mubr.bf16.gmra.mrb[12].mxu1 %v4299_v47  ;;  %v4395_v47 = vld [vmem:[%s4930_s15 + $0x260] ss:$16 sps:$4 sm:$0xff]  }
  0xc1   : > { %1868 = vmatmul.mubr.bf16.gmra.mrb[12].mxu0 %v4300_v48  ;;  %1586 = vmatprep.mubr.bf16.mxu1 %v4301_v49  ;;  %v4396_v48 = vld [vmem:[%s4930_s15 + $0x268] ss:$16 sps:$4 sm:$0xff]   ;;  %v4397_v49 = vld [vmem:[%s4930_s15 + $0x284] ss:$16 sps:$4 sm:$0xff]  }
  0xc2   : > { %1875 = vmatprep.mubr.bf16.mxu0 %v4303_v50  ;;  %v4399_v50 = vld [vmem:[%s4930_s15 + $0x28c] ss:$16 sps:$4 sm:$0xff]  }
  0xc8   : > { %1587 = vmatmul.mubr.bf16.gmra.mrb[16].mxu1 %v4305_v51  ;;  %v4401_v51 = vld [vmem:[%s4930_s15 + $0x280] ss:$16 sps:$4 sm:$0xff]  }
  0xc9   : > { %1876 = vmatmul.mubr.bf16.gmra.mrb[16].mxu0 %v4306_v52  ;;  %1594 = vmatprep.mubr.bf16.mxu1 %v4307_v53  ;;  %v4402_v52 = vld [vmem:[%s4930_s15 + $0x288] ss:$16 sps:$4 sm:$0xff]   ;;  %v4403_v53 = vld [vmem:[%s4930_s15 + $0x2a4] ss:$16 sps:$4 sm:$0xff]  }
  0xca   : > { %1883 = vmatprep.mubr.bf16.mxu0 %v4309_v54  ;;  %v4405_v54 = vld [vmem:[%s4930_s15 + $0x2ac] ss:$16 sps:$4 sm:$0xff]  }
  0xd0   : > { %1595 = vmatmul.mubr.bf16.gmra.mrb[20].mxu1 %v4311_v55  ;;  %v4407_v55 = vld [vmem:[%s4930_s15 + $0x2a0] ss:$16 sps:$4 sm:$0xff]  }
  0xd1   : > { %1884 = vmatmul.mubr.bf16.gmra.mrb[20].mxu0 %v4312_v56  ;;  %1602 = vmatprep.mubr.bf16.mxu1 %v4313_v57  ;;  %v4408_v56 = vld [vmem:[%s4930_s15 + $0x2a8] ss:$16 sps:$4 sm:$0xff]   ;;  %v4409_v57 = vld [vmem:[%s4930_s15 + $0x2c4] ss:$16 sps:$4 sm:$0xff]  }
  0xd2   : > { %1891 = vmatprep.mubr.bf16.mxu0 %v4315_v58  ;;  %v4411_v58 = vld [vmem:[%s4930_s15 + $0x2cc] ss:$16 sps:$4 sm:$0xff]  }
  0xd8   : > { %1603 = vmatmul.mubr.bf16.gmra.mrb[24].mxu1 %v4317_v59  ;;  %v4413_v59 = vld [vmem:[%s4930_s15 + $0x2c0] ss:$16 sps:$4 sm:$0xff]  }
  0xd9   : > { %1892 = vmatmul.mubr.bf16.gmra.mrb[24].mxu0 %v4318_v60  ;;  %1610 = vmatprep.mubr.bf16.mxu1 %v4319_v61  ;;  %v4414_v60 = vld [vmem:[%s4930_s15 + $0x2c8] ss:$16 sps:$4 sm:$0xff]   ;;  %v4415_v61 = vld [vmem:[%s4930_s15 + $0x2e4] ss:$16 sps:$4 sm:$0xff]  }
  0xda   : > { %1899 = vmatprep.mubr.bf16.mxu0 %v4321_v62  ;;  %v4417_v62 = vld [vmem:[%s4930_s15 + $0x2ec] ss:$16 sps:$4 sm:$0xff]  }
  0xe0   : > { %1611 = vmatmul.mubr.bf16.gmra.mrb[28].mxu1 %v4323_v63  ;;  %v4419_v63 = vld [vmem:[%s4930_s15 + $0x2e0] ss:$16 sps:$4 sm:$0xff]  }
  0xe1   : > { %1900 = vmatmul.mubr.bf16.gmra.mrb[28].mxu0 %v4324_v0  ;;  %1618 = vmatprep.mubr.bf16.mxu1 %v4325_v1  ;;  %v4420_v0 = vld [vmem:[%s4930_s15 + $0x2e8] ss:$16 sps:$4 sm:$0xff]   ;;  %v4421_v1 = vld [vmem:[%s4930_s15 + $0x304] ss:$16 sps:$4 sm:$0xff]  }
  0xe2   : > { %1907 = vmatprep.mubr.bf16.mxu0 %v4327_v2  ;;  %v4423_v2 = vld [vmem:[%s4930_s15 + $0x30c] ss:$16 sps:$4 sm:$0xff]  }
  0xe8   : > { %1619 = vmatmul.mubr.bf16.gmra.mrb[32].mxu1 %v4329_v3  ;;  %v4425_v3 = vld [vmem:[%s4930_s15 + $0x300] ss:$16 sps:$4 sm:$0xff]  }
  0xe9   : > { %1908 = vmatmul.mubr.bf16.gmra.mrb[32].mxu0 %v4330_v4  ;;  %1626 = vmatprep.mubr.bf16.mxu1 %v4331_v5  ;;  %v4426_v4 = vld [vmem:[%s4930_s15 + $0x308] ss:$16 sps:$4 sm:$0xff]   ;;  %v4427_v5 = vld [vmem:[%s4930_s15 + $0x324] ss:$16 sps:$4 sm:$0xff]  }
  0xea   : > { %1915 = vmatprep.mubr.bf16.mxu0 %v4333_v6  ;;  %v4429_v6 = vld [vmem:[%s4930_s15 + $0x32c] ss:$16 sps:$4 sm:$0xff]  }
  0xf0   : > { %1627 = vmatmul.mubr.bf16.gmra.mrb[36].mxu1 %v4335_v7  ;;  %v4431_v7 = vld [vmem:[%s4930_s15 + $0x320] ss:$16 sps:$4 sm:$0xff]  }
  0xf1   : > { %1916 = vmatmul.mubr.bf16.gmra.mrb[36].mxu0 %v4336_v8  ;;  %1634 = vmatprep.mubr.bf16.mxu1 %v4337_v9  ;;  %v4432_v8 = vld [vmem:[%s4930_s15 + $0x328] ss:$16 sps:$4 sm:$0xff]   ;;  %v4433_v9 = vld [vmem:[%s4930_s15 + $0x344] ss:$16 sps:$4 sm:$0xff]  }
  0xf2   : > { %1923 = vmatprep.mubr.bf16.mxu0 %v4339_v10  ;;  %v4435_v10 = vld [vmem:[%s4930_s15 + $0x34c] ss:$16 sps:$4 sm:$0xff]  }
  0xf8   : > { %1635 = vmatmul.mubr.bf16.gmra.mrb[40].mxu1 %v4341_v11  ;;  %v4437_v11 = vld [vmem:[%s4930_s15 + $0x340] ss:$16 sps:$4 sm:$0xff]  }
  0xf9   : > { %1924 = vmatmul.mubr.bf16.gmra.mrb[40].mxu0 %v4342_v12  ;;  %1642 = vmatprep.mubr.bf16.mxu1 %v4343_v13  ;;  %v4438_v12 = vld [vmem:[%s4930_s15 + $0x348] ss:$16 sps:$4 sm:$0xff]   ;;  %v4439_v13 = vld [vmem:[%s4930_s15 + $0x364] ss:$16 sps:$4 sm:$0xff]  }
  0xfa   : > { %1931 = vmatprep.mubr.bf16.mxu0 %v4345_v14  ;;  %v4441_v14 = vld [vmem:[%s4930_s15 + $0x36c] ss:$16 sps:$4 sm:$0xff]  }
 0x100   : > { %1643 = vmatmul.mubr.bf16.gmra.mrb[44].mxu1 %v4347_v15 }
 0x101   : > { %1932 = vmatmul.mubr.bf16.gmra.mrb[44].mxu0 %v4348_v16  ;;  %1650 = vmatprep.mubr.bf16.mxu1 %v4349_v17 }
 0x102   : > { %1939 = vmatprep.mubr.bf16.mxu0 %v4351_v18  ;;  %v4443_v18 = vld [vmem:[%s4930_s15 + $0x360] ss:$16 sps:$4 sm:$0xff]  }
 0x108   : > { %1651 = vmatmul.mubr.bf16.gmra.mrb[48].mxu1 %v4353_v19 }
 0x109   : > { %1940 = vmatmul.mubr.bf16.gmra.mrb[48].mxu0 %v4354_v20  ;;  %1658 = vmatprep.mubr.bf16.mxu1 %v4355_v21 }
 0x10a   : > { %1947 = vmatprep.mubr.bf16.mxu0 %v4357_v22  ;;  %v4444_v22 = vld [vmem:[%s4930_s15 + $0x368] ss:$16 sps:$4 sm:$0xff]  }
 0x110   : > { %1659 = vmatmul.mubr.bf16.gmra.mrb[52].mxu1 %v4359_v23  ;;  %v4445_v23 = vld [vmem:[%s4930_s15 + $0x384] ss:$16 sps:$4 sm:$0xff]  }
 0x111   : > { %1948 = vmatmul.mubr.bf16.gmra.mrb[52].mxu0 %v4360_v24  ;;  %1666 = vmatprep.mubr.bf16.mxu1 %v4361_v25 }
 0x112   : > { %1955 = vmatprep.mubr.bf16.mxu0 %v4363_v26  ;;  %v4447_v26 = vld [vmem:[%s4930_s15 + $0x38c] ss:$16 sps:$4 sm:$0xff]  }
 0x118   : > { %1667 = vmatmul.mubr.bf16.gmra.mrb[56].mxu1 %v4365_v27 }
 0x119   : > { %1956 = vmatmul.mubr.bf16.gmra.mrb[56].mxu0 %v4366_v28  ;;  %1674 = vmatprep.mubr.bf16.mxu1 %v4367_v29 }
 0x11a   : > { %1963 = vmatprep.mubr.bf16.mxu0 %v4369_v30 }
 0x120   : > { %1675 = vmatmul.mubr.bf16.gmra.mrb[60].mxu1 %v4371_v31 }
 0x121   : > { %1964 = vmatmul.mubr.bf16.gmra.mrb[60].mxu0 %v4372_v32  ;;  %1682 = vmatprep.mubr.bf16.mxu1 %v4373_v33  ;;  %v4449_v32 = vld [vmem:[%s4930_s15 + $0x380] ss:$16 sps:$4 sm:$0xff]  }
 0x122   : > { %1971 = vmatprep.mubr.bf16.mxu0 %v4375_v34 }
 0x128   : > { %1683 = vmatmul.mubr.bf16.gmra.mrb[64].mxu1 %v4377_v35 }
 0x129   : > { %1972 = vmatmul.mubr.bf16.gmra.mrb[64].mxu0 %v4378_v36  ;;  %1690 = vmatprep.mubr.bf16.mxu1 %v4379_v37  ;;  %v4450_v36 = vld [vmem:[%s4930_s15 + $0x388] ss:$16 sps:$4 sm:$0xff]   ;;  %v4451_v37 = vld [vmem:[%s4930_s15 + $0x3a4] ss:$16 sps:$4 sm:$0xff]  }
 0x12a   : > { %1979 = vmatprep.mubr.bf16.mxu0 %v4381_v38 }
 0x130   : > { %1691 = vmatmul.mubr.bf16.gmra.mrb[68].mxu1 %v4383_v39 }
 0x131   : > { %1980 = vmatmul.mubr.bf16.gmra.mrb[68].mxu0 %v4384_v40  ;;  %1698 = vmatprep.mubr.bf16.mxu1 %v4385_v41  ;;  %v4453_v40 = vld [vmem:[%s4930_s15 + $0x3ac] ss:$16 sps:$4 sm:$0xff]  }
 0x132   : > { %1987 = vmatprep.mubr.bf16.mxu0 %v4387_v42 }
 0x138   : > { %1699 = vmatmul.mubr.bf16.gmra.mrb[72].mxu1 %v4389_v43 }
 0x139   : > { %1988 = vmatmul.mubr.bf16.gmra.mrb[72].mxu0 %v4390_v44  ;;  %1706 = vmatprep.mubr.bf16.mxu1 %v4391_v45 }
 0x13a   : > { %1995 = vmatprep.mubr.bf16.mxu0 %v4393_v46  ;;  %v4455_v46 = vld [vmem:[%s4930_s15 + $0x3a0] ss:$16 sps:$4 sm:$0xff]  }
 0x140   : > { %1707 = vmatmul.mubr.bf16.gmra.mrb[76].mxu1 %v4395_v47 }
 0x141   : > { %1996 = vmatmul.mubr.bf16.gmra.mrb[76].mxu0 %v4396_v48  ;;  %1714 = vmatprep.mubr.bf16.mxu1 %v4397_v49 }
 0x142   : > { %2003 = vmatprep.mubr.bf16.mxu0 %v4399_v50  ;;  %v4456_v50 = vld [vmem:[%s4930_s15 + $0x3a8] ss:$16 sps:$4 sm:$0xff]  }
 0x148   : > { %1715 = vmatmul.mubr.bf16.gmra.mrb[80].mxu1 %v4401_v51  ;;  %v4457_v51 = vld [vmem:[%s4930_s15 + $0x3c4] ss:$16 sps:$4 sm:$0xff]  }
 0x149   : > { %2004 = vmatmul.mubr.bf16.gmra.mrb[80].mxu0 %v4402_v52  ;;  %1722 = vmatprep.mubr.bf16.mxu1 %v4403_v53 }
 0x14a   : > { %2011 = vmatprep.mubr.bf16.mxu0 %v4405_v54  ;;  %v4459_v54 = vld [vmem:[%s4930_s15 + $0x3cc] ss:$16 sps:$4 sm:$0xff]  }
 0x150   : > { %1723 = vmatmul.mubr.bf16.gmra.mrb[84].mxu1 %v4407_v55 }
 0x151   : > { %2012 = vmatmul.mubr.bf16.gmra.mrb[84].mxu0 %v4408_v56  ;;  %1730 = vmatprep.mubr.bf16.mxu1 %v4409_v57 }
 0x152   : > { %2019 = vmatprep.mubr.bf16.mxu0 %v4411_v58 }
 0x158   : > { %1731 = vmatmul.mubr.bf16.gmra.mrb[88].mxu1 %v4413_v59 }
 0x159   : > { %2020 = vmatmul.mubr.bf16.gmra.mrb[88].mxu0 %v4414_v60  ;;  %1738 = vmatprep.mubr.bf16.mxu1 %v4415_v61  ;;  %v4461_v60 = vld [vmem:[%s4930_s15 + $0x3c0] ss:$16 sps:$4 sm:$0xff]  }
 0x15a   : > { %2027 = vmatprep.mubr.bf16.mxu0 %v4417_v62 }
 0x160   : > { %1739 = vmatmul.mubr.bf16.gmra.mrb[92].mxu1 %v4419_v63 }
 0x161   : > { %2028 = vmatmul.mubr.bf16.gmra.mrb[92].mxu0 %v4420_v0  ;;  %1746 = vmatprep.mubr.bf16.mxu1 %v4421_v1  ;;  %v4462_v0 = vld [vmem:[%s4930_s15 + $0x3c8] ss:$16 sps:$4 sm:$0xff]   ;;  %v4463_v1 = vld [vmem:[%s4930_s15 + $0x3e4] ss:$16 sps:$4 sm:$0xff]  }
 0x162   : > { %2035 = vmatprep.mubr.bf16.mxu0 %v4423_v2 }
 0x168   : > { %1747 = vmatmul.mubr.bf16.gmra.mrb[96].mxu1 %v4425_v3 }
 0x169   : > { %2036 = vmatmul.mubr.bf16.gmra.mrb[96].mxu0 %v4426_v4  ;;  %1754 = vmatprep.mubr.bf16.mxu1 %v4427_v5  ;;  %v4465_v4 = vld [vmem:[%s4930_s15 + $0x3ec] ss:$16 sps:$4 sm:$0xff]  }
 0x16a   : > { %2043 = vmatprep.mubr.bf16.mxu0 %v4429_v6 }
 0x170   : > { %1755 = vmatmul.mubr.bf16.gmra.mrb[100].mxu1 %v4431_v7 }
 0x171   : > { %2044 = vmatmul.mubr.bf16.gmra.mrb[100].mxu0 %v4432_v8  ;;  %1762 = vmatprep.mubr.bf16.mxu1 %v4433_v9 }
 0x172   : > { %2051 = vmatprep.mubr.bf16.mxu0 %v4435_v10  ;;  %v4467_v10 = vld [vmem:[%s4930_s15 + $0x3e0] ss:$16 sps:$4 sm:$0xff]  }
 0x178   : > { %1763 = vmatmul.mubr.bf16.gmra.mrb[104].mxu1 %v4437_v11 }
 0x179   : > { %2052 = vmatmul.mubr.bf16.gmra.mrb[104].mxu0 %v4438_v12  ;;  %1770 = vmatprep.mubr.bf16.mxu1 %v4439_v13 }
 0x17a   : > { %2059 = vmatprep.mubr.bf16.mxu0 %v4441_v14  ;;  %v4468_v14 = vld [vmem:[%s4930_s15 + $0x3e8] ss:$16 sps:$4 sm:$0xff]  }
 0x17b   : > { %v1556_v15 = vpop.f32.mrb[0].mxu1 }
 0x17c   : > { %v1845_v16 = vpop.f32.mrb[0].mxu0  ;;  %v1558_v17 = vpop.f32.mrb[1].mxu1 }
 0x17d   : > { %v5071_v19 = vadd.f32 %v1845_v16, %v1556_v15  ;;  %v1847_v20 = vpop.f32.mrb[1].mxu0  ;;  %v1559_v21 = vpop.f32.mrb[2].mxu1 }
 0x17e   : > { %v1848_v24 = vpop.f32.mrb[2].mxu0  ;;  %v1561_v25 = vpop.f32.mrb[3].mxu1 }
 0x17f   : > { %v5076_v27 = vadd.f32 %v1848_v24, %v1559_v21  ;;  %v1850_v28 = vpop.f32.mrb[3].mxu0  ;;  %2104 = vst [vmem:[#allocation2] sm:$0xff] (!%p3654_p11), %v5071_v19 }
 0x180   : > { %1771 = vmatmul.mubr.bf16.gmra.mrb[108].mxu1 %v4443_v18 }
 0x181   : > { %2060 = vmatmul.mubr.bf16.gmra.mrb[108].mxu0 %v4444_v22  ;;  %1778 = vmatprep.mubr.bf16.mxu1 %v4445_v23  ;;  %2105 = vst [vmem:[#allocation2 + $0x8] sm:$0xff] (!%p3654_p11), %v5076_v27 }
 0x182   : > { %2067 = vmatprep.mubr.bf16.mxu0 %v4447_v26 }
 0x183   : > { %v1564_v29 = vpop.f32.mrb[4].mxu1 }
 0x184   : > { %v1853_v30 = vpop.f32.mrb[4].mxu0  ;;  %v1566_v31 = vpop.f32.mrb[5].mxu1 }
 0x185   : > { %v5079_v33 = vadd.f32 %v1853_v30, %v1564_v29  ;;  %v1855_v34 = vpop.f32.mrb[5].mxu0  ;;  %v1567_v35 = vpop.f32.mrb[6].mxu1 }
 0x186   : > { %v1856_v38 = vpop.f32.mrb[6].mxu0  ;;  %v1569_v39 = vpop.f32.mrb[7].mxu1 }
 0x187   : > { %v5084_v41 = vadd.f32 %v1856_v38, %v1567_v35  ;;  %v1858_v42 = vpop.f32.mrb[7].mxu0  ;;  %2106 = vst [vmem:[#allocation2 + $0x10] sm:$0xff] (!%p3654_p11), %v5079_v33 }
 0x188   : > { %1779 = vmatmul.mubr.bf16.gmra.mrb[112].mxu1 %v4449_v32 }
 0x189   : > { %2068 = vmatmul.mubr.bf16.gmra.mrb[112].mxu0 %v4450_v36  ;;  %1786 = vmatprep.mubr.bf16.mxu1 %v4451_v37  ;;  %2107 = vst [vmem:[#allocation2 + $0x18] sm:$0xff] (!%p3654_p11), %v5084_v41 }
 0x18a   : > { %2075 = vmatprep.mubr.bf16.mxu0 %v4453_v40 }
 0x18b   : > { %v1572_v43 = vpop.f32.mrb[8].mxu1 }
 0x18c   : > { %v1861_v44 = vpop.f32.mrb[8].mxu0  ;;  %v1574_v45 = vpop.f32.mrb[9].mxu1 }
 0x18d   : > { %v5087_v47 = vadd.f32 %v1861_v44, %v1572_v43  ;;  %v1863_v48 = vpop.f32.mrb[9].mxu0  ;;  %v1575_v49 = vpop.f32.mrb[10].mxu1 }
 0x18e   : > { %v1864_v52 = vpop.f32.mrb[10].mxu0  ;;  %v1577_v53 = vpop.f32.mrb[11].mxu1 }
 0x18f   : > { %v5092_v55 = vadd.f32 %v1864_v52, %v1575_v49  ;;  %v1866_v56 = vpop.f32.mrb[11].mxu0  ;;  %2108 = vst [vmem:[#allocation2 + $0x20] sm:$0xff] (!%p3654_p11), %v5087_v47 }
 0x190   : > { %1787 = vmatmul.mubr.bf16.gmra.mrb[116].mxu1 %v4455_v46 }
 0x191   : > { %2076 = vmatmul.mubr.bf16.gmra.mrb[116].mxu0 %v4456_v50  ;;  %1794 = vmatprep.mubr.bf16.mxu1 %v4457_v51  ;;  %2109 = vst [vmem:[#allocation2 + $0x28] sm:$0xff] (!%p3654_p11), %v5092_v55 }
 0x192   : > { %2083 = vmatprep.mubr.bf16.mxu0 %v4459_v54 }
 0x193   : > { %v1580_v57 = vpop.f32.mrb[12].mxu1 }
 0x194   : > { %v1869_v58 = vpop.f32.mrb[12].mxu0  ;;  %v1582_v59 = vpop.f32.mrb[13].mxu1 }
 0x195   : > { %v5095_v61 = vadd.f32 %v1869_v58, %v1580_v57  ;;  %v1871_v62 = vpop.f32.mrb[13].mxu0  ;;  %v1583_v63 = vpop.f32.mrb[14].mxu1 }
 0x196   : > { %v1872_v2 = vpop.f32.mrb[14].mxu0  ;;  %v1585_v3 = vpop.f32.mrb[15].mxu1 }
 0x197   : > { %v5100_v5 = vadd.f32 %v1872_v2, %v1583_v63  ;;  %v1874_v6 = vpop.f32.mrb[15].mxu0  ;;  %2110 = vst [vmem:[#allocation2 + $0x30] sm:$0xff] (!%p3654_p11), %v5095_v61 }
 0x198   : > { %1795 = vmatmul.mubr.bf16.gmra.mrb[120].mxu1 %v4461_v60 }
 0x199   : > { %2084 = vmatmul.mubr.bf16.gmra.mrb[120].mxu0 %v4462_v0  ;;  %1802 = vmatprep.mubr.bf16.mxu1 %v4463_v1  ;;  %2111 = vst [vmem:[#allocation2 + $0x38] sm:$0xff] (!%p3654_p11), %v5100_v5 }
 0x19a   : > { %2091 = vmatprep.mubr.bf16.mxu0 %v4465_v4 }
 0x19b   : > { %v1588_v7 = vpop.f32.mrb[16].mxu1 }
 0x19c   : > { %v1877_v8 = vpop.f32.mrb[16].mxu0  ;;  %v1590_v9 = vpop.f32.mrb[17].mxu1 }
 0x19d   : > { %v5103_v11 = vadd.f32 %v1877_v8, %v1588_v7  ;;  %v1879_v12 = vpop.f32.mrb[17].mxu0  ;;  %v1591_v13 = vpop.f32.mrb[18].mxu1 }
 0x19e   : > { %v1880_v15 = vpop.f32.mrb[18].mxu0  ;;  %v1593_v16 = vpop.f32.mrb[19].mxu1 }
 0x19f   : > { %v5106_v17 = vadd.f32 %v1880_v15, %v1591_v13  ;;  %v1882_v18 = vpop.f32.mrb[19].mxu0  ;;  %2112 = vst [vmem:[#allocation2 + $0x40] sm:$0xff] (!%p3654_p11), %v5103_v11 }
 0x1a0   : > { %1803 = vmatmul.mubr.bf16.gmra.mrb[124].mxu1 %v4467_v10 }
 0x1a1   : > { %2092 = vmatmul.mubr.bf16.gmra.mrb[124].mxu0 %v4468_v14  ;;  %2113 = vst [vmem:[#allocation2 + $0x48] sm:$0xff] (!%p3654_p11), %v5106_v17 }
 0x1a3   : > { %v1596_v20 = vpop.f32.mrb[20].mxu1 }
 0x1a4   : > { %v1885_v21 = vpop.f32.mrb[20].mxu0  ;;  %v1598_v22 = vpop.f32.mrb[21].mxu1 }
 0x1a5   : > { %v5108_v23 = vadd.f32 %v1885_v21, %v1596_v20  ;;  %v1887_v24 = vpop.f32.mrb[21].mxu0  ;;  %v1599_v25 = vpop.f32.mrb[22].mxu1 }
 0x1a6   : > { %v1888_v26 = vpop.f32.mrb[22].mxu0  ;;  %v1601_v28 = vpop.f32.mrb[23].mxu1 }
 0x1a7   : > { %v5110_v29 = vadd.f32 %v1888_v26, %v1599_v25  ;;  %v1890_v30 = vpop.f32.mrb[23].mxu0  ;;  %2114 = vst [vmem:[#allocation2 + $0x50] sm:$0xff] (!%p3654_p11), %v5108_v23 }
 0x1a9   : > { %2115 = vst [vmem:[#allocation2 + $0x58] sm:$0xff] (!%p3654_p11), %v5110_v29 }
 0x1ab   : > { %v1604_v31 = vpop.f32.mrb[24].mxu1 }
 0x1ac   : > { %v1893_v32 = vpop.f32.mrb[24].mxu0  ;;  %v1606_v34 = vpop.f32.mrb[25].mxu1 }
 0x1ad   : > { %v5112_v35 = vadd.f32 %v1893_v32, %v1604_v31  ;;  %v1895_v36 = vpop.f32.mrb[25].mxu0  ;;  %v1607_v37 = vpop.f32.mrb[26].mxu1 }
 0x1ae   : > { %v1896_v38 = vpop.f32.mrb[26].mxu0  ;;  %v1609_v39 = vpop.f32.mrb[27].mxu1 }
 0x1af   : > { %v5114_v40 = vadd.f32 %v1896_v38, %v1607_v37  ;;  %v1898_v42 = vpop.f32.mrb[27].mxu0  ;;  %2116 = vst [vmem:[#allocation2 + $0x60] sm:$0xff] (!%p3654_p11), %v5112_v35 }
 0x1b1   : > { %2117 = vst [vmem:[#allocation2 + $0x68] sm:$0xff] (!%p3654_p11), %v5114_v40 }
 0x1b3   : > { %v1612_v43 = vpop.f32.mrb[28].mxu1 }
 0x1b4   : > { %v1901_v44 = vpop.f32.mrb[28].mxu0  ;;  %v1614_v45 = vpop.f32.mrb[29].mxu1 }
 0x1b5   : > { %v5116_v46 = vadd.f32 %v1901_v44, %v1612_v43  ;;  %v1903_v48 = vpop.f32.mrb[29].mxu0  ;;  %v1615_v49 = vpop.f32.mrb[30].mxu1 }
 0x1b6   : > { %v1904_v50 = vpop.f32.mrb[30].mxu0  ;;  %v1617_v51 = vpop.f32.mrb[31].mxu1 }
 0x1b7   : > { %v5118_v52 = vadd.f32 %v1904_v50, %v1615_v49  ;;  %v1906_v53 = vpop.f32.mrb[31].mxu0  ;;  %2118 = vst [vmem:[#allocation2 + $0x70] sm:$0xff] (!%p3654_p11), %v5116_v46 }
 0x1b9   : > { %2119 = vst [vmem:[#allocation2 + $0x78] sm:$0xff] (!%p3654_p11), %v5118_v52 }
 0x1bb   : > { %v1620_v54 = vpop.f32.mrb[32].mxu1 }
 0x1bc   : > { %v1909_v56 = vpop.f32.mrb[32].mxu0  ;;  %v1622_v57 = vpop.f32.mrb[33].mxu1 }
 0x1bd   : > { %v5120_v58 = vadd.f32 %v1909_v56, %v1620_v54  ;;  %v1911_v59 = vpop.f32.mrb[33].mxu0  ;;  %v1623_v60 = vpop.f32.mrb[34].mxu1 }
 0x1be   : > { %v1912_v62 = vpop.f32.mrb[34].mxu0  ;;  %v1625_v63 = vpop.f32.mrb[35].mxu1 }
 0x1bf   : > { %v5122_v0 = vadd.f32 %v1912_v62, %v1623_v60  ;;  %v1914_v1 = vpop.f32.mrb[35].mxu0  ;;  %2120 = vst [vmem:[#allocation2 + $0x80] sm:$0xff] (!%p3654_p11), %v5120_v58 }
 0x1c1   : > { %2121 = vst [vmem:[#allocation2 + $0x88] sm:$0xff] (!%p3654_p11), %v5122_v0 }
 0x1c3   : > { %v1628_v2 = vpop.f32.mrb[36].mxu1 }
 0x1c4   : > { %v1917_v3 = vpop.f32.mrb[36].mxu0  ;;  %v1630_v4 = vpop.f32.mrb[37].mxu1 }
 0x1c5   : > { %v5124_v6 = vadd.f32 %v1917_v3, %v1628_v2  ;;  %v1919_v7 = vpop.f32.mrb[37].mxu0  ;;  %v1631_v8 = vpop.f32.mrb[38].mxu1 }
 0x1c6   : > { %v1920_v9 = vpop.f32.mrb[38].mxu0  ;;  %v1633_v10 = vpop.f32.mrb[39].mxu1 }
 0x1c7   : > { %v5126_v12 = vadd.f32 %v1920_v9, %v1631_v8  ;;  %v1922_v13 = vpop.f32.mrb[39].mxu0  ;;  %2122 = vst [vmem:[#allocation2 + $0x90] sm:$0xff] (!%p3654_p11), %v5124_v6 }
 0x1c9   : > { %2123 = vst [vmem:[#allocation2 + $0x98] sm:$0xff] (!%p3654_p11), %v5126_v12 }
 0x1cb   : > { %v1636_v14 = vpop.f32.mrb[40].mxu1 }
 0x1cc   : > { %v1925_v15 = vpop.f32.mrb[40].mxu0  ;;  %v1638_v16 = vpop.f32.mrb[41].mxu1 }
 0x1cd   : > { %v5128_v18 = vadd.f32 %v1925_v15, %v1636_v14  ;;  %v1927_v20 = vpop.f32.mrb[41].mxu0  ;;  %v1639_v21 = vpop.f32.mrb[42].mxu1 }
 0x1ce   : > { %v1928_v22 = vpop.f32.mrb[42].mxu0  ;;  %v1641_v24 = vpop.f32.mrb[43].mxu1 }
 0x1cf   : > { %v5130_v25 = vadd.f32 %v1928_v22, %v1639_v21  ;;  %v1930_v26 = vpop.f32.mrb[43].mxu0  ;;  %2124 = vst [vmem:[#allocation2 + $0xa0] sm:$0xff] (!%p3654_p11), %v5128_v18 }
 0x1d1   : > { %2125 = vst [vmem:[#allocation2 + $0xa8] sm:$0xff] (!%p3654_p11), %v5130_v25 }
 0x1d3   : > { %v1644_v28 = vpop.f32.mrb[44].mxu1 }
 0x1d4   : > { %v1933_v30 = vpop.f32.mrb[44].mxu0  ;;  %v1646_v31 = vpop.f32.mrb[45].mxu1 }
 0x1d5   : > { %v5132_v32 = vadd.f32 %v1933_v30, %v1644_v28  ;;  %v1935_v34 = vpop.f32.mrb[45].mxu0  ;;  %v1647_v36 = vpop.f32.mrb[46].mxu1 }
 0x1d6   : > { %v1936_v37 = vpop.f32.mrb[46].mxu0  ;;  %v1649_v38 = vpop.f32.mrb[47].mxu1 }
 0x1d7   : > { %v5134_v39 = vadd.f32 %v1936_v37, %v1647_v36  ;;  %v1938_v42 = vpop.f32.mrb[47].mxu0  ;;  %2126 = vst [vmem:[#allocation2 + $0xb0] sm:$0xff] (!%p3654_p11), %v5132_v32 }
 0x1d9   : > { %2127 = vst [vmem:[#allocation2 + $0xb8] sm:$0xff] (!%p3654_p11), %v5134_v39 }
 0x1db   : > { %v1652_v43 = vpop.f32.mrb[48].mxu1 }
 0x1dc   : > { %v1941_v44 = vpop.f32.mrb[48].mxu0  ;;  %v1654_v45 = vpop.f32.mrb[49].mxu1 }
 0x1dd   : > { %v5136_v48 = vadd.f32 %v1941_v44, %v1652_v43  ;;  %v1943_v49 = vpop.f32.mrb[49].mxu0  ;;  %v1655_v50 = vpop.f32.mrb[50].mxu1 }
 0x1de   : > { %v1944_v51 = vpop.f32.mrb[50].mxu0  ;;  %v1657_v53 = vpop.f32.mrb[51].mxu1 }
 0x1df   : > { %v5138_v54 = vadd.f32 %v1944_v51, %v1655_v50  ;;  %v1946_v56 = vpop.f32.mrb[51].mxu0  ;;  %2128 = vst [vmem:[#allocation2 + $0xc0] sm:$0xff] (!%p3654_p11), %v5136_v48 }
 0x1e1   : > { %2129 = vst [vmem:[#allocation2 + $0xc8] sm:$0xff] (!%p3654_p11), %v5138_v54 }
 0x1e3   : > { %v1660_v57 = vpop.f32.mrb[52].mxu1 }
 0x1e4   : > { %v1949_v59 = vpop.f32.mrb[52].mxu0  ;;  %v1662_v60 = vpop.f32.mrb[53].mxu1 }
 0x1e5   : > { %v5140_v62 = vadd.f32 %v1949_v59, %v1660_v57  ;;  %v1951_v63 = vpop.f32.mrb[53].mxu0  ;;  %v1663_v1 = vpop.f32.mrb[54].mxu1 }
 0x1e6   : > { %v1952_v2 = vpop.f32.mrb[54].mxu0  ;;  %v1665_v3 = vpop.f32.mrb[55].mxu1 }
 0x1e7   : > { %v5142_v4 = vadd.f32 %v1952_v2, %v1663_v1  ;;  %v1954_v7 = vpop.f32.mrb[55].mxu0  ;;  %2130 = vst [vmem:[#allocation2 + $0xd0] sm:$0xff] (!%p3654_p11), %v5140_v62 }
 0x1e9   : > { %2131 = vst [vmem:[#allocation2 + $0xd8] sm:$0xff] (!%p3654_p11), %v5142_v4 }
 0x1eb   : > { %v1668_v8 = vpop.f32.mrb[56].mxu1 }
 0x1ec   : > { %v1957_v9 = vpop.f32.mrb[56].mxu0  ;;  %v1670_v10 = vpop.f32.mrb[57].mxu1 }
 0x1ed   : > { %v5144_v13 = vadd.f32 %v1957_v9, %v1668_v8  ;;  %v1959_v14 = vpop.f32.mrb[57].mxu0  ;;  %v1671_v15 = vpop.f32.mrb[58].mxu1 }
 0x1ee   : > { %v1960_v16 = vpop.f32.mrb[58].mxu0  ;;  %v1673_v20 = vpop.f32.mrb[59].mxu1 }
 0x1ef   : > { %v5146_v21 = vadd.f32 %v1960_v16, %v1671_v15  ;;  %v1962_v22 = vpop.f32.mrb[59].mxu0  ;;  %2132 = vst [vmem:[#allocation2 + $0xe0] sm:$0xff] (!%p3654_p11), %v5144_v13 }
 0x1f1   : > { %2133 = vst [vmem:[#allocation2 + $0xe8] sm:$0xff] (!%p3654_p11), %v5146_v21 }
 0x1f3   : > { %v1676_v24 = vpop.f32.mrb[60].mxu1 }
 0x1f4   : > { %v1965_v26 = vpop.f32.mrb[60].mxu0  ;;  %v1678_v28 = vpop.f32.mrb[61].mxu1 }
 0x1f5   : > { %v5148_v30 = vadd.f32 %v1965_v26, %v1676_v24  ;;  %v1967_v31 = vpop.f32.mrb[61].mxu0  ;;  %v1679_v34 = vpop.f32.mrb[62].mxu1 }
 0x1f6   : > { %v1968_v36 = vpop.f32.mrb[62].mxu0  ;;  %v1681_v37 = vpop.f32.mrb[63].mxu1 }
 0x1f7   : > { %v5150_v38 = vadd.f32 %v1968_v36, %v1679_v34  ;;  %v1970_v42 = vpop.f32.mrb[63].mxu0  ;;  %2134 = vst [vmem:[#allocation2 + $0xf0] sm:$0xff] (!%p3654_p11), %v5148_v30 }
 0x1f9   : > { %2135 = vst [vmem:[#allocation2 + $0xf8] sm:$0xff] (!%p3654_p11), %v5150_v38 }
 0x1fb   : > { %v1684_v43 = vpop.f32.mrb[64].mxu1 }
 0x1fc   : > { %v1973_v44 = vpop.f32.mrb[64].mxu0  ;;  %v1686_v45 = vpop.f32.mrb[65].mxu1 }
 0x1fd   : > { %v5152_v49 = vadd.f32 %v1973_v44, %v1684_v43  ;;  %v1975_v50 = vpop.f32.mrb[65].mxu0  ;;  %v1687_v51 = vpop.f32.mrb[66].mxu1 }
 0x1fe   : > { %v1976_v53 = vpop.f32.mrb[66].mxu0  ;;  %v1689_v56 = vpop.f32.mrb[67].mxu1 }
 0x1ff   : > { %v5154_v57 = vadd.f32 %v1976_v53, %v1687_v51  ;;  %v1978_v59 = vpop.f32.mrb[67].mxu0  ;;  %2136 = vst [vmem:[#allocation2 + $0x100] sm:$0xff] (!%p3654_p11), %v5152_v49 }
 0x201   : > { %2137 = vst [vmem:[#allocation2 + $0x108] sm:$0xff] (!%p3654_p11), %v5154_v57 }
 0x203   : > { %v1692_v60 = vpop.f32.mrb[68].mxu1 }
 0x204   : > { %v1981_v63 = vpop.f32.mrb[68].mxu0  ;;  %v1694_v1 = vpop.f32.mrb[69].mxu1 }
 0x205   : > { %v5156_v2 = vadd.f32 %v1981_v63, %v1692_v60  ;;  %v1983_v3 = vpop.f32.mrb[69].mxu0  ;;  %v1695_v7 = vpop.f32.mrb[70].mxu1 }
 0x206   : > { %v1984_v8 = vpop.f32.mrb[70].mxu0  ;;  %v1697_v9 = vpop.f32.mrb[71].mxu1 }
 0x207   : > { %v5158_v10 = vadd.f32 %v1984_v8, %v1695_v7  ;;  %v1986_v14 = vpop.f32.mrb[71].mxu0  ;;  %2138 = vst [vmem:[#allocation2 + $0x110] sm:$0xff] (!%p3654_p11), %v5156_v2 }
 0x209   : > { %2139 = vst [vmem:[#allocation2 + $0x118] sm:$0xff] (!%p3654_p11), %v5158_v10 }
 0x20b   : > { %v1700_v15 = vpop.f32.mrb[72].mxu1 }
 0x20c   : > { %v1989_v16 = vpop.f32.mrb[72].mxu0  ;;  %v1702_v20 = vpop.f32.mrb[73].mxu1 }
 0x20d   : > { %v5160_v22 = vadd.f32 %v1989_v16, %v1700_v15  ;;  %v1991_v24 = vpop.f32.mrb[73].mxu0  ;;  %v1703_v26 = vpop.f32.mrb[74].mxu1 }
 0x20e   : > { %v1992_v28 = vpop.f32.mrb[74].mxu0  ;;  %v1705_v31 = vpop.f32.mrb[75].mxu1 }
 0x20f   : > { %v5162_v34 = vadd.f32 %v1992_v28, %v1703_v26  ;;  %v1994_v36 = vpop.f32.mrb[75].mxu0  ;;  %2140 = vst [vmem:[#allocation2 + $0x120] sm:$0xff] (!%p3654_p11), %v5160_v22 }
 0x211   : > { %2141 = vst [vmem:[#allocation2 + $0x128] sm:$0xff] (!%p3654_p11), %v5162_v34 }
 0x213   : > { %v1708_v37 = vpop.f32.mrb[76].mxu1 }
 0x214   : > { %v1997_v42 = vpop.f32.mrb[76].mxu0  ;;  %v1710_v43 = vpop.f32.mrb[77].mxu1 }
 0x215   : > { %v5164_v44 = vadd.f32 %v1997_v42, %v1708_v37  ;;  %v1999_v45 = vpop.f32.mrb[77].mxu0  ;;  %v1711_v50 = vpop.f32.mrb[78].mxu1 }
 0x216   : > { %v2000_v51 = vpop.f32.mrb[78].mxu0  ;;  %v1713_v53 = vpop.f32.mrb[79].mxu1 }
 0x217   : > { %v5166_v56 = vadd.f32 %v2000_v51, %v1711_v50  ;;  %v2002_v59 = vpop.f32.mrb[79].mxu0  ;;  %2142 = vst [vmem:[#allocation2 + $0x130] sm:$0xff] (!%p3654_p11), %v5164_v44 }
 0x219   : > { %2143 = vst [vmem:[#allocation2 + $0x138] sm:$0xff] (!%p3654_p11), %v5166_v56 }
 0x21b   : > { %v1716_v60 = vpop.f32.mrb[80].mxu1 }
 0x21c   : > { %v2005_v63 = vpop.f32.mrb[80].mxu0  ;;  %v1718_v1 = vpop.f32.mrb[81].mxu1 }
 0x21d   : > { %v5168_v3 = vadd.f32 %v2005_v63, %v1716_v60  ;;  %v2007_v7 = vpop.f32.mrb[81].mxu0  ;;  %v1719_v8 = vpop.f32.mrb[82].mxu1 }
 0x21e   : > { %v2008_v9 = vpop.f32.mrb[82].mxu0  ;;  %v1721_v14 = vpop.f32.mrb[83].mxu1 }
 0x21f   : > { %v5170_v15 = vadd.f32 %v2008_v9, %v1719_v8  ;;  %v2010_v16 = vpop.f32.mrb[83].mxu0  ;;  %2144 = vst [vmem:[#allocation2 + $0x140] sm:$0xff] (!%p3654_p11), %v5168_v3 }
 0x221   : > { %2145 = vst [vmem:[#allocation2 + $0x148] sm:$0xff] (!%p3654_p11), %v5170_v15 }
 0x223   : > { %v1724_v20 = vpop.f32.mrb[84].mxu1 }
 0x224   : > { %v2013_v24 = vpop.f32.mrb[84].mxu0  ;;  %v1726_v26 = vpop.f32.mrb[85].mxu1 }
 0x225   : > { %v5172_v28 = vadd.f32 %v2013_v24, %v1724_v20  ;;  %v2015_v31 = vpop.f32.mrb[85].mxu0  ;;  %v1727_v36 = vpop.f32.mrb[86].mxu1 }
 0x226   : > { %v2016_v37 = vpop.f32.mrb[86].mxu0  ;;  %v1729_v42 = vpop.f32.mrb[87].mxu1 }
 0x227   : > { %v5174_v43 = vadd.f32 %v2016_v37, %v1727_v36  ;;  %v2018_v45 = vpop.f32.mrb[87].mxu0  ;;  %2146 = vst [vmem:[#allocation2 + $0x150] sm:$0xff] (!%p3654_p11), %v5172_v28 }
 0x229   : > { %2147 = vst [vmem:[#allocation2 + $0x158] sm:$0xff] (!%p3654_p11), %v5174_v43 }
 0x22b   : > { %v1732_v50 = vpop.f32.mrb[88].mxu1 }
 0x22c   : > { %v2021_v51 = vpop.f32.mrb[88].mxu0  ;;  %v1734_v53 = vpop.f32.mrb[89].mxu1 }
 0x22d   : > { %v5176_v59 = vadd.f32 %v2021_v51, %v1732_v50  ;;  %v2023_v60 = vpop.f32.mrb[89].mxu0  ;;  %v1735_v63 = vpop.f32.mrb[90].mxu1 }
 0x22e   : > { %v2024_v1 = vpop.f32.mrb[90].mxu0  ;;  %v1737_v7 = vpop.f32.mrb[91].mxu1 }
 0x22f   : > { %v5178_v8 = vadd.f32 %v2024_v1, %v1735_v63  ;;  %v2026_v9 = vpop.f32.mrb[91].mxu0  ;;  %2148 = vst [vmem:[#allocation2 + $0x160] sm:$0xff] (!%p3654_p11), %v5176_v59 }
 0x231   : > { %5582 = vst [vmem:[#allocation4_spill] sm:$0xff] %v5178_v8 }
 0x233   : > { %v1740_v14 = vpop.f32.mrb[92].mxu1 }
 0x234   : > { %v2029_v16 = vpop.f32.mrb[92].mxu0  ;;  %v1742_v20 = vpop.f32.mrb[93].mxu1 }
 0x235   : > { %v5180_v24 = vadd.f32 %v2029_v16, %v1740_v14  ;;  %v2031_v26 = vpop.f32.mrb[93].mxu0  ;;  %v1743_v31 = vpop.f32.mrb[94].mxu1 }
 0x236   : > { %v2032_v36 = vpop.f32.mrb[94].mxu0  ;;  %v1745_v37 = vpop.f32.mrb[95].mxu1 }
 0x237   : > { %5583 = vst [vmem:[#allocation5_spill] sm:$0xff] %v5180_v24  ;;  %v5182_v42 = vadd.f32 %v2032_v36, %v1743_v31  ;;  %v2034_v45 = vpop.f32.mrb[95].mxu0 }
 0x239   : > { %5584 = vst [vmem:[#allocation6_spill] sm:$0xff] %v5182_v42 }
 0x23b   : > { %v1748_v50 = vpop.f32.mrb[96].mxu1 }
 0x23c   : > { %v2037_v51 = vpop.f32.mrb[96].mxu0  ;;  %v1750_v53 = vpop.f32.mrb[97].mxu1 }
 0x23d   : > { %v5184_v60 = vadd.f32 %v2037_v51, %v1748_v50  ;;  %v2039_v63 = vpop.f32.mrb[97].mxu0  ;;  %v1751_v1 = vpop.f32.mrb[98].mxu1 }
 0x23e   : > { %v2040_v7 = vpop.f32.mrb[98].mxu0  ;;  %v1753_v9 = vpop.f32.mrb[99].mxu1 }
 0x23f   : > { %5585 = vst [vmem:[#allocation7_spill] sm:$0xff] %v5184_v60  ;;  %v5186_v8 = vadd.f32 %v2040_v7, %v1751_v1  ;;  %v2042_v14 = vpop.f32.mrb[99].mxu0 }
 0x241   : > { %5586 = vst [vmem:[#allocation8_spill] sm:$0xff] %v5186_v8 }
 0x243   : > { %v1756_v16 = vpop.f32.mrb[100].mxu1 }
 0x244   : > { %v2045_v20 = vpop.f32.mrb[100].mxu0  ;;  %v1758_v26 = vpop.f32.mrb[101].mxu1 }
 0x245   : > { %v5188_v24 = vadd.f32 %v2045_v20, %v1756_v16  ;;  %v2047_v31 = vpop.f32.mrb[101].mxu0  ;;  %v1759_v36 = vpop.f32.mrb[102].mxu1 }
 0x246   : > { %v2048_v37 = vpop.f32.mrb[102].mxu0  ;;  %v1761_v45 = vpop.f32.mrb[103].mxu1 }
 0x247   : > { %5587 = vst [vmem:[#allocation9_spill] sm:$0xff] %v5188_v24  ;;  %v5190_v42 = vadd.f32 %v2048_v37, %v1759_v36  ;;  %v2050_v50 = vpop.f32.mrb[103].mxu0 }
 0x249   : > { %5588 = vst [vmem:[#allocation10_spill] sm:$0xff] %v5190_v42 }
 0x24b   : > { %v1764_v51 = vpop.f32.mrb[104].mxu1 }
 0x24c   : > { %v2053_v53 = vpop.f32.mrb[104].mxu0  ;;  %v1766_v63 = vpop.f32.mrb[105].mxu1 }
 0x24d   : > { %v5192_v60 = vadd.f32 %v2053_v53, %v1764_v51  ;;  %v2055_v1 = vpop.f32.mrb[105].mxu0  ;;  %v1767_v7 = vpop.f32.mrb[106].mxu1 }
 0x24e   : > { %v2056_v9 = vpop.f32.mrb[106].mxu0  ;;  %v1769_v14 = vpop.f32.mrb[107].mxu1 }
 0x24f   : > { %5589 = vst [vmem:[#allocation11_spill] sm:$0xff] %v5192_v60  ;;  %v5194_v8 = vadd.f32 %v2056_v9, %v1767_v7  ;;  %v2058_v16 = vpop.f32.mrb[107].mxu0 }
 0x251   : > { %5590 = vst [vmem:[#allocation12_spill] sm:$0xff] %v5194_v8 }
 0x253   : > { %v1772_v20 = vpop.f32.mrb[108].mxu1 }
 0x254   : > { %v2061_v26 = vpop.f32.mrb[108].mxu0  ;;  %v1774_v31 = vpop.f32.mrb[109].mxu1 }
 0x255   : > { %v5196_v24 = vadd.f32 %v2061_v26, %v1772_v20  ;;  %v2063_v36 = vpop.f32.mrb[109].mxu0  ;;  %v1775_v37 = vpop.f32.mrb[110].mxu1 }
 0x256   : > { %v2064_v45 = vpop.f32.mrb[110].mxu0  ;;  %v1777_v50 = vpop.f32.mrb[111].mxu1 }
 0x257   : > { %5591 = vst [vmem:[#allocation13_spill] sm:$0xff] %v5196_v24  ;;  %v5198_v42 = vadd.f32 %v2064_v45, %v1775_v37  ;;  %v2066_v51 = vpop.f32.mrb[111].mxu0 }
 0x259   : > { %5592 = vst [vmem:[#allocation14_spill] sm:$0xff] %v5198_v42 }
 0x25b   : > { %v1780_v53 = vpop.f32.mrb[112].mxu1 }
 0x25c   : > { %v2069_v63 = vpop.f32.mrb[112].mxu0  ;;  %v1782_v1 = vpop.f32.mrb[113].mxu1 }
 0x25d   : > { %v5200_v60 = vadd.f32 %v2069_v63, %v1780_v53  ;;  %v2071_v7 = vpop.f32.mrb[113].mxu0  ;;  %v1783_v9 = vpop.f32.mrb[114].mxu1 }
 0x25e   : > { %v2072_v14 = vpop.f32.mrb[114].mxu0  ;;  %v1785_v16 = vpop.f32.mrb[115].mxu1 }
 0x25f   : > { %5593 = vst [vmem:[#allocation15_spill] sm:$0xff] %v5200_v60  ;;  %v5202_v8 = vadd.f32 %v2072_v14, %v1783_v9  ;;  %v2074_v20 = vpop.f32.mrb[115].mxu0 }
 0x261   : > { %5594 = vst [vmem:[#allocation16_spill] sm:$0xff] %v5202_v8 }
 0x263   : > { %v1788_v26 = vpop.f32.mrb[116].mxu1 }
 0x264   : > { %v2077_v31 = vpop.f32.mrb[116].mxu0  ;;  %v1790_v36 = vpop.f32.mrb[117].mxu1 }
 0x265   : > { %v5204_v24 = vadd.f32 %v2077_v31, %v1788_v26  ;;  %v2079_v37 = vpop.f32.mrb[117].mxu0  ;;  %v1791_v45 = vpop.f32.mrb[118].mxu1 }
 0x266   : > { %v2080_v50 = vpop.f32.mrb[118].mxu0  ;;  %v1793_v51 = vpop.f32.mrb[119].mxu1 }
 0x267   : > { %5595 = vst [vmem:[#allocation17_spill] sm:$0xff] %v5204_v24  ;;  %v5206_v42 = vadd.f32 %v2080_v50, %v1791_v45  ;;  %v2082_v53 = vpop.f32.mrb[119].mxu0 }
 0x269   : > { %5596 = vst [vmem:[#allocation18_spill] sm:$0xff] %v5206_v42 }
 0x26b   : > { %v1796_v63 = vpop.f32.mrb[120].mxu1 }
 0x26c   : > { %v2085_v1 = vpop.f32.mrb[120].mxu0  ;;  %v1798_v7 = vpop.f32.mrb[121].mxu1 }
 0x26d   : > { %v5208_v60 = vadd.f32 %v2085_v1, %v1796_v63  ;;  %v2087_v9 = vpop.f32.mrb[121].mxu0  ;;  %v1799_v14 = vpop.f32.mrb[122].mxu1  ;;  %v5597_v1 = vld [vmem:[#allocation4_spill] sm:$0xff] (!%p3654_p11)  ;;  %v5598_v7 = vld [vmem:[#allocation5_spill] sm:$0xff] (!%p3654_p11) }
 0x26e   : > { %v2088_v16 = vpop.f32.mrb[122].mxu0  ;;  %v1801_v20 = vpop.f32.mrb[123].mxu1  ;;  %2149 = vst [vmem:[#allocation2 + $0x168] sm:$0xff] (!%p3654_p11), %v5597_v1  ;;  %2150 = vst [vmem:[#allocation2 + $0x170] sm:$0xff] (!%p3654_p11), %v5598_v7  ;;  %v5599_v9 = vld [vmem:[#allocation6_spill] sm:$0xff] (!%p3654_p11) }
 0x26f   : > { %v5210_v8 = vadd.f32 %v2088_v16, %v1799_v14  ;;  %v2090_v26 = vpop.f32.mrb[123].mxu0  ;;  %2151 = vst [vmem:[#allocation2 + $0x178] sm:$0xff] (!%p3654_p11), %v5599_v9  ;;  %v5600_v14 = vld [vmem:[#allocation7_spill] sm:$0xff] (!%p3654_p11)  ;;  %v5601_v16 = vld [vmem:[#allocation8_spill] sm:$0xff] (!%p3654_p11)  ;;  %v5602_v20 = vld [vmem:[#allocation9_spill] sm:$0xff] (!%p3654_p11) }
 0x270   : > { %2152 = vst [vmem:[#allocation2 + $0x180] sm:$0xff] (!%p3654_p11), %v5600_v14  ;;  %2153 = vst [vmem:[#allocation2 + $0x188] sm:$0xff] (!%p3654_p11), %v5601_v16  ;;  %v5603_v26 = vld [vmem:[#allocation10_spill] sm:$0xff] (!%p3654_p11) }
 0x271   : > { %2103 = sbr.rel (%p3654_p11) target bundleno = 635 (0x27b), region = 63  ;;  %2154 = vst [vmem:[#allocation2 + $0x190] sm:$0xff] (!%p3654_p11), %v5602_v20  ;;  %2155 = vst [vmem:[#allocation2 + $0x198] sm:$0xff] (!%p3654_p11), %v5603_v26 }
 0x272   : > { %2164 = vst [vmem:[#allocation2 + $0x1e0] sm:$0xff] (!%p3654_p11), %v5208_v60  ;;  %2165 = vst [vmem:[#allocation2 + $0x1e8] sm:$0xff] (!%p3654_p11), %v5210_v8 }
 0x273   : > { %v1804_v31 = vpop.f32.mrb[124].mxu1 }
 0x274   : > { %v2093_v36 = vpop.f32.mrb[124].mxu0  ;;  %v1806_v37 = vpop.f32.mrb[125].mxu1 }
 0x275   : > { %v5212_v24 = vadd.f32 %v2093_v36, %v1804_v31  ;;  %v2095_v45 = vpop.f32.mrb[125].mxu0  ;;  %v1807_v50 = vpop.f32.mrb[126].mxu1  ;;  %v5604_v31 = vld [vmem:[#allocation11_spill] sm:$0xff] (!%p3654_p11)  ;;  %v5605_v36 = vld [vmem:[#allocation12_spill] sm:$0xff] (!%p3654_p11)  ;;  %v5606_v37 = vld [vmem:[#allocation13_spill] sm:$0xff] (!%p3654_p11) }
 0x276   : > { %v2096_v51 = vpop.f32.mrb[126].mxu0  ;;  %v1809_v53 = vpop.f32.mrb[127].mxu1  ;;  %2156 = vst [vmem:[#allocation2 + $0x1a0] sm:$0xff] (!%p3654_p11), %v5604_v31  ;;  %2157 = vst [vmem:[#allocation2 + $0x1a8] sm:$0xff] (!%p3654_p11), %v5605_v36  ;;  %v5607_v45 = vld [vmem:[#allocation14_spill] sm:$0xff] (!%p3654_p11) }
 0x277   : > { %v5214_v42 = vadd.f32 %v2096_v51, %v1807_v50  ;;  %v2098_v63 = vpop.f32.mrb[127].mxu0  ;;  %2158 = vst [vmem:[#allocation2 + $0x1b0] sm:$0xff] (!%p3654_p11), %v5606_v37  ;;  %2159 = vst [vmem:[#allocation2 + $0x1b8] sm:$0xff] (!%p3654_p11), %v5607_v45  ;;  %v5608_v50 = vld [vmem:[#allocation15_spill] sm:$0xff] (!%p3654_p11)  ;;  %v5609_v51 = vld [vmem:[#allocation16_spill] sm:$0xff] (!%p3654_p11) }
 0x278   : > { %2160 = vst [vmem:[#allocation2 + $0x1c0] sm:$0xff] %v5608_v50  ;;  %2161 = vst [vmem:[#allocation2 + $0x1c8] sm:$0xff] %v5609_v51  ;;  %v5610_v53 = vld [vmem:[#allocation17_spill] sm:$0xff]  ;;  %v5611_v63 = vld [vmem:[#allocation18_spill] sm:$0xff] }
 0x279   : > { %2162 = vst [vmem:[#allocation2 + $0x1d0] sm:$0xff] %v5610_v53  ;;  %2163 = vst [vmem:[#allocation2 + $0x1d8] sm:$0xff] %v5611_v63 }
 0x27a   : > { %2166 = vst [vmem:[#allocation2 + $0x1f0] sm:$0xff] %v5212_v24  ;;  %2167 = vst [vmem:[#allocation2 + $0x1f8] sm:$0xff] %v5214_v42 }
 0x27b PF: > { %p3655_p12 = scmp.eq.s32.totalorder %s4515_s17, 0 }
 0x27c   : > { %v2172_v1 = vld [vmem:[#allocation2] sm:$0xff] (!%p3655_p12)  ;;  %v2173_v7 = vld [vmem:[#allocation2 + $0x8] sm:$0xff] (!%p3655_p12)  ;;  %v2174_v9 = vld [vmem:[#allocation2 + $0x10] sm:$0xff] (!%p3655_p12) }
 0x27d   : > { %2171 = sbr.rel (%p3655_p12) target bundleno = 675 (0x2a3), region = 67  ;;  %v2236_v14 = vadd.f32 (!%p3655_p12), %v2172_v1, %v5071_v19  ;;  %v2237_v16 = vadd.f32 (!%p3655_p12), %v2173_v7, %v5076_v27  ;;  %v2238_v20 = vadd.f32 (!%p3655_p12), %v2174_v9, %v5079_v33  ;;  %v2175_v26 = vld [vmem:[#allocation2 + $0x18] sm:$0xff] (!%p3655_p12)  ;;  %v2176_v31 = vld [vmem:[#allocation2 + $0x20] sm:$0xff] (!%p3655_p12)  ;;  %v2177_v36 = vld [vmem:[#allocation2 + $0x28] sm:$0xff] (!%p3655_p12) }
 0x27e   : > { %v2239_v37 = vadd.f32 (!%p3655_p12), %v2175_v26, %v5084_v41  ;;  %v2240_v45 = vadd.f32 (!%p3655_p12), %v2176_v31, %v5087_v47  ;;  %v2241_v50 = vadd.f32 (!%p3655_p12), %v2177_v36, %v5092_v55  ;;  %v2178_v51 = vld [vmem:[#allocation2 + $0x30] sm:$0xff] (!%p3655_p12)  ;;  %v2179_v53 = vld [vmem:[#allocation2 + $0x38] sm:$0xff] (!%p3655_p12)  ;;  %v2180_v63 = vld [vmem:[#allocation2 + $0x40] sm:$0xff] (!%p3655_p12) }
 0x27f   : > { %2300 = vst [vmem:[#allocation2] sm:$0xff] (!%p3655_p12), %v2236_v14  ;;  %2301 = vst [vmem:[#allocation2 + $0x8] sm:$0xff] (!%p3655_p12), %v2237_v16  ;;  %v2242_v19 = vadd.f32 (!%p3655_p12), %v2178_v51, %v5095_v61  ;;  %v2243_v27 = vadd.f32 (!%p3655_p12), %v2179_v53, %v5100_v5  ;;  %v2244_v33 = vadd.f32 (!%p3655_p12), %v2180_v63, %v5103_v11  ;;  %v2181_v1 = vld [vmem:[#allocation2 + $0x48] sm:$0xff] (!%p3655_p12)  ;;  %v2182_v7 = vld [vmem:[#allocation2 + $0x50] sm:$0xff] (!%p3655_p12) }
 0x280   : > { %2302 = vst [vmem:[#allocation2 + $0x10] sm:$0xff] (!%p3655_p12), %v2238_v20  ;;  %v2183_v9 = vld [vmem:[#allocation2 + $0x58] sm:$0xff] (!%p3655_p12)  ;;  %2303 = vst [vmem:[#allocation2 + $0x18] sm:$0xff] (!%p3655_p12), %v2239_v37  ;;  %v2245_v41 = vadd.f32 (!%p3655_p12), %v2181_v1, %v5106_v17  ;;  %v2246_v47 = vadd.f32 (!%p3655_p12), %v2182_v7, %v5108_v23  ;;  %v2184_v14 = vld [vmem:[#allocation2 + $0x60] sm:$0xff] (!%p3655_p12) }
 0x281   : > { %2304 = vst [vmem:[#allocation2 + $0x20] sm:$0xff] (!%p3655_p12), %v2240_v45  ;;  %2305 = vst [vmem:[#allocation2 + $0x28] sm:$0xff] (!%p3655_p12), %v2241_v50  ;;  %v2247_v55 = vadd.f32 (!%p3655_p12), %v2183_v9, %v5110_v29  ;;  %v2185_v16 = vld [vmem:[#allocation2 + $0x68] sm:$0xff] (!%p3655_p12)  ;;  %v2186_v20 = vld [vmem:[#allocation2 + $0x70] sm:$0xff] (!%p3655_p12)  ;;  %v2248_v61 = vadd.f32 (!%p3655_p12), %v2184_v14, %v5112_v35 }
 0x282   : > { %2306 = vst [vmem:[#allocation2 + $0x30] sm:$0xff] (!%p3655_p12), %v2242_v19  ;;  %2307 = vst [vmem:[#allocation2 + $0x38] sm:$0xff] (!%p3655_p12), %v2243_v27  ;;  %v2249_v5 = vadd.f32 (!%p3655_p12), %v2185_v16, %v5114_v40  ;;  %v2250_v11 = vadd.f32 (!%p3655_p12), %v2186_v20, %v5116_v46  ;;  %v2187_v26 = vld [vmem:[#allocation2 + $0x78] sm:$0xff] (!%p3655_p12)  ;;  %v2188_v31 = vld [vmem:[#allocation2 + $0x80] sm:$0xff] (!%p3655_p12) }
 0x283   : > { %2308 = vst [vmem:[#allocation2 + $0x40] sm:$0xff] (!%p3655_p12), %v2244_v33  ;;  %v2189_v36 = vld [vmem:[#allocation2 + $0x88] sm:$0xff] (!%p3655_p12)  ;;  %2309 = vst [vmem:[#allocation2 + $0x48] sm:$0xff] (!%p3655_p12), %v2245_v41  ;;  %v2251_v17 = vadd.f32 (!%p3655_p12), %v2187_v26, %v5118_v52  ;;  %v2252_v23 = vadd.f32 (!%p3655_p12), %v2188_v31, %v5120_v58  ;;  %v2190_v37 = vld [vmem:[#allocation2 + $0x90] sm:$0xff] (!%p3655_p12) }
 0x284   : > { %2310 = vst [vmem:[#allocation2 + $0x50] sm:$0xff] %v2246_v47  ;;  %2311 = vst [vmem:[#allocation2 + $0x58] sm:$0xff] %v2247_v55  ;;  %v2253_v29 = vadd.f32 %v2189_v36, %v5122_v0  ;;  %v2191_v45 = vld [vmem:[#allocation2 + $0x98] sm:$0xff]  ;;  %v2192_v50 = vld [vmem:[#allocation2 + $0xa0] sm:$0xff]  ;;  %v2254_v35 = vadd.f32 %v2190_v37, %v5124_v6 }
 0x285   : > { %2312 = vst [vmem:[#allocation2 + $0x60] sm:$0xff] %v2248_v61  ;;  %2313 = vst [vmem:[#allocation2 + $0x68] sm:$0xff] %v2249_v5  ;;  %v2255_v40 = vadd.f32 %v2191_v45, %v5126_v12  ;;  %v2256_v46 = vadd.f32 %v2192_v50, %v5128_v18  ;;  %v2193_v51 = vld [vmem:[#allocation2 + $0xa8] sm:$0xff]  ;;  %v2194_v53 = vld [vmem:[#allocation2 + $0xb0] sm:$0xff] }
 0x286   : > { %2314 = vst [vmem:[#allocation2 + $0x70] sm:$0xff] %v2250_v11  ;;  %v2195_v63 = vld [vmem:[#allocation2 + $0xb8] sm:$0xff]  ;;  %2315 = vst [vmem:[#allocation2 + $0x78] sm:$0xff] %v2251_v17  ;;  %v2257_v52 = vadd.f32 %v2193_v51, %v5130_v25  ;;  %v2258_v58 = vadd.f32 %v2194_v53, %v5132_v32  ;;  %v2196_v19 = vld [vmem:[#allocation2 + $0xc0] sm:$0xff] }
 0x287   : > { %2316 = vst [vmem:[#allocation2 + $0x80] sm:$0xff] %v2252_v23  ;;  %2317 = vst [vmem:[#allocation2 + $0x88] sm:$0xff] %v2253_v29  ;;  %v2259_v0 = vadd.f32 %v2195_v63, %v5134_v39  ;;  %v2197_v27 = vld [vmem:[#allocation2 + $0xc8] sm:$0xff]  ;;  %v2198_v33 = vld [vmem:[#allocation2 + $0xd0] sm:$0xff]  ;;  %v2260_v6 = vadd.f32 %v2196_v19, %v5136_v48 }
 0x288   : > { %2318 = vst [vmem:[#allocation2 + $0x90] sm:$0xff] %v2254_v35  ;;  %2319 = vst [vmem:[#allocation2 + $0x98] sm:$0xff] %v2255_v40  ;;  %v2261_v12 = vadd.f32 %v2197_v27, %v5138_v54  ;;  %v2262_v18 = vadd.f32 %v2198_v33, %v5140_v62  ;;  %v2199_v1 = vld [vmem:[#allocation2 + $0xd8] sm:$0xff]  ;;  %v2200_v7 = vld [vmem:[#allocation2 + $0xe0] sm:$0xff] }
 0x289   : > { %2320 = vst [vmem:[#allocation2 + $0xa0] sm:$0xff] %v2256_v46  ;;  %v2201_v9 = vld [vmem:[#allocation2 + $0xe8] sm:$0xff]  ;;  %2321 = vst [vmem:[#allocation2 + $0xa8] sm:$0xff] %v2257_v52  ;;  %v2263_v25 = vadd.f32 %v2199_v1, %v5142_v4  ;;  %v2264_v32 = vadd.f32 %v2200_v7, %v5144_v13  ;;  %v2202_v41 = vld [vmem:[#allocation2 + $0xf0] sm:$0xff] }
 0x28a   : > { %2322 = vst [vmem:[#allocation2 + $0xb0] sm:$0xff] %v2258_v58  ;;  %2323 = vst [vmem:[#allocation2 + $0xb8] sm:$0xff] %v2259_v0  ;;  %v2265_v39 = vadd.f32 %v2201_v9, %v5146_v21  ;;  %v2203_v47 = vld [vmem:[#allocation2 + $0xf8] sm:$0xff]  ;;  %v2204_v55 = vld [vmem:[#allocation2 + $0x100] sm:$0xff]  ;;  %v2266_v48 = vadd.f32 %v2202_v41, %v5148_v30 }
 0x28b   : > { %2324 = vst [vmem:[#allocation2 + $0xc0] sm:$0xff] %v2260_v6  ;;  %2325 = vst [vmem:[#allocation2 + $0xc8] sm:$0xff] %v2261_v12  ;;  %v2267_v54 = vadd.f32 %v2203_v47, %v5150_v38  ;;  %v2268_v62 = vadd.f32 %v2204_v55, %v5152_v49  ;;  %v2205_v14 = vld [vmem:[#allocation2 + $0x108] sm:$0xff]  ;;  %v2206_v16 = vld [vmem:[#allocation2 + $0x110] sm:$0xff] }
 0x28c   : > { %2326 = vst [vmem:[#allocation2 + $0xd0] sm:$0xff] %v2262_v18  ;;  %v2207_v20 = vld [vmem:[#allocation2 + $0x118] sm:$0xff]  ;;  %2327 = vst [vmem:[#allocation2 + $0xd8] sm:$0xff] %v2263_v25  ;;  %v2269_v4 = vadd.f32 %v2205_v14, %v5154_v57  ;;  %v2270_v13 = vadd.f32 %v2206_v16, %v5156_v2  ;;  %v2208_v61 = vld [vmem:[#allocation2 + $0x120] sm:$0xff] }
 0x28d   : > { %2328 = vst [vmem:[#allocation2 + $0xe0] sm:$0xff] %v2264_v32  ;;  %2329 = vst [vmem:[#allocation2 + $0xe8] sm:$0xff] %v2265_v39  ;;  %v2271_v21 = vadd.f32 %v2207_v20, %v5158_v10  ;;  %v2209_v5 = vld [vmem:[#allocation2 + $0x128] sm:$0xff]  ;;  %v2210_v11 = vld [vmem:[#allocation2 + $0x130] sm:$0xff]  ;;  %v2272_v30 = vadd.f32 %v2208_v61, %v5160_v22 }
 0x28e   : > { %2330 = vst [vmem:[#allocation2 + $0xf0] sm:$0xff] %v2266_v48  ;;  %2331 = vst [vmem:[#allocation2 + $0xf8] sm:$0xff] %v2267_v54  ;;  %v2273_v38 = vadd.f32 %v2209_v5, %v5162_v34  ;;  %v2274_v49 = vadd.f32 %v2210_v11, %v5164_v44  ;;  %v2211_v26 = vld [vmem:[#allocation2 + $0x138] sm:$0xff]  ;;  %v2212_v31 = vld [vmem:[#allocation2 + $0x140] sm:$0xff] }
 0x28f   : > { %2332 = vst [vmem:[#allocation2 + $0x100] sm:$0xff] %v2268_v62  ;;  %v2213_v36 = vld [vmem:[#allocation2 + $0x148] sm:$0xff]  ;;  %2333 = vst [vmem:[#allocation2 + $0x108] sm:$0xff] %v2269_v4  ;;  %v2275_v57 = vadd.f32 %v2211_v26, %v5166_v56  ;;  %v2276_v2 = vadd.f32 %v2212_v31, %v5168_v3  ;;  %v2214_v17 = vld [vmem:[#allocation2 + $0x150] sm:$0xff] }
 0x290   : > { %2334 = vst [vmem:[#allocation2 + $0x110] sm:$0xff] %v2270_v13  ;;  %2335 = vst [vmem:[#allocation2 + $0x118] sm:$0xff] %v2271_v21  ;;  %v2277_v10 = vadd.f32 %v2213_v36, %v5170_v15  ;;  %v2215_v23 = vld [vmem:[#allocation2 + $0x158] sm:$0xff]  ;;  %v2216_v29 = vld [vmem:[#allocation2 + $0x160] sm:$0xff]  ;;  %v2278_v22 = vadd.f32 %v2214_v17, %v5172_v28 }
 0x291   : > { %2336 = vst [vmem:[#allocation2 + $0x120] sm:$0xff] %v2272_v30  ;;  %2337 = vst [vmem:[#allocation2 + $0x128] sm:$0xff] %v2273_v38  ;;  %v2279_v34 = vadd.f32 %v2215_v23, %v5174_v43  ;;  %v2280_v44 = vadd.f32 %v2216_v29, %v5176_v59  ;;  %v2217_v37 = vld [vmem:[#allocation2 + $0x168] sm:$0xff]  ;;  %v2218_v45 = vld [vmem:[#allocation2 + $0x170] sm:$0xff] }
 0x292   : > { %2338 = vst [vmem:[#allocation2 + $0x130] sm:$0xff] %v2274_v49  ;;  %v2219_v50 = vld [vmem:[#allocation2 + $0x178] sm:$0xff]  ;;  %2339 = vst [vmem:[#allocation2 + $0x138] sm:$0xff] %v2275_v57  ;;  %v5612_v56 = vld [vmem:[#allocation4_spill] sm:$0xff] }
 0x293   : > { %2340 = vst [vmem:[#allocation2 + $0x140] sm:$0xff] %v2276_v2  ;;  %2341 = vst [vmem:[#allocation2 + $0x148] sm:$0xff] %v2277_v10  ;;  %v2281_v3 = vadd.f32 %v2217_v37, %v5612_v56  ;;  %v5613_v15 = vld [vmem:[#allocation5_spill] sm:$0xff]  ;;  %v5614_v40 = vld [vmem:[#allocation6_spill] sm:$0xff] }
 0x294   : > { %v2282_v35 = vadd.f32 %v2218_v45, %v5613_v15  ;;  %v2283_v46 = vadd.f32 %v2219_v50, %v5614_v40  ;;  %v2220_v51 = vld [vmem:[#allocation2 + $0x180] sm:$0xff]  ;;  %v2221_v53 = vld [vmem:[#allocation2 + $0x188] sm:$0xff]  ;;  %v2222_v63 = vld [vmem:[#allocation2 + $0x190] sm:$0xff]  ;;  %2342 = vst [vmem:[#allocation2 + $0x150] sm:$0xff] %v2278_v22 }
 0x295   : > { %2343 = vst [vmem:[#allocation2 + $0x158] sm:$0xff] %v2279_v34  ;;  %2344 = vst [vmem:[#allocation2 + $0x160] sm:$0xff] %v2280_v44  ;;  %v5615_v28 = vld [vmem:[#allocation7_spill] sm:$0xff]  ;;  %v5616_v59 = vld [vmem:[#allocation8_spill] sm:$0xff] }
 0x296   : > { %v2284_v43 = vadd.f32 %v2220_v51, %v5615_v28  ;;  %v2285_v52 = vadd.f32 %v2221_v53, %v5616_v59  ;;  %v5617_v58 = vld [vmem:[#allocation9_spill] sm:$0xff]  ;;  %v2223_v19 = vld [vmem:[#allocation2 + $0x198] sm:$0xff]  ;;  %v2224_v27 = vld [vmem:[#allocation2 + $0x1a0] sm:$0xff]  ;;  %2345 = vst [vmem:[#allocation2 + $0x168] sm:$0xff] %v2281_v3 }
 0x297   : > { %v2286_v0 = vadd.f32 %v2222_v63, %v5617_v58  ;;  %v2225_v33 = vld [vmem:[#allocation2 + $0x1a8] sm:$0xff]  ;;  %2346 = vst [vmem:[#allocation2 + $0x170] sm:$0xff] %v2282_v35  ;;  %2347 = vst [vmem:[#allocation2 + $0x178] sm:$0xff] %v2283_v46  ;;  %v5618_v6 = vld [vmem:[#allocation10_spill] sm:$0xff] }
 0x298   : > { %v2287_v12 = vadd.f32 %v2223_v19, %v5618_v6  ;;  %v5619_v18 = vld [vmem:[#allocation11_spill] sm:$0xff]  ;;  %v5620_v7 = vld [vmem:[#allocation12_spill] sm:$0xff]  ;;  %v2226_v25 = vld [vmem:[#allocation2 + $0x1b0] sm:$0xff]  ;;  %2348 = vst [vmem:[#allocation2 + $0x180] sm:$0xff] %v2284_v43 }
 0x299   : > { %v2288_v1 = vadd.f32 %v2224_v27, %v5619_v18  ;;  %v2289_v9 = vadd.f32 %v2225_v33, %v5620_v7  ;;  %v2227_v32 = vld [vmem:[#allocation2 + $0x1b8] sm:$0xff]  ;;  %v2228_v39 = vld [vmem:[#allocation2 + $0x1c0] sm:$0xff]  ;;  %2349 = vst [vmem:[#allocation2 + $0x188] sm:$0xff] %v2285_v52  ;;  %2350 = vst [vmem:[#allocation2 + $0x190] sm:$0xff] %v2286_v0 }
 0x29a   : > { %v5621_v41 = vld [vmem:[#allocation13_spill] sm:$0xff]  ;;  %v5622_v55 = vld [vmem:[#allocation14_spill] sm:$0xff]  ;;  %v5623_v54 = vld [vmem:[#allocation15_spill] sm:$0xff]  ;;  %2351 = vst [vmem:[#allocation2 + $0x198] sm:$0xff] %v2287_v12 }
 0x29b   : > { %v2290_v47 = vadd.f32 %v2226_v25, %v5621_v41  ;;  %v2291_v48 = vadd.f32 %v2227_v32, %v5622_v55  ;;  %v2292_v62 = vadd.f32 %v2228_v39, %v5623_v54  ;;  %v2229_v14 = vld [vmem:[#allocation2 + $0x1c8] sm:$0xff]  ;;  %v2230_v16 = vld [vmem:[#allocation2 + $0x1d0] sm:$0xff]  ;;  %v2231_v20 = vld [vmem:[#allocation2 + $0x1d8] sm:$0xff]  ;;  %2352 = vst [vmem:[#allocation2 + $0x1a0] sm:$0xff] %v2288_v1 }
 0x29c   : > { %2353 = vst [vmem:[#allocation2 + $0x1a8] sm:$0xff] %v2289_v9  ;;  %v5624_v4 = vld [vmem:[#allocation16_spill] sm:$0xff]  ;;  %v5625_v21 = vld [vmem:[#allocation17_spill] sm:$0xff]  ;;  %v5626_v5 = vld [vmem:[#allocation18_spill] sm:$0xff] }
 0x29d   : > { %v2293_v13 = vadd.f32 %v2229_v14, %v5624_v4  ;;  %v2294_v61 = vadd.f32 %v2230_v16, %v5625_v21  ;;  %v2295_v11 = vadd.f32 %v2231_v20, %v5626_v5  ;;  %v2232_v30 = vld [vmem:[#allocation2 + $0x1e0] sm:$0xff]  ;;  %v2233_v38 = vld [vmem:[#allocation2 + $0x1e8] sm:$0xff]  ;;  %v2234_v49 = vld [vmem:[#allocation2 + $0x1f0] sm:$0xff]  ;;  %2354 = vst [vmem:[#allocation2 + $0x1b0] sm:$0xff] %v2290_v47 }
 0x29e   : > { %2355 = vst [vmem:[#allocation2 + $0x1b8] sm:$0xff] %v2291_v48  ;;  %2356 = vst [vmem:[#allocation2 + $0x1c0] sm:$0xff] %v2292_v62  ;;  %v2296_v26 = vadd.f32 %v2232_v30, %v5208_v60  ;;  %v2297_v31 = vadd.f32 %v2233_v38, %v5210_v8  ;;  %v2298_v36 = vadd.f32 %v2234_v49, %v5212_v24  ;;  %v2235_v57 = vld [vmem:[#allocation2 + $0x1f8] sm:$0xff] }
 0x29f   : > { %2357 = vst [vmem:[#allocation2 + $0x1c8] sm:$0xff] %v2293_v13  ;;  %2358 = vst [vmem:[#allocation2 + $0x1d0] sm:$0xff] %v2294_v61  ;;  %v2299_v2 = vadd.f32 %v2235_v57, %v5214_v42 }
 0x2a0   : > { %2359 = vst [vmem:[#allocation2 + $0x1d8] sm:$0xff] %v2295_v11  ;;  %2360 = vst [vmem:[#allocation2 + $0x1e0] sm:$0xff] %v2296_v26 }
 0x2a1   : > { %2361 = vst [vmem:[#allocation2 + $0x1e8] sm:$0xff] %v2297_v31  ;;  %2362 = vst [vmem:[#allocation2 + $0x1f0] sm:$0xff] %v2298_v36 }
 0x2a2   : > { %2363 = vst [vmem:[#allocation2 + $0x1f8] sm:$0xff] %v2299_v2 }
 0x2a3 PF: > { %p3656_p13 = scmp.ne.s32.totalorder %s4515_s17, 1 }
 0x2a4   : > { %v4469_v8 = vld [vmem:[%s5579_s2] sm:$0xff] (!%p3656_p13)   ;;  %v4470_v24 = vld [vmem:[%s5579_s2 + $0x8] sm:$0xff] (!%p3656_p13)   ;;  %v4471_v42 = vld [vmem:[%s5579_s2 + $0x10] sm:$0xff] (!%p3656_p13)  }
 0x2a5   : > { %2367 = sbr.rel (%p3656_p13) target bundleno = 983 (0x3d7), region = 71  ;;  %4028 = vmatprep.subr.bf16.mxu0 (!%p3656_p13), %v4469_v8  ;;  %4172 = vmatprep.subr.bf16.mxu1 (!%p3656_p13), %v4469_v8  ;;  %v4472_v60 = vld [vmem:[%s5579_s2 + $0x18] sm:$0xff] (!%p3656_p13)   ;;  %v2368_v10 = vld [vmem:[#allocation2] sm:$0xff] (!%p3656_p13)  ;;  %v2369_v17 = vld [vmem:[#allocation2 + $0x8] sm:$0xff] (!%p3656_p13) }
 0x2a6   : > { %4029 = vmatpush3.bf16.msra.mxu0 (!%p3656_p13), %v4469_v8  ;;  %4180 = vmatpush3.bf16.msra.mxu1 (!%p3656_p13), %v4469_v8  ;;  %v5362_v23 = vld [vmem:[%s5580_s3] ss:$0 sm:$0xff] (!%p3656_p13)  ;;  %v2401_v44 = vld [vmem:[#allocation2 + $0x108] sm:$0xff] (!%p3656_p13)  ;;  %v2370_v37 = vld [vmem:[#allocation2 + $0x10] sm:$0xff] (!%p3656_p13) }
 0x2a7   : > { %4030 = vmatprep.subr.bf16.mxu0 (!%p3656_p13), %v4470_v24  ;;  %4173 = vmatprep.subr.bf16.mxu1 (!%p3656_p13), %v4470_v24  ;;  %v2439_v29 = vadd.f32 (!%p3656_p13), %v5362_v23, %v2368_v10  ;;  %v2440_v22 = vadd.f32 (!%p3656_p13), %v5362_v23, %v2369_v17  ;;  %v2400_v34 = vld [vmem:[#allocation2 + $0x100] sm:$0xff] (!%p3656_p13)  ;;  %v2472_v56 = vadd.f32 (!%p3656_p13), %v5362_v23, %v2401_v44  ;;  %v2371_v3 = vld [vmem:[#allocation2 + $0x18] sm:$0xff] (!%p3656_p13)  ;;  %v2402_v35 = vld [vmem:[#allocation2 + $0x110] sm:$0xff] (!%p3656_p13) }
 0x2a8   : > { %v4473_v45 = vld [vmem:[%s5579_s2 + $0x20] sm:$0xff] (!%p3656_p13)   ;;  %v2471_v50 = vadd.f32 (!%p3656_p13), %v5362_v23, %v2400_v34  ;;  %v2441_v15 = vadd.f32 (!%p3656_p13), %v5362_v23, %v2370_v37  ;;  %v2442_v43 = vadd.f32 (!%p3656_p13), %v5362_v23, %v2371_v3  ;;  %v2403_v59 = vld [vmem:[#allocation2 + $0x118] sm:$0xff] (!%p3656_p13)  ;;  %v2373_v33 = vld [vmem:[#allocation2 + $0x28] sm:$0xff] (!%p3656_p13)  ;;  %v2473_v18 = vadd.f32 (!%p3656_p13), %v5362_v23, %v2402_v35 }
 0x2a9   : > { %vm2503_vm0 = vcmp.gt.f32.partialorder (!%p3656_p13), %v2439_v29, 0.0  ;;  %vm2504_vm1 = vcmp.gt.f32.partialorder (!%p3656_p13), %v2440_v22, 0.0  ;;  %v2567_v40 = vmul.f32 (!%p3656_p13), 0.01, %v2439_v29  ;;  %v2568_v46 = vmul.f32 (!%p3656_p13), 0.01, %v2440_v22 }
 0x2aa   : > { %4031 = vmatpush3.bf16.msra.mxu0 (!%p3656_p13), %v4470_v24  ;;  %4181 = vmatpush3.bf16.msra.mxu1 (!%p3656_p13), %v4470_v24  ;;  %vm2535_vm2 = vcmp.gt.f32.partialorder (!%p3656_p13), %v2471_v50, 0.0  ;;  %vm2536_vm3 = vcmp.gt.f32.partialorder (!%p3656_p13), %v2472_v56, 0.0  ;;  %v2599_v51 = vmul.f32 (!%p3656_p13), 0.01, %v2471_v50  ;;  %v2600_v53 = vmul.f32 (!%p3656_p13), 0.01, %v2472_v56 }
 0x2ab   : > { %4032 = vmatprep.subr.bf16.mxu0 (!%p3656_p13), %v4471_v42  ;;  %4174 = vmatprep.subr.bf16.mxu1 (!%p3656_p13), %v4471_v42  ;;  %v2631_v63 = vsel (!%p3656_p13), %vm2503_vm0, %v2439_v29, %v2567_v40  ;;  %v2632_v28 = vsel (!%p3656_p13), %vm2504_vm1, %v2440_v22, %v2568_v46  ;;  %vm2505_vm4 = vcmp.gt.f32.partialorder (!%p3656_p13), %v2441_v15, 0.0  ;;  %v2372_v52 = vld [vmem:[#allocation2 + $0x20] sm:$0xff] (!%p3656_p13)  ;;  %v2569_v27 = vmul.f32 (!%p3656_p13), 0.01, %v2441_v15  ;;  %v4474_v1 = vld [vmem:[%s5579_s2 + $0x28] sm:$0xff] (!%p3656_p13)   ;;  %v2374_v62 = vld [vmem:[#allocation2 + $0x30] sm:$0xff] (!%p3656_p13) }
 0x2ac   : > { %v2695_v58 = vpack.c.bf16 %v2632_v28, %v2631_v63  ;;  %v2663_v0 = vsel %vm2535_vm2, %v2471_v50, %v2599_v51  ;;  %v2664_v19 = vsel %vm2536_vm3, %v2472_v56, %v2600_v53  ;;  %vm2506_vm5 = vcmp.gt.f32.partialorder %v2442_v43, 0.0  ;;  %v2404_v47 = vld [vmem:[#allocation2 + $0x120] sm:$0xff]  ;;  %v2405_v55 = vld [vmem:[#allocation2 + $0x128] sm:$0xff]  ;;  %v4475_v4 = vld [vmem:[%s5579_s2 + $0x30] sm:$0xff]  }
 0x2ad   : > { %v2711_v6 = vpack.c.bf16 %v2664_v19, %v2663_v0  ;;  %v2570_v12 = vmul.f32 0.01, %v2442_v43  ;;  %v5378_v7 = vsel %vm2505_vm4, %v2441_v15, %v2569_v27  ;;  %v2474_v9 = vadd.f32 %v5362_v23, %v2403_v59  ;;  %v2375_v5 = vld [vmem:[#allocation2 + $0x38] sm:$0xff]  ;;  %v2406_v26 = vld [vmem:[#allocation2 + $0x130] sm:$0xff]  ;;  %v2376_v29 = vld [vmem:[#allocation2 + $0x40] sm:$0xff] }
 0x2ae   : > { %4033 = vmatpush3.bf16.msra.mxu0 %v4471_v42  ;;  %4182 = vmatpush3.bf16.msra.mxu1 %v4471_v42  ;;  %v2443_v25 = vadd.f32 %v5362_v23, %v2372_v52  ;;  %vm2537_vm6 = vcmp.gt.f32.partialorder %v2473_v18, 0.0  ;;  %v2601_v39 = vmul.f32 0.01, %v2473_v18  ;;  %v2444_v41 = vadd.f32 %v5362_v23, %v2373_v33  ;;  %v2407_v31 = vld [vmem:[#allocation2 + $0x138] sm:$0xff]  ;;  %v2377_v22 = vld [vmem:[#allocation2 + $0x48] sm:$0xff]  ;;  %v2378_v28 = vld [vmem:[#allocation2 + $0x50] sm:$0xff] }
 0x2af   : > { %4034 = vmatprep.subr.bf16.mxu0 %v4472_v60  ;;  %4175 = vmatprep.subr.bf16.mxu1 %v4472_v60  ;;  %v5382_v32 = vsel %vm2506_vm5, %v2442_v43, %v2570_v12  ;;  %vm2538_vm7 = vcmp.gt.f32.partialorder %v2474_v9, 0.0  ;;  %v2602_v54 = vmul.f32 0.01, %v2474_v9  ;;  %v2475_v21 = vadd.f32 %v5362_v23, %v2404_v47  ;;  %v4476_v42 = vld [vmem:[%s5579_s2 + $0x38] sm:$0xff]   ;;  %v2409_v46 = vld [vmem:[#allocation2 + $0x148] sm:$0xff] }
 0x2b0   : > { %4044 = vmatprep.mubr.bf16.mxu0 %v2695_v58  ;;  %4076 = vmatprep.mubr.bf16.mxu1 %v2711_v6  ;;  %v2696_v48 = vpack.c.bf16 %v5382_v32, %v5378_v7  ;;  %vm2507_vm8 = vcmp.gt.f32.partialorder %v2443_v25, 0.0  ;;  %v5387_v14 = vsel %vm2537_vm6, %v2473_v18, %v2601_v39  ;;  %vm2508_vm9 = vcmp.gt.f32.partialorder %v2444_v41, 0.0  ;;  %v2379_v43 = vld [vmem:[#allocation2 + $0x58] sm:$0xff]  ;;  %v2410_v58 = vld [vmem:[#allocation2 + $0x150] sm:$0xff]  ;;  %v2412_v32 = vld [vmem:[#allocation2 + $0x160] sm:$0xff] }
 0x2b1   : > { %v2571_v16 = vmul.f32 0.01, %v2443_v25  ;;  %v2572_v20 = vmul.f32 0.01, %v2444_v41  ;;  %v5392_v13 = vsel %vm2538_vm7, %v2474_v9, %v2602_v54  ;;  %v2476_v61 = vadd.f32 %v5362_v23, %v2405_v55 }
 0x2b2   : > { %4035 = vmatpush3.bf16.msra.mxu0 %v4472_v60  ;;  %4183 = vmatpush3.bf16.msra.mxu1 %v4472_v60  ;;  %v2712_v11 = vpack.c.bf16 %v5392_v13, %v5387_v14  ;;  %v2445_v49 = vadd.f32 %v5362_v23, %v2374_v62  ;;  %vm2539_vm10 = vcmp.gt.f32.partialorder %v2475_v21, 0.0  ;;  %v2603_v57 = vmul.f32 0.01, %v2475_v21 }
 0x2b3   : > { %4036 = vmatprep.subr.bf16.mxu0 %v4473_v45  ;;  %4176 = vmatprep.subr.bf16.mxu1 %v4473_v45  ;;  %v5399_v30 = vsel %vm2507_vm8, %v2443_v25, %v2571_v16  ;;  %v5401_v38 = vsel %vm2508_vm9, %v2444_v41, %v2572_v20  ;;  %vm2540_vm11 = vcmp.gt.f32.partialorder %v2476_v61, 0.0  ;;  %v2604_v2 = vmul.f32 0.01, %v2476_v61  ;;  %v2380_v41 = vld [vmem:[#allocation2 + $0x60] sm:$0xff] }
 0x2b4   : > { %v2697_v36 = vpack.c.bf16 %v5401_v38, %v5399_v30  ;;  %v2446_v8 = vadd.f32 %v5362_v23, %v2375_v5  ;;  %vm2509_vm12 = vcmp.gt.f32.partialorder %v2445_v49, 0.0  ;;  %v2573_v24 = vmul.f32 0.01, %v2445_v49 }
 0x2b5   : > { %v2667_v60 = vsel %vm2539_vm10, %v2475_v21, %v2603_v57  ;;  %v2477_v10 = vadd.f32 %v5362_v23, %v2406_v26  ;;  %v2478_v17 = vadd.f32 %v5362_v23, %v2407_v31  ;;  %v2668_v34 = vsel %vm2540_vm11, %v2476_v61, %v2604_v2  ;;  %v2383_v2 = vld [vmem:[#allocation2 + $0x78] sm:$0xff] }
 0x2b6   : > { %4037 = vmatpush3.bf16.msra.mxu0 %v4473_v45  ;;  %4184 = vmatpush3.bf16.msra.mxu1 %v4473_v45  ;;  %vm2510_vm13 = vcmp.gt.f32.partialorder %v2446_v8, 0.0  ;;  %v2574_v44 = vmul.f32 0.01, %v2446_v8  ;;  %v5413_v37 = vsel %vm2509_vm12, %v2445_v49, %v2573_v24  ;;  %v2408_v45 = vld [vmem:[#allocation2 + $0x140] sm:$0xff]  ;;  %v2713_v50 = vpack.c.bf16 %v2668_v34, %v2667_v60  ;;  %v2414_v60 = vld [vmem:[#allocation2 + $0x170] sm:$0xff] }
 0x2b7   : > { %4038 = vmatprep.subr.bf16.mxu0 %v4474_v1  ;;  %4177 = vmatprep.subr.bf16.mxu1 %v4474_v1  ;;  %vm2541_vm14 = vcmp.gt.f32.partialorder %v2477_v10, 0.0  ;;  %vm2542_vm15 = vcmp.gt.f32.partialorder %v2478_v17, 0.0  ;;  %v2605_v56 = vmul.f32 0.01, %v2477_v10  ;;  %v2606_v15 = vmul.f32 0.01, %v2478_v17 }
 0x2b8   : > { %v5415_v3 = vsel %vm2510_vm13, %v2446_v8, %v2574_v44  ;;  %v2447_v35 = vadd.f32 %v5362_v23, %v2376_v29  ;;  %v2448_v40 = vadd.f32 %v5362_v23, %v2377_v22  ;;  %v2479_v63 = vadd.f32 %v5362_v23, %v2408_v45  ;;  %v2415_v29 = vld [vmem:[#allocation2 + $0x178] sm:$0xff] }
 0x2b9   : > { %v2698_v51 = vpack.c.bf16 %v5415_v3, %v5413_v37  ;;  %v5421_v53 = vsel %vm2541_vm14, %v2477_v10, %v2605_v56  ;;  %v5425_v59 = vsel %vm2542_vm15, %v2478_v17, %v2606_v15  ;;  %v2480_v27 = vadd.f32 %v5362_v23, %v2409_v46  ;;  %v2385_v37 = vld [vmem:[#allocation2 + $0x88] sm:$0xff]  ;;  %v2416_v3 = vld [vmem:[#allocation2 + $0x180] sm:$0xff] }
 0x2ba   : > { %4039 = vmatpush3.bf16.msra.mxu0 %v4474_v1  ;;  %4185 = vmatpush3.bf16.msra.mxu1 %v4474_v1  ;;  %vm2511_vm0 = vcmp.gt.f32.partialorder %v2447_v35, 0.0  ;;  %vm2512_vm1 = vcmp.gt.f32.partialorder %v2448_v40, 0.0  ;;  %v2575_v52 = vmul.f32 0.01, %v2447_v35  ;;  %v2714_v0 = vpack.c.bf16 %v5425_v59, %v5421_v53  ;;  %v2411_v1 = vld [vmem:[#allocation2 + $0x158] sm:$0xff] }
 0x2bb   : > { %4040 = vmatprep.subr.bf16.mxu0 %v4475_v4  ;;  %4178 = vmatprep.subr.bf16.mxu1 %v4475_v4  ;;  %v2576_v19 = vmul.f32 0.01, %v2448_v40  ;;  %vm2543_vm2 = vcmp.gt.f32.partialorder %v2479_v63, 0.0  ;;  %v2607_v6 = vmul.f32 0.01, %v2479_v63  ;;  %v2449_v12 = vadd.f32 %v5362_v23, %v2378_v28 }
 0x2bc   : > { %v5430_v33 = vsel %vm2511_vm0, %v2447_v35, %v2575_v52  ;;  %v2450_v18 = vadd.f32 %v5362_v23, %v2379_v43  ;;  %vm2544_vm3 = vcmp.gt.f32.partialorder %v2480_v27, 0.0  ;;  %v2608_v25 = vmul.f32 0.01, %v2480_v27  ;;  %v2384_v35 = vld [vmem:[#allocation2 + $0x80] sm:$0xff]  ;;  %v2417_v43 = vld [vmem:[#allocation2 + $0x188] sm:$0xff] }
 0x2bd   : > { %v2640_v9 = vsel %vm2512_vm1, %v2448_v40, %v2576_v19  ;;  %v2481_v39 = vadd.f32 %v5362_v23, %v2410_v58  ;;  %v2671_v55 = vsel %vm2543_vm2, %v2479_v63, %v2607_v6  ;;  %vm2513_vm4 = vcmp.gt.f32.partialorder %v2449_v12, 0.0 }
 0x2be   : > { %4041 = vmatpush3.bf16.msra.mxu0 %v4475_v4  ;;  %4186 = vmatpush3.bf16.msra.mxu1 %v4475_v4  ;;  %v2699_v47 = vpack.c.bf16 %v2640_v9, %v5430_v33  ;;  %vm2514_vm5 = vcmp.gt.f32.partialorder %v2450_v18, 0.0  ;;  %v2672_v54 = vsel %vm2544_vm3, %v2480_v27, %v2608_v25  ;;  %v2577_v62 = vmul.f32 0.01, %v2449_v12  ;;  %v2381_v4 = vld [vmem:[#allocation2 + $0x68] sm:$0xff]  ;;  %v2387_v9 = vld [vmem:[#allocation2 + $0x98] sm:$0xff] }
 0x2bf   : > { %4042 = vmatprep.subr.bf16.mxu0 %v4476_v42  ;;  %4179 = vmatprep.subr.bf16.mxu1 %v4476_v42  ;;  %v2578_v16 = vmul.f32 0.01, %v2450_v18  ;;  %v2482_v20 = vadd.f32 %v5362_v23, %v2411_v1  ;;  %v2715_v21 = vpack.c.bf16 %v2672_v54, %v2671_v55  ;;  %vm2545_vm6 = vcmp.gt.f32.partialorder %v2481_v39, 0.0  ;;  %v2386_v1 = vld [vmem:[#allocation2 + $0x90] sm:$0xff] }
 0x2c0   : > { %v2609_v61 = vmul.f32 0.01, %v2481_v39  ;;  %v2451_v7 = vadd.f32 %v5362_v23, %v2380_v41  ;;  %v5448_v14 = vsel %vm2513_vm4, %v2449_v12, %v2577_v62  ;;  %v2452_v49 = vadd.f32 %v5362_v23, %v2381_v4  ;;  %v2419_v4 = vld [vmem:[#allocation2 + $0x198] sm:$0xff] }
 0x2c1   : > { %v5451_v13 = vsel %vm2514_vm5, %v2450_v18, %v2578_v16  ;;  %vm2546_vm7 = vcmp.gt.f32.partialorder %v2482_v20, 0.0  ;;  %v2610_v5 = vmul.f32 0.01, %v2482_v20  ;;  %v2454_v44 = vadd.f32 %v5362_v23, %v2383_v2 }
 0x2c2   : > { %4043 = vmatpush3.bf16.msra.mxu0 %v4476_v42  ;;  %4187 = vmatpush3.bf16.msra.mxu1 %v4476_v42  ;;  %v2700_v30 = vpack.c.bf16 %v5451_v13, %v5448_v14  ;;  %v5455_v38 = vsel %vm2545_vm6, %v2481_v39, %v2609_v61  ;;  %vm2515_vm8 = vcmp.gt.f32.partialorder %v2451_v7, 0.0  ;;  %v2579_v31 = vmul.f32 0.01, %v2451_v7 }
 0x2c3   : > { %v2674_v26 = vsel %vm2546_vm7, %v2482_v20, %v2610_v5  ;;  %vm2516_vm9 = vcmp.gt.f32.partialorder %v2452_v49, 0.0  ;;  %v2580_v24 = vmul.f32 0.01, %v2452_v49  ;;  %v2485_v15 = vadd.f32 %v5362_v23, %v2414_v60  ;;  %v2418_v20 = vld [vmem:[#allocation2 + $0x190] sm:$0xff]  ;;  %v2420_v5 = vld [vmem:[#allocation2 + $0x1a0] sm:$0xff] }
 0x2c4   : > { %v2716_v8 = vpack.c.bf16 %v2674_v26, %v5455_v38  ;;  %v2643_v10 = vsel %vm2515_vm8, %v2451_v7, %v2579_v31  ;;  %vm2518_vm13 = vcmp.gt.f32.partialorder %v2454_v44, 0.0  ;;  %v2582_v46 = vmul.f32 0.01, %v2454_v44 }
 0x2c5   : > { %4045 = vmatmul.mubr.bf16.vlgmr.msra.gmra.mrb[0].mxu0 %v2696_v48  ;;  %4077 = vmatmul.mubr.bf16.vlgmr.msra.gmra.mrb[0].mxu1 %v2712_v11  ;;  %v2413_v48 = vld [vmem:[#allocation2 + $0x168] sm:$0xff]  ;;  %v2382_v11 = vld [vmem:[#allocation2 + $0x70] sm:$0xff]  ;;  %v2644_v22 = vsel %vm2516_vm9, %v2452_v49, %v2580_v24  ;;  %v2486_v63 = vadd.f32 %v5362_v23, %v2415_v29  ;;  %vm2549_vm14 = vcmp.gt.f32.partialorder %v2485_v15, 0.0  ;;  %v2613_v28 = vmul.f32 0.01, %v2485_v15 }
 0x2c6   : > { %4048 = vmatprep.mubr.bf16.mxu0 %v2697_v36  ;;  %4080 = vmatprep.mubr.bf16.mxu1 %v2713_v50  ;;  %v2483_v36 = vadd.f32 %v5362_v23, %v2412_v32  ;;  %v2484_v57 = vadd.f32 %v5362_v23, %v2413_v48  ;;  %v2453_v42 = vadd.f32 %v5362_v23, %v2382_v11  ;;  %v2389_v48 = vld [vmem:[#allocation2 + $0xa8] sm:$0xff] }
 0x2c7   : > { %v2701_v45 = vpack.c.bf16 %v2644_v22, %v2643_v10  ;;  %v5475_v59 = vsel %vm2518_vm13, %v2454_v44, %v2582_v46  ;;  %vm2550_vm15 = vcmp.gt.f32.partialorder %v2486_v63, 0.0  ;;  %v2614_v52 = vmul.f32 0.01, %v2486_v63  ;;  %v2421_v11 = vld [vmem:[#allocation2 + $0x1a8] sm:$0xff]  ;;  %v2390_v10 = vld [vmem:[#allocation2 + $0xb0] sm:$0xff] }
 0x2c8   : > { %vm2547_vm10 = vcmp.gt.f32.partialorder %v2483_v36, 0.0  ;;  %vm2548_vm11 = vcmp.gt.f32.partialorder %v2484_v57, 0.0  ;;  %v2611_v17 = vmul.f32 0.01, %v2483_v36  ;;  %v2612_v34 = vmul.f32 0.01, %v2484_v57 }
 0x2c9   : > { %vm2517_vm12 = vcmp.gt.f32.partialorder %v2453_v42, 0.0  ;;  %v2581_v56 = vmul.f32 0.01, %v2453_v42  ;;  %v2455_v58 = vadd.f32 %v5362_v23, %v2384_v35  ;;  %v2677_v19 = vsel %vm2549_vm14, %v2485_v15, %v2613_v28  ;;  %v2422_v44 = vld [vmem:[#allocation2 + $0x1b0] sm:$0xff]  ;;  %v2423_v15 = vld [vmem:[#allocation2 + $0x1b8] sm:$0xff] }
 0x2ca   : > { %v2675_v50 = vsel %vm2547_vm10, %v2483_v36, %v2611_v17  ;;  %v2676_v40 = vsel %vm2548_vm11, %v2484_v57, %v2612_v34  ;;  %v2456_v27 = vadd.f32 %v5362_v23, %v2385_v37  ;;  %v2487_v33 = vadd.f32 %v5362_v23, %v2416_v3  ;;  %v2391_v17 = vld [vmem:[#allocation2 + $0xb8] sm:$0xff]  ;;  %v2393_v37 = vld [vmem:[#allocation2 + $0xc8] sm:$0xff] }
 0x2cb   : > { %v5473_v53 = vsel %vm2517_vm12, %v2453_v42, %v2581_v56  ;;  %v2678_v6 = vsel %vm2550_vm15, %v2486_v63, %v2614_v52  ;;  %vm2519_vm0 = vcmp.gt.f32.partialorder %v2455_v58, 0.0  ;;  %v2583_v12 = vmul.f32 0.01, %v2455_v58  ;;  %v2392_v63 = vld [vmem:[#allocation2 + $0xc0] sm:$0xff] }
 0x2cc   : > { %v2488_v18 = vadd.f32 %v5362_v23, %v2417_v43  ;;  %v2718_v25 = vpack.c.bf16 %v2678_v6, %v2677_v19  ;;  %vm2520_vm1 = vcmp.gt.f32.partialorder %v2456_v27, 0.0  ;;  %v2584_v39 = vmul.f32 0.01, %v2456_v27  ;;  %v2424_v6 = vld [vmem:[#allocation2 + $0x1c0] sm:$0xff] }
 0x2cd   : > { %4049 = vmatmul.mubr.bf16.gmra.mrb[4].mxu0 %v2698_v51  ;;  %4081 = vmatmul.mubr.bf16.gmra.mrb[4].mxu1 %v2714_v0  ;;  %v2717_v51 = vpack.c.bf16 %v2676_v40, %v2675_v50  ;;  %v2702_v0 = vpack.c.bf16 %v5475_v59, %v5473_v53  ;;  %vm2551_vm2 = vcmp.gt.f32.partialorder %v2487_v33, 0.0  ;;  %v2647_v41 = vsel %vm2519_vm0, %v2455_v58, %v2583_v12  ;;  %v2425_v12 = vld [vmem:[#allocation2 + $0x1c8] sm:$0xff] }
 0x2ce   : > { %4052 = vmatprep.mubr.bf16.mxu0 %v2699_v47  ;;  %4084 = vmatprep.mubr.bf16.mxu1 %v2715_v21  ;;  %vm2552_vm3 = vcmp.gt.f32.partialorder %v2488_v18, 0.0  ;;  %v2615_v47 = vmul.f32 0.01, %v2487_v33  ;;  %v2616_v55 = vmul.f32 0.01, %v2488_v18  ;;  %v2648_v54 = vsel %vm2520_vm1, %v2456_v27, %v2584_v39  ;;  %v2388_v21 = vld [vmem:[#allocation2 + $0xa0] sm:$0xff] }
 0x2cf   : > { %v2457_v62 = vadd.f32 %v5362_v23, %v2386_v1  ;;  %v2458_v16 = vadd.f32 %v5362_v23, %v2387_v9  ;;  %v2703_v61 = vpack.c.bf16 %v2648_v54, %v2647_v41  ;;  %v2489_v38 = vadd.f32 %v5362_v23, %v2418_v20  ;;  %v2426_v20 = vld [vmem:[#allocation2 + $0x1d0] sm:$0xff] }
 0x2d0   : > { %v2679_v7 = vsel %vm2551_vm2, %v2487_v33, %v2615_v47  ;;  %v2680_v32 = vsel %vm2552_vm3, %v2488_v18, %v2616_v55  ;;  %v2490_v49 = vadd.f32 %v5362_v23, %v2419_v4  ;;  %v2459_v26 = vadd.f32 %v5362_v23, %v2388_v21  ;;  %v2395_v55 = vld [vmem:[#allocation2 + $0xd8] sm:$0xff]  ;;  %v2396_v21 = vld [vmem:[#allocation2 + $0xe0] sm:$0xff] }
 0x2d1   : > { %v2719_v14 = vpack.c.bf16 %v2680_v32, %v2679_v7  ;;  %vm2521_vm4 = vcmp.gt.f32.partialorder %v2457_v62, 0.0  ;;  %vm2522_vm5 = vcmp.gt.f32.partialorder %v2458_v16, 0.0  ;;  %v2585_v13 = vmul.f32 0.01, %v2457_v62  ;;  %v2427_v4 = vld [vmem:[#allocation2 + $0x1d8] sm:$0xff] }
 0x2d2   : > { %v2460_v36 = vadd.f32 %v5362_v23, %v2389_v48  ;;  %v2491_v57 = vadd.f32 %v5362_v23, %v2420_v5  ;;  %v2492_v2 = vadd.f32 %v5362_v23, %v2421_v11  ;;  %vm2553_vm6 = vcmp.gt.f32.partialorder %v2489_v38, 0.0 }
 0x2d3   : > { %v2649_v31 = vsel %vm2521_vm4, %v2457_v62, %v2585_v13  ;;  %vm2554_vm7 = vcmp.gt.f32.partialorder %v2490_v49, 0.0  ;;  %v2617_v24 = vmul.f32 0.01, %v2489_v38  ;;  %v2618_v60 = vmul.f32 0.01, %v2490_v49 }
 0x2d4   : > { %vm2523_vm8 = vcmp.gt.f32.partialorder %v2459_v26, 0.0  ;;  %vm2524_vm9 = vcmp.gt.f32.partialorder %v2460_v36, 0.0  ;;  %v2587_v22 = vmul.f32 0.01, %v2459_v26  ;;  %v2588_v34 = vmul.f32 0.01, %v2460_v36 }
 0x2d5   : > { %4053 = vmatmul.mubr.bf16.gmra.mrb[8].mxu0 %v2700_v30  ;;  %4085 = vmatmul.mubr.bf16.gmra.mrb[8].mxu1 %v2716_v8  ;;  %v2586_v30 = vmul.f32 0.01, %v2458_v16  ;;  %v2681_v29 = vsel %vm2553_vm6, %v2489_v38, %v2617_v24  ;;  %vm2555_vm10 = vcmp.gt.f32.partialorder %v2491_v57, 0.0  ;;  %vm2556_vm11 = vcmp.gt.f32.partialorder %v2492_v2, 0.0 }
 0x2d6   : > { %4056 = vmatprep.mubr.bf16.mxu0 %v2701_v45  ;;  %4088 = vmatprep.mubr.bf16.mxu1 %v2717_v51  ;;  %v2682_v45 = vsel %vm2554_vm7, %v2490_v49, %v2618_v60  ;;  %v2619_v50 = vmul.f32 0.01, %v2491_v57  ;;  %v2620_v56 = vmul.f32 0.01, %v2492_v2  ;;  %v2651_v40 = vsel %vm2523_vm8, %v2459_v26, %v2587_v22  ;;  %v2397_v49 = vld [vmem:[#allocation2 + $0xe8] sm:$0xff] }
 0x2d7   : > { %v2650_v8 = vsel %vm2522_vm5, %v2458_v16, %v2586_v30  ;;  %v2720_v35 = vpack.c.bf16 %v2682_v45, %v2681_v29  ;;  %v2652_v46 = vsel %vm2524_vm9, %v2460_v36, %v2588_v34  ;;  %v2461_v28 = vadd.f32 %v5362_v23, %v2390_v10  ;;  %v2429_v60 = vld [vmem:[#allocation2 + $0x1e8] sm:$0xff]  ;;  %v2398_v34 = vld [vmem:[#allocation2 + $0xf0] sm:$0xff] }
 0x2d8   : > { %v2704_v42 = vpack.c.bf16 %v2650_v8, %v2649_v31  ;;  %v2705_v3 = vpack.c.bf16 %v2652_v46, %v2651_v40  ;;  %v2683_v51 = vsel %vm2555_vm10, %v2491_v57, %v2619_v50  ;;  %v2684_v53 = vsel %vm2556_vm11, %v2492_v2, %v2620_v56  ;;  %v2399_v46 = vld [vmem:[#allocation2 + $0xf8] sm:$0xff] }
 0x2d9   : > { %v2721_v43 = vpack.c.bf16 %v2684_v53, %v2683_v51  ;;  %v2462_v59 = vadd.f32 %v5362_v23, %v2391_v17  ;;  %v2493_v52 = vadd.f32 %v5362_v23, %v2422_v44  ;;  %v2494_v58 = vadd.f32 %v5362_v23, %v2423_v15  ;;  %v2430_v51 = vld [vmem:[#allocation2 + $0x1f0] sm:$0xff] }
 0x2da   : > { %vm2525_vm12 = vcmp.gt.f32.partialorder %v2461_v28, 0.0  ;;  %v2463_v19 = vadd.f32 %v5362_v23, %v2392_v63  ;;  %v2464_v27 = vadd.f32 %v5362_v23, %v2393_v37  ;;  %v2495_v5 = vadd.f32 %v5362_v23, %v2424_v6 }
 0x2db   : > { %vm2526_vm13 = vcmp.gt.f32.partialorder %v2462_v59, 0.0  ;;  %v2590_v33 = vmul.f32 0.01, %v2462_v59  ;;  %vm2557_vm14 = vcmp.gt.f32.partialorder %v2493_v52, 0.0  ;;  %vm2558_vm15 = vcmp.gt.f32.partialorder %v2494_v58, 0.0 }
 0x2dc   : > { %v2621_v1 = vmul.f32 0.01, %v2493_v52  ;;  %v2622_v9 = vmul.f32 0.01, %v2494_v58  ;;  %vm2527_vm0 = vcmp.gt.f32.partialorder %v2463_v19, 0.0  ;;  %vm2528_vm1 = vcmp.gt.f32.partialorder %v2464_v27, 0.0 }
 0x2dd   : > { %4057 = vmatmul.mubr.bf16.gmra.mrb[12].mxu0 %v2702_v0  ;;  %4089 = vmatmul.mubr.bf16.gmra.mrb[12].mxu1 %v2718_v25  ;;  %v2589_v0 = vmul.f32 0.01, %v2461_v28  ;;  %v2394_v25 = vld [vmem:[#allocation2 + $0xd0] sm:$0xff]  ;;  %v2654_v39 = vsel %vm2526_vm13, %v2462_v59, %v2590_v33  ;;  %v2591_v41 = vmul.f32 0.01, %v2463_v19  ;;  %v2496_v11 = vadd.f32 %v5362_v23, %v2425_v12 }
 0x2de   : > { %4060 = vmatprep.mubr.bf16.mxu0 %v2703_v61  ;;  %4092 = vmatprep.mubr.bf16.mxu1 %v2719_v14  ;;  %v2592_v47 = vmul.f32 0.01, %v2464_v27  ;;  %v2685_v62 = vsel %vm2557_vm14, %v2493_v52, %v2621_v1  ;;  %v2686_v16 = vsel %vm2558_vm15, %v2494_v58, %v2622_v9  ;;  %v2465_v14 = vadd.f32 %v5362_v23, %v2394_v25 }
 0x2df   : > { %v2653_v18 = vsel %vm2525_vm12, %v2461_v28, %v2589_v0  ;;  %v2722_v61 = vpack.c.bf16 %v2686_v16, %v2685_v62  ;;  %v2655_v7 = vsel %vm2527_vm0, %v2463_v19, %v2591_v41  ;;  %v2466_v13 = vadd.f32 %v5362_v23, %v2395_v55  ;;  %v2431_v0 = vld [vmem:[#allocation2 + $0x1f8] sm:$0xff] }
 0x2e0   : > { %v2706_v54 = vpack.c.bf16 %v2654_v39, %v2653_v18  ;;  %v2656_v32 = vsel %vm2528_vm1, %v2464_v27, %v2592_v47  ;;  %v2497_v30 = vadd.f32 %v5362_v23, %v2426_v20  ;;  %v2498_v38 = vadd.f32 %v5362_v23, %v2427_v4 }
 0x2e1   : > { %v2707_v48 = vpack.c.bf16 %v2656_v32, %v2655_v7  ;;  %v2467_v26 = vadd.f32 %v5362_v23, %v2396_v21  ;;  %vm2559_vm2 = vcmp.gt.f32.partialorder %v2495_v5, 0.0  ;;  %vm2560_vm3 = vcmp.gt.f32.partialorder %v2496_v11, 0.0 }
 0x2e2   : > { %v2623_v31 = vmul.f32 0.01, %v2495_v5  ;;  %v2624_v36 = vmul.f32 0.01, %v2496_v11  ;;  %vm2529_vm4 = vcmp.gt.f32.partialorder %v2465_v14, 0.0  ;;  %vm2530_vm5 = vcmp.gt.f32.partialorder %v2466_v13, 0.0 }
 0x2e3   : > { %v2593_v57 = vmul.f32 0.01, %v2465_v14  ;;  %v2594_v2 = vmul.f32 0.01, %v2466_v13  ;;  %vm2561_vm6 = vcmp.gt.f32.partialorder %v2497_v30, 0.0  ;;  %vm2562_vm7 = vcmp.gt.f32.partialorder %v2498_v38, 0.0 }
 0x2e4   : > { %v2687_v8 = vsel %vm2559_vm2, %v2495_v5, %v2623_v31  ;;  %v2688_v24 = vsel %vm2560_vm3, %v2496_v11, %v2624_v36  ;;  %v2625_v22 = vmul.f32 0.01, %v2497_v30  ;;  %v2626_v45 = vmul.f32 0.01, %v2498_v38 }
 0x2e5   : > { %4061 = vmatmul.mubr.bf16.gmra.mrb[16].mxu0 %v2704_v42  ;;  %4093 = vmatmul.mubr.bf16.gmra.mrb[16].mxu1 %v2720_v35  ;;  %v2428_v42 = vld [vmem:[#allocation2 + $0x1e0] sm:$0xff]  ;;  %v2723_v10 = vpack.c.bf16 %v2688_v24, %v2687_v8  ;;  %v2657_v17 = vsel %vm2529_vm4, %v2465_v14, %v2593_v57  ;;  %v2658_v29 = vsel %vm2530_vm5, %v2466_v13, %v2594_v2  ;;  %vm2531_vm8 = vcmp.gt.f32.partialorder %v2467_v26, 0.0 }
 0x2e6   : > { %4064 = vmatprep.mubr.bf16.mxu0 %v2705_v3  ;;  %4096 = vmatprep.mubr.bf16.mxu1 %v2721_v43  ;;  %v2708_v44 = vpack.c.bf16 %v2658_v29, %v2657_v17  ;;  %v2468_v50 = vadd.f32 %v5362_v23, %v2397_v49  ;;  %v2689_v56 = vsel %vm2561_vm6, %v2497_v30, %v2625_v22  ;;  %v2595_v15 = vmul.f32 0.01, %v2467_v26 }
 0x2e7   : > { %v2499_v35 = vadd.f32 %v5362_v23, %v2428_v42  ;;  %v2500_v40 = vadd.f32 %v5362_v23, %v2429_v60  ;;  %v2690_v63 = vsel %vm2562_vm7, %v2498_v38, %v2626_v45  ;;  %v2469_v3 = vadd.f32 %v5362_v23, %v2398_v34 }
 0x2e8   : > { %vm2532_vm9 = vcmp.gt.f32.partialorder %v2468_v50, 0.0  ;;  %v2596_v37 = vmul.f32 0.01, %v2468_v50  ;;  %v2724_v53 = vpack.c.bf16 %v2690_v63, %v2689_v56  ;;  %v2659_v28 = vsel %vm2531_vm8, %v2467_v26, %v2595_v15 }
 0x2e9   : > { %vm2563_vm10 = vcmp.gt.f32.partialorder %v2499_v35, 0.0  ;;  %vm2564_vm11 = vcmp.gt.f32.partialorder %v2500_v40, 0.0  ;;  %v2627_v59 = vmul.f32 0.01, %v2499_v35  ;;  %v2628_v52 = vmul.f32 0.01, %v2500_v40 }
 0x2ea   : > { %v2660_v43 = vsel %vm2532_vm9, %v2468_v50, %v2596_v37  ;;  %v2470_v58 = vadd.f32 %v5362_v23, %v2399_v46  ;;  %vm2533_vm12 = vcmp.gt.f32.partialorder %v2469_v3, 0.0  ;;  %v2597_v27 = vmul.f32 0.01, %v2469_v3 }
 0x2eb   : > { %v2709_v19 = vpack.c.bf16 %v2660_v43, %v2659_v28  ;;  %v2501_v33 = vadd.f32 %v5362_v23, %v2430_v51  ;;  %v2691_v6 = vsel %vm2563_vm10, %v2499_v35, %v2627_v59  ;;  %v2692_v12 = vsel %vm2564_vm11, %v2500_v40, %v2628_v52 }
 0x2ec   : > { %vm2534_vm13 = vcmp.gt.f32.partialorder %v2470_v58, 0.0  ;;  %v2598_v18 = vmul.f32 0.01, %v2470_v58  ;;  %v2725_v1 = vpack.c.bf16 %v2692_v12, %v2691_v6  ;;  %v2502_v9 = vadd.f32 %v5362_v23, %v2431_v0 }
 0x2ed   : > { %4065 = vmatmul.mubr.bf16.gmra.mrb[20].mxu0 %v2706_v54  ;;  %4097 = vmatmul.mubr.bf16.gmra.mrb[20].mxu1 %v2722_v61  ;;  %vm2565_vm14 = vcmp.gt.f32.partialorder %v2501_v33, 0.0  ;;  %v2629_v25 = vmul.f32 0.01, %v2501_v33  ;;  %v2661_v39 = vsel %vm2533_vm12, %v2469_v3, %v2597_v27 }
 0x2ee   : > { %4068 = vmatprep.mubr.bf16.mxu0 %v2707_v48  ;;  %4100 = vmatprep.mubr.bf16.mxu1 %v2723_v10  ;;  %v2662_v41 = vsel %vm2534_vm13, %v2470_v58, %v2598_v18  ;;  %vm2566_vm15 = vcmp.gt.f32.partialorder %v2502_v9, 0.0  ;;  %v2630_v47 = vmul.f32 0.01, %v2502_v9 }
 0x2ef   : > { %v2693_v55 = vsel %vm2565_vm14, %v2501_v33, %v2629_v25  ;;  %v2710_v62 = vpack.c.bf16 %v2662_v41, %v2661_v39 }
 0x2f0   : > { %v2694_v54 = vsel %vm2566_vm15, %v2502_v9, %v2630_v47 }
 0x2f1   : > { %v2726_v16 = vpack.c.bf16 %v2694_v54, %v2693_v55 }
 0x2f5   : > { %4069 = vmatmul.mubr.bf16.gmra.mrb[24].mxu0 %v2708_v44  ;;  %4101 = vmatmul.mubr.bf16.gmra.mrb[24].mxu1 %v2724_v53 }
 0x2f6   : > { %4072 = vmatprep.mubr.bf16.mxu0 %v2709_v19  ;;  %4104 = vmatprep.mubr.bf16.mxu1 %v2725_v1 }
 0x2fd   : > { %4073 = vmatmul.mubr.bf16.gmra.mrb[28].mxu0 %v2710_v62  ;;  %4105 = vmatmul.mubr.bf16.gmra.mrb[28].mxu1 %v2726_v16 }
 0x398   : > { %v4046_v23 = vpop.f32.mrb[0].mxu0  ;;  %v4078_v20 = vpop.f32.mrb[0].mxu1 }
 0x399   : > { %v2825_v4 = vpop.f32.mrb[1].mxu0  ;;  %v2953_v21 = vpop.f32.mrb[1].mxu1 }
 0x39a   : > { %v4047_v61 = vpop.f32.mrb[2].mxu0  ;;  %v4079_v7 = vpop.f32.mrb[2].mxu1 }
 0x39b   : > { %v3805_v32 = vpack.c.bf16 %v4047_v61, %v4046_v23  ;;  %v3885_v48 = vpack.c.bf16 %v4079_v7, %v4078_v20  ;;  %v2828_v5 = vpop.f32.mrb[3].mxu0  ;;  %v2956_v11 = vpop.f32.mrb[3].mxu1 }
 0x39c   : > { %v3800_v14 = vpack.c.bf16 %v2828_v5, %v2825_v4  ;;  %v3880_v13 = vpack.c.bf16 %v2956_v11, %v2953_v21 }
 0x39d   : > { %3957 = vst [vmem:[%s4894_s6 + $0x8] sm:$0xff] %v3805_v32   ;;  %3973 = vst [vmem:[%s4894_s6 + $0x88] sm:$0xff] %v3885_v48  }
 0x39e   : > { %3801 = vst [vmem:[%s4894_s6] sm:$0xff] %v3800_v14   ;;  %3972 = vst [vmem:[%s4894_s6 + $0x80] sm:$0xff] %v3880_v13  }
 0x3a0   : > { %v4050_v30 = vpop.f32.mrb[4].mxu0  ;;  %v4082_v38 = vpop.f32.mrb[4].mxu1 }
 0x3a1   : > { %v2841_v49 = vpop.f32.mrb[5].mxu0  ;;  %v2969_v26 = vpop.f32.mrb[5].mxu1 }
 0x3a2   : > { %v4051_v31 = vpop.f32.mrb[6].mxu0  ;;  %v4083_v36 = vpop.f32.mrb[6].mxu1 }
 0x3a3   : > { %v3815_v57 = vpack.c.bf16 %v4051_v31, %v4050_v30  ;;  %v3895_v2 = vpack.c.bf16 %v4083_v36, %v4082_v38  ;;  %v2844_v8 = vpop.f32.mrb[7].mxu0  ;;  %v2972_v24 = vpop.f32.mrb[7].mxu1 }
 0x3a4   : > { %v3810_v42 = vpack.c.bf16 %v2844_v8, %v2841_v49  ;;  %v3890_v60 = vpack.c.bf16 %v2972_v24, %v2969_v26 }
 0x3a5   : > { %3959 = vst [vmem:[%s4894_s6 + $0x18] sm:$0xff] %v3815_v57   ;;  %3975 = vst [vmem:[%s4894_s6 + $0x98] sm:$0xff] %v3895_v2  }
 0x3a6   : > { %3958 = vst [vmem:[%s4894_s6 + $0x10] sm:$0xff] %v3810_v42   ;;  %3974 = vst [vmem:[%s4894_s6 + $0x90] sm:$0xff] %v3890_v60  }
 0x3a8   : > { %v4054_v10 = vpop.f32.mrb[8].mxu0  ;;  %v4086_v17 = vpop.f32.mrb[8].mxu1 }
 0x3a9   : > { %v2857_v29 = vpop.f32.mrb[9].mxu0  ;;  %v2985_v22 = vpop.f32.mrb[9].mxu1 }
 0x3aa   : > { %v4055_v34 = vpop.f32.mrb[10].mxu0  ;;  %v4087_v44 = vpop.f32.mrb[10].mxu1 }
 0x3ab   : > { %v3825_v45 = vpack.c.bf16 %v4055_v34, %v4054_v10  ;;  %v3905_v50 = vpack.c.bf16 %v4087_v44, %v4086_v17  ;;  %v2860_v56 = vpop.f32.mrb[11].mxu0  ;;  %v2988_v15 = vpop.f32.mrb[11].mxu1 }
 0x3ac   : > { %v3820_v35 = vpack.c.bf16 %v2860_v56, %v2857_v29  ;;  %v3900_v40 = vpack.c.bf16 %v2988_v15, %v2985_v22 }
 0x3ad   : > { %3961 = vst [vmem:[%s4894_s6 + $0x28] sm:$0xff] %v3825_v45   ;;  %3977 = vst [vmem:[%s4894_s6 + $0xa8] sm:$0xff] %v3905_v50  }
 0x3ae   : > { %3960 = vst [vmem:[%s4894_s6 + $0x20] sm:$0xff] %v3820_v35   ;;  %3976 = vst [vmem:[%s4894_s6 + $0xa0] sm:$0xff] %v3900_v40  }
 0x3b0   : > { %v4058_v46 = vpop.f32.mrb[12].mxu0  ;;  %v4090_v63 = vpop.f32.mrb[12].mxu1 }
 0x3b1   : > { %v2873_v37 = vpop.f32.mrb[13].mxu0  ;;  %v3001_v3 = vpop.f32.mrb[13].mxu1 }
 0x3b2   : > { %v4059_v51 = vpop.f32.mrb[14].mxu0  ;;  %v4091_v53 = vpop.f32.mrb[14].mxu1 }
 0x3b3   : > { %v3835_v28 = vpack.c.bf16 %v4059_v51, %v4058_v46  ;;  %v3915_v43 = vpack.c.bf16 %v4091_v53, %v4090_v63  ;;  %v2876_v59 = vpop.f32.mrb[15].mxu0  ;;  %v3004_v52 = vpop.f32.mrb[15].mxu1 }
 0x3b4   : > { %v3830_v58 = vpack.c.bf16 %v2876_v59, %v2873_v37  ;;  %v3910_v0 = vpack.c.bf16 %v3004_v52, %v3001_v3 }
 0x3b5   : > { %3963 = vst [vmem:[%s4894_s6 + $0x38] sm:$0xff] %v3835_v28   ;;  %3979 = vst [vmem:[%s4894_s6 + $0xb8] sm:$0xff] %v3915_v43  }
 0x3b6   : > { %3962 = vst [vmem:[%s4894_s6 + $0x30] sm:$0xff] %v3830_v58   ;;  %3978 = vst [vmem:[%s4894_s6 + $0xb0] sm:$0xff] %v3910_v0  }
 0x3b8   : > { %v4062_v19 = vpop.f32.mrb[16].mxu0  ;;  %v4094_v27 = vpop.f32.mrb[16].mxu1 }
 0x3b9   : > { %v2889_v33 = vpop.f32.mrb[17].mxu0  ;;  %v3017_v6 = vpop.f32.mrb[17].mxu1 }
 0x3ba   : > { %v4063_v12 = vpop.f32.mrb[18].mxu0  ;;  %v4095_v18 = vpop.f32.mrb[18].mxu1 }
 0x3bb   : > { %v3845_v1 = vpack.c.bf16 %v4063_v12, %v4062_v19  ;;  %v3925_v9 = vpack.c.bf16 %v4095_v18, %v4094_v27  ;;  %v2892_v25 = vpop.f32.mrb[19].mxu0  ;;  %v3020_v39 = vpop.f32.mrb[19].mxu1 }
 0x3bc   : > { %v3840_v41 = vpack.c.bf16 %v2892_v25, %v2889_v33  ;;  %v3920_v47 = vpack.c.bf16 %v3020_v39, %v3017_v6 }
 0x3bd   : > { %3965 = vst [vmem:[%s4894_s6 + $0x48] sm:$0xff] %v3845_v1   ;;  %3981 = vst [vmem:[%s4894_s6 + $0xc8] sm:$0xff] %v3925_v9  }
 0x3be   : > { %3964 = vst [vmem:[%s4894_s6 + $0x40] sm:$0xff] %v3840_v41   ;;  %3980 = vst [vmem:[%s4894_s6 + $0xc0] sm:$0xff] %v3920_v47  }
 0x3c0   : > { %v4066_v55 = vpop.f32.mrb[20].mxu0  ;;  %v4098_v54 = vpop.f32.mrb[20].mxu1 }
 0x3c1   : > { %v2905_v62 = vpop.f32.mrb[21].mxu0  ;;  %v3033_v16 = vpop.f32.mrb[21].mxu1 }
 0x3c2   : > { %v4067_v23 = vpop.f32.mrb[22].mxu0  ;;  %v4099_v20 = vpop.f32.mrb[22].mxu1 }
 0x3c3   : > { %v3855_v4 = vpack.c.bf16 %v4067_v23, %v4066_v55  ;;  %v3935_v21 = vpack.c.bf16 %v4099_v20, %v4098_v54  ;;  %v2908_v61 = vpop.f32.mrb[23].mxu0  ;;  %v3036_v7 = vpop.f32.mrb[23].mxu1 }
 0x3c4   : > { %v3850_v32 = vpack.c.bf16 %v2908_v61, %v2905_v62  ;;  %v3930_v48 = vpack.c.bf16 %v3036_v7, %v3033_v16 }
 0x3c5   : > { %3967 = vst [vmem:[%s4894_s6 + $0x58] sm:$0xff] %v3855_v4   ;;  %3983 = vst [vmem:[%s4894_s6 + $0xd8] sm:$0xff] %v3935_v21  }
 0x3c6   : > { %3966 = vst [vmem:[%s4894_s6 + $0x50] sm:$0xff] %v3850_v32   ;;  %3982 = vst [vmem:[%s4894_s6 + $0xd0] sm:$0xff] %v3930_v48  }
 0x3c8   : > { %v4070_v5 = vpop.f32.mrb[24].mxu0  ;;  %v4102_v11 = vpop.f32.mrb[24].mxu1 }
 0x3c9   : > { %v2921_v14 = vpop.f32.mrb[25].mxu0  ;;  %v3049_v13 = vpop.f32.mrb[25].mxu1 }
 0x3ca   : > { %v4071_v30 = vpop.f32.mrb[26].mxu0  ;;  %v4103_v38 = vpop.f32.mrb[26].mxu1 }
 0x3cb   : > { %v3865_v49 = vpack.c.bf16 %v4071_v30, %v4070_v5  ;;  %v3945_v26 = vpack.c.bf16 %v4103_v38, %v4102_v11  ;;  %v2924_v31 = vpop.f32.mrb[27].mxu0  ;;  %v3052_v36 = vpop.f32.mrb[27].mxu1 }
 0x3cc   : > { %v3860_v57 = vpack.c.bf16 %v2924_v31, %v2921_v14  ;;  %v3940_v2 = vpack.c.bf16 %v3052_v36, %v3049_v13 }
 0x3cd   : > { %3969 = vst [vmem:[%s4894_s6 + $0x68] sm:$0xff] %v3865_v49   ;;  %3985 = vst [vmem:[%s4894_s6 + $0xe8] sm:$0xff] %v3945_v26  }
 0x3ce   : > { %3968 = vst [vmem:[%s4894_s6 + $0x60] sm:$0xff] %v3860_v57   ;;  %3984 = vst [vmem:[%s4894_s6 + $0xe0] sm:$0xff] %v3940_v2  }
 0x3d0   : > { %v4074_v8 = vpop.f32.mrb[28].mxu0  ;;  %v4106_v24 = vpop.f32.mrb[28].mxu1 }
 0x3d1   : > { %v2937_v42 = vpop.f32.mrb[29].mxu0  ;;  %v3065_v60 = vpop.f32.mrb[29].mxu1 }
 0x3d2   : > { %v4075_v10 = vpop.f32.mrb[30].mxu0  ;;  %v4107_v17 = vpop.f32.mrb[30].mxu1 }
 0x3d3   : > { %v3875_v29 = vpack.c.bf16 %v4075_v10, %v4074_v8  ;;  %v3955_v22 = vpack.c.bf16 %v4107_v17, %v4106_v24  ;;  %v2940_v34 = vpop.f32.mrb[31].mxu0  ;;  %v3068_v44 = vpop.f32.mrb[31].mxu1 }
 0x3d4   : > { %v3870_v45 = vpack.c.bf16 %v2940_v34, %v2937_v42  ;;  %v3950_v50 = vpack.c.bf16 %v3068_v44, %v3065_v60 }
 0x3d5   : > { %3971 = vst [vmem:[%s4894_s6 + $0x78] sm:$0xff] %v3875_v29   ;;  %3987 = vst [vmem:[%s4894_s6 + $0xf8] sm:$0xff] %v3955_v22  }
 0x3d6   : > { %3970 = vst [vmem:[%s4894_s6 + $0x70] sm:$0xff] %v3870_v45   ;;  %3986 = vst [vmem:[%s4894_s6 + $0xf0] sm:$0xff] %v3950_v50  }
 0x3d7 PF: > { %s14_s21 = sadd.s32 1, %s4531_s21   ;;  %s5627_s15 = smov %s4511_s16 }
 0x3d8   : > { %p11_p0 = scmp.ge.s32.totalorder %s14_s21, 6   ;;  %s5628_s16 = smov %s4610_s28 }
 0x3d9   : > { %s5629_s17 = smov %s4523_s19  ;;  %s5630_s18 = smov %s4527_s20 }
 0x3da   : > { %s5631_s19 = smov %s5634_s22  ;;  %s5632_s20 = smov %s5638_s23 }
 0x3db   :  { %13 = sbr.rel (!%p11_p0) target bundleno = 4 (0x4), region = 107 }

// kernel: gcn_forward.5
= control target key start
LH: loop header
LB: loop body
LE: loop exit
PB: predicated region body
PF: predicated region fallthrough
CT: control target
= control target key end

     0   :  { %s3223_s12 = smov 0   ;;  %s3225_s13 = smov 0   ;;  %s4165_s0 = inlined_call_operand.vmem [shape: bf16[1024,1024], index: 0, kind: input, shape index: {}]   ;;  %s4166_s1 = inlined_call_operand.vmem [shape: bf16[1024,128], index: 1, kind: input, shape index: {}]   ;;  %s4167_s2 = inlined_call_operand.vmem [shape: f32[1,128], index: 2, kind: input, shape index: {}]   ;;  %s4168_s3 = inlined_call_operand.vmem [shape: f32[1024,128], index: 3, kind: output, shape index: {}]  }
   0x1   :  { %s3227_s14 = smov 0   ;;  %s3229_s15 = smov 0  }
   0x2   :  { %s3231_s16 = smov 0   ;;  %s3233_s17 = smov 0  }
   0x3   :  { %s3235_s18 = smov 0  }
   0x4 LB: > { %s22_s19 = sadd.s32 1, %s3192_s16  ;;  %s25_s20 = sadd.s32 1, %s3196_s17  ;;  %s3200_s18 = sphi %s3235_s18, %s13_s18   ;;  %s3196_s17 = sphi %s3233_s17, %s4219_s17   ;;  %s3192_s16 = sphi %s3231_s16, %s4218_s16   ;;  %s3188_s15 = sphi %s3229_s15, %s4217_s15   ;;  %s3184_s14 = sphi %s3227_s14, %s4216_s14   ;;  %s3180_s13 = sphi %s3225_s13, %s4215_s13   ;;  %s3176_s12 = sphi %s3223_s12, %s4214_s12  }
   0x5   : > { %p23_p0 = scmp.ge.s32.totalorder %s22_s19, 2  ;;  %p41_p1 = scmp.ne.s32.totalorder %s3180_s13, %s3176_s12 }
   0x6   : > { %p42_p2 = scmp.eq.s32.totalorder %s3200_s18, 0  ;;  %s34_s24 = sadd.s32 1, %s3180_s13 }
   0x7   : > { %s4221_s19 = smov (%p23_p0, %s22_s19), 0  ;;  %s4223_s20 = smov (!%p23_p0, %s25_s20), %s3196_s17 }
   0x8   : > { %p43_p3 = por %p42_p2, %p41_p1  ;;  %p27_p4 = scmp.ge.s32.totalorder %s4223_s20, 2 }
   0x9   : > { %s30_s21 = ssub.s32 %s3192_s16, %s4221_s19  ;;  %p2622_p6 = scmp.ge.s32.totalorder %s3200_s18, 4 }
   0xa   : > { %s4225_s20 = smov (%p27_p4, %s4223_s20), 0 }
   0xb   : > { %s29_s22 = ssub.s32 %s3196_s17, %s4225_s20  ;;  %141 = sbr.rel (%p2622_p6) target bundleno = 89 (0x59), region = 24 }
   0xc   : > { %s31_s23 = sor.u32 %s30_s21, %s29_s22 }
   0xd   : > { %p32_p5 = scmp.eq.s32.totalorder %s31_s23, 0 }
   0xf   : > { %s3274_s25 = scalar_select %p32_p5, %s3180_s13, %s34_s24  }
  0x12   : > { %144 = sbr.rel (!%p43_p3) target bundleno = 89 (0x59), region = 28  ;;  %s146_s26 = sand.u32 (%p43_p3), 1, %s3180_s13  }
  0x13   : > { %s2625_s27 = sshll.u32 (%p43_p3), %s3192_s16, 2  ;;  %s2623_s28 = sshll.u32 (%p43_p3), %s146_s26, 10 }
  0x14   : > { %s2800_s29 = sshll.u32 (%p43_p3), %s3196_s17, 9  ;;  %s3288_s8 = scalar_lea.vmem (%p43_p3), [#allocation3], %s2623_s28 }
  0x15   : > { %s152_s30 = sadd.s32 (%p43_p3), %s2800_s29, %s2625_s27 }
  0x16   : > { %s2627_s4 = sshll.u32 (%p43_p3), %s152_s30, 2 }
  0x17   : > { %s3283_s7 = scalar_lea.vmem (%p43_p3), %s4165_s0, %s2627_s4 }
  0x18   : > { %v167_v0 = vld [vmem:[%s3283_s7] sm:$0xff] (%p43_p3)  ;;  %v169_v1 = vld [vmem:[%s3283_s7 + $0x8] sm:$0xff] (%p43_p3) }
  0x19   : > { %v171_v2 = vld [vmem:[%s3283_s7 + $0x20] sm:$0xff]  ;;  %168 = vst [vmem:[%s3288_s8] sm:$0xff] %v167_v0  ;;  %170 = vst [vmem:[%s3288_s8 + $0x8] sm:$0xff] %v169_v1  ;;  %v173_v3 = vld [vmem:[%s3283_s7 + $0x28] sm:$0xff] }
  0x1a   : > { %172 = vst [vmem:[%s3288_s8 + $0x10] sm:$0xff] %v171_v2  ;;  %v175_v4 = vld [vmem:[%s3283_s7 + $0x40] sm:$0xff]  ;;  %v177_v5 = vld [vmem:[%s3283_s7 + $0x48] sm:$0xff]  ;;  %174 = vst [vmem:[%s3288_s8 + $0x18] sm:$0xff] %v173_v3 }
  0x1b   : > { %176 = vst [vmem:[%s3288_s8 + $0x20] sm:$0xff] %v175_v4  ;;  %178 = vst [vmem:[%s3288_s8 + $0x28] sm:$0xff] %v177_v5  ;;  %v179_v6 = vld [vmem:[%s3283_s7 + $0x60] sm:$0xff]  ;;  %v181_v7 = vld [vmem:[%s3283_s7 + $0x68] sm:$0xff] }
  0x1c   : > { %v183_v8 = vld [vmem:[%s3283_s7 + $0x80] sm:$0xff]  ;;  %180 = vst [vmem:[%s3288_s8 + $0x30] sm:$0xff] %v179_v6  ;;  %182 = vst [vmem:[%s3288_s8 + $0x38] sm:$0xff] %v181_v7  ;;  %v185_v9 = vld [vmem:[%s3283_s7 + $0x88] sm:$0xff] }
  0x1d   : > { %184 = vst [vmem:[%s3288_s8 + $0x40] sm:$0xff] %v183_v8  ;;  %v187_v10 = vld [vmem:[%s3283_s7 + $0xa0] sm:$0xff]  ;;  %v189_v11 = vld [vmem:[%s3283_s7 + $0xa8] sm:$0xff]  ;;  %186 = vst [vmem:[%s3288_s8 + $0x48] sm:$0xff] %v185_v9 }
  0x1e   : > { %188 = vst [vmem:[%s3288_s8 + $0x50] sm:$0xff] %v187_v10  ;;  %190 = vst [vmem:[%s3288_s8 + $0x58] sm:$0xff] %v189_v11  ;;  %v191_v12 = vld [vmem:[%s3283_s7 + $0xc0] sm:$0xff]  ;;  %v193_v13 = vld [vmem:[%s3283_s7 + $0xc8] sm:$0xff] }
  0x1f   : > { %v195_v14 = vld [vmem:[%s3283_s7 + $0xe0] sm:$0xff]  ;;  %192 = vst [vmem:[%s3288_s8 + $0x60] sm:$0xff] %v191_v12  ;;  %194 = vst [vmem:[%s3288_s8 + $0x68] sm:$0xff] %v193_v13  ;;  %v197_v15 = vld [vmem:[%s3283_s7 + $0xe8] sm:$0xff] }
  0x20   : > { %196 = vst [vmem:[%s3288_s8 + $0x70] sm:$0xff] %v195_v14  ;;  %v199_v16 = vld [vmem:[%s3283_s7 + $0x100] sm:$0xff]  ;;  %v201_v17 = vld [vmem:[%s3283_s7 + $0x108] sm:$0xff]  ;;  %198 = vst [vmem:[%s3288_s8 + $0x78] sm:$0xff] %v197_v15 }
  0x21   : > { %200 = vst [vmem:[%s3288_s8 + $0x80] sm:$0xff] %v199_v16  ;;  %202 = vst [vmem:[%s3288_s8 + $0x88] sm:$0xff] %v201_v17  ;;  %v203_v18 = vld [vmem:[%s3283_s7 + $0x120] sm:$0xff]  ;;  %v205_v19 = vld [vmem:[%s3283_s7 + $0x128] sm:$0xff] }
  0x22   : > { %v207_v20 = vld [vmem:[%s3283_s7 + $0x140] sm:$0xff]  ;;  %204 = vst [vmem:[%s3288_s8 + $0x90] sm:$0xff] %v203_v18  ;;  %206 = vst [vmem:[%s3288_s8 + $0x98] sm:$0xff] %v205_v19  ;;  %v209_v21 = vld [vmem:[%s3283_s7 + $0x148] sm:$0xff] }
  0x23   : > { %208 = vst [vmem:[%s3288_s8 + $0xa0] sm:$0xff] %v207_v20  ;;  %v211_v22 = vld [vmem:[%s3283_s7 + $0x160] sm:$0xff]  ;;  %v213_v23 = vld [vmem:[%s3283_s7 + $0x168] sm:$0xff]  ;;  %210 = vst [vmem:[%s3288_s8 + $0xa8] sm:$0xff] %v209_v21 }
  0x24   : > { %212 = vst [vmem:[%s3288_s8 + $0xb0] sm:$0xff] %v211_v22  ;;  %214 = vst [vmem:[%s3288_s8 + $0xb8] sm:$0xff] %v213_v23  ;;  %v215_v24 = vld [vmem:[%s3283_s7 + $0x180] sm:$0xff]  ;;  %v217_v25 = vld [vmem:[%s3283_s7 + $0x188] sm:$0xff] }
  0x25   : > { %v219_v26 = vld [vmem:[%s3283_s7 + $0x1a0] sm:$0xff]  ;;  %216 = vst [vmem:[%s3288_s8 + $0xc0] sm:$0xff] %v215_v24  ;;  %218 = vst [vmem:[%s3288_s8 + $0xc8] sm:$0xff] %v217_v25  ;;  %v221_v27 = vld [vmem:[%s3283_s7 + $0x1a8] sm:$0xff] }
  0x26   : > { %220 = vst [vmem:[%s3288_s8 + $0xd0] sm:$0xff] %v219_v26  ;;  %v223_v28 = vld [vmem:[%s3283_s7 + $0x1c0] sm:$0xff]  ;;  %v225_v29 = vld [vmem:[%s3283_s7 + $0x1c8] sm:$0xff]  ;;  %222 = vst [vmem:[%s3288_s8 + $0xd8] sm:$0xff] %v221_v27 }
  0x27   : > { %224 = vst [vmem:[%s3288_s8 + $0xe0] sm:$0xff] %v223_v28  ;;  %226 = vst [vmem:[%s3288_s8 + $0xe8] sm:$0xff] %v225_v29  ;;  %v227_v30 = vld [vmem:[%s3283_s7 + $0x1e0] sm:$0xff]  ;;  %v229_v31 = vld [vmem:[%s3283_s7 + $0x1e8] sm:$0xff] }
  0x28   : > { %v231_v32 = vld [vmem:[%s3283_s7 + $0x200] sm:$0xff]  ;;  %228 = vst [vmem:[%s3288_s8 + $0xf0] sm:$0xff] %v227_v30  ;;  %230 = vst [vmem:[%s3288_s8 + $0xf8] sm:$0xff] %v229_v31  ;;  %v233_v33 = vld [vmem:[%s3283_s7 + $0x208] sm:$0xff] }
  0x29   : > { %232 = vst [vmem:[%s3288_s8 + $0x100] sm:$0xff] %v231_v32  ;;  %v235_v34 = vld [vmem:[%s3283_s7 + $0x220] sm:$0xff]  ;;  %v237_v35 = vld [vmem:[%s3283_s7 + $0x228] sm:$0xff]  ;;  %234 = vst [vmem:[%s3288_s8 + $0x108] sm:$0xff] %v233_v33 }
  0x2a   : > { %236 = vst [vmem:[%s3288_s8 + $0x110] sm:$0xff] %v235_v34  ;;  %238 = vst [vmem:[%s3288_s8 + $0x118] sm:$0xff] %v237_v35  ;;  %v239_v36 = vld [vmem:[%s3283_s7 + $0x240] sm:$0xff]  ;;  %v241_v37 = vld [vmem:[%s3283_s7 + $0x248] sm:$0xff] }
  0x2b   : > { %v243_v38 = vld [vmem:[%s3283_s7 + $0x260] sm:$0xff]  ;;  %240 = vst [vmem:[%s3288_s8 + $0x120] sm:$0xff] %v239_v36  ;;  %242 = vst [vmem:[%s3288_s8 + $0x128] sm:$0xff] %v241_v37  ;;  %v245_v39 = vld [vmem:[%s3283_s7 + $0x268] sm:$0xff] }
  0x2c   : > { %244 = vst [vmem:[%s3288_s8 + $0x130] sm:$0xff] %v243_v38  ;;  %v247_v40 = vld [vmem:[%s3283_s7 + $0x280] sm:$0xff]  ;;  %v249_v41 = vld [vmem:[%s3283_s7 + $0x288] sm:$0xff]  ;;  %246 = vst [vmem:[%s3288_s8 + $0x138] sm:$0xff] %v245_v39 }
  0x2d   : > { %248 = vst [vmem:[%s3288_s8 + $0x140] sm:$0xff] %v247_v40  ;;  %250 = vst [vmem:[%s3288_s8 + $0x148] sm:$0xff] %v249_v41  ;;  %v251_v42 = vld [vmem:[%s3283_s7 + $0x2a0] sm:$0xff]  ;;  %v253_v43 = vld [vmem:[%s3283_s7 + $0x2a8] sm:$0xff] }
  0x2e   : > { %v255_v44 = vld [vmem:[%s3283_s7 + $0x2c0] sm:$0xff]  ;;  %252 = vst [vmem:[%s3288_s8 + $0x150] sm:$0xff] %v251_v42  ;;  %254 = vst [vmem:[%s3288_s8 + $0x158] sm:$0xff] %v253_v43  ;;  %v257_v45 = vld [vmem:[%s3283_s7 + $0x2c8] sm:$0xff] }
  0x2f   : > { %256 = vst [vmem:[%s3288_s8 + $0x160] sm:$0xff] %v255_v44  ;;  %v259_v46 = vld [vmem:[%s3283_s7 + $0x2e0] sm:$0xff]  ;;  %v261_v47 = vld [vmem:[%s3283_s7 + $0x2e8] sm:$0xff]  ;;  %258 = vst [vmem:[%s3288_s8 + $0x168] sm:$0xff] %v257_v45 }
  0x30   : > { %260 = vst [vmem:[%s3288_s8 + $0x170] sm:$0xff] %v259_v46  ;;  %262 = vst [vmem:[%s3288_s8 + $0x178] sm:$0xff] %v261_v47  ;;  %v263_v48 = vld [vmem:[%s3283_s7 + $0x300] sm:$0xff]  ;;  %v265_v49 = vld [vmem:[%s3283_s7 + $0x308] sm:$0xff] }
  0x31   : > { %v267_v50 = vld [vmem:[%s3283_s7 + $0x320] sm:$0xff]  ;;  %264 = vst [vmem:[%s3288_s8 + $0x180] sm:$0xff] %v263_v48  ;;  %266 = vst [vmem:[%s3288_s8 + $0x188] sm:$0xff] %v265_v49  ;;  %v269_v51 = vld [vmem:[%s3283_s7 + $0x328] sm:$0xff] }
  0x32   : > { %268 = vst [vmem:[%s3288_s8 + $0x190] sm:$0xff] %v267_v50  ;;  %v271_v52 = vld [vmem:[%s3283_s7 + $0x340] sm:$0xff]  ;;  %v273_v53 = vld [vmem:[%s3283_s7 + $0x348] sm:$0xff]  ;;  %270 = vst [vmem:[%s3288_s8 + $0x198] sm:$0xff] %v269_v51 }
  0x33   : > { %272 = vst [vmem:[%s3288_s8 + $0x1a0] sm:$0xff] %v271_v52  ;;  %274 = vst [vmem:[%s3288_s8 + $0x1a8] sm:$0xff] %v273_v53  ;;  %v275_v54 = vld [vmem:[%s3283_s7 + $0x360] sm:$0xff]  ;;  %v277_v55 = vld [vmem:[%s3283_s7 + $0x368] sm:$0xff] }
  0x34   : > { %v279_v56 = vld [vmem:[%s3283_s7 + $0x380] sm:$0xff]  ;;  %276 = vst [vmem:[%s3288_s8 + $0x1b0] sm:$0xff] %v275_v54  ;;  %278 = vst [vmem:[%s3288_s8 + $0x1b8] sm:$0xff] %v277_v55  ;;  %v281_v57 = vld [vmem:[%s3283_s7 + $0x388] sm:$0xff] }
  0x35   : > { %280 = vst [vmem:[%s3288_s8 + $0x1c0] sm:$0xff] %v279_v56  ;;  %v283_v58 = vld [vmem:[%s3283_s7 + $0x3a0] sm:$0xff]  ;;  %v285_v59 = vld [vmem:[%s3283_s7 + $0x3a8] sm:$0xff]  ;;  %282 = vst [vmem:[%s3288_s8 + $0x1c8] sm:$0xff] %v281_v57 }
  0x36   : > { %284 = vst [vmem:[%s3288_s8 + $0x1d0] sm:$0xff] %v283_v58  ;;  %286 = vst [vmem:[%s3288_s8 + $0x1d8] sm:$0xff] %v285_v59  ;;  %v287_v60 = vld [vmem:[%s3283_s7 + $0x3c0] sm:$0xff]  ;;  %v289_v61 = vld [vmem:[%s3283_s7 + $0x3c8] sm:$0xff] }
  0x37   : > { %v291_v62 = vld [vmem:[%s3283_s7 + $0x3e0] sm:$0xff]  ;;  %288 = vst [vmem:[%s3288_s8 + $0x1e0] sm:$0xff] %v287_v60  ;;  %290 = vst [vmem:[%s3288_s8 + $0x1e8] sm:$0xff] %v289_v61  ;;  %v293_v63 = vld [vmem:[%s3283_s7 + $0x3e8] sm:$0xff] }
  0x38   : > { %292 = vst [vmem:[%s3288_s8 + $0x1f0] sm:$0xff] %v291_v62  ;;  %v295_v0 = vld [vmem:[%s3283_s7 + $0x400] sm:$0xff]  ;;  %v297_v1 = vld [vmem:[%s3283_s7 + $0x408] sm:$0xff]  ;;  %294 = vst [vmem:[%s3288_s8 + $0x1f8] sm:$0xff] %v293_v63 }
  0x39   : > { %296 = vst [vmem:[%s3288_s8 + $0x200] sm:$0xff] %v295_v0  ;;  %298 = vst [vmem:[%s3288_s8 + $0x208] sm:$0xff] %v297_v1  ;;  %v299_v2 = vld [vmem:[%s3283_s7 + $0x420] sm:$0xff]  ;;  %v301_v3 = vld [vmem:[%s3283_s7 + $0x428] sm:$0xff] }
  0x3a   : > { %v303_v4 = vld [vmem:[%s3283_s7 + $0x440] sm:$0xff]  ;;  %300 = vst [vmem:[%s3288_s8 + $0x210] sm:$0xff] %v299_v2  ;;  %302 = vst [vmem:[%s3288_s8 + $0x218] sm:$0xff] %v301_v3  ;;  %v305_v5 = vld [vmem:[%s3283_s7 + $0x448] sm:$0xff] }
  0x3b   : > { %304 = vst [vmem:[%s3288_s8 + $0x220] sm:$0xff] %v303_v4  ;;  %v307_v6 = vld [vmem:[%s3283_s7 + $0x460] sm:$0xff]  ;;  %v309_v7 = vld [vmem:[%s3283_s7 + $0x468] sm:$0xff]  ;;  %306 = vst [vmem:[%s3288_s8 + $0x228] sm:$0xff] %v305_v5 }
  0x3c   : > { %308 = vst [vmem:[%s3288_s8 + $0x230] sm:$0xff] %v307_v6  ;;  %310 = vst [vmem:[%s3288_s8 + $0x238] sm:$0xff] %v309_v7  ;;  %v311_v8 = vld [vmem:[%s3283_s7 + $0x480] sm:$0xff]  ;;  %v313_v9 = vld [vmem:[%s3283_s7 + $0x488] sm:$0xff] }
  0x3d   : > { %v315_v10 = vld [vmem:[%s3283_s7 + $0x4a0] sm:$0xff]  ;;  %312 = vst [vmem:[%s3288_s8 + $0x240] sm:$0xff] %v311_v8  ;;  %314 = vst [vmem:[%s3288_s8 + $0x248] sm:$0xff] %v313_v9  ;;  %v317_v11 = vld [vmem:[%s3283_s7 + $0x4a8] sm:$0xff] }
  0x3e   : > { %316 = vst [vmem:[%s3288_s8 + $0x250] sm:$0xff] %v315_v10  ;;  %v319_v12 = vld [vmem:[%s3283_s7 + $0x4c0] sm:$0xff]  ;;  %v321_v13 = vld [vmem:[%s3283_s7 + $0x4c8] sm:$0xff]  ;;  %318 = vst [vmem:[%s3288_s8 + $0x258] sm:$0xff] %v317_v11 }
  0x3f   : > { %320 = vst [vmem:[%s3288_s8 + $0x260] sm:$0xff] %v319_v12  ;;  %322 = vst [vmem:[%s3288_s8 + $0x268] sm:$0xff] %v321_v13  ;;  %v323_v14 = vld [vmem:[%s3283_s7 + $0x4e0] sm:$0xff]  ;;  %v325_v15 = vld [vmem:[%s3283_s7 + $0x4e8] sm:$0xff] }
  0x40   : > { %v327_v16 = vld [vmem:[%s3283_s7 + $0x500] sm:$0xff]  ;;  %324 = vst [vmem:[%s3288_s8 + $0x270] sm:$0xff] %v323_v14  ;;  %326 = vst [vmem:[%s3288_s8 + $0x278] sm:$0xff] %v325_v15  ;;  %v329_v17 = vld [vmem:[%s3283_s7 + $0x508] sm:$0xff] }
  0x41   : > { %328 = vst [vmem:[%s3288_s8 + $0x280] sm:$0xff] %v327_v16  ;;  %v331_v18 = vld [vmem:[%s3283_s7 + $0x520] sm:$0xff]  ;;  %v333_v19 = vld [vmem:[%s3283_s7 + $0x528] sm:$0xff]  ;;  %330 = vst [vmem:[%s3288_s8 + $0x288] sm:$0xff] %v329_v17 }
  0x42   : > { %332 = vst [vmem:[%s3288_s8 + $0x290] sm:$0xff] %v331_v18  ;;  %334 = vst [vmem:[%s3288_s8 + $0x298] sm:$0xff] %v333_v19  ;;  %v335_v20 = vld [vmem:[%s3283_s7 + $0x540] sm:$0xff]  ;;  %v337_v21 = vld [vmem:[%s3283_s7 + $0x548] sm:$0xff] }
  0x43   : > { %v339_v22 = vld [vmem:[%s3283_s7 + $0x560] sm:$0xff]  ;;  %336 = vst [vmem:[%s3288_s8 + $0x2a0] sm:$0xff] %v335_v20  ;;  %338 = vst [vmem:[%s3288_s8 + $0x2a8] sm:$0xff] %v337_v21  ;;  %v341_v23 = vld [vmem:[%s3283_s7 + $0x568] sm:$0xff] }
  0x44   : > { %340 = vst [vmem:[%s3288_s8 + $0x2b0] sm:$0xff] %v339_v22  ;;  %v343_v24 = vld [vmem:[%s3283_s7 + $0x580] sm:$0xff]  ;;  %v345_v25 = vld [vmem:[%s3283_s7 + $0x588] sm:$0xff]  ;;  %342 = vst [vmem:[%s3288_s8 + $0x2b8] sm:$0xff] %v341_v23 }
  0x45   : > { %344 = vst [vmem:[%s3288_s8 + $0x2c0] sm:$0xff] %v343_v24  ;;  %346 = vst [vmem:[%s3288_s8 + $0x2c8] sm:$0xff] %v345_v25  ;;  %v347_v26 = vld [vmem:[%s3283_s7 + $0x5a0] sm:$0xff]  ;;  %v349_v27 = vld [vmem:[%s3283_s7 + $0x5a8] sm:$0xff] }
  0x46   : > { %v351_v28 = vld [vmem:[%s3283_s7 + $0x5c0] sm:$0xff]  ;;  %348 = vst [vmem:[%s3288_s8 + $0x2d0] sm:$0xff] %v347_v26  ;;  %350 = vst [vmem:[%s3288_s8 + $0x2d8] sm:$0xff] %v349_v27  ;;  %v353_v29 = vld [vmem:[%s3283_s7 + $0x5c8] sm:$0xff] }
  0x47   : > { %352 = vst [vmem:[%s3288_s8 + $0x2e0] sm:$0xff] %v351_v28  ;;  %v355_v30 = vld [vmem:[%s3283_s7 + $0x5e0] sm:$0xff]  ;;  %v357_v31 = vld [vmem:[%s3283_s7 + $0x5e8] sm:$0xff]  ;;  %354 = vst [vmem:[%s3288_s8 + $0x2e8] sm:$0xff] %v353_v29 }
  0x48   : > { %356 = vst [vmem:[%s3288_s8 + $0x2f0] sm:$0xff] %v355_v30  ;;  %358 = vst [vmem:[%s3288_s8 + $0x2f8] sm:$0xff] %v357_v31  ;;  %v359_v32 = vld [vmem:[%s3283_s7 + $0x600] sm:$0xff]  ;;  %v361_v33 = vld [vmem:[%s3283_s7 + $0x608] sm:$0xff] }
  0x49   : > { %v363_v34 = vld [vmem:[%s3283_s7 + $0x620] sm:$0xff]  ;;  %360 = vst [vmem:[%s3288_s8 + $0x300] sm:$0xff] %v359_v32  ;;  %362 = vst [vmem:[%s3288_s8 + $0x308] sm:$0xff] %v361_v33  ;;  %v365_v35 = vld [vmem:[%s3283_s7 + $0x628] sm:$0xff] }
  0x4a   : > { %364 = vst [vmem:[%s3288_s8 + $0x310] sm:$0xff] %v363_v34  ;;  %v367_v36 = vld [vmem:[%s3283_s7 + $0x640] sm:$0xff]  ;;  %v369_v37 = vld [vmem:[%s3283_s7 + $0x648] sm:$0xff]  ;;  %366 = vst [vmem:[%s3288_s8 + $0x318] sm:$0xff] %v365_v35 }
  0x4b   : > { %368 = vst [vmem:[%s3288_s8 + $0x320] sm:$0xff] %v367_v36  ;;  %370 = vst [vmem:[%s3288_s8 + $0x328] sm:$0xff] %v369_v37  ;;  %v371_v38 = vld [vmem:[%s3283_s7 + $0x660] sm:$0xff]  ;;  %v373_v39 = vld [vmem:[%s3283_s7 + $0x668] sm:$0xff] }
  0x4c   : > { %v375_v40 = vld [vmem:[%s3283_s7 + $0x680] sm:$0xff]  ;;  %372 = vst [vmem:[%s3288_s8 + $0x330] sm:$0xff] %v371_v38  ;;  %374 = vst [vmem:[%s3288_s8 + $0x338] sm:$0xff] %v373_v39  ;;  %v377_v41 = vld [vmem:[%s3283_s7 + $0x688] sm:$0xff] }
  0x4d   : > { %376 = vst [vmem:[%s3288_s8 + $0x340] sm:$0xff] %v375_v40  ;;  %v379_v42 = vld [vmem:[%s3283_s7 + $0x6a0] sm:$0xff]  ;;  %v381_v43 = vld [vmem:[%s3283_s7 + $0x6a8] sm:$0xff]  ;;  %378 = vst [vmem:[%s3288_s8 + $0x348] sm:$0xff] %v377_v41 }
  0x4e   : > { %380 = vst [vmem:[%s3288_s8 + $0x350] sm:$0xff] %v379_v42  ;;  %382 = vst [vmem:[%s3288_s8 + $0x358] sm:$0xff] %v381_v43  ;;  %v383_v44 = vld [vmem:[%s3283_s7 + $0x6c0] sm:$0xff]  ;;  %v385_v45 = vld [vmem:[%s3283_s7 + $0x6c8] sm:$0xff] }
  0x4f   : > { %v387_v46 = vld [vmem:[%s3283_s7 + $0x6e0] sm:$0xff]  ;;  %384 = vst [vmem:[%s3288_s8 + $0x360] sm:$0xff] %v383_v44  ;;  %386 = vst [vmem:[%s3288_s8 + $0x368] sm:$0xff] %v385_v45  ;;  %v389_v47 = vld [vmem:[%s3283_s7 + $0x6e8] sm:$0xff] }
  0x50   : > { %388 = vst [vmem:[%s3288_s8 + $0x370] sm:$0xff] %v387_v46  ;;  %v391_v48 = vld [vmem:[%s3283_s7 + $0x700] sm:$0xff]  ;;  %v393_v49 = vld [vmem:[%s3283_s7 + $0x708] sm:$0xff]  ;;  %390 = vst [vmem:[%s3288_s8 + $0x378] sm:$0xff] %v389_v47 }
  0x51   : > { %392 = vst [vmem:[%s3288_s8 + $0x380] sm:$0xff] %v391_v48  ;;  %394 = vst [vmem:[%s3288_s8 + $0x388] sm:$0xff] %v393_v49  ;;  %v395_v50 = vld [vmem:[%s3283_s7 + $0x720] sm:$0xff]  ;;  %v397_v51 = vld [vmem:[%s3283_s7 + $0x728] sm:$0xff] }
  0x52   : > { %v399_v52 = vld [vmem:[%s3283_s7 + $0x740] sm:$0xff]  ;;  %396 = vst [vmem:[%s3288_s8 + $0x390] sm:$0xff] %v395_v50  ;;  %398 = vst [vmem:[%s3288_s8 + $0x398] sm:$0xff] %v397_v51  ;;  %v401_v53 = vld [vmem:[%s3283_s7 + $0x748] sm:$0xff] }
  0x53   : > { %400 = vst [vmem:[%s3288_s8 + $0x3a0] sm:$0xff] %v399_v52  ;;  %v403_v54 = vld [vmem:[%s3283_s7 + $0x760] sm:$0xff]  ;;  %v405_v55 = vld [vmem:[%s3283_s7 + $0x768] sm:$0xff]  ;;  %402 = vst [vmem:[%s3288_s8 + $0x3a8] sm:$0xff] %v401_v53 }
  0x54   : > { %404 = vst [vmem:[%s3288_s8 + $0x3b0] sm:$0xff] %v403_v54  ;;  %406 = vst [vmem:[%s3288_s8 + $0x3b8] sm:$0xff] %v405_v55  ;;  %v407_v56 = vld [vmem:[%s3283_s7 + $0x780] sm:$0xff]  ;;  %v409_v57 = vld [vmem:[%s3283_s7 + $0x788] sm:$0xff] }
  0x55   : > { %v411_v58 = vld [vmem:[%s3283_s7 + $0x7a0] sm:$0xff]  ;;  %408 = vst [vmem:[%s3288_s8 + $0x3c0] sm:$0xff] %v407_v56  ;;  %410 = vst [vmem:[%s3288_s8 + $0x3c8] sm:$0xff] %v409_v57  ;;  %v413_v59 = vld [vmem:[%s3283_s7 + $0x7a8] sm:$0xff] }
  0x56   : > { %412 = vst [vmem:[%s3288_s8 + $0x3d0] sm:$0xff] %v411_v58  ;;  %v415_v60 = vld [vmem:[%s3283_s7 + $0x7c0] sm:$0xff]  ;;  %v417_v61 = vld [vmem:[%s3283_s7 + $0x7c8] sm:$0xff]  ;;  %414 = vst [vmem:[%s3288_s8 + $0x3d8] sm:$0xff] %v413_v59 }
  0x57   : > { %416 = vst [vmem:[%s3288_s8 + $0x3e0] sm:$0xff] %v415_v60  ;;  %418 = vst [vmem:[%s3288_s8 + $0x3e8] sm:$0xff] %v417_v61  ;;  %v419_v62 = vld [vmem:[%s3283_s7 + $0x7e0] sm:$0xff]  ;;  %v421_v63 = vld [vmem:[%s3283_s7 + $0x7e8] sm:$0xff] }
  0x58   : > { %420 = vst [vmem:[%s3288_s8 + $0x3f0] sm:$0xff] %v419_v62  ;;  %422 = vst [vmem:[%s3288_s8 + $0x3f8] sm:$0xff] %v421_v63 }
  0x59 PF: > { %p2628_p7 = scmp.ge.s32.totalorder %s3200_s18, 1  ;;  %p427_p8 = scmp.lt.s32.totalorder %s3200_s18, 5 }
  0x5b   : > { %p428_p9 = pnand %p2628_p7, %p427_p8 }
  0x5d   : > { %431 = sbr.rel (%p428_p9) target bundleno = 712 (0x2c8), region = 51 }
  0x64   : > { %s2630_s9 = sshll.u32 %s3188_s15, 6  ;;  %s2632_s10 = sshll.u32 %s3184_s14, 9  ;;  %v3202_v0 = vmov 0  }
  0x65   : > { %p460_p10 = scmp.lt.s32.totalorder %s2630_s9, 127  ;;  %1495 = vmatprep.subr.bf16.mxu1 %v3202_v0  ;;  %1784 = vmatprep.subr.bf16.mxu0 %v3202_v0  ;;  %s467_s11 = sshra.s32 %s2632_s10, 3 }
  0x66   : > { %s2633_s21 = sshll.u32 %s467_s11, 2  ;;  %s434_s29 = sand.u32 1, %s3176_s12  }
  0x67   : > { %s4227_s9 = smov (!%p460_p10, %s2630_s9), 127  ;;  %s3552_s24 = scalar_lea.vmem %s4166_s1, %s2633_s21 }
  0x68   : > { %s2631_s15 = sshll.u32 %s4227_s9, 3  ;;  %v2922_v1 = vld [vmem:[%s3552_s24] sm:$0xff]   ;;  %v2924_v3 = vld [vmem:[%s3552_s24 + $0x8] sm:$0xff]   ;;  %v2926_v5 = vld [vmem:[%s3552_s24 + $0x10] sm:$0xff]   ;;  %s2629_s30 = sshll.u32 %s434_s29, 10 }
  0x69   : > { %s3558_s28 = scalar_lea.vmem %s4168_s3, %s2631_s15  ;;  %v2923_v2 = vld [vmem:[%s3552_s24 + $0x80] sm:$0xff]   ;;  %1496 = vmatpush1.bf16.msra.mxu1 %v2922_v1  ;;  %v2925_v4 = vld [vmem:[%s3552_s24 + $0x88] sm:$0xff]   ;;  %v2927_v6 = vld [vmem:[%s3552_s24 + $0x90] sm:$0xff]   ;;  %s3594_s12 = scalar_lea.vmem [#allocation3], %s2629_s30 }
  0x6a   : > { %1785 = vmatpush1.bf16.msra.mxu0 %v2923_v2  ;;  %1497 = vmatprep.subr.bf16.mxu1 %v3202_v0  ;;  %v2928_v7 = vld [vmem:[%s3552_s24 + $0x18] sm:$0xff]   ;;  %v2930_v9 = vld [vmem:[%s3552_s24 + $0x20] sm:$0xff]   ;;  %v2932_v11 = vld [vmem:[%s3552_s24 + $0x28] sm:$0xff]   ;;  %p2794_p11 = scmp.ne.s32.totalorder %s3184_s14, 0 }
  0x6b   : > { %1786 = vmatprep.subr.bf16.mxu0 %v3202_v0  ;;  %v2929_v8 = vld [vmem:[%s3552_s24 + $0x98] sm:$0xff]   ;;  %v2931_v10 = vld [vmem:[%s3552_s24 + $0xa0] sm:$0xff]   ;;  %v2933_v12 = vld [vmem:[%s3552_s24 + $0xa8] sm:$0xff]  }
  0x6c   : > { %v2934_v13 = vld [vmem:[%s3552_s24 + $0x30] sm:$0xff]   ;;  %v2936_v15 = vld [vmem:[%s3552_s24 + $0x38] sm:$0xff]   ;;  %v2938_v17 = vld [vmem:[%s3552_s24 + $0x40] sm:$0xff]  }
  0x6d   : > { %1498 = vmatpush1.bf16.msra.mxu1 %v2924_v3  ;;  %v2935_v14 = vld [vmem:[%s3552_s24 + $0xb0] sm:$0xff]   ;;  %v2937_v16 = vld [vmem:[%s3552_s24 + $0xb8] sm:$0xff]   ;;  %v2939_v18 = vld [vmem:[%s3552_s24 + $0xc0] sm:$0xff]  }
  0x6e   : > { %1787 = vmatpush1.bf16.msra.mxu0 %v2925_v4  ;;  %1499 = vmatprep.subr.bf16.mxu1 %v3202_v0  ;;  %v2956_v19 = vld [vmem:[%s3594_s12 + $0x4] ss:$16 sps:$4 sm:$0xff]   ;;  %v2940_v20 = vld [vmem:[%s3552_s24 + $0x48] sm:$0xff]   ;;  %v2944_v25 = vld [vmem:[%s3552_s24 + $0x58] sm:$0xff]  }
  0x6f   : > { %1788 = vmatprep.subr.bf16.mxu0 %v3202_v0  ;;  %v2959_v21 = vld [vmem:[%s3594_s12 + $0xc] ss:$16 sps:$4 sm:$0xff]   ;;  %1527 = vmatprep.mubr.bf16.mxu1 %v2956_v19  ;;  %v2942_v23 = vld [vmem:[%s3552_s24 + $0x50] sm:$0xff]   ;;  %v2946_v27 = vld [vmem:[%s3552_s24 + $0x60] sm:$0xff]  }
  0x70   : > { %v2941_v22 = vld [vmem:[%s3552_s24 + $0xc8] sm:$0xff]   ;;  %1816 = vmatprep.mubr.bf16.mxu0 %v2959_v21  ;;  %v2943_v24 = vld [vmem:[%s3552_s24 + $0xd0] sm:$0xff]   ;;  %v2945_v26 = vld [vmem:[%s3552_s24 + $0xd8] sm:$0xff]  }
  0x71   : > { %1500 = vmatpush1.bf16.msra.mxu1 %v2926_v5  ;;  %v2947_v28 = vld [vmem:[%s3552_s24 + $0xe0] sm:$0xff]   ;;  %v2948_v29 = vld [vmem:[%s3552_s24 + $0x68] sm:$0xff]   ;;  %v2950_v31 = vld [vmem:[%s3552_s24 + $0x70] sm:$0xff]  }
  0x72   : > { %1789 = vmatpush1.bf16.msra.mxu0 %v2927_v6  ;;  %1501 = vmatprep.subr.bf16.mxu1 %v3202_v0  ;;  %v2949_v30 = vld [vmem:[%s3552_s24 + $0xe8] sm:$0xff]   ;;  %v2951_v32 = vld [vmem:[%s3552_s24 + $0xf0] sm:$0xff]   ;;  %v2952_v33 = vld [vmem:[%s3552_s24 + $0x78] sm:$0xff]  }
  0x73   : > { %1790 = vmatprep.subr.bf16.mxu0 %v3202_v0  ;;  %v2953_v34 = vld [vmem:[%s3552_s24 + $0xf8] sm:$0xff]   ;;  %v2954_v35 = vld [vmem:[%s3594_s12] ss:$16 sps:$4 sm:$0xff]   ;;  %v2960_v37 = vld [vmem:[%s3594_s12 + $0x24] ss:$16 sps:$4 sm:$0xff]  }
  0x74   : > { %v2957_v36 = vld [vmem:[%s3594_s12 + $0x8] ss:$16 sps:$4 sm:$0xff]   ;;  %v2962_v38 = vld [vmem:[%s3594_s12 + $0x2c] ss:$16 sps:$4 sm:$0xff]   ;;  %v2964_v39 = vld [vmem:[%s3594_s12 + $0x20] ss:$16 sps:$4 sm:$0xff]  }
  0x75   : > { %1502 = vmatpush1.bf16.msra.mxu1 %v2928_v7  ;;  %v2965_v40 = vld [vmem:[%s3594_s12 + $0x28] ss:$16 sps:$4 sm:$0xff]   ;;  %v2966_v41 = vld [vmem:[%s3594_s12 + $0x44] ss:$16 sps:$4 sm:$0xff]   ;;  %v2968_v42 = vld [vmem:[%s3594_s12 + $0x4c] ss:$16 sps:$4 sm:$0xff]  }
  0x76   : > { %1791 = vmatpush1.bf16.msra.mxu0 %v2929_v8  ;;  %1503 = vmatprep.subr.bf16.mxu1 %v3202_v0  ;;  %v2970_v43 = vld [vmem:[%s3594_s12 + $0x40] ss:$16 sps:$4 sm:$0xff]   ;;  %v2971_v44 = vld [vmem:[%s3594_s12 + $0x48] ss:$16 sps:$4 sm:$0xff]   ;;  %v2972_v45 = vld [vmem:[%s3594_s12 + $0x64] ss:$16 sps:$4 sm:$0xff]  }
  0x77   : > { %1792 = vmatprep.subr.bf16.mxu0 %v3202_v0  ;;  %v2974_v46 = vld [vmem:[%s3594_s12 + $0x6c] ss:$16 sps:$4 sm:$0xff]   ;;  %v2976_v47 = vld [vmem:[%s3594_s12 + $0x60] ss:$16 sps:$4 sm:$0xff]   ;;  %v2977_v48 = vld [vmem:[%s3594_s12 + $0x68] ss:$16 sps:$4 sm:$0xff]  }
  0x78   : > { %v2978_v49 = vld [vmem:[%s3594_s12 + $0x84] ss:$16 sps:$4 sm:$0xff]   ;;  %v2980_v50 = vld [vmem:[%s3594_s12 + $0x8c] ss:$16 sps:$4 sm:$0xff]   ;;  %v2982_v51 = vld [vmem:[%s3594_s12 + $0x80] ss:$16 sps:$4 sm:$0xff]  }
  0x79   : > { %1504 = vmatpush1.bf16.msra.mxu1 %v2930_v9  ;;  %v2983_v52 = vld [vmem:[%s3594_s12 + $0x88] ss:$16 sps:$4 sm:$0xff]   ;;  %v2984_v53 = vld [vmem:[%s3594_s12 + $0xa4] ss:$16 sps:$4 sm:$0xff]   ;;  %v2986_v54 = vld [vmem:[%s3594_s12 + $0xac] ss:$16 sps:$4 sm:$0xff]  }
  0x7a   : > { %1793 = vmatpush1.bf16.msra.mxu0 %v2931_v10  ;;  %1505 = vmatprep.subr.bf16.mxu1 %v3202_v0  ;;  %v2988_v55 = vld [vmem:[%s3594_s12 + $0xa0] ss:$16 sps:$4 sm:$0xff]   ;;  %v2989_v56 = vld [vmem:[%s3594_s12 + $0xa8] ss:$16 sps:$4 sm:$0xff]   ;;  %v2990_v57 = vld [vmem:[%s3594_s12 + $0xc4] ss:$16 sps:$4 sm:$0xff]  }
  0x7b   : > { %1794 = vmatprep.subr.bf16.mxu0 %v3202_v0  ;;  %v2992_v58 = vld [vmem:[%s3594_s12 + $0xcc] ss:$16 sps:$4 sm:$0xff]   ;;  %v2994_v59 = vld [vmem:[%s3594_s12 + $0xc0] ss:$16 sps:$4 sm:$0xff]   ;;  %v2995_v60 = vld [vmem:[%s3594_s12 + $0xc8] ss:$16 sps:$4 sm:$0xff]  }
  0x7c   : > { %v2996_v61 = vld [vmem:[%s3594_s12 + $0xe4] ss:$16 sps:$4 sm:$0xff]   ;;  %v2998_v62 = vld [vmem:[%s3594_s12 + $0xec] ss:$16 sps:$4 sm:$0xff]   ;;  %v3000_v63 = vld [vmem:[%s3594_s12 + $0xe0] ss:$16 sps:$4 sm:$0xff]  }
  0x7d   : > { %1506 = vmatpush1.bf16.msra.mxu1 %v2932_v11  ;;  %v3002_v1 = vld [vmem:[%s3594_s12 + $0x104] ss:$16 sps:$4 sm:$0xff]   ;;  %v3004_v2 = vld [vmem:[%s3594_s12 + $0x10c] ss:$16 sps:$4 sm:$0xff]   ;;  %v3006_v3 = vld [vmem:[%s3594_s12 + $0x100] ss:$16 sps:$4 sm:$0xff]  }
  0x7e   : > { %1795 = vmatpush1.bf16.msra.mxu0 %v2933_v12  ;;  %1507 = vmatprep.subr.bf16.mxu1 %v3202_v0  ;;  %v3007_v4 = vld [vmem:[%s3594_s12 + $0x108] ss:$16 sps:$4 sm:$0xff]   ;;  %v3008_v5 = vld [vmem:[%s3594_s12 + $0x124] ss:$16 sps:$4 sm:$0xff]   ;;  %v3010_v6 = vld [vmem:[%s3594_s12 + $0x12c] ss:$16 sps:$4 sm:$0xff]  }
  0x7f   : > { %1796 = vmatprep.subr.bf16.mxu0 %v3202_v0  ;;  %v3012_v7 = vld [vmem:[%s3594_s12 + $0x120] ss:$16 sps:$4 sm:$0xff]   ;;  %v3013_v8 = vld [vmem:[%s3594_s12 + $0x128] ss:$16 sps:$4 sm:$0xff]   ;;  %v3014_v9 = vld [vmem:[%s3594_s12 + $0x144] ss:$16 sps:$4 sm:$0xff]  }
  0x80   : > { %v3016_v10 = vld [vmem:[%s3594_s12 + $0x14c] ss:$16 sps:$4 sm:$0xff]   ;;  %v3018_v11 = vld [vmem:[%s3594_s12 + $0x140] ss:$16 sps:$4 sm:$0xff]   ;;  %v3019_v12 = vld [vmem:[%s3594_s12 + $0x148] ss:$16 sps:$4 sm:$0xff]  }
  0x81   : > { %1508 = vmatpush1.bf16.msra.mxu1 %v2934_v13  ;;  %v3020_v13 = vld [vmem:[%s3594_s12 + $0x164] ss:$16 sps:$4 sm:$0xff]   ;;  %v3030_v19 = vld [vmem:[%s3594_s12 + $0x180] ss:$16 sps:$4 sm:$0xff]  }
  0x82   : > { %1797 = vmatpush1.bf16.msra.mxu0 %v2935_v14  ;;  %1509 = vmatprep.subr.bf16.mxu1 %v3202_v0  ;;  %v3022_v14 = vld [vmem:[%s3594_s12 + $0x16c] ss:$16 sps:$4 sm:$0xff]   ;;  %v3032_v21 = vld [vmem:[%s3594_s12 + $0x1a4] ss:$16 sps:$4 sm:$0xff]  }
  0x83   : > { %1798 = vmatprep.subr.bf16.mxu0 %v3202_v0 }
  0x85   : > { %1510 = vmatpush1.bf16.msra.mxu1 %v2936_v15  ;;  %v3024_v15 = vld [vmem:[%s3594_s12 + $0x160] ss:$16 sps:$4 sm:$0xff]  }
  0x86   : > { %1799 = vmatpush1.bf16.msra.mxu0 %v2937_v16  ;;  %1511 = vmatprep.subr.bf16.mxu1 %v3202_v0  ;;  %v3025_v16 = vld [vmem:[%s3594_s12 + $0x168] ss:$16 sps:$4 sm:$0xff]  }
  0x87   : > { %1800 = vmatprep.subr.bf16.mxu0 %v3202_v0 }
  0x89   : > { %1512 = vmatpush1.bf16.msra.mxu1 %v2938_v17  ;;  %v3026_v17 = vld [vmem:[%s3594_s12 + $0x184] ss:$16 sps:$4 sm:$0xff]  }
  0x8a   : > { %1801 = vmatpush1.bf16.msra.mxu0 %v2939_v18  ;;  %1513 = vmatprep.subr.bf16.mxu1 %v3202_v0  ;;  %v3028_v18 = vld [vmem:[%s3594_s12 + $0x18c] ss:$16 sps:$4 sm:$0xff]  }
  0x8b   : > { %1802 = vmatprep.subr.bf16.mxu0 %v3202_v0 }
  0x8d   : > { %1514 = vmatpush1.bf16.msra.mxu1 %v2940_v20  ;;  %v3031_v20 = vld [vmem:[%s3594_s12 + $0x188] ss:$16 sps:$4 sm:$0xff]  }
  0x8e   : > { %1803 = vmatpush1.bf16.msra.mxu0 %v2941_v22  ;;  %1515 = vmatprep.subr.bf16.mxu1 %v3202_v0  ;;  %v3034_v22 = vld [vmem:[%s3594_s12 + $0x1ac] ss:$16 sps:$4 sm:$0xff]  }
  0x8f   : > { %1804 = vmatprep.subr.bf16.mxu0 %v3202_v0 }
  0x91   : > { %1516 = vmatpush1.bf16.msra.mxu1 %v2942_v23  ;;  %v3036_v23 = vld [vmem:[%s3594_s12 + $0x1a0] ss:$16 sps:$4 sm:$0xff]  }
  0x92   : > { %1805 = vmatpush1.bf16.msra.mxu0 %v2943_v24  ;;  %1517 = vmatprep.subr.bf16.mxu1 %v3202_v0  ;;  %v3037_v24 = vld [vmem:[%s3594_s12 + $0x1a8] ss:$16 sps:$4 sm:$0xff]  }
  0x93   : > { %1806 = vmatprep.subr.bf16.mxu0 %v3202_v0 }
  0x95   : > { %1518 = vmatpush1.bf16.msra.mxu1 %v2944_v25  ;;  %v3038_v25 = vld [vmem:[%s3594_s12 + $0x1c4] ss:$16 sps:$4 sm:$0xff]  }
  0x96   : > { %1807 = vmatpush1.bf16.msra.mxu0 %v2945_v26  ;;  %1519 = vmatprep.subr.bf16.mxu1 %v3202_v0  ;;  %v3040_v26 = vld [vmem:[%s3594_s12 + $0x1cc] ss:$16 sps:$4 sm:$0xff]  }
  0x97   : > { %1808 = vmatprep.subr.bf16.mxu0 %v3202_v0 }
  0x99   : > { %1520 = vmatpush1.bf16.msra.mxu1 %v2946_v27  ;;  %v3042_v27 = vld [vmem:[%s3594_s12 + $0x1c0] ss:$16 sps:$4 sm:$0xff]  }
  0x9a   : > { %1809 = vmatpush1.bf16.msra.mxu0 %v2947_v28  ;;  %1521 = vmatprep.subr.bf16.mxu1 %v3202_v0  ;;  %v3043_v28 = vld [vmem:[%s3594_s12 + $0x1c8] ss:$16 sps:$4 sm:$0xff]  }
  0x9b   : > { %1810 = vmatprep.subr.bf16.mxu0 %v3202_v0 }
  0x9d   : > { %1522 = vmatpush1.bf16.msra.mxu1 %v2948_v29  ;;  %v3044_v29 = vld [vmem:[%s3594_s12 + $0x1e4] ss:$16 sps:$4 sm:$0xff]  }
  0x9e   : > { %1811 = vmatpush1.bf16.msra.mxu0 %v2949_v30  ;;  %1523 = vmatprep.subr.bf16.mxu1 %v3202_v0  ;;  %v3046_v30 = vld [vmem:[%s3594_s12 + $0x1ec] ss:$16 sps:$4 sm:$0xff]  }
  0x9f   : > { %1812 = vmatprep.subr.bf16.mxu0 %v3202_v0 }
  0xa1   : > { %1524 = vmatpush1.bf16.msra.mxu1 %v2950_v31  ;;  %v3048_v31 = vld [vmem:[%s3594_s12 + $0x1e0] ss:$16 sps:$4 sm:$0xff]  }
  0xa2   : > { %1813 = vmatpush1.bf16.msra.mxu0 %v2951_v32  ;;  %1525 = vmatprep.subr.bf16.mxu1 %v3202_v0  ;;  %v3049_v32 = vld [vmem:[%s3594_s12 + $0x1e8] ss:$16 sps:$4 sm:$0xff]  }
  0xa3   : > { %1814 = vmatprep.subr.bf16.mxu0 %v3202_v0  ;;  %v3001_v0 = vld [vmem:[%s3594_s12 + $0xe8] ss:$16 sps:$4 sm:$0xff]  }
  0xa5   : > { %1526 = vmatpush1.bf16.msra.mxu1 %v2952_v33  ;;  %v3050_v33 = vld [vmem:[%s3594_s12 + $0x204] ss:$16 sps:$4 sm:$0xff]  }
  0xa6   : > { %1815 = vmatpush1.bf16.msra.mxu0 %v2953_v34  ;;  %v3052_v34 = vld [vmem:[%s3594_s12 + $0x20c] ss:$16 sps:$4 sm:$0xff]  }
  0xa8   : > { %1528 = vmatmul.mubr.bf16.vlgmr.msra.gmra.mrb[0].mxu1 %v2954_v35  ;;  %v3054_v35 = vld [vmem:[%s3594_s12 + $0x200] ss:$16 sps:$4 sm:$0xff]  }
  0xa9   : > { %1817 = vmatmul.mubr.bf16.vlgmr.msra.gmra.mrb[0].mxu0 %v2957_v36  ;;  %1535 = vmatprep.mubr.bf16.mxu1 %v2960_v37  ;;  %v3055_v36 = vld [vmem:[%s3594_s12 + $0x208] ss:$16 sps:$4 sm:$0xff]   ;;  %v3056_v37 = vld [vmem:[%s3594_s12 + $0x224] ss:$16 sps:$4 sm:$0xff]  }
  0xaa   : > { %1824 = vmatprep.mubr.bf16.mxu0 %v2962_v38  ;;  %v3058_v38 = vld [vmem:[%s3594_s12 + $0x22c] ss:$16 sps:$4 sm:$0xff]  }
  0xb0   : > { %1536 = vmatmul.mubr.bf16.gmra.mrb[4].mxu1 %v2964_v39  ;;  %v3060_v39 = vld [vmem:[%s3594_s12 + $0x220] ss:$16 sps:$4 sm:$0xff]  }
  0xb1   : > { %1825 = vmatmul.mubr.bf16.gmra.mrb[4].mxu0 %v2965_v40  ;;  %1543 = vmatprep.mubr.bf16.mxu1 %v2966_v41  ;;  %v3061_v40 = vld [vmem:[%s3594_s12 + $0x228] ss:$16 sps:$4 sm:$0xff]   ;;  %v3062_v41 = vld [vmem:[%s3594_s12 + $0x244] ss:$16 sps:$4 sm:$0xff]  }
  0xb2   : > { %1832 = vmatprep.mubr.bf16.mxu0 %v2968_v42  ;;  %v3064_v42 = vld [vmem:[%s3594_s12 + $0x24c] ss:$16 sps:$4 sm:$0xff]  }
  0xb8   : > { %1544 = vmatmul.mubr.bf16.gmra.mrb[8].mxu1 %v2970_v43  ;;  %v3066_v43 = vld [vmem:[%s3594_s12 + $0x240] ss:$16 sps:$4 sm:$0xff]  }
  0xb9   : > { %1833 = vmatmul.mubr.bf16.gmra.mrb[8].mxu0 %v2971_v44  ;;  %1551 = vmatprep.mubr.bf16.mxu1 %v2972_v45  ;;  %v3067_v44 = vld [vmem:[%s3594_s12 + $0x248] ss:$16 sps:$4 sm:$0xff]   ;;  %v3068_v45 = vld [vmem:[%s3594_s12 + $0x264] ss:$16 sps:$4 sm:$0xff]  }
  0xba   : > { %1840 = vmatprep.mubr.bf16.mxu0 %v2974_v46  ;;  %v3070_v46 = vld [vmem:[%s3594_s12 + $0x26c] ss:$16 sps:$4 sm:$0xff]  }
  0xc0   : > { %1552 = vmatmul.mubr.bf16.gmra.mrb[12].mxu1 %v2976_v47  ;;  %v3072_v47 = vld [vmem:[%s3594_s12 + $0x260] ss:$16 sps:$4 sm:$0xff]  }
  0xc1   : > { %1841 = vmatmul.mubr.bf16.gmra.mrb[12].mxu0 %v2977_v48  ;;  %1559 = vmatprep.mubr.bf16.mxu1 %v2978_v49  ;;  %v3073_v48 = vld [vmem:[%s3594_s12 + $0x268] ss:$16 sps:$4 sm:$0xff]   ;;  %v3074_v49 = vld [vmem:[%s3594_s12 + $0x284] ss:$16 sps:$4 sm:$0xff]  }
  0xc2   : > { %1848 = vmatprep.mubr.bf16.mxu0 %v2980_v50  ;;  %v3076_v50 = vld [vmem:[%s3594_s12 + $0x28c] ss:$16 sps:$4 sm:$0xff]  }
  0xc8   : > { %1560 = vmatmul.mubr.bf16.gmra.mrb[16].mxu1 %v2982_v51  ;;  %v3078_v51 = vld [vmem:[%s3594_s12 + $0x280] ss:$16 sps:$4 sm:$0xff]  }
  0xc9   : > { %1849 = vmatmul.mubr.bf16.gmra.mrb[16].mxu0 %v2983_v52  ;;  %1567 = vmatprep.mubr.bf16.mxu1 %v2984_v53  ;;  %v3079_v52 = vld [vmem:[%s3594_s12 + $0x288] ss:$16 sps:$4 sm:$0xff]   ;;  %v3080_v53 = vld [vmem:[%s3594_s12 + $0x2a4] ss:$16 sps:$4 sm:$0xff]  }
  0xca   : > { %1856 = vmatprep.mubr.bf16.mxu0 %v2986_v54  ;;  %v3082_v54 = vld [vmem:[%s3594_s12 + $0x2ac] ss:$16 sps:$4 sm:$0xff]  }
  0xd0   : > { %1568 = vmatmul.mubr.bf16.gmra.mrb[20].mxu1 %v2988_v55  ;;  %v3084_v55 = vld [vmem:[%s3594_s12 + $0x2a0] ss:$16 sps:$4 sm:$0xff]  }
  0xd1   : > { %1857 = vmatmul.mubr.bf16.gmra.mrb[20].mxu0 %v2989_v56  ;;  %1575 = vmatprep.mubr.bf16.mxu1 %v2990_v57  ;;  %v3085_v56 = vld [vmem:[%s3594_s12 + $0x2a8] ss:$16 sps:$4 sm:$0xff]   ;;  %v3086_v57 = vld [vmem:[%s3594_s12 + $0x2c4] ss:$16 sps:$4 sm:$0xff]  }
  0xd2   : > { %1864 = vmatprep.mubr.bf16.mxu0 %v2992_v58  ;;  %v3088_v58 = vld [vmem:[%s3594_s12 + $0x2cc] ss:$16 sps:$4 sm:$0xff]  }
  0xd8   : > { %1576 = vmatmul.mubr.bf16.gmra.mrb[24].mxu1 %v2994_v59  ;;  %v3090_v59 = vld [vmem:[%s3594_s12 + $0x2c0] ss:$16 sps:$4 sm:$0xff]  }
  0xd9   : > { %1865 = vmatmul.mubr.bf16.gmra.mrb[24].mxu0 %v2995_v60  ;;  %1583 = vmatprep.mubr.bf16.mxu1 %v2996_v61  ;;  %v3091_v60 = vld [vmem:[%s3594_s12 + $0x2c8] ss:$16 sps:$4 sm:$0xff]   ;;  %v3092_v61 = vld [vmem:[%s3594_s12 + $0x2e4] ss:$16 sps:$4 sm:$0xff]  }
  0xda   : > { %1872 = vmatprep.mubr.bf16.mxu0 %v2998_v62  ;;  %v3094_v62 = vld [vmem:[%s3594_s12 + $0x2ec] ss:$16 sps:$4 sm:$0xff]  }
  0xe0   : > { %1584 = vmatmul.mubr.bf16.gmra.mrb[28].mxu1 %v3000_v63  ;;  %v3096_v63 = vld [vmem:[%s3594_s12 + $0x2e0] ss:$16 sps:$4 sm:$0xff]  }
  0xe1   : > { %1873 = vmatmul.mubr.bf16.gmra.mrb[28].mxu0 %v3001_v0  ;;  %1591 = vmatprep.mubr.bf16.mxu1 %v3002_v1  ;;  %v3097_v0 = vld [vmem:[%s3594_s12 + $0x2e8] ss:$16 sps:$4 sm:$0xff]   ;;  %v3098_v1 = vld [vmem:[%s3594_s12 + $0x304] ss:$16 sps:$4 sm:$0xff]  }
  0xe2   : > { %1880 = vmatprep.mubr.bf16.mxu0 %v3004_v2  ;;  %v3100_v2 = vld [vmem:[%s3594_s12 + $0x30c] ss:$16 sps:$4 sm:$0xff]  }
  0xe8   : > { %1592 = vmatmul.mubr.bf16.gmra.mrb[32].mxu1 %v3006_v3  ;;  %v3102_v3 = vld [vmem:[%s3594_s12 + $0x300] ss:$16 sps:$4 sm:$0xff]  }
  0xe9   : > { %1881 = vmatmul.mubr.bf16.gmra.mrb[32].mxu0 %v3007_v4  ;;  %1599 = vmatprep.mubr.bf16.mxu1 %v3008_v5  ;;  %v3103_v4 = vld [vmem:[%s3594_s12 + $0x308] ss:$16 sps:$4 sm:$0xff]   ;;  %v3104_v5 = vld [vmem:[%s3594_s12 + $0x324] ss:$16 sps:$4 sm:$0xff]  }
  0xea   : > { %1888 = vmatprep.mubr.bf16.mxu0 %v3010_v6  ;;  %v3106_v6 = vld [vmem:[%s3594_s12 + $0x32c] ss:$16 sps:$4 sm:$0xff]  }
  0xf0   : > { %1600 = vmatmul.mubr.bf16.gmra.mrb[36].mxu1 %v3012_v7  ;;  %v3108_v7 = vld [vmem:[%s3594_s12 + $0x320] ss:$16 sps:$4 sm:$0xff]  }
  0xf1   : > { %1889 = vmatmul.mubr.bf16.gmra.mrb[36].mxu0 %v3013_v8  ;;  %1607 = vmatprep.mubr.bf16.mxu1 %v3014_v9  ;;  %v3109_v8 = vld [vmem:[%s3594_s12 + $0x328] ss:$16 sps:$4 sm:$0xff]   ;;  %v3110_v9 = vld [vmem:[%s3594_s12 + $0x344] ss:$16 sps:$4 sm:$0xff]  }
  0xf2   : > { %1896 = vmatprep.mubr.bf16.mxu0 %v3016_v10  ;;  %v3112_v10 = vld [vmem:[%s3594_s12 + $0x34c] ss:$16 sps:$4 sm:$0xff]  }
  0xf8   : > { %1608 = vmatmul.mubr.bf16.gmra.mrb[40].mxu1 %v3018_v11  ;;  %v3114_v11 = vld [vmem:[%s3594_s12 + $0x340] ss:$16 sps:$4 sm:$0xff]  }
  0xf9   : > { %1897 = vmatmul.mubr.bf16.gmra.mrb[40].mxu0 %v3019_v12  ;;  %1615 = vmatprep.mubr.bf16.mxu1 %v3020_v13  ;;  %v3115_v12 = vld [vmem:[%s3594_s12 + $0x348] ss:$16 sps:$4 sm:$0xff]   ;;  %v3116_v13 = vld [vmem:[%s3594_s12 + $0x364] ss:$16 sps:$4 sm:$0xff]  }
  0xfa   : > { %1904 = vmatprep.mubr.bf16.mxu0 %v3022_v14  ;;  %v3118_v14 = vld [vmem:[%s3594_s12 + $0x36c] ss:$16 sps:$4 sm:$0xff]  }
 0x100   : > { %1616 = vmatmul.mubr.bf16.gmra.mrb[44].mxu1 %v3024_v15 }
 0x101   : > { %1905 = vmatmul.mubr.bf16.gmra.mrb[44].mxu0 %v3025_v16  ;;  %1623 = vmatprep.mubr.bf16.mxu1 %v3026_v17 }
 0x102   : > { %1912 = vmatprep.mubr.bf16.mxu0 %v3028_v18  ;;  %v3120_v18 = vld [vmem:[%s3594_s12 + $0x360] ss:$16 sps:$4 sm:$0xff]  }
 0x108   : > { %1624 = vmatmul.mubr.bf16.gmra.mrb[48].mxu1 %v3030_v19 }
 0x109   : > { %1913 = vmatmul.mubr.bf16.gmra.mrb[48].mxu0 %v3031_v20  ;;  %1631 = vmatprep.mubr.bf16.mxu1 %v3032_v21 }
 0x10a   : > { %1920 = vmatprep.mubr.bf16.mxu0 %v3034_v22  ;;  %v3121_v22 = vld [vmem:[%s3594_s12 + $0x368] ss:$16 sps:$4 sm:$0xff]  }
 0x110   : > { %1632 = vmatmul.mubr.bf16.gmra.mrb[52].mxu1 %v3036_v23  ;;  %v3122_v23 = vld [vmem:[%s3594_s12 + $0x384] ss:$16 sps:$4 sm:$0xff]  }
 0x111   : > { %1921 = vmatmul.mubr.bf16.gmra.mrb[52].mxu0 %v3037_v24  ;;  %1639 = vmatprep.mubr.bf16.mxu1 %v3038_v25 }
 0x112   : > { %1928 = vmatprep.mubr.bf16.mxu0 %v3040_v26  ;;  %v3124_v26 = vld [vmem:[%s3594_s12 + $0x38c] ss:$16 sps:$4 sm:$0xff]  }
 0x118   : > { %1640 = vmatmul.mubr.bf16.gmra.mrb[56].mxu1 %v3042_v27 }
 0x119   : > { %1929 = vmatmul.mubr.bf16.gmra.mrb[56].mxu0 %v3043_v28  ;;  %1647 = vmatprep.mubr.bf16.mxu1 %v3044_v29 }
 0x11a   : > { %1936 = vmatprep.mubr.bf16.mxu0 %v3046_v30 }
 0x120   : > { %1648 = vmatmul.mubr.bf16.gmra.mrb[60].mxu1 %v3048_v31 }
 0x121   : > { %1937 = vmatmul.mubr.bf16.gmra.mrb[60].mxu0 %v3049_v32  ;;  %1655 = vmatprep.mubr.bf16.mxu1 %v3050_v33  ;;  %v3126_v32 = vld [vmem:[%s3594_s12 + $0x380] ss:$16 sps:$4 sm:$0xff]  }
 0x122   : > { %1944 = vmatprep.mubr.bf16.mxu0 %v3052_v34 }
 0x128   : > { %1656 = vmatmul.mubr.bf16.gmra.mrb[64].mxu1 %v3054_v35 }
 0x129   : > { %1945 = vmatmul.mubr.bf16.gmra.mrb[64].mxu0 %v3055_v36  ;;  %1663 = vmatprep.mubr.bf16.mxu1 %v3056_v37  ;;  %v3127_v36 = vld [vmem:[%s3594_s12 + $0x388] ss:$16 sps:$4 sm:$0xff]   ;;  %v3128_v37 = vld [vmem:[%s3594_s12 + $0x3a4] ss:$16 sps:$4 sm:$0xff]  }
 0x12a   : > { %1952 = vmatprep.mubr.bf16.mxu0 %v3058_v38 }
 0x130   : > { %1664 = vmatmul.mubr.bf16.gmra.mrb[68].mxu1 %v3060_v39 }
 0x131   : > { %1953 = vmatmul.mubr.bf16.gmra.mrb[68].mxu0 %v3061_v40  ;;  %1671 = vmatprep.mubr.bf16.mxu1 %v3062_v41  ;;  %v3130_v40 = vld [vmem:[%s3594_s12 + $0x3ac] ss:$16 sps:$4 sm:$0xff]  }
 0x132   : > { %1960 = vmatprep.mubr.bf16.mxu0 %v3064_v42 }
 0x138   : > { %1672 = vmatmul.mubr.bf16.gmra.mrb[72].mxu1 %v3066_v43 }
 0x139   : > { %1961 = vmatmul.mubr.bf16.gmra.mrb[72].mxu0 %v3067_v44  ;;  %1679 = vmatprep.mubr.bf16.mxu1 %v3068_v45 }
 0x13a   : > { %1968 = vmatprep.mubr.bf16.mxu0 %v3070_v46  ;;  %v3132_v46 = vld [vmem:[%s3594_s12 + $0x3a0] ss:$16 sps:$4 sm:$0xff]  }
 0x140   : > { %1680 = vmatmul.mubr.bf16.gmra.mrb[76].mxu1 %v3072_v47 }
 0x141   : > { %1969 = vmatmul.mubr.bf16.gmra.mrb[76].mxu0 %v3073_v48  ;;  %1687 = vmatprep.mubr.bf16.mxu1 %v3074_v49 }
 0x142   : > { %1976 = vmatprep.mubr.bf16.mxu0 %v3076_v50  ;;  %v3133_v50 = vld [vmem:[%s3594_s12 + $0x3a8] ss:$16 sps:$4 sm:$0xff]  }
 0x148   : > { %1688 = vmatmul.mubr.bf16.gmra.mrb[80].mxu1 %v3078_v51  ;;  %v3134_v51 = vld [vmem:[%s3594_s12 + $0x3c4] ss:$16 sps:$4 sm:$0xff]  }
 0x149   : > { %1977 = vmatmul.mubr.bf16.gmra.mrb[80].mxu0 %v3079_v52  ;;  %1695 = vmatprep.mubr.bf16.mxu1 %v3080_v53 }
 0x14a   : > { %1984 = vmatprep.mubr.bf16.mxu0 %v3082_v54  ;;  %v3136_v54 = vld [vmem:[%s3594_s12 + $0x3cc] ss:$16 sps:$4 sm:$0xff]  }
 0x150   : > { %1696 = vmatmul.mubr.bf16.gmra.mrb[84].mxu1 %v3084_v55 }
 0x151   : > { %1985 = vmatmul.mubr.bf16.gmra.mrb[84].mxu0 %v3085_v56  ;;  %1703 = vmatprep.mubr.bf16.mxu1 %v3086_v57 }
 0x152   : > { %1992 = vmatprep.mubr.bf16.mxu0 %v3088_v58 }
 0x158   : > { %1704 = vmatmul.mubr.bf16.gmra.mrb[88].mxu1 %v3090_v59 }
 0x159   : > { %1993 = vmatmul.mubr.bf16.gmra.mrb[88].mxu0 %v3091_v60  ;;  %1711 = vmatprep.mubr.bf16.mxu1 %v3092_v61  ;;  %v3138_v60 = vld [vmem:[%s3594_s12 + $0x3c0] ss:$16 sps:$4 sm:$0xff]  }
 0x15a   : > { %2000 = vmatprep.mubr.bf16.mxu0 %v3094_v62 }
 0x160   : > { %1712 = vmatmul.mubr.bf16.gmra.mrb[92].mxu1 %v3096_v63 }
 0x161   : > { %2001 = vmatmul.mubr.bf16.gmra.mrb[92].mxu0 %v3097_v0  ;;  %1719 = vmatprep.mubr.bf16.mxu1 %v3098_v1  ;;  %v3139_v0 = vld [vmem:[%s3594_s12 + $0x3c8] ss:$16 sps:$4 sm:$0xff]   ;;  %v3140_v1 = vld [vmem:[%s3594_s12 + $0x3e4] ss:$16 sps:$4 sm:$0xff]  }
 0x162   : > { %2008 = vmatprep.mubr.bf16.mxu0 %v3100_v2 }
 0x168   : > { %1720 = vmatmul.mubr.bf16.gmra.mrb[96].mxu1 %v3102_v3 }
 0x169   : > { %2009 = vmatmul.mubr.bf16.gmra.mrb[96].mxu0 %v3103_v4  ;;  %1727 = vmatprep.mubr.bf16.mxu1 %v3104_v5  ;;  %v3142_v4 = vld [vmem:[%s3594_s12 + $0x3ec] ss:$16 sps:$4 sm:$0xff]  }
 0x16a   : > { %2016 = vmatprep.mubr.bf16.mxu0 %v3106_v6 }
 0x170   : > { %1728 = vmatmul.mubr.bf16.gmra.mrb[100].mxu1 %v3108_v7 }
 0x171   : > { %2017 = vmatmul.mubr.bf16.gmra.mrb[100].mxu0 %v3109_v8  ;;  %1735 = vmatprep.mubr.bf16.mxu1 %v3110_v9 }
 0x172   : > { %2024 = vmatprep.mubr.bf16.mxu0 %v3112_v10  ;;  %v3144_v10 = vld [vmem:[%s3594_s12 + $0x3e0] ss:$16 sps:$4 sm:$0xff]  }
 0x178   : > { %1736 = vmatmul.mubr.bf16.gmra.mrb[104].mxu1 %v3114_v11 }
 0x179   : > { %2025 = vmatmul.mubr.bf16.gmra.mrb[104].mxu0 %v3115_v12  ;;  %1743 = vmatprep.mubr.bf16.mxu1 %v3116_v13 }
 0x17a   : > { %2032 = vmatprep.mubr.bf16.mxu0 %v3118_v14  ;;  %v3145_v14 = vld [vmem:[%s3594_s12 + $0x3e8] ss:$16 sps:$4 sm:$0xff]  }
 0x17b   : > { %v1529_v15 = vpop.f32.mrb[0].mxu1 }
 0x17c   : > { %v1818_v16 = vpop.f32.mrb[0].mxu0  ;;  %v1531_v17 = vpop.f32.mrb[1].mxu1 }
 0x17d   : > { %v3735_v19 = vadd.f32 %v1818_v16, %v1529_v15  ;;  %v1820_v20 = vpop.f32.mrb[1].mxu0  ;;  %v1532_v21 = vpop.f32.mrb[2].mxu1 }
 0x17e   : > { %v1821_v24 = vpop.f32.mrb[2].mxu0  ;;  %v1534_v25 = vpop.f32.mrb[3].mxu1 }
 0x17f   : > { %v3740_v27 = vadd.f32 %v1821_v24, %v1532_v21  ;;  %v1823_v28 = vpop.f32.mrb[3].mxu0  ;;  %2077 = vst [vmem:[#allocation2] sm:$0xff] (!%p2794_p11), %v3735_v19 }
 0x180   : > { %1744 = vmatmul.mubr.bf16.gmra.mrb[108].mxu1 %v3120_v18 }
 0x181   : > { %2033 = vmatmul.mubr.bf16.gmra.mrb[108].mxu0 %v3121_v22  ;;  %1751 = vmatprep.mubr.bf16.mxu1 %v3122_v23  ;;  %2078 = vst [vmem:[#allocation2 + $0x8] sm:$0xff] (!%p2794_p11), %v3740_v27 }
 0x182   : > { %2040 = vmatprep.mubr.bf16.mxu0 %v3124_v26 }
 0x183   : > { %v1537_v29 = vpop.f32.mrb[4].mxu1 }
 0x184   : > { %v1826_v30 = vpop.f32.mrb[4].mxu0  ;;  %v1539_v31 = vpop.f32.mrb[5].mxu1 }
 0x185   : > { %v3743_v33 = vadd.f32 %v1826_v30, %v1537_v29  ;;  %v1828_v34 = vpop.f32.mrb[5].mxu0  ;;  %v1540_v35 = vpop.f32.mrb[6].mxu1 }
 0x186   : > { %v1829_v38 = vpop.f32.mrb[6].mxu0  ;;  %v1542_v39 = vpop.f32.mrb[7].mxu1 }
 0x187   : > { %v3748_v41 = vadd.f32 %v1829_v38, %v1540_v35  ;;  %v1831_v42 = vpop.f32.mrb[7].mxu0  ;;  %2079 = vst [vmem:[#allocation2 + $0x10] sm:$0xff] (!%p2794_p11), %v3743_v33 }
 0x188   : > { %1752 = vmatmul.mubr.bf16.gmra.mrb[112].mxu1 %v3126_v32 }
 0x189   : > { %2041 = vmatmul.mubr.bf16.gmra.mrb[112].mxu0 %v3127_v36  ;;  %1759 = vmatprep.mubr.bf16.mxu1 %v3128_v37  ;;  %2080 = vst [vmem:[#allocation2 + $0x18] sm:$0xff] (!%p2794_p11), %v3748_v41 }
 0x18a   : > { %2048 = vmatprep.mubr.bf16.mxu0 %v3130_v40 }
 0x18b   : > { %v1545_v43 = vpop.f32.mrb[8].mxu1 }
 0x18c   : > { %v1834_v44 = vpop.f32.mrb[8].mxu0  ;;  %v1547_v45 = vpop.f32.mrb[9].mxu1 }
 0x18d   : > { %v3751_v47 = vadd.f32 %v1834_v44, %v1545_v43  ;;  %v1836_v48 = vpop.f32.mrb[9].mxu0  ;;  %v1548_v49 = vpop.f32.mrb[10].mxu1 }
 0x18e   : > { %v1837_v52 = vpop.f32.mrb[10].mxu0  ;;  %v1550_v53 = vpop.f32.mrb[11].mxu1 }
 0x18f   : > { %v3756_v55 = vadd.f32 %v1837_v52, %v1548_v49  ;;  %v1839_v56 = vpop.f32.mrb[11].mxu0  ;;  %2081 = vst [vmem:[#allocation2 + $0x20] sm:$0xff] (!%p2794_p11), %v3751_v47 }
 0x190   : > { %1760 = vmatmul.mubr.bf16.gmra.mrb[116].mxu1 %v3132_v46 }
 0x191   : > { %2049 = vmatmul.mubr.bf16.gmra.mrb[116].mxu0 %v3133_v50  ;;  %1767 = vmatprep.mubr.bf16.mxu1 %v3134_v51  ;;  %2082 = vst [vmem:[#allocation2 + $0x28] sm:$0xff] (!%p2794_p11), %v3756_v55 }
 0x192   : > { %2056 = vmatprep.mubr.bf16.mxu0 %v3136_v54 }
 0x193   : > { %v1553_v57 = vpop.f32.mrb[12].mxu1 }
 0x194   : > { %v1842_v58 = vpop.f32.mrb[12].mxu0  ;;  %v1555_v59 = vpop.f32.mrb[13].mxu1 }
 0x195   : > { %v3759_v61 = vadd.f32 %v1842_v58, %v1553_v57  ;;  %v1844_v62 = vpop.f32.mrb[13].mxu0  ;;  %v1556_v63 = vpop.f32.mrb[14].mxu1 }
 0x196   : > { %v1845_v2 = vpop.f32.mrb[14].mxu0  ;;  %v1558_v3 = vpop.f32.mrb[15].mxu1 }
 0x197   : > { %v3764_v5 = vadd.f32 %v1845_v2, %v1556_v63  ;;  %v1847_v6 = vpop.f32.mrb[15].mxu0  ;;  %2083 = vst [vmem:[#allocation2 + $0x30] sm:$0xff] (!%p2794_p11), %v3759_v61 }
 0x198   : > { %1768 = vmatmul.mubr.bf16.gmra.mrb[120].mxu1 %v3138_v60 }
 0x199   : > { %2057 = vmatmul.mubr.bf16.gmra.mrb[120].mxu0 %v3139_v0  ;;  %1775 = vmatprep.mubr.bf16.mxu1 %v3140_v1  ;;  %2084 = vst [vmem:[#allocation2 + $0x38] sm:$0xff] (!%p2794_p11), %v3764_v5 }
 0x19a   : > { %2064 = vmatprep.mubr.bf16.mxu0 %v3142_v4 }
 0x19b   : > { %v1561_v7 = vpop.f32.mrb[16].mxu1 }
 0x19c   : > { %v1850_v8 = vpop.f32.mrb[16].mxu0  ;;  %v1563_v9 = vpop.f32.mrb[17].mxu1 }
 0x19d   : > { %v3767_v11 = vadd.f32 %v1850_v8, %v1561_v7  ;;  %v1852_v12 = vpop.f32.mrb[17].mxu0  ;;  %v1564_v13 = vpop.f32.mrb[18].mxu1 }
 0x19e   : > { %v1853_v15 = vpop.f32.mrb[18].mxu0  ;;  %v1566_v16 = vpop.f32.mrb[19].mxu1 }
 0x19f   : > { %v3770_v17 = vadd.f32 %v1853_v15, %v1564_v13  ;;  %v1855_v18 = vpop.f32.mrb[19].mxu0  ;;  %2085 = vst [vmem:[#allocation2 + $0x40] sm:$0xff] (!%p2794_p11), %v3767_v11 }
 0x1a0   : > { %1776 = vmatmul.mubr.bf16.gmra.mrb[124].mxu1 %v3144_v10 }
 0x1a1   : > { %2065 = vmatmul.mubr.bf16.gmra.mrb[124].mxu0 %v3145_v14  ;;  %2086 = vst [vmem:[#allocation2 + $0x48] sm:$0xff] (!%p2794_p11), %v3770_v17 }
 0x1a3   : > { %v1569_v20 = vpop.f32.mrb[20].mxu1 }
 0x1a4   : > { %v1858_v21 = vpop.f32.mrb[20].mxu0  ;;  %v1571_v22 = vpop.f32.mrb[21].mxu1 }
 0x1a5   : > { %v3772_v23 = vadd.f32 %v1858_v21, %v1569_v20  ;;  %v1860_v24 = vpop.f32.mrb[21].mxu0  ;;  %v1572_v25 = vpop.f32.mrb[22].mxu1 }
 0x1a6   : > { %v1861_v26 = vpop.f32.mrb[22].mxu0  ;;  %v1574_v28 = vpop.f32.mrb[23].mxu1 }
 0x1a7   : > { %v3774_v29 = vadd.f32 %v1861_v26, %v1572_v25  ;;  %v1863_v30 = vpop.f32.mrb[23].mxu0  ;;  %2087 = vst [vmem:[#allocation2 + $0x50] sm:$0xff] (!%p2794_p11), %v3772_v23 }
 0x1a9   : > { %2088 = vst [vmem:[#allocation2 + $0x58] sm:$0xff] (!%p2794_p11), %v3774_v29 }
 0x1ab   : > { %v1577_v31 = vpop.f32.mrb[24].mxu1 }
 0x1ac   : > { %v1866_v32 = vpop.f32.mrb[24].mxu0  ;;  %v1579_v34 = vpop.f32.mrb[25].mxu1 }
 0x1ad   : > { %v3776_v35 = vadd.f32 %v1866_v32, %v1577_v31  ;;  %v1868_v36 = vpop.f32.mrb[25].mxu0  ;;  %v1580_v37 = vpop.f32.mrb[26].mxu1 }
 0x1ae   : > { %v1869_v38 = vpop.f32.mrb[26].mxu0  ;;  %v1582_v39 = vpop.f32.mrb[27].mxu1 }
 0x1af   : > { %v3778_v40 = vadd.f32 %v1869_v38, %v1580_v37  ;;  %v1871_v42 = vpop.f32.mrb[27].mxu0  ;;  %2089 = vst [vmem:[#allocation2 + $0x60] sm:$0xff] (!%p2794_p11), %v3776_v35 }
 0x1b1   : > { %2090 = vst [vmem:[#allocation2 + $0x68] sm:$0xff] (!%p2794_p11), %v3778_v40 }
 0x1b3   : > { %v1585_v43 = vpop.f32.mrb[28].mxu1 }
 0x1b4   : > { %v1874_v44 = vpop.f32.mrb[28].mxu0  ;;  %v1587_v45 = vpop.f32.mrb[29].mxu1 }
 0x1b5   : > { %v3780_v46 = vadd.f32 %v1874_v44, %v1585_v43  ;;  %v1876_v48 = vpop.f32.mrb[29].mxu0  ;;  %v1588_v49 = vpop.f32.mrb[30].mxu1 }
 0x1b6   : > { %v1877_v50 = vpop.f32.mrb[30].mxu0  ;;  %v1590_v51 = vpop.f32.mrb[31].mxu1 }
 0x1b7   : > { %v3782_v52 = vadd.f32 %v1877_v50, %v1588_v49  ;;  %v1879_v53 = vpop.f32.mrb[31].mxu0  ;;  %2091 = vst [vmem:[#allocation2 + $0x70] sm:$0xff] (!%p2794_p11), %v3780_v46 }
 0x1b9   : > { %2092 = vst [vmem:[#allocation2 + $0x78] sm:$0xff] (!%p2794_p11), %v3782_v52 }
 0x1bb   : > { %v1593_v54 = vpop.f32.mrb[32].mxu1 }
 0x1bc   : > { %v1882_v56 = vpop.f32.mrb[32].mxu0  ;;  %v1595_v57 = vpop.f32.mrb[33].mxu1 }
 0x1bd   : > { %v3784_v58 = vadd.f32 %v1882_v56, %v1593_v54  ;;  %v1884_v59 = vpop.f32.mrb[33].mxu0  ;;  %v1596_v60 = vpop.f32.mrb[34].mxu1 }
 0x1be   : > { %v1885_v62 = vpop.f32.mrb[34].mxu0  ;;  %v1598_v63 = vpop.f32.mrb[35].mxu1 }
 0x1bf   : > { %v3786_v0 = vadd.f32 %v1885_v62, %v1596_v60  ;;  %v1887_v1 = vpop.f32.mrb[35].mxu0  ;;  %2093 = vst [vmem:[#allocation2 + $0x80] sm:$0xff] (!%p2794_p11), %v3784_v58 }
 0x1c1   : > { %2094 = vst [vmem:[#allocation2 + $0x88] sm:$0xff] (!%p2794_p11), %v3786_v0 }
 0x1c3   : > { %v1601_v2 = vpop.f32.mrb[36].mxu1 }
 0x1c4   : > { %v1890_v3 = vpop.f32.mrb[36].mxu0  ;;  %v1603_v4 = vpop.f32.mrb[37].mxu1 }
 0x1c5   : > { %v3788_v6 = vadd.f32 %v1890_v3, %v1601_v2  ;;  %v1892_v7 = vpop.f32.mrb[37].mxu0  ;;  %v1604_v8 = vpop.f32.mrb[38].mxu1 }
 0x1c6   : > { %v1893_v9 = vpop.f32.mrb[38].mxu0  ;;  %v1606_v10 = vpop.f32.mrb[39].mxu1 }
 0x1c7   : > { %v3790_v12 = vadd.f32 %v1893_v9, %v1604_v8  ;;  %v1895_v13 = vpop.f32.mrb[39].mxu0  ;;  %2095 = vst [vmem:[#allocation2 + $0x90] sm:$0xff] (!%p2794_p11), %v3788_v6 }
 0x1c9   : > { %2096 = vst [vmem:[#allocation2 + $0x98] sm:$0xff] (!%p2794_p11), %v3790_v12 }
 0x1cb   : > { %v1609_v14 = vpop.f32.mrb[40].mxu1 }
 0x1cc   : > { %v1898_v15 = vpop.f32.mrb[40].mxu0  ;;  %v1611_v16 = vpop.f32.mrb[41].mxu1 }
 0x1cd   : > { %v3792_v18 = vadd.f32 %v1898_v15, %v1609_v14  ;;  %v1900_v20 = vpop.f32.mrb[41].mxu0  ;;  %v1612_v21 = vpop.f32.mrb[42].mxu1 }
 0x1ce   : > { %v1901_v22 = vpop.f32.mrb[42].mxu0  ;;  %v1614_v24 = vpop.f32.mrb[43].mxu1 }
 0x1cf   : > { %v3794_v25 = vadd.f32 %v1901_v22, %v1612_v21  ;;  %v1903_v26 = vpop.f32.mrb[43].mxu0  ;;  %2097 = vst [vmem:[#allocation2 + $0xa0] sm:$0xff] (!%p2794_p11), %v3792_v18 }
 0x1d1   : > { %2098 = vst [vmem:[#allocation2 + $0xa8] sm:$0xff] (!%p2794_p11), %v3794_v25 }
 0x1d3   : > { %v1617_v28 = vpop.f32.mrb[44].mxu1 }
 0x1d4   : > { %v1906_v30 = vpop.f32.mrb[44].mxu0  ;;  %v1619_v31 = vpop.f32.mrb[45].mxu1 }
 0x1d5   : > { %v3796_v32 = vadd.f32 %v1906_v30, %v1617_v28  ;;  %v1908_v34 = vpop.f32.mrb[45].mxu0  ;;  %v1620_v36 = vpop.f32.mrb[46].mxu1 }
 0x1d6   : > { %v1909_v37 = vpop.f32.mrb[46].mxu0  ;;  %v1622_v38 = vpop.f32.mrb[47].mxu1 }
 0x1d7   : > { %v3798_v39 = vadd.f32 %v1909_v37, %v1620_v36  ;;  %v1911_v42 = vpop.f32.mrb[47].mxu0  ;;  %2099 = vst [vmem:[#allocation2 + $0xb0] sm:$0xff] (!%p2794_p11), %v3796_v32 }
 0x1d9   : > { %2100 = vst [vmem:[#allocation2 + $0xb8] sm:$0xff] (!%p2794_p11), %v3798_v39 }
 0x1db   : > { %v1625_v43 = vpop.f32.mrb[48].mxu1 }
 0x1dc   : > { %v1914_v44 = vpop.f32.mrb[48].mxu0  ;;  %v1627_v45 = vpop.f32.mrb[49].mxu1 }
 0x1dd   : > { %v3800_v48 = vadd.f32 %v1914_v44, %v1625_v43  ;;  %v1916_v49 = vpop.f32.mrb[49].mxu0  ;;  %v1628_v50 = vpop.f32.mrb[50].mxu1 }
 0x1de   : > { %v1917_v51 = vpop.f32.mrb[50].mxu0  ;;  %v1630_v53 = vpop.f32.mrb[51].mxu1 }
 0x1df   : > { %v3802_v54 = vadd.f32 %v1917_v51, %v1628_v50  ;;  %v1919_v56 = vpop.f32.mrb[51].mxu0  ;;  %2101 = vst [vmem:[#allocation2 + $0xc0] sm:$0xff] (!%p2794_p11), %v3800_v48 }
 0x1e1   : > { %2102 = vst [vmem:[#allocation2 + $0xc8] sm:$0xff] (!%p2794_p11), %v3802_v54 }
 0x1e3   : > { %v1633_v57 = vpop.f32.mrb[52].mxu1 }
 0x1e4   : > { %v1922_v59 = vpop.f32.mrb[52].mxu0  ;;  %v1635_v60 = vpop.f32.mrb[53].mxu1 }
 0x1e5   : > { %v3804_v62 = vadd.f32 %v1922_v59, %v1633_v57  ;;  %v1924_v63 = vpop.f32.mrb[53].mxu0  ;;  %v1636_v1 = vpop.f32.mrb[54].mxu1 }
 0x1e6   : > { %v1925_v2 = vpop.f32.mrb[54].mxu0  ;;  %v1638_v3 = vpop.f32.mrb[55].mxu1 }
 0x1e7   : > { %v3806_v4 = vadd.f32 %v1925_v2, %v1636_v1  ;;  %v1927_v7 = vpop.f32.mrb[55].mxu0  ;;  %2103 = vst [vmem:[#allocation2 + $0xd0] sm:$0xff] (!%p2794_p11), %v3804_v62 }
 0x1e9   : > { %2104 = vst [vmem:[#allocation2 + $0xd8] sm:$0xff] (!%p2794_p11), %v3806_v4 }
 0x1eb   : > { %v1641_v8 = vpop.f32.mrb[56].mxu1 }
 0x1ec   : > { %v1930_v9 = vpop.f32.mrb[56].mxu0  ;;  %v1643_v10 = vpop.f32.mrb[57].mxu1 }
 0x1ed   : > { %v3808_v13 = vadd.f32 %v1930_v9, %v1641_v8  ;;  %v1932_v14 = vpop.f32.mrb[57].mxu0  ;;  %v1644_v15 = vpop.f32.mrb[58].mxu1 }
 0x1ee   : > { %v1933_v16 = vpop.f32.mrb[58].mxu0  ;;  %v1646_v20 = vpop.f32.mrb[59].mxu1 }
 0x1ef   : > { %v3810_v21 = vadd.f32 %v1933_v16, %v1644_v15  ;;  %v1935_v22 = vpop.f32.mrb[59].mxu0  ;;  %2105 = vst [vmem:[#allocation2 + $0xe0] sm:$0xff] (!%p2794_p11), %v3808_v13 }
 0x1f1   : > { %2106 = vst [vmem:[#allocation2 + $0xe8] sm:$0xff] (!%p2794_p11), %v3810_v21 }
 0x1f3   : > { %v1649_v24 = vpop.f32.mrb[60].mxu1 }
 0x1f4   : > { %v1938_v26 = vpop.f32.mrb[60].mxu0  ;;  %v1651_v28 = vpop.f32.mrb[61].mxu1 }
 0x1f5   : > { %v3812_v30 = vadd.f32 %v1938_v26, %v1649_v24  ;;  %v1940_v31 = vpop.f32.mrb[61].mxu0  ;;  %v1652_v34 = vpop.f32.mrb[62].mxu1 }
 0x1f6   : > { %v1941_v36 = vpop.f32.mrb[62].mxu0  ;;  %v1654_v37 = vpop.f32.mrb[63].mxu1 }
 0x1f7   : > { %v3814_v38 = vadd.f32 %v1941_v36, %v1652_v34  ;;  %v1943_v42 = vpop.f32.mrb[63].mxu0  ;;  %2107 = vst [vmem:[#allocation2 + $0xf0] sm:$0xff] (!%p2794_p11), %v3812_v30 }
 0x1f9   : > { %2108 = vst [vmem:[#allocation2 + $0xf8] sm:$0xff] (!%p2794_p11), %v3814_v38 }
 0x1fb   : > { %v1657_v43 = vpop.f32.mrb[64].mxu1 }
 0x1fc   : > { %v1946_v44 = vpop.f32.mrb[64].mxu0  ;;  %v1659_v45 = vpop.f32.mrb[65].mxu1 }
 0x1fd   : > { %v3816_v49 = vadd.f32 %v1946_v44, %v1657_v43  ;;  %v1948_v50 = vpop.f32.mrb[65].mxu0  ;;  %v1660_v51 = vpop.f32.mrb[66].mxu1 }
 0x1fe   : > { %v1949_v53 = vpop.f32.mrb[66].mxu0  ;;  %v1662_v56 = vpop.f32.mrb[67].mxu1 }
 0x1ff   : > { %v3818_v57 = vadd.f32 %v1949_v53, %v1660_v51  ;;  %v1951_v59 = vpop.f32.mrb[67].mxu0  ;;  %2109 = vst [vmem:[#allocation2 + $0x100] sm:$0xff] (!%p2794_p11), %v3816_v49 }
 0x201   : > { %2110 = vst [vmem:[#allocation2 + $0x108] sm:$0xff] (!%p2794_p11), %v3818_v57 }
 0x203   : > { %v1665_v60 = vpop.f32.mrb[68].mxu1 }
 0x204   : > { %v1954_v63 = vpop.f32.mrb[68].mxu0  ;;  %v1667_v1 = vpop.f32.mrb[69].mxu1 }
 0x205   : > { %v3820_v2 = vadd.f32 %v1954_v63, %v1665_v60  ;;  %v1956_v3 = vpop.f32.mrb[69].mxu0  ;;  %v1668_v7 = vpop.f32.mrb[70].mxu1 }
 0x206   : > { %v1957_v8 = vpop.f32.mrb[70].mxu0  ;;  %v1670_v9 = vpop.f32.mrb[71].mxu1 }
 0x207   : > { %v3822_v10 = vadd.f32 %v1957_v8, %v1668_v7  ;;  %v1959_v14 = vpop.f32.mrb[71].mxu0  ;;  %2111 = vst [vmem:[#allocation2 + $0x110] sm:$0xff] (!%p2794_p11), %v3820_v2 }
 0x209   : > { %2112 = vst [vmem:[#allocation2 + $0x118] sm:$0xff] (!%p2794_p11), %v3822_v10 }
 0x20b   : > { %v1673_v15 = vpop.f32.mrb[72].mxu1 }
 0x20c   : > { %v1962_v16 = vpop.f32.mrb[72].mxu0  ;;  %v1675_v20 = vpop.f32.mrb[73].mxu1 }
 0x20d   : > { %v3824_v22 = vadd.f32 %v1962_v16, %v1673_v15  ;;  %v1964_v24 = vpop.f32.mrb[73].mxu0  ;;  %v1676_v26 = vpop.f32.mrb[74].mxu1 }
 0x20e   : > { %v1965_v28 = vpop.f32.mrb[74].mxu0  ;;  %v1678_v31 = vpop.f32.mrb[75].mxu1 }
 0x20f   : > { %v3826_v34 = vadd.f32 %v1965_v28, %v1676_v26  ;;  %v1967_v36 = vpop.f32.mrb[75].mxu0  ;;  %2113 = vst [vmem:[#allocation2 + $0x120] sm:$0xff] (!%p2794_p11), %v3824_v22 }
 0x211   : > { %2114 = vst [vmem:[#allocation2 + $0x128] sm:$0xff] (!%p2794_p11), %v3826_v34 }
 0x213   : > { %v1681_v37 = vpop.f32.mrb[76].mxu1 }
 0x214   : > { %v1970_v42 = vpop.f32.mrb[76].mxu0  ;;  %v1683_v43 = vpop.f32.mrb[77].mxu1 }
 0x215   : > { %v3828_v44 = vadd.f32 %v1970_v42, %v1681_v37  ;;  %v1972_v45 = vpop.f32.mrb[77].mxu0  ;;  %v1684_v50 = vpop.f32.mrb[78].mxu1 }
 0x216   : > { %v1973_v51 = vpop.f32.mrb[78].mxu0  ;;  %v1686_v53 = vpop.f32.mrb[79].mxu1 }
 0x217   : > { %v3830_v56 = vadd.f32 %v1973_v51, %v1684_v50  ;;  %v1975_v59 = vpop.f32.mrb[79].mxu0  ;;  %2115 = vst [vmem:[#allocation2 + $0x130] sm:$0xff] (!%p2794_p11), %v3828_v44 }
 0x219   : > { %2116 = vst [vmem:[#allocation2 + $0x138] sm:$0xff] (!%p2794_p11), %v3830_v56 }
 0x21b   : > { %v1689_v60 = vpop.f32.mrb[80].mxu1 }
 0x21c   : > { %v1978_v63 = vpop.f32.mrb[80].mxu0  ;;  %v1691_v1 = vpop.f32.mrb[81].mxu1 }
 0x21d   : > { %v3832_v3 = vadd.f32 %v1978_v63, %v1689_v60  ;;  %v1980_v7 = vpop.f32.mrb[81].mxu0  ;;  %v1692_v8 = vpop.f32.mrb[82].mxu1 }
 0x21e   : > { %v1981_v9 = vpop.f32.mrb[82].mxu0  ;;  %v1694_v14 = vpop.f32.mrb[83].mxu1 }
 0x21f   : > { %v3834_v15 = vadd.f32 %v1981_v9, %v1692_v8  ;;  %v1983_v16 = vpop.f32.mrb[83].mxu0  ;;  %2117 = vst [vmem:[#allocation2 + $0x140] sm:$0xff] (!%p2794_p11), %v3832_v3 }
 0x221   : > { %2118 = vst [vmem:[#allocation2 + $0x148] sm:$0xff] (!%p2794_p11), %v3834_v15 }
 0x223   : > { %v1697_v20 = vpop.f32.mrb[84].mxu1 }
 0x224   : > { %v1986_v24 = vpop.f32.mrb[84].mxu0  ;;  %v1699_v26 = vpop.f32.mrb[85].mxu1 }
 0x225   : > { %v3836_v28 = vadd.f32 %v1986_v24, %v1697_v20  ;;  %v1988_v31 = vpop.f32.mrb[85].mxu0  ;;  %v1700_v36 = vpop.f32.mrb[86].mxu1 }
 0x226   : > { %v1989_v37 = vpop.f32.mrb[86].mxu0  ;;  %v1702_v42 = vpop.f32.mrb[87].mxu1 }
 0x227   : > { %v3838_v43 = vadd.f32 %v1989_v37, %v1700_v36  ;;  %v1991_v45 = vpop.f32.mrb[87].mxu0  ;;  %2119 = vst [vmem:[#allocation2 + $0x150] sm:$0xff] (!%p2794_p11), %v3836_v28 }
 0x229   : > { %2120 = vst [vmem:[#allocation2 + $0x158] sm:$0xff] (!%p2794_p11), %v3838_v43 }
 0x22b   : > { %v1705_v50 = vpop.f32.mrb[88].mxu1 }
 0x22c   : > { %v1994_v51 = vpop.f32.mrb[88].mxu0  ;;  %v1707_v53 = vpop.f32.mrb[89].mxu1 }
 0x22d   : > { %v3840_v59 = vadd.f32 %v1994_v51, %v1705_v50  ;;  %v1996_v60 = vpop.f32.mrb[89].mxu0  ;;  %v1708_v63 = vpop.f32.mrb[90].mxu1 }
 0x22e   : > { %v1997_v1 = vpop.f32.mrb[90].mxu0  ;;  %v1710_v7 = vpop.f32.mrb[91].mxu1 }
 0x22f   : > { %v3842_v8 = vadd.f32 %v1997_v1, %v1708_v63  ;;  %v1999_v9 = vpop.f32.mrb[91].mxu0  ;;  %2121 = vst [vmem:[#allocation2 + $0x160] sm:$0xff] (!%p2794_p11), %v3840_v59 }
 0x231   : > { %4169 = vst [vmem:[#allocation4_spill] sm:$0xff] %v3842_v8 }
 0x233   : > { %v1713_v14 = vpop.f32.mrb[92].mxu1 }
 0x234   : > { %v2002_v16 = vpop.f32.mrb[92].mxu0  ;;  %v1715_v20 = vpop.f32.mrb[93].mxu1 }
 0x235   : > { %v3844_v24 = vadd.f32 %v2002_v16, %v1713_v14  ;;  %v2004_v26 = vpop.f32.mrb[93].mxu0  ;;  %v1716_v31 = vpop.f32.mrb[94].mxu1 }
 0x236   : > { %v2005_v36 = vpop.f32.mrb[94].mxu0  ;;  %v1718_v37 = vpop.f32.mrb[95].mxu1 }
 0x237   : > { %4170 = vst [vmem:[#allocation5_spill] sm:$0xff] %v3844_v24  ;;  %v3846_v42 = vadd.f32 %v2005_v36, %v1716_v31  ;;  %v2007_v45 = vpop.f32.mrb[95].mxu0 }
 0x239   : > { %4171 = vst [vmem:[#allocation6_spill] sm:$0xff] %v3846_v42 }
 0x23b   : > { %v1721_v50 = vpop.f32.mrb[96].mxu1 }
 0x23c   : > { %v2010_v51 = vpop.f32.mrb[96].mxu0  ;;  %v1723_v53 = vpop.f32.mrb[97].mxu1 }
 0x23d   : > { %v3848_v60 = vadd.f32 %v2010_v51, %v1721_v50  ;;  %v2012_v63 = vpop.f32.mrb[97].mxu0  ;;  %v1724_v1 = vpop.f32.mrb[98].mxu1 }
 0x23e   : > { %v2013_v7 = vpop.f32.mrb[98].mxu0  ;;  %v1726_v9 = vpop.f32.mrb[99].mxu1 }
 0x23f   : > { %4172 = vst [vmem:[#allocation7_spill] sm:$0xff] %v3848_v60  ;;  %v3850_v8 = vadd.f32 %v2013_v7, %v1724_v1  ;;  %v2015_v14 = vpop.f32.mrb[99].mxu0 }
 0x241   : > { %4173 = vst [vmem:[#allocation8_spill] sm:$0xff] %v3850_v8 }
 0x243   : > { %v1729_v16 = vpop.f32.mrb[100].mxu1 }
 0x244   : > { %v2018_v20 = vpop.f32.mrb[100].mxu0  ;;  %v1731_v26 = vpop.f32.mrb[101].mxu1 }
 0x245   : > { %v3852_v24 = vadd.f32 %v2018_v20, %v1729_v16  ;;  %v2020_v31 = vpop.f32.mrb[101].mxu0  ;;  %v1732_v36 = vpop.f32.mrb[102].mxu1 }
 0x246   : > { %v2021_v37 = vpop.f32.mrb[102].mxu0  ;;  %v1734_v45 = vpop.f32.mrb[103].mxu1 }
 0x247   : > { %4174 = vst [vmem:[#allocation9_spill] sm:$0xff] %v3852_v24  ;;  %v3854_v42 = vadd.f32 %v2021_v37, %v1732_v36  ;;  %v2023_v50 = vpop.f32.mrb[103].mxu0 }
 0x249   : > { %4175 = vst [vmem:[#allocation10_spill] sm:$0xff] %v3854_v42 }
 0x24b   : > { %v1737_v51 = vpop.f32.mrb[104].mxu1 }
 0x24c   : > { %v2026_v53 = vpop.f32.mrb[104].mxu0  ;;  %v1739_v63 = vpop.f32.mrb[105].mxu1 }
 0x24d   : > { %v3856_v60 = vadd.f32 %v2026_v53, %v1737_v51  ;;  %v2028_v1 = vpop.f32.mrb[105].mxu0  ;;  %v1740_v7 = vpop.f32.mrb[106].mxu1 }
 0x24e   : > { %v2029_v9 = vpop.f32.mrb[106].mxu0  ;;  %v1742_v14 = vpop.f32.mrb[107].mxu1 }
 0x24f   : > { %4176 = vst [vmem:[#allocation11_spill] sm:$0xff] %v3856_v60  ;;  %v3858_v8 = vadd.f32 %v2029_v9, %v1740_v7  ;;  %v2031_v16 = vpop.f32.mrb[107].mxu0 }
 0x251   : > { %4177 = vst [vmem:[#allocation12_spill] sm:$0xff] %v3858_v8 }
 0x253   : > { %v1745_v20 = vpop.f32.mrb[108].mxu1 }
 0x254   : > { %v2034_v26 = vpop.f32.mrb[108].mxu0  ;;  %v1747_v31 = vpop.f32.mrb[109].mxu1 }
 0x255   : > { %v3860_v24 = vadd.f32 %v2034_v26, %v1745_v20  ;;  %v2036_v36 = vpop.f32.mrb[109].mxu0  ;;  %v1748_v37 = vpop.f32.mrb[110].mxu1 }
 0x256   : > { %v2037_v45 = vpop.f32.mrb[110].mxu0  ;;  %v1750_v50 = vpop.f32.mrb[111].mxu1 }
 0x257   : > { %4178 = vst [vmem:[#allocation13_spill] sm:$0xff] %v3860_v24  ;;  %v3862_v42 = vadd.f32 %v2037_v45, %v1748_v37  ;;  %v2039_v51 = vpop.f32.mrb[111].mxu0 }
 0x259   : > { %4179 = vst [vmem:[#allocation14_spill] sm:$0xff] %v3862_v42 }
 0x25b   : > { %v1753_v53 = vpop.f32.mrb[112].mxu1 }
 0x25c   : > { %v2042_v63 = vpop.f32.mrb[112].mxu0  ;;  %v1755_v1 = vpop.f32.mrb[113].mxu1 }
 0x25d   : > { %v3864_v60 = vadd.f32 %v2042_v63, %v1753_v53  ;;  %v2044_v7 = vpop.f32.mrb[113].mxu0  ;;  %v1756_v9 = vpop.f32.mrb[114].mxu1 }
 0x25e   : > { %v2045_v14 = vpop.f32.mrb[114].mxu0  ;;  %v1758_v16 = vpop.f32.mrb[115].mxu1 }
 0x25f   : > { %4180 = vst [vmem:[#allocation15_spill] sm:$0xff] %v3864_v60  ;;  %v3866_v8 = vadd.f32 %v2045_v14, %v1756_v9  ;;  %v2047_v20 = vpop.f32.mrb[115].mxu0 }
 0x261   : > { %4181 = vst [vmem:[#allocation16_spill] sm:$0xff] %v3866_v8 }
 0x263   : > { %v1761_v26 = vpop.f32.mrb[116].mxu1 }
 0x264   : > { %v2050_v31 = vpop.f32.mrb[116].mxu0  ;;  %v1763_v36 = vpop.f32.mrb[117].mxu1 }
 0x265   : > { %v3868_v24 = vadd.f32 %v2050_v31, %v1761_v26  ;;  %v2052_v37 = vpop.f32.mrb[117].mxu0  ;;  %v1764_v45 = vpop.f32.mrb[118].mxu1 }
 0x266   : > { %v2053_v50 = vpop.f32.mrb[118].mxu0  ;;  %v1766_v51 = vpop.f32.mrb[119].mxu1 }
 0x267   : > { %4182 = vst [vmem:[#allocation17_spill] sm:$0xff] %v3868_v24  ;;  %v3870_v42 = vadd.f32 %v2053_v50, %v1764_v45  ;;  %v2055_v53 = vpop.f32.mrb[119].mxu0 }
 0x269   : > { %4183 = vst [vmem:[#allocation18_spill] sm:$0xff] %v3870_v42 }
 0x26b   : > { %v1769_v63 = vpop.f32.mrb[120].mxu1 }
 0x26c   : > { %v2058_v1 = vpop.f32.mrb[120].mxu0  ;;  %v1771_v7 = vpop.f32.mrb[121].mxu1 }
 0x26d   : > { %v3872_v60 = vadd.f32 %v2058_v1, %v1769_v63  ;;  %v2060_v9 = vpop.f32.mrb[121].mxu0  ;;  %v1772_v14 = vpop.f32.mrb[122].mxu1  ;;  %v4184_v1 = vld [vmem:[#allocation4_spill] sm:$0xff] (!%p2794_p11)  ;;  %v4185_v7 = vld [vmem:[#allocation5_spill] sm:$0xff] (!%p2794_p11) }
 0x26e   : > { %v2061_v16 = vpop.f32.mrb[122].mxu0  ;;  %v1774_v20 = vpop.f32.mrb[123].mxu1  ;;  %2122 = vst [vmem:[#allocation2 + $0x168] sm:$0xff] (!%p2794_p11), %v4184_v1  ;;  %2123 = vst [vmem:[#allocation2 + $0x170] sm:$0xff] (!%p2794_p11), %v4185_v7  ;;  %v4186_v9 = vld [vmem:[#allocation6_spill] sm:$0xff] (!%p2794_p11) }
 0x26f   : > { %v3874_v8 = vadd.f32 %v2061_v16, %v1772_v14  ;;  %v2063_v26 = vpop.f32.mrb[123].mxu0  ;;  %2124 = vst [vmem:[#allocation2 + $0x178] sm:$0xff] (!%p2794_p11), %v4186_v9  ;;  %v4187_v14 = vld [vmem:[#allocation7_spill] sm:$0xff] (!%p2794_p11)  ;;  %v4188_v16 = vld [vmem:[#allocation8_spill] sm:$0xff] (!%p2794_p11)  ;;  %v4189_v20 = vld [vmem:[#allocation9_spill] sm:$0xff] (!%p2794_p11) }
 0x270   : > { %2125 = vst [vmem:[#allocation2 + $0x180] sm:$0xff] (!%p2794_p11), %v4187_v14  ;;  %2126 = vst [vmem:[#allocation2 + $0x188] sm:$0xff] (!%p2794_p11), %v4188_v16  ;;  %v4190_v26 = vld [vmem:[#allocation10_spill] sm:$0xff] (!%p2794_p11) }
 0x271   : > { %2076 = sbr.rel (%p2794_p11) target bundleno = 635 (0x27b), region = 59  ;;  %2127 = vst [vmem:[#allocation2 + $0x190] sm:$0xff] (!%p2794_p11), %v4189_v20  ;;  %2128 = vst [vmem:[#allocation2 + $0x198] sm:$0xff] (!%p2794_p11), %v4190_v26 }
 0x272   : > { %2137 = vst [vmem:[#allocation2 + $0x1e0] sm:$0xff] (!%p2794_p11), %v3872_v60  ;;  %2138 = vst [vmem:[#allocation2 + $0x1e8] sm:$0xff] (!%p2794_p11), %v3874_v8 }
 0x273   : > { %v1777_v31 = vpop.f32.mrb[124].mxu1 }
 0x274   : > { %v2066_v36 = vpop.f32.mrb[124].mxu0  ;;  %v1779_v37 = vpop.f32.mrb[125].mxu1 }
 0x275   : > { %v3876_v24 = vadd.f32 %v2066_v36, %v1777_v31  ;;  %v2068_v45 = vpop.f32.mrb[125].mxu0  ;;  %v1780_v50 = vpop.f32.mrb[126].mxu1  ;;  %v4191_v31 = vld [vmem:[#allocation11_spill] sm:$0xff] (!%p2794_p11)  ;;  %v4192_v36 = vld [vmem:[#allocation12_spill] sm:$0xff] (!%p2794_p11)  ;;  %v4193_v37 = vld [vmem:[#allocation13_spill] sm:$0xff] (!%p2794_p11) }
 0x276   : > { %v2069_v51 = vpop.f32.mrb[126].mxu0  ;;  %v1782_v53 = vpop.f32.mrb[127].mxu1  ;;  %2129 = vst [vmem:[#allocation2 + $0x1a0] sm:$0xff] (!%p2794_p11), %v4191_v31  ;;  %2130 = vst [vmem:[#allocation2 + $0x1a8] sm:$0xff] (!%p2794_p11), %v4192_v36  ;;  %v4194_v45 = vld [vmem:[#allocation14_spill] sm:$0xff] (!%p2794_p11) }
 0x277   : > { %v3878_v42 = vadd.f32 %v2069_v51, %v1780_v50  ;;  %v2071_v63 = vpop.f32.mrb[127].mxu0  ;;  %2131 = vst [vmem:[#allocation2 + $0x1b0] sm:$0xff] (!%p2794_p11), %v4193_v37  ;;  %2132 = vst [vmem:[#allocation2 + $0x1b8] sm:$0xff] (!%p2794_p11), %v4194_v45  ;;  %v4195_v50 = vld [vmem:[#allocation15_spill] sm:$0xff] (!%p2794_p11)  ;;  %v4196_v51 = vld [vmem:[#allocation16_spill] sm:$0xff] (!%p2794_p11) }
 0x278   : > { %2133 = vst [vmem:[#allocation2 + $0x1c0] sm:$0xff] %v4195_v50  ;;  %2134 = vst [vmem:[#allocation2 + $0x1c8] sm:$0xff] %v4196_v51  ;;  %v4197_v53 = vld [vmem:[#allocation17_spill] sm:$0xff]  ;;  %v4198_v63 = vld [vmem:[#allocation18_spill] sm:$0xff] }
 0x279   : > { %2135 = vst [vmem:[#allocation2 + $0x1d0] sm:$0xff] %v4197_v53  ;;  %2136 = vst [vmem:[#allocation2 + $0x1d8] sm:$0xff] %v4198_v63 }
 0x27a   : > { %2139 = vst [vmem:[#allocation2 + $0x1f0] sm:$0xff] %v3876_v24  ;;  %2140 = vst [vmem:[#allocation2 + $0x1f8] sm:$0xff] %v3878_v42 }
 0x27b PF: > { %p2795_p12 = scmp.eq.s32.totalorder %s3184_s14, 0 }
 0x27c   : > { %v2145_v1 = vld [vmem:[#allocation2] sm:$0xff] (!%p2795_p12)  ;;  %v2146_v7 = vld [vmem:[#allocation2 + $0x8] sm:$0xff] (!%p2795_p12)  ;;  %v2147_v9 = vld [vmem:[#allocation2 + $0x10] sm:$0xff] (!%p2795_p12) }
 0x27d   : > { %2144 = sbr.rel (%p2795_p12) target bundleno = 675 (0x2a3), region = 63  ;;  %v2209_v14 = vadd.f32 (!%p2795_p12), %v2145_v1, %v3735_v19  ;;  %v2210_v16 = vadd.f32 (!%p2795_p12), %v2146_v7, %v3740_v27  ;;  %v2211_v20 = vadd.f32 (!%p2795_p12), %v2147_v9, %v3743_v33  ;;  %v2148_v26 = vld [vmem:[#allocation2 + $0x18] sm:$0xff] (!%p2795_p12)  ;;  %v2149_v31 = vld [vmem:[#allocation2 + $0x20] sm:$0xff] (!%p2795_p12)  ;;  %v2150_v36 = vld [vmem:[#allocation2 + $0x28] sm:$0xff] (!%p2795_p12) }
 0x27e   : > { %v2212_v37 = vadd.f32 (!%p2795_p12), %v2148_v26, %v3748_v41  ;;  %v2213_v45 = vadd.f32 (!%p2795_p12), %v2149_v31, %v3751_v47  ;;  %v2214_v50 = vadd.f32 (!%p2795_p12), %v2150_v36, %v3756_v55  ;;  %v2151_v51 = vld [vmem:[#allocation2 + $0x30] sm:$0xff] (!%p2795_p12)  ;;  %v2152_v53 = vld [vmem:[#allocation2 + $0x38] sm:$0xff] (!%p2795_p12)  ;;  %v2153_v63 = vld [vmem:[#allocation2 + $0x40] sm:$0xff] (!%p2795_p12) }
 0x27f   : > { %2273 = vst [vmem:[#allocation2] sm:$0xff] (!%p2795_p12), %v2209_v14  ;;  %2274 = vst [vmem:[#allocation2 + $0x8] sm:$0xff] (!%p2795_p12), %v2210_v16  ;;  %v2215_v19 = vadd.f32 (!%p2795_p12), %v2151_v51, %v3759_v61  ;;  %v2216_v27 = vadd.f32 (!%p2795_p12), %v2152_v53, %v3764_v5  ;;  %v2217_v33 = vadd.f32 (!%p2795_p12), %v2153_v63, %v3767_v11  ;;  %v2154_v1 = vld [vmem:[#allocation2 + $0x48] sm:$0xff] (!%p2795_p12)  ;;  %v2155_v7 = vld [vmem:[#allocation2 + $0x50] sm:$0xff] (!%p2795_p12) }
 0x280   : > { %2275 = vst [vmem:[#allocation2 + $0x10] sm:$0xff] (!%p2795_p12), %v2211_v20  ;;  %v2156_v9 = vld [vmem:[#allocation2 + $0x58] sm:$0xff] (!%p2795_p12)  ;;  %2276 = vst [vmem:[#allocation2 + $0x18] sm:$0xff] (!%p2795_p12), %v2212_v37  ;;  %v2218_v41 = vadd.f32 (!%p2795_p12), %v2154_v1, %v3770_v17  ;;  %v2219_v47 = vadd.f32 (!%p2795_p12), %v2155_v7, %v3772_v23  ;;  %v2157_v14 = vld [vmem:[#allocation2 + $0x60] sm:$0xff] (!%p2795_p12) }
 0x281   : > { %2277 = vst [vmem:[#allocation2 + $0x20] sm:$0xff] (!%p2795_p12), %v2213_v45  ;;  %2278 = vst [vmem:[#allocation2 + $0x28] sm:$0xff] (!%p2795_p12), %v2214_v50  ;;  %v2220_v55 = vadd.f32 (!%p2795_p12), %v2156_v9, %v3774_v29  ;;  %v2158_v16 = vld [vmem:[#allocation2 + $0x68] sm:$0xff] (!%p2795_p12)  ;;  %v2159_v20 = vld [vmem:[#allocation2 + $0x70] sm:$0xff] (!%p2795_p12)  ;;  %v2221_v61 = vadd.f32 (!%p2795_p12), %v2157_v14, %v3776_v35 }
 0x282   : > { %2279 = vst [vmem:[#allocation2 + $0x30] sm:$0xff] (!%p2795_p12), %v2215_v19  ;;  %2280 = vst [vmem:[#allocation2 + $0x38] sm:$0xff] (!%p2795_p12), %v2216_v27  ;;  %v2222_v5 = vadd.f32 (!%p2795_p12), %v2158_v16, %v3778_v40  ;;  %v2223_v11 = vadd.f32 (!%p2795_p12), %v2159_v20, %v3780_v46  ;;  %v2160_v26 = vld [vmem:[#allocation2 + $0x78] sm:$0xff] (!%p2795_p12)  ;;  %v2161_v31 = vld [vmem:[#allocation2 + $0x80] sm:$0xff] (!%p2795_p12) }
 0x283   : > { %2281 = vst [vmem:[#allocation2 + $0x40] sm:$0xff] (!%p2795_p12), %v2217_v33  ;;  %v2162_v36 = vld [vmem:[#allocation2 + $0x88] sm:$0xff] (!%p2795_p12)  ;;  %2282 = vst [vmem:[#allocation2 + $0x48] sm:$0xff] (!%p2795_p12), %v2218_v41  ;;  %v2224_v17 = vadd.f32 (!%p2795_p12), %v2160_v26, %v3782_v52  ;;  %v2225_v23 = vadd.f32 (!%p2795_p12), %v2161_v31, %v3784_v58  ;;  %v2163_v37 = vld [vmem:[#allocation2 + $0x90] sm:$0xff] (!%p2795_p12) }
 0x284   : > { %2283 = vst [vmem:[#allocation2 + $0x50] sm:$0xff] %v2219_v47  ;;  %2284 = vst [vmem:[#allocation2 + $0x58] sm:$0xff] %v2220_v55  ;;  %v2226_v29 = vadd.f32 %v2162_v36, %v3786_v0  ;;  %v2164_v45 = vld [vmem:[#allocation2 + $0x98] sm:$0xff]  ;;  %v2165_v50 = vld [vmem:[#allocation2 + $0xa0] sm:$0xff]  ;;  %v2227_v35 = vadd.f32 %v2163_v37, %v3788_v6 }
 0x285   : > { %2285 = vst [vmem:[#allocation2 + $0x60] sm:$0xff] %v2221_v61  ;;  %2286 = vst [vmem:[#allocation2 + $0x68] sm:$0xff] %v2222_v5  ;;  %v2228_v40 = vadd.f32 %v2164_v45, %v3790_v12  ;;  %v2229_v46 = vadd.f32 %v2165_v50, %v3792_v18  ;;  %v2166_v51 = vld [vmem:[#allocation2 + $0xa8] sm:$0xff]  ;;  %v2167_v53 = vld [vmem:[#allocation2 + $0xb0] sm:$0xff] }
 0x286   : > { %2287 = vst [vmem:[#allocation2 + $0x70] sm:$0xff] %v2223_v11  ;;  %v2168_v63 = vld [vmem:[#allocation2 + $0xb8] sm:$0xff]  ;;  %2288 = vst [vmem:[#allocation2 + $0x78] sm:$0xff] %v2224_v17  ;;  %v2230_v52 = vadd.f32 %v2166_v51, %v3794_v25  ;;  %v2231_v58 = vadd.f32 %v2167_v53, %v3796_v32  ;;  %v2169_v19 = vld [vmem:[#allocation2 + $0xc0] sm:$0xff] }
 0x287   : > { %2289 = vst [vmem:[#allocation2 + $0x80] sm:$0xff] %v2225_v23  ;;  %2290 = vst [vmem:[#allocation2 + $0x88] sm:$0xff] %v2226_v29  ;;  %v2232_v0 = vadd.f32 %v2168_v63, %v3798_v39  ;;  %v2170_v27 = vld [vmem:[#allocation2 + $0xc8] sm:$0xff]  ;;  %v2171_v33 = vld [vmem:[#allocation2 + $0xd0] sm:$0xff]  ;;  %v2233_v6 = vadd.f32 %v2169_v19, %v3800_v48 }
 0x288   : > { %2291 = vst [vmem:[#allocation2 + $0x90] sm:$0xff] %v2227_v35  ;;  %2292 = vst [vmem:[#allocation2 + $0x98] sm:$0xff] %v2228_v40  ;;  %v2234_v12 = vadd.f32 %v2170_v27, %v3802_v54  ;;  %v2235_v18 = vadd.f32 %v2171_v33, %v3804_v62  ;;  %v2172_v1 = vld [vmem:[#allocation2 + $0xd8] sm:$0xff]  ;;  %v2173_v7 = vld [vmem:[#allocation2 + $0xe0] sm:$0xff] }
 0x289   : > { %2293 = vst [vmem:[#allocation2 + $0xa0] sm:$0xff] %v2229_v46  ;;  %v2174_v9 = vld [vmem:[#allocation2 + $0xe8] sm:$0xff]  ;;  %2294 = vst [vmem:[#allocation2 + $0xa8] sm:$0xff] %v2230_v52  ;;  %v2236_v25 = vadd.f32 %v2172_v1, %v3806_v4  ;;  %v2237_v32 = vadd.f32 %v2173_v7, %v3808_v13  ;;  %v2175_v41 = vld [vmem:[#allocation2 + $0xf0] sm:$0xff] }
 0x28a   : > { %2295 = vst [vmem:[#allocation2 + $0xb0] sm:$0xff] %v2231_v58  ;;  %2296 = vst [vmem:[#allocation2 + $0xb8] sm:$0xff] %v2232_v0  ;;  %v2238_v39 = vadd.f32 %v2174_v9, %v3810_v21  ;;  %v2176_v47 = vld [vmem:[#allocation2 + $0xf8] sm:$0xff]  ;;  %v2177_v55 = vld [vmem:[#allocation2 + $0x100] sm:$0xff]  ;;  %v2239_v48 = vadd.f32 %v2175_v41, %v3812_v30 }
 0x28b   : > { %2297 = vst [vmem:[#allocation2 + $0xc0] sm:$0xff] %v2233_v6  ;;  %2298 = vst [vmem:[#allocation2 + $0xc8] sm:$0xff] %v2234_v12  ;;  %v2240_v54 = vadd.f32 %v2176_v47, %v3814_v38  ;;  %v2241_v62 = vadd.f32 %v2177_v55, %v3816_v49  ;;  %v2178_v14 = vld [vmem:[#allocation2 + $0x108] sm:$0xff]  ;;  %v2179_v16 = vld [vmem:[#allocation2 + $0x110] sm:$0xff] }
 0x28c   : > { %2299 = vst [vmem:[#allocation2 + $0xd0] sm:$0xff] %v2235_v18  ;;  %v2180_v20 = vld [vmem:[#allocation2 + $0x118] sm:$0xff]  ;;  %2300 = vst [vmem:[#allocation2 + $0xd8] sm:$0xff] %v2236_v25  ;;  %v2242_v4 = vadd.f32 %v2178_v14, %v3818_v57  ;;  %v2243_v13 = vadd.f32 %v2179_v16, %v3820_v2  ;;  %v2181_v61 = vld [vmem:[#allocation2 + $0x120] sm:$0xff] }
 0x28d   : > { %2301 = vst [vmem:[#allocation2 + $0xe0] sm:$0xff] %v2237_v32  ;;  %2302 = vst [vmem:[#allocation2 + $0xe8] sm:$0xff] %v2238_v39  ;;  %v2244_v21 = vadd.f32 %v2180_v20, %v3822_v10  ;;  %v2182_v5 = vld [vmem:[#allocation2 + $0x128] sm:$0xff]  ;;  %v2183_v11 = vld [vmem:[#allocation2 + $0x130] sm:$0xff]  ;;  %v2245_v30 = vadd.f32 %v2181_v61, %v3824_v22 }
 0x28e   : > { %2303 = vst [vmem:[#allocation2 + $0xf0] sm:$0xff] %v2239_v48  ;;  %2304 = vst [vmem:[#allocation2 + $0xf8] sm:$0xff] %v2240_v54  ;;  %v2246_v38 = vadd.f32 %v2182_v5, %v3826_v34  ;;  %v2247_v49 = vadd.f32 %v2183_v11, %v3828_v44  ;;  %v2184_v26 = vld [vmem:[#allocation2 + $0x138] sm:$0xff]  ;;  %v2185_v31 = vld [vmem:[#allocation2 + $0x140] sm:$0xff] }
 0x28f   : > { %2305 = vst [vmem:[#allocation2 + $0x100] sm:$0xff] %v2241_v62  ;;  %v2186_v36 = vld [vmem:[#allocation2 + $0x148] sm:$0xff]  ;;  %2306 = vst [vmem:[#allocation2 + $0x108] sm:$0xff] %v2242_v4  ;;  %v2248_v57 = vadd.f32 %v2184_v26, %v3830_v56  ;;  %v2249_v2 = vadd.f32 %v2185_v31, %v3832_v3  ;;  %v2187_v17 = vld [vmem:[#allocation2 + $0x150] sm:$0xff] }
 0x290   : > { %2307 = vst [vmem:[#allocation2 + $0x110] sm:$0xff] %v2243_v13  ;;  %2308 = vst [vmem:[#allocation2 + $0x118] sm:$0xff] %v2244_v21  ;;  %v2250_v10 = vadd.f32 %v2186_v36, %v3834_v15  ;;  %v2188_v23 = vld [vmem:[#allocation2 + $0x158] sm:$0xff]  ;;  %v2189_v29 = vld [vmem:[#allocation2 + $0x160] sm:$0xff]  ;;  %v2251_v22 = vadd.f32 %v2187_v17, %v3836_v28 }
 0x291   : > { %2309 = vst [vmem:[#allocation2 + $0x120] sm:$0xff] %v2245_v30  ;;  %2310 = vst [vmem:[#allocation2 + $0x128] sm:$0xff] %v2246_v38  ;;  %v2252_v34 = vadd.f32 %v2188_v23, %v3838_v43  ;;  %v2253_v44 = vadd.f32 %v2189_v29, %v3840_v59  ;;  %v2190_v37 = vld [vmem:[#allocation2 + $0x168] sm:$0xff]  ;;  %v2191_v45 = vld [vmem:[#allocation2 + $0x170] sm:$0xff] }
 0x292   : > { %2311 = vst [vmem:[#allocation2 + $0x130] sm:$0xff] %v2247_v49  ;;  %v2192_v50 = vld [vmem:[#allocation2 + $0x178] sm:$0xff]  ;;  %2312 = vst [vmem:[#allocation2 + $0x138] sm:$0xff] %v2248_v57  ;;  %v4199_v56 = vld [vmem:[#allocation4_spill] sm:$0xff] }
 0x293   : > { %2313 = vst [vmem:[#allocation2 + $0x140] sm:$0xff] %v2249_v2  ;;  %2314 = vst [vmem:[#allocation2 + $0x148] sm:$0xff] %v2250_v10  ;;  %v2254_v3 = vadd.f32 %v2190_v37, %v4199_v56  ;;  %v4200_v15 = vld [vmem:[#allocation5_spill] sm:$0xff]  ;;  %v4201_v40 = vld [vmem:[#allocation6_spill] sm:$0xff] }
 0x294   : > { %v2255_v35 = vadd.f32 %v2191_v45, %v4200_v15  ;;  %v2256_v46 = vadd.f32 %v2192_v50, %v4201_v40  ;;  %v2193_v51 = vld [vmem:[#allocation2 + $0x180] sm:$0xff]  ;;  %v2194_v53 = vld [vmem:[#allocation2 + $0x188] sm:$0xff]  ;;  %v2195_v63 = vld [vmem:[#allocation2 + $0x190] sm:$0xff]  ;;  %2315 = vst [vmem:[#allocation2 + $0x150] sm:$0xff] %v2251_v22 }
 0x295   : > { %2316 = vst [vmem:[#allocation2 + $0x158] sm:$0xff] %v2252_v34  ;;  %2317 = vst [vmem:[#allocation2 + $0x160] sm:$0xff] %v2253_v44  ;;  %v4202_v28 = vld [vmem:[#allocation7_spill] sm:$0xff]  ;;  %v4203_v59 = vld [vmem:[#allocation8_spill] sm:$0xff] }
 0x296   : > { %v2257_v43 = vadd.f32 %v2193_v51, %v4202_v28  ;;  %v2258_v52 = vadd.f32 %v2194_v53, %v4203_v59  ;;  %v4204_v58 = vld [vmem:[#allocation9_spill] sm:$0xff]  ;;  %v2196_v19 = vld [vmem:[#allocation2 + $0x198] sm:$0xff]  ;;  %v2197_v27 = vld [vmem:[#allocation2 + $0x1a0] sm:$0xff]  ;;  %2318 = vst [vmem:[#allocation2 + $0x168] sm:$0xff] %v2254_v3 }
 0x297   : > { %v2259_v0 = vadd.f32 %v2195_v63, %v4204_v58  ;;  %v2198_v33 = vld [vmem:[#allocation2 + $0x1a8] sm:$0xff]  ;;  %2319 = vst [vmem:[#allocation2 + $0x170] sm:$0xff] %v2255_v35  ;;  %2320 = vst [vmem:[#allocation2 + $0x178] sm:$0xff] %v2256_v46  ;;  %v4205_v6 = vld [vmem:[#allocation10_spill] sm:$0xff] }
 0x298   : > { %v2260_v12 = vadd.f32 %v2196_v19, %v4205_v6  ;;  %v4206_v18 = vld [vmem:[#allocation11_spill] sm:$0xff]  ;;  %v4207_v7 = vld [vmem:[#allocation12_spill] sm:$0xff]  ;;  %v2199_v25 = vld [vmem:[#allocation2 + $0x1b0] sm:$0xff]  ;;  %2321 = vst [vmem:[#allocation2 + $0x180] sm:$0xff] %v2257_v43 }
 0x299   : > { %v2261_v1 = vadd.f32 %v2197_v27, %v4206_v18  ;;  %v2262_v9 = vadd.f32 %v2198_v33, %v4207_v7  ;;  %v2200_v32 = vld [vmem:[#allocation2 + $0x1b8] sm:$0xff]  ;;  %v2201_v39 = vld [vmem:[#allocation2 + $0x1c0] sm:$0xff]  ;;  %2322 = vst [vmem:[#allocation2 + $0x188] sm:$0xff] %v2258_v52  ;;  %2323 = vst [vmem:[#allocation2 + $0x190] sm:$0xff] %v2259_v0 }
 0x29a   : > { %v4208_v41 = vld [vmem:[#allocation13_spill] sm:$0xff]  ;;  %v4209_v55 = vld [vmem:[#allocation14_spill] sm:$0xff]  ;;  %v4210_v54 = vld [vmem:[#allocation15_spill] sm:$0xff]  ;;  %2324 = vst [vmem:[#allocation2 + $0x198] sm:$0xff] %v2260_v12 }
 0x29b   : > { %v2263_v47 = vadd.f32 %v2199_v25, %v4208_v41  ;;  %v2264_v48 = vadd.f32 %v2200_v32, %v4209_v55  ;;  %v2265_v62 = vadd.f32 %v2201_v39, %v4210_v54  ;;  %v2202_v14 = vld [vmem:[#allocation2 + $0x1c8] sm:$0xff]  ;;  %v2203_v16 = vld [vmem:[#allocation2 + $0x1d0] sm:$0xff]  ;;  %v2204_v20 = vld [vmem:[#allocation2 + $0x1d8] sm:$0xff]  ;;  %2325 = vst [vmem:[#allocation2 + $0x1a0] sm:$0xff] %v2261_v1 }
 0x29c   : > { %2326 = vst [vmem:[#allocation2 + $0x1a8] sm:$0xff] %v2262_v9  ;;  %v4211_v4 = vld [vmem:[#allocation16_spill] sm:$0xff]  ;;  %v4212_v21 = vld [vmem:[#allocation17_spill] sm:$0xff]  ;;  %v4213_v5 = vld [vmem:[#allocation18_spill] sm:$0xff] }
 0x29d   : > { %v2266_v13 = vadd.f32 %v2202_v14, %v4211_v4  ;;  %v2267_v61 = vadd.f32 %v2203_v16, %v4212_v21  ;;  %v2268_v11 = vadd.f32 %v2204_v20, %v4213_v5  ;;  %v2205_v30 = vld [vmem:[#allocation2 + $0x1e0] sm:$0xff]  ;;  %v2206_v38 = vld [vmem:[#allocation2 + $0x1e8] sm:$0xff]  ;;  %v2207_v49 = vld [vmem:[#allocation2 + $0x1f0] sm:$0xff]  ;;  %2327 = vst [vmem:[#allocation2 + $0x1b0] sm:$0xff] %v2263_v47 }
 0x29e   : > { %2328 = vst [vmem:[#allocation2 + $0x1b8] sm:$0xff] %v2264_v48  ;;  %2329 = vst [vmem:[#allocation2 + $0x1c0] sm:$0xff] %v2265_v62  ;;  %v2269_v26 = vadd.f32 %v2205_v30, %v3872_v60  ;;  %v2270_v31 = vadd.f32 %v2206_v38, %v3874_v8  ;;  %v2271_v36 = vadd.f32 %v2207_v49, %v3876_v24  ;;  %v2208_v57 = vld [vmem:[#allocation2 + $0x1f8] sm:$0xff] }
 0x29f   : > { %2330 = vst [vmem:[#allocation2 + $0x1c8] sm:$0xff] %v2266_v13  ;;  %2331 = vst [vmem:[#allocation2 + $0x1d0] sm:$0xff] %v2267_v61  ;;  %v2272_v2 = vadd.f32 %v2208_v57, %v3878_v42 }
 0x2a0   : > { %2332 = vst [vmem:[#allocation2 + $0x1d8] sm:$0xff] %v2268_v11  ;;  %2333 = vst [vmem:[#allocation2 + $0x1e0] sm:$0xff] %v2269_v26 }
 0x2a1   : > { %2334 = vst [vmem:[#allocation2 + $0x1e8] sm:$0xff] %v2270_v31  ;;  %2335 = vst [vmem:[#allocation2 + $0x1f0] sm:$0xff] %v2271_v36 }
 0x2a2   : > { %2336 = vst [vmem:[#allocation2 + $0x1f8] sm:$0xff] %v2272_v2 }
 0x2a3 PF: > { %p2796_p13 = scmp.ne.s32.totalorder %s3184_s14, 1 }
 0x2a4   : > { %v4014_v8 = vld [vmem:[%s4167_s2] ss:$0 sm:$0xff] (!%p2796_p13)  ;;  %v2354_v59 = vld [vmem:[#allocation2 + $0x68] sm:$0xff] (!%p2796_p13)  ;;  %v2355_v19 = vld [vmem:[#allocation2 + $0x70] sm:$0xff] (!%p2796_p13) }
 0x2a5   : > { %2340 = sbr.rel (%p2796_p13) target bundleno = 712 (0x2c8), region = 67  ;;  %v2341_v10 = vld [vmem:[#allocation2] sm:$0xff] (!%p2796_p13)  ;;  %v2342_v24 = vld [vmem:[#allocation2 + $0x8] sm:$0xff] (!%p2796_p13)  ;;  %v2425_v0 = vadd.f32 (!%p2796_p13), %v4014_v8, %v2354_v59  ;;  %v2356_v27 = vld [vmem:[#allocation2 + $0x78] sm:$0xff] (!%p2796_p13)  ;;  %v2426_v6 = vadd.f32 (!%p2796_p13), %v4014_v8, %v2355_v19 }
 0x2a6   : > { %v2412_v60 = vadd.f32 (!%p2796_p13), %v4014_v8, %v2341_v10  ;;  %v2413_v42 = vadd.f32 (!%p2796_p13), %v4014_v8, %v2342_v24  ;;  %v2343_v17 = vld [vmem:[#allocation2 + $0x10] sm:$0xff] (!%p2796_p13)  ;;  %v2344_v23 = vld [vmem:[#allocation2 + $0x18] sm:$0xff] (!%p2796_p13)  ;;  %v2353_v43 = vld [vmem:[#allocation2 + $0x60] sm:$0xff] (!%p2796_p13)  ;;  %v2427_v12 = vadd.f32 (!%p2796_p13), %v4014_v8, %v2356_v27 }
 0x2a7   : > { %v2345_v29 = vld [vmem:[#allocation2 + $0x20] sm:$0xff] (!%p2796_p13)  ;;  %v2414_v22 = vadd.f32 (!%p2796_p13), %v4014_v8, %v2343_v17  ;;  %v2415_v34 = vadd.f32 (!%p2796_p13), %v4014_v8, %v2344_v23  ;;  %v2346_v37 = vld [vmem:[#allocation2 + $0x28] sm:$0xff] (!%p2796_p13)  ;;  %v2424_v58 = vadd.f32 (!%p2796_p13), %v4014_v8, %v2353_v43  ;;  %v2359_v7 = vld [vmem:[#allocation2 + $0x90] sm:$0xff] (!%p2796_p13)  ;;  %2489 = vst [vmem:[%s3558_s28 + $0x68] sm:$0xff] (!%p2796_p13), %v2425_v0 }
 0x2a8   : > { %v2416_v44 = vadd.f32 (!%p2796_p13), %v4014_v8, %v2345_v29  ;;  %v2347_v45 = vld [vmem:[#allocation2 + $0x30] sm:$0xff] (!%p2796_p13)  ;;  %v2348_v50 = vld [vmem:[#allocation2 + $0x38] sm:$0xff] (!%p2796_p13)  ;;  %2476 = vst [vmem:[%s3558_s28] sm:$0xff] (!%p2796_p13), %v2412_v60  ;;  %2477 = vst [vmem:[%s3558_s28 + $0x8] sm:$0xff] (!%p2796_p13), %v2413_v42  ;;  %v2417_v56 = vadd.f32 (!%p2796_p13), %v4014_v8, %v2346_v37  ;;  %v2430_v32 = vadd.f32 (!%p2796_p13), %v4014_v8, %v2359_v7 }
 0x2a9   : > { %v2418_v3 = vadd.f32 (!%p2796_p13), %v4014_v8, %v2347_v45  ;;  %v2419_v15 = vadd.f32 (!%p2796_p13), %v4014_v8, %v2348_v50  ;;  %v2349_v35 = vld [vmem:[#allocation2 + $0x40] sm:$0xff] (!%p2796_p13)  ;;  %v2350_v40 = vld [vmem:[#allocation2 + $0x48] sm:$0xff] (!%p2796_p13)  ;;  %2478 = vst [vmem:[%s3558_s28 + $0x10] sm:$0xff] (!%p2796_p13), %v2414_v22  ;;  %2479 = vst [vmem:[%s3558_s28 + $0x18] sm:$0xff] (!%p2796_p13), %v2415_v34 }
 0x2aa   : > { %v2351_v46 = vld [vmem:[#allocation2 + $0x50] sm:$0xff] (!%p2796_p13)  ;;  %2480 = vst [vmem:[%s3558_s28 + $0x20] sm:$0xff] (!%p2796_p13), %v2416_v44  ;;  %v2420_v51 = vadd.f32 (!%p2796_p13), %v4014_v8, %v2349_v35  ;;  %v2421_v53 = vadd.f32 (!%p2796_p13), %v4014_v8, %v2350_v40  ;;  %v2352_v28 = vld [vmem:[#allocation2 + $0x58] sm:$0xff] (!%p2796_p13)  ;;  %2481 = vst [vmem:[%s3558_s28 + $0x28] sm:$0xff] (!%p2796_p13), %v2417_v56 }
 0x2ab   : > { %v2422_v63 = vadd.f32 (!%p2796_p13), %v4014_v8, %v2351_v46  ;;  %2482 = vst [vmem:[%s3558_s28 + $0x30] sm:$0xff] (!%p2796_p13), %v2418_v3  ;;  %2483 = vst [vmem:[%s3558_s28 + $0x38] sm:$0xff] (!%p2796_p13), %v2419_v15  ;;  %v2423_v52 = vadd.f32 (!%p2796_p13), %v4014_v8, %v2352_v28  ;;  %v2357_v33 = vld [vmem:[#allocation2 + $0x80] sm:$0xff] (!%p2796_p13)  ;;  %v2358_v1 = vld [vmem:[#allocation2 + $0x88] sm:$0xff] (!%p2796_p13) }
 0x2ac   : > { %2484 = vst [vmem:[%s3558_s28 + $0x40] sm:$0xff] %v2420_v51  ;;  %2485 = vst [vmem:[%s3558_s28 + $0x48] sm:$0xff] %v2421_v53  ;;  %v2428_v18 = vadd.f32 %v4014_v8, %v2357_v33  ;;  %v2360_v9 = vld [vmem:[#allocation2 + $0x98] sm:$0xff]  ;;  %v2429_v25 = vadd.f32 %v4014_v8, %v2358_v1  ;;  %v2361_v41 = vld [vmem:[#allocation2 + $0xa0] sm:$0xff] }
 0x2ad   : > { %2486 = vst [vmem:[%s3558_s28 + $0x50] sm:$0xff] %v2422_v63  ;;  %2487 = vst [vmem:[%s3558_s28 + $0x58] sm:$0xff] %v2423_v52  ;;  %v2431_v39 = vadd.f32 %v4014_v8, %v2360_v9  ;;  %v2362_v47 = vld [vmem:[#allocation2 + $0xa8] sm:$0xff]  ;;  %v2363_v55 = vld [vmem:[#allocation2 + $0xb0] sm:$0xff]  ;;  %v2432_v48 = vadd.f32 %v4014_v8, %v2361_v41 }
 0x2ae   : > { %2488 = vst [vmem:[%s3558_s28 + $0x60] sm:$0xff] %v2424_v58  ;;  %2490 = vst [vmem:[%s3558_s28 + $0x70] sm:$0xff] %v2426_v6  ;;  %v2433_v54 = vadd.f32 %v4014_v8, %v2362_v47  ;;  %v2434_v62 = vadd.f32 %v4014_v8, %v2363_v55  ;;  %v2364_v14 = vld [vmem:[#allocation2 + $0xb8] sm:$0xff]  ;;  %v2365_v16 = vld [vmem:[#allocation2 + $0xc0] sm:$0xff] }
 0x2af   : > { %2491 = vst [vmem:[%s3558_s28 + $0x78] sm:$0xff] %v2427_v12  ;;  %2492 = vst [vmem:[%s3558_s28 + $0x80] sm:$0xff] %v2428_v18  ;;  %v2366_v20 = vld [vmem:[#allocation2 + $0xc8] sm:$0xff]  ;;  %v2435_v4 = vadd.f32 %v4014_v8, %v2364_v14  ;;  %v2436_v13 = vadd.f32 %v4014_v8, %v2365_v16  ;;  %v2367_v61 = vld [vmem:[#allocation2 + $0xd0] sm:$0xff] }
 0x2b0   : > { %2493 = vst [vmem:[%s3558_s28 + $0x88] sm:$0xff] %v2429_v25  ;;  %2494 = vst [vmem:[%s3558_s28 + $0x90] sm:$0xff] %v2430_v32  ;;  %v2437_v21 = vadd.f32 %v4014_v8, %v2366_v20  ;;  %v2368_v5 = vld [vmem:[#allocation2 + $0xd8] sm:$0xff]  ;;  %v2369_v11 = vld [vmem:[#allocation2 + $0xe0] sm:$0xff]  ;;  %v2438_v30 = vadd.f32 %v4014_v8, %v2367_v61 }
 0x2b1   : > { %2495 = vst [vmem:[%s3558_s28 + $0x98] sm:$0xff] %v2431_v39  ;;  %2496 = vst [vmem:[%s3558_s28 + $0xa0] sm:$0xff] %v2432_v48  ;;  %v2439_v38 = vadd.f32 %v4014_v8, %v2368_v5  ;;  %v2440_v49 = vadd.f32 %v4014_v8, %v2369_v11  ;;  %v2370_v26 = vld [vmem:[#allocation2 + $0xe8] sm:$0xff]  ;;  %v2371_v31 = vld [vmem:[#allocation2 + $0xf0] sm:$0xff] }
 0x2b2   : > { %2497 = vst [vmem:[%s3558_s28 + $0xa8] sm:$0xff] %v2433_v54  ;;  %2498 = vst [vmem:[%s3558_s28 + $0xb0] sm:$0xff] %v2434_v62  ;;  %v2372_v36 = vld [vmem:[#allocation2 + $0xf8] sm:$0xff]  ;;  %v2441_v57 = vadd.f32 %v4014_v8, %v2370_v26  ;;  %v2442_v2 = vadd.f32 %v4014_v8, %v2371_v31  ;;  %v2373_v24 = vld [vmem:[#allocation2 + $0x100] sm:$0xff] }
 0x2b3   : > { %2499 = vst [vmem:[%s3558_s28 + $0xb8] sm:$0xff] %v2435_v4  ;;  %2500 = vst [vmem:[%s3558_s28 + $0xc0] sm:$0xff] %v2436_v13  ;;  %v2443_v10 = vadd.f32 %v4014_v8, %v2372_v36  ;;  %v2374_v60 = vld [vmem:[#allocation2 + $0x108] sm:$0xff]  ;;  %v2375_v42 = vld [vmem:[#allocation2 + $0x110] sm:$0xff]  ;;  %v2444_v17 = vadd.f32 %v4014_v8, %v2373_v24 }
 0x2b4   : > { %2501 = vst [vmem:[%s3558_s28 + $0xc8] sm:$0xff] %v2437_v21  ;;  %2502 = vst [vmem:[%s3558_s28 + $0xd0] sm:$0xff] %v2438_v30  ;;  %v2445_v23 = vadd.f32 %v4014_v8, %v2374_v60  ;;  %v2446_v29 = vadd.f32 %v4014_v8, %v2375_v42  ;;  %v2376_v22 = vld [vmem:[#allocation2 + $0x118] sm:$0xff]  ;;  %v2377_v34 = vld [vmem:[#allocation2 + $0x120] sm:$0xff] }
 0x2b5   : > { %2503 = vst [vmem:[%s3558_s28 + $0xd8] sm:$0xff] %v2439_v38  ;;  %2504 = vst [vmem:[%s3558_s28 + $0xe0] sm:$0xff] %v2440_v49  ;;  %v2378_v44 = vld [vmem:[#allocation2 + $0x128] sm:$0xff]  ;;  %v2447_v37 = vadd.f32 %v4014_v8, %v2376_v22  ;;  %v2448_v45 = vadd.f32 %v4014_v8, %v2377_v34  ;;  %v2379_v56 = vld [vmem:[#allocation2 + $0x130] sm:$0xff] }
 0x2b6   : > { %2505 = vst [vmem:[%s3558_s28 + $0xe8] sm:$0xff] %v2441_v57  ;;  %2506 = vst [vmem:[%s3558_s28 + $0xf0] sm:$0xff] %v2442_v2  ;;  %v2449_v50 = vadd.f32 %v4014_v8, %v2378_v44  ;;  %v2380_v3 = vld [vmem:[#allocation2 + $0x138] sm:$0xff]  ;;  %v2381_v15 = vld [vmem:[#allocation2 + $0x140] sm:$0xff]  ;;  %v2450_v35 = vadd.f32 %v4014_v8, %v2379_v56 }
 0x2b7   : > { %2507 = vst [vmem:[%s3558_s28 + $0xf8] sm:$0xff] %v2443_v10  ;;  %2508 = vst [vmem:[%s3558_s28 + $0x100] sm:$0xff] %v2444_v17  ;;  %v2451_v40 = vadd.f32 %v4014_v8, %v2380_v3  ;;  %v2452_v46 = vadd.f32 %v4014_v8, %v2381_v15  ;;  %v2382_v51 = vld [vmem:[#allocation2 + $0x148] sm:$0xff]  ;;  %v2383_v53 = vld [vmem:[#allocation2 + $0x150] sm:$0xff] }
 0x2b8   : > { %2509 = vst [vmem:[%s3558_s28 + $0x108] sm:$0xff] %v2445_v23  ;;  %2510 = vst [vmem:[%s3558_s28 + $0x110] sm:$0xff] %v2446_v29  ;;  %v2384_v63 = vld [vmem:[#allocation2 + $0x158] sm:$0xff]  ;;  %v2453_v28 = vadd.f32 %v4014_v8, %v2382_v51  ;;  %v2454_v43 = vadd.f32 %v4014_v8, %v2383_v53  ;;  %v2385_v52 = vld [vmem:[#allocation2 + $0x160] sm:$0xff] }
 0x2b9   : > { %2511 = vst [vmem:[%s3558_s28 + $0x118] sm:$0xff] %v2447_v37  ;;  %2512 = vst [vmem:[%s3558_s28 + $0x120] sm:$0xff] %v2448_v45  ;;  %v2455_v59 = vadd.f32 %v4014_v8, %v2384_v63  ;;  %v2386_v58 = vld [vmem:[#allocation2 + $0x168] sm:$0xff]  ;;  %v2387_v0 = vld [vmem:[#allocation2 + $0x170] sm:$0xff]  ;;  %v2456_v19 = vadd.f32 %v4014_v8, %v2385_v52 }
 0x2ba   : > { %2513 = vst [vmem:[%s3558_s28 + $0x128] sm:$0xff] %v2449_v50  ;;  %2514 = vst [vmem:[%s3558_s28 + $0x130] sm:$0xff] %v2450_v35  ;;  %v2457_v27 = vadd.f32 %v4014_v8, %v2386_v58  ;;  %v2458_v33 = vadd.f32 %v4014_v8, %v2387_v0  ;;  %v2388_v6 = vld [vmem:[#allocation2 + $0x178] sm:$0xff]  ;;  %v2389_v12 = vld [vmem:[#allocation2 + $0x180] sm:$0xff] }
 0x2bb   : > { %2515 = vst [vmem:[%s3558_s28 + $0x138] sm:$0xff] %v2451_v40  ;;  %2516 = vst [vmem:[%s3558_s28 + $0x140] sm:$0xff] %v2452_v46  ;;  %v2390_v18 = vld [vmem:[#allocation2 + $0x188] sm:$0xff]  ;;  %v2459_v1 = vadd.f32 %v4014_v8, %v2388_v6  ;;  %v2460_v7 = vadd.f32 %v4014_v8, %v2389_v12  ;;  %v2391_v25 = vld [vmem:[#allocation2 + $0x190] sm:$0xff] }
 0x2bc   : > { %2517 = vst [vmem:[%s3558_s28 + $0x148] sm:$0xff] %v2453_v28  ;;  %2518 = vst [vmem:[%s3558_s28 + $0x150] sm:$0xff] %v2454_v43  ;;  %v2461_v9 = vadd.f32 %v4014_v8, %v2390_v18  ;;  %v2392_v32 = vld [vmem:[#allocation2 + $0x198] sm:$0xff]  ;;  %v2393_v39 = vld [vmem:[#allocation2 + $0x1a0] sm:$0xff]  ;;  %v2462_v41 = vadd.f32 %v4014_v8, %v2391_v25 }
 0x2bd   : > { %2519 = vst [vmem:[%s3558_s28 + $0x158] sm:$0xff] %v2455_v59  ;;  %2520 = vst [vmem:[%s3558_s28 + $0x160] sm:$0xff] %v2456_v19  ;;  %v2463_v47 = vadd.f32 %v4014_v8, %v2392_v32  ;;  %v2464_v55 = vadd.f32 %v4014_v8, %v2393_v39  ;;  %v2394_v48 = vld [vmem:[#allocation2 + $0x1a8] sm:$0xff]  ;;  %v2395_v54 = vld [vmem:[#allocation2 + $0x1b0] sm:$0xff] }
 0x2be   : > { %2521 = vst [vmem:[%s3558_s28 + $0x168] sm:$0xff] %v2457_v27  ;;  %2522 = vst [vmem:[%s3558_s28 + $0x170] sm:$0xff] %v2458_v33  ;;  %v2396_v62 = vld [vmem:[#allocation2 + $0x1b8] sm:$0xff]  ;;  %v2465_v14 = vadd.f32 %v4014_v8, %v2394_v48  ;;  %v2466_v16 = vadd.f32 %v4014_v8, %v2395_v54  ;;  %v2397_v4 = vld [vmem:[#allocation2 + $0x1c0] sm:$0xff] }
 0x2bf   : > { %2523 = vst [vmem:[%s3558_s28 + $0x178] sm:$0xff] %v2459_v1  ;;  %2524 = vst [vmem:[%s3558_s28 + $0x180] sm:$0xff] %v2460_v7  ;;  %v2467_v20 = vadd.f32 %v4014_v8, %v2396_v62  ;;  %v2398_v13 = vld [vmem:[#allocation2 + $0x1c8] sm:$0xff]  ;;  %v2399_v21 = vld [vmem:[#allocation2 + $0x1d0] sm:$0xff]  ;;  %v2468_v61 = vadd.f32 %v4014_v8, %v2397_v4 }
 0x2c0   : > { %2525 = vst [vmem:[%s3558_s28 + $0x188] sm:$0xff] %v2461_v9  ;;  %2526 = vst [vmem:[%s3558_s28 + $0x190] sm:$0xff] %v2462_v41  ;;  %v2469_v5 = vadd.f32 %v4014_v8, %v2398_v13  ;;  %v2470_v11 = vadd.f32 %v4014_v8, %v2399_v21  ;;  %v2400_v30 = vld [vmem:[#allocation2 + $0x1d8] sm:$0xff]  ;;  %v2401_v38 = vld [vmem:[#allocation2 + $0x1e0] sm:$0xff] }
 0x2c1   : > { %2527 = vst [vmem:[%s3558_s28 + $0x198] sm:$0xff] %v2463_v47  ;;  %2528 = vst [vmem:[%s3558_s28 + $0x1a0] sm:$0xff] %v2464_v55  ;;  %v2402_v49 = vld [vmem:[#allocation2 + $0x1e8] sm:$0xff]  ;;  %v2471_v26 = vadd.f32 %v4014_v8, %v2400_v30  ;;  %v2472_v31 = vadd.f32 %v4014_v8, %v2401_v38  ;;  %v2403_v57 = vld [vmem:[#allocation2 + $0x1f0] sm:$0xff] }
 0x2c2   : > { %2529 = vst [vmem:[%s3558_s28 + $0x1a8] sm:$0xff] %v2465_v14  ;;  %2530 = vst [vmem:[%s3558_s28 + $0x1b0] sm:$0xff] %v2466_v16  ;;  %v2473_v36 = vadd.f32 %v4014_v8, %v2402_v49  ;;  %v2404_v2 = vld [vmem:[#allocation2 + $0x1f8] sm:$0xff]  ;;  %v2474_v10 = vadd.f32 %v4014_v8, %v2403_v57 }
 0x2c3   : > { %2531 = vst [vmem:[%s3558_s28 + $0x1b8] sm:$0xff] %v2467_v20  ;;  %2532 = vst [vmem:[%s3558_s28 + $0x1c0] sm:$0xff] %v2468_v61  ;;  %v2475_v24 = vadd.f32 %v4014_v8, %v2404_v2 }
 0x2c4   : > { %2533 = vst [vmem:[%s3558_s28 + $0x1c8] sm:$0xff] %v2469_v5  ;;  %2534 = vst [vmem:[%s3558_s28 + $0x1d0] sm:$0xff] %v2470_v11 }
 0x2c5   : > { %2535 = vst [vmem:[%s3558_s28 + $0x1d8] sm:$0xff] %v2471_v26  ;;  %2536 = vst [vmem:[%s3558_s28 + $0x1e0] sm:$0xff] %v2472_v31 }
 0x2c6   : > { %2537 = vst [vmem:[%s3558_s28 + $0x1e8] sm:$0xff] %v2473_v36  ;;  %2538 = vst [vmem:[%s3558_s28 + $0x1f0] sm:$0xff] %v2474_v10 }
 0x2c7   : > { %2539 = vst [vmem:[%s3558_s28 + $0x1f8] sm:$0xff] %v2475_v24 }
 0x2c8 PF: > { %s13_s18 = sadd.s32 1, %s3200_s18   ;;  %s4214_s12 = smov %s3180_s13 }
 0x2c9   : > { %p10_p0 = scmp.ge.s32.totalorder %s13_s18, 6   ;;  %s4215_s13 = smov %s3274_s25 }
 0x2ca   : > { %s4216_s14 = smov %s3192_s16  ;;  %s4217_s15 = smov %s3196_s17 }
 0x2cb   : > { %s4218_s16 = smov %s4221_s19  ;;  %s4219_s17 = smov %s4225_s20 }
 0x2cc   :  { %12 = sbr.rel (!%p10_p0) target bundleno = 4 (0x4), region = 103 }

</bundles_post_ra>
